<compile_context>
chip_gen: v7x
topology: tpu7x:2x2x1
jax: 0.10.0
libtpu: 0.0.40
codegen_flags: <defaults>
</compile_context>

<pallas_src>
import math

import jax
import jax.numpy as jnp
from jax import lax
from jax.experimental import pallas as pl
from jax.experimental.pallas import tpu as pltpu

# ---- small, shape-consistent hyperparameters --------------------------------
VOCAB = 256
D_MODEL = 128
NHEAD = 4
HEAD_DIM = D_MODEL // NHEAD
NUM_LAYERS = 2
SEQ_LEN = 16
DFF = 256            # == VOCAB so wide biases share one slab width
BATCH = 2
EPS = 1e-5           # PyTorch nn.LayerNorm default
NEG_INF = -1e30      # safe finite "additive -inf" for the causal mask


# ---- fused model kernel (one grid step == one row-slab of the batch) ---------
def _model_kernel(h_ref, wsa_qkv_ref, wsa_o_ref, wca_qkv_ref, wca_o_ref,
                  w1_ref, w2_ref, wlm_ref, vec_ref, out_ref, attn_ref):
    D, S, HD = D_MODEL, SEQ_LEN, HEAD_DIM
    R = h_ref.shape[0]            # rows handled in this grid step (= NB * S)
    NB = R // S                   # batch elements folded into this slab
    scale = 1.0 / math.sqrt(HD)

    # activations arrive bf16; residual / LayerNorm stream kept in f32
    x = h_ref[...].astype(jnp.float32)                               # (R, D)

    # causal additive mask built once in-kernel (large finite negative)
    r = lax.broadcasted_iota(jnp.int32, (S, S), 0)
    c = lax.broadcasted_iota(jnp.int32, (S, S), 1)
    causal = jnp.where(c > r, jnp.float32(NEG_INF), jnp.float32(0.0))

    # unpack the packed small-parameter slab (all slices 128-lane aligned)
    vec = vec_ref[...]                                               # (8, 3*D)
    ln1_w, ln1_b, ln2_w = vec[0:1, 0:D], vec[0:1, D:2 * D], vec[0:1, 2 * D:3 * D]
    ln2_b, ln3_w, ln3_b = vec[1:2, 0:D], vec[1:2, D:2 * D], vec[1:2, 2 * D:3 * D]
    b_sa_o, b_ca_o, b_ff2 = vec[2:3, 0:D], vec[2:3, D:2 * D], vec[2:3, 2 * D:3 * D]
    b_sa_in = vec[3:4, :]                                            # (1, 3D)
    b_ca_in = vec[4:5, :]
    b_ff1 = vec[5:6, 0:DFF]
    b_lm = vec[6:7, 0:VOCAB]

    # weights stay bf16 (MXU native); accumulation is f32
    wsa_qkv = wsa_qkv_ref[...]
    wsa_o = wsa_o_ref[...]
    wca_qkv = wca_qkv_ref[...]
    wca_o = wca_o_ref[...]
    w1 = w1_ref[...]
    w2 = w2_ref[...]
    wlm = wlm_ref[...]

    def layer_norm(v, w, b):                       # f32 statistics
        mu = jnp.mean(v, axis=-1, keepdims=True)
        var = jnp.mean(jnp.square(v - mu), axis=-1, keepdims=True)
        return (v - mu) * lax.rsqrt(var + EPS) * w + b

    def softmax(s):                                # f32 stats, EUP reciprocal
        s = s - jnp.max(s, axis=-1, keepdims=True)
        p = jnp.exp(s)
        return p * pl.reciprocal(jnp.sum(p, axis=-1, keepdims=True), approx=True)

    def attn_core(q, k, v, mask):
        """(R,D) bf16 q (pre-scaled) / k / v -> (R,D) bf16 concat of head outs.

        Per-head (S,S) attention; each head's (S,HD) output is stored into the
        bf16 VMEM scratch at its lane offset -> one lane-dense slab for the
        single K=128 output projection afterwards."""
        for b in range(NB):                        # static unroll
            r0 = b * S
            for hh in range(NHEAD):                # static unroll (NHEAD == 4)
                c0 = hh * HD
                s = lax.dot_general(q[r0:r0 + S, c0:c0 + HD],
                                    k[r0:r0 + S, c0:c0 + HD],
                                    (((1,), (1,)), ((), ())),
                                    preferred_element_type=jnp.float32)  # (S,S)
                if mask is not None:
                    s = s + mask
                p = softmax(s).astype(jnp.bfloat16)
                oh = jnp.dot(p, v[r0:r0 + S, c0:c0 + HD],
                             preferred_element_type=jnp.float32)         # (S,HD)
                attn_ref[r0:r0 + S, c0:c0 + HD] = oh.astype(jnp.bfloat16)
        return attn_ref[...]

    def self_attn(xb):
        # fused q/k/v projection: ONE (R,D)x(D,3D) matmul
        qkv = jnp.dot(xb, wsa_qkv, preferred_element_type=jnp.float32) + b_sa_in
        q = (qkv[:, 0:D] * scale).astype(jnp.bfloat16)
        k = qkv[:, D:2 * D].astype(jnp.bfloat16)
        v = qkv[:, 2 * D:].astype(jnp.bfloat16)
        att = attn_core(q, k, v, causal)
        return jnp.dot(att, wsa_o, preferred_element_type=jnp.float32) + b_sa_o

    def cross_attn(xb, memb):
        # q from the post-LN1 stream, k/v from this layer's input (memory)
        q = (jnp.dot(xb, wca_qkv[:, 0:D], preferred_element_type=jnp.float32)
             + b_ca_in[:, 0:D])
        kv = (jnp.dot(memb, wca_qkv[:, D:], preferred_element_type=jnp.float32)
              + b_ca_in[:, D:])
        q = (q * scale).astype(jnp.bfloat16)
        k = kv[:, 0:D].astype(jnp.bfloat16)
        v = kv[:, D:].astype(jnp.bfloat16)
        att = attn_core(q, k, v, None)
        return jnp.dot(att, wca_o, preferred_element_type=jnp.float32) + b_ca_o

    # NUM_LAYERS applications of the single (weight-shared) decoder layer
    for _ in range(NUM_LAYERS):
        xb = x.astype(jnp.bfloat16)          # layer input; also cross-attn memory
        x = layer_norm(x + self_attn(xb), ln1_w, ln1_b)
        xb2 = x.astype(jnp.bfloat16)
        x = layer_norm(x + cross_attn(xb2, xb), ln2_w, ln2_b)
        xb3 = x.astype(jnp.bfloat16)
        f1 = jnp.maximum(
            jnp.dot(xb3, w1, preferred_element_type=jnp.float32) + b_ff1, 0.0)
        ff = jnp.dot(f1.astype(jnp.bfloat16), w2,
                     preferred_element_type=jnp.float32) + b_ff2
        x = layer_norm(x + ff, ln3_w, ln3_b)

    # LM head (lane-dense 256-wide output)
    logits = jnp.dot(x.astype(jnp.bfloat16), wlm,
                     preferred_element_type=jnp.float32) + b_lm
    out_ref[...] = logits.astype(out_ref.dtype)


# ---- pallas_call wrapper ------------------------------------------------------
_WEIGHT_KEYS = ("wsa_qkv", "wsa_o", "wca_qkv", "wca_o", "w1", "w2", "wlm", "vecs")


def _grid_blocks(batch):
    """Grid steps to split the batch over: one per TensorCore.

    v5e/v6e have a single TensorCore -> fold the whole batch into one grid step
    (bigger M, no serial grid revolution).  v7x (and v4 megacore) expose two
    TensorCores to one Pallas program via a 'parallel' grid axis -> 2 steps."""
    try:
        kind = jax.devices()[0].device_kind.lower()
    except Exception:
        kind = ""
    multi_tc = any(tag in kind for tag in ("v7", "7x", "v4"))
    blocks = 2 if multi_tc else 1
    blocks = max(1, min(blocks, batch))
    while batch % blocks:
        blocks -= 1
    return blocks


def fused_transformer_forward(h, params):
    """h: (B, S, D) f32 embedded + pos-encoded input -> logits (B, S, VOCAB) f32."""
    B, S, D = h.shape
    blocks = _grid_blocks(B)
    rows = (B * S) // blocks
    # fold batch into rows; ship activations as bf16 (halves the only non-weight DMA)
    h2 = h.reshape(B * S, D).astype(jnp.bfloat16)
    weights = [params[k] for k in _WEIGHT_KEYS]

    in_specs = [pl.BlockSpec((rows, D), lambda g: (g, 0))]
    # whole weight matrices resident in VMEM; constant index map -> DMA'd once
    in_specs += [pl.BlockSpec(w.shape, lambda g: (0, 0)) for w in weights]

    logits = pl.pallas_call(
        _model_kernel,
        out_shape=jax.ShapeDtypeStruct((B * S, VOCAB), jnp.float32),
        grid=(blocks,),
        in_specs=in_specs,
        out_specs=pl.BlockSpec((rows, VOCAB), lambda g: (g, 0)),
        scratch_shapes=[pltpu.VMEM((rows, D_MODEL), jnp.bfloat16)],
        compiler_params=pltpu.CompilerParams(dimension_semantics=("parallel",)),
    )(h2, *weights)
    return logits.reshape(B, S, VOCAB)


# ---- parameter init (deterministic; LN weight=1/bias=0, zero biases) ----------
def init_params(key):
    keys = jax.random.split(key, 8)

    def nrm(k, shape, std=0.02):
        return std * jax.random.normal(k, shape, dtype=jnp.float32)

    # packed slab (8, 3D): [ln1_w|ln1_b|ln2_w], [ln2_b|ln3_w|ln3_b],
    # [b_sa_o|b_ca_o|b_ff2], b_sa_in, b_ca_in, b_ff1(+pad), b_lm(+pad), pad
    vecs = jnp.zeros((8, 3 * D_MODEL), jnp.float32)
    for row, col in ((0, 0), (0, 2 * D_MODEL), (1, D_MODEL)):  # ln1_w, ln2_w, ln3_w = 1
        vecs = vecs.at[row, col:col + D_MODEL].set(1.0)

    return {
        "tok_emb": jax.random.normal(keys[0], (VOCAB, D_MODEL), dtype=jnp.float32),
        # the single shared nn.TransformerDecoderLayer (all "layers" alias it)
        "wsa_qkv": nrm(keys[1], (D_MODEL, 3 * D_MODEL)).astype(jnp.bfloat16),
        "wsa_o":   nrm(keys[2], (D_MODEL, D_MODEL)).astype(jnp.bfloat16),
        "wca_qkv": nrm(keys[3], (D_MODEL, 3 * D_MODEL)).astype(jnp.bfloat16),
        "wca_o":   nrm(keys[4], (D_MODEL, D_MODEL)).astype(jnp.bfloat16),
        "w1":      nrm(keys[5], (D_MODEL, DFF)).astype(jnp.bfloat16),
        "w2":      nrm(keys[6], (DFF, D_MODEL)).astype(jnp.bfloat16),
        "wlm":     nrm(keys[7], (D_MODEL, VOCAB)).astype(jnp.bfloat16),
        "vecs":    vecs,
    }


# ---- glue (embedding gather + sinusoidal PE) and full forward -----------------
def sinusoidal_positional_encoding(seq_len, d_model):
    pos = jnp.arange(seq_len, dtype=jnp.float32)[:, None]
    div = jnp.exp(jnp.arange(0, d_model, 2, dtype=jnp.float32)
                  * (-math.log(10000.0) / d_model))
    pe = jnp.zeros((seq_len, d_model), jnp.float32)
    pe = pe.at[:, 0::2].set(jnp.sin(pos * div))
    pe = pe.at[:, 1::2].set(jnp.cos(pos * div))
    return pe


def transformer_lm_forward(params, x):
    """x: (B, S) int32 token ids -> (logits (B, S, VOCAB), (zeros(d_model),))."""
    B, S = x.shape
    assert (B, S) == (BATCH, SEQ_LEN)
    # embedding gather + PE are glue; nn.Dropout layers are identity (eval mode)
    h = params["tok_emb"][x] * math.sqrt(D_MODEL)
    h = h + sinusoidal_positional_encoding(S, D_MODEL)[None]
    logits = fused_transformer_forward(h.astype(jnp.float32), params)
    return logits, (jnp.zeros((D_MODEL,), jnp.float32),)


if __name__ == "__main__":
    key = jax.random.PRNGKey(0)
    pkey, xkey = jax.random.split(key)
    params = init_params(pkey)
    x = jax.random.randint(xkey, (BATCH, SEQ_LEN), 0, VOCAB, dtype=jnp.int32)

    logits, hidden = transformer_lm_forward(params, x)
    logits = jax.block_until_ready(logits)

    assert logits.shape == (BATCH, SEQ_LEN, VOCAB)
    assert logits.dtype == jnp.float32
    assert bool(jnp.all(jnp.isfinite(logits)))
    print("KERNEL_OK")
</pallas_src>

<mosaic_0001>
module attributes {stable_mosaic.version = 11 : i64} {
  func.func @_model_kernel(%arg0: i32, %arg1: memref<32x128xbf16, #tpu.memory_space<vmem>>, %arg2: memref<128x384xbf16, #tpu.memory_space<vmem>>, %arg3: memref<128x128xbf16, #tpu.memory_space<vmem>>, %arg4: memref<128x384xbf16, #tpu.memory_space<vmem>>, %arg5: memref<128x128xbf16, #tpu.memory_space<vmem>>, %arg6: memref<128x256xbf16, #tpu.memory_space<vmem>>, %arg7: memref<256x128xbf16, #tpu.memory_space<vmem>>, %arg8: memref<128x256xbf16, #tpu.memory_space<vmem>>, %arg9: memref<8x384xf32, #tpu.memory_space<vmem>>, %arg10: memref<32x256xf32, #tpu.memory_space<vmem>>, %arg11: memref<32x128xbf16, #tpu.memory_space<vmem>>) attributes {dimension_semantics = [#tpu.dimension_semantics<parallel>], iteration_bounds = array<i64: 1>, scalar_prefetch = 0 : i64, scratch_operands = 1 : i64, tpu.core_type = #tpu.core_type<tc>, window_params = [{transform_indices = @transform_0, window_bounds = array<i64: 32, 128>}, {pipeline_mode = #tpu.pipeline_mode<synchronous>, transform_indices = @transform_1, window_bounds = array<i64: 128, 384>}, {pipeline_mode = #tpu.pipeline_mode<synchronous>, transform_indices = @transform_2, window_bounds = array<i64: 128, 128>}, {pipeline_mode = #tpu.pipeline_mode<synchronous>, transform_indices = @transform_3, window_bounds = array<i64: 128, 384>}, {pipeline_mode = #tpu.pipeline_mode<synchronous>, transform_indices = @transform_4, window_bounds = array<i64: 128, 128>}, {pipeline_mode = #tpu.pipeline_mode<synchronous>, transform_indices = @transform_5, window_bounds = array<i64: 128, 256>}, {pipeline_mode = #tpu.pipeline_mode<synchronous>, transform_indices = @transform_6, window_bounds = array<i64: 256, 128>}, {pipeline_mode = #tpu.pipeline_mode<synchronous>, transform_indices = @transform_7, window_bounds = array<i64: 128, 256>}, {pipeline_mode = #tpu.pipeline_mode<synchronous>, transform_indices = @transform_8, window_bounds = array<i64: 8, 384>}, {transform_indices = @transform_9, window_bounds = array<i64: 32, 256>}]} {
    %c0 = arith.constant 0 : index
    %c0_0 = arith.constant 0 : index
    %0 = vector.load %arg1[%c0, %c0_0] : memref<32x128xbf16, #tpu.memory_space<vmem>>, vector<32x128xbf16>
    %1 = arith.extf %0 : vector<32x128xbf16> to vector<32x128xf32>
    %2 = tpu.iota {dimensions = array<i32: 0>} : vector<16x16xi32>
    %3 = tpu.iota {dimensions = array<i32: 1>} : vector<16x16xi32>
    %4 = arith.cmpi sgt, %3, %2 : vector<16x16xi32>
    %cst = arith.constant -1.000000e+30 : f32
    %cst_1 = arith.constant 0.000000e+00 : f32
    %5 = vector.broadcast %cst : f32 to vector<16x16xf32>
    %6 = vector.broadcast %cst_1 : f32 to vector<16x16xf32>
    %7 = arith.select %4, %5, %6 : vector<16x16xi1>, vector<16x16xf32>
    %c0_2 = arith.constant 0 : index
    %c0_3 = arith.constant 0 : index
    %8 = vector.load %arg9[%c0_2, %c0_3] : memref<8x384xf32, #tpu.memory_space<vmem>>, vector<8x384xf32>
    %9 = vector.extract_strided_slice %8 {offsets = [0, 0], sizes = [1, 128], strides = [1, 1]} : vector<8x384xf32> to vector<1x128xf32>
    %10 = vector.extract_strided_slice %8 {offsets = [0, 128], sizes = [1, 128], strides = [1, 1]} : vector<8x384xf32> to vector<1x128xf32>
    %11 = vector.extract_strided_slice %8 {offsets = [0, 256], sizes = [1, 128], strides = [1, 1]} : vector<8x384xf32> to vector<1x128xf32>
    %12 = vector.extract_strided_slice %8 {offsets = [1, 0], sizes = [1, 128], strides = [1, 1]} : vector<8x384xf32> to vector<1x128xf32>
    %13 = vector.extract_strided_slice %8 {offsets = [1, 128], sizes = [1, 128], strides = [1, 1]} : vector<8x384xf32> to vector<1x128xf32>
    %14 = vector.extract_strided_slice %8 {offsets = [1, 256], sizes = [1, 128], strides = [1, 1]} : vector<8x384xf32> to vector<1x128xf32>
    %15 = vector.extract_strided_slice %8 {offsets = [2, 0], sizes = [1, 128], strides = [1, 1]} : vector<8x384xf32> to vector<1x128xf32>
    %16 = vector.extract_strided_slice %8 {offsets = [2, 128], sizes = [1, 128], strides = [1, 1]} : vector<8x384xf32> to vector<1x128xf32>
    %17 = vector.extract_strided_slice %8 {offsets = [2, 256], sizes = [1, 128], strides = [1, 1]} : vector<8x384xf32> to vector<1x128xf32>
    %18 = vector.extract_strided_slice %8 {offsets = [3, 0], sizes = [1, 384], strides = [1, 1]} : vector<8x384xf32> to vector<1x384xf32>
    %19 = vector.extract_strided_slice %8 {offsets = [4, 0], sizes = [1, 384], strides = [1, 1]} : vector<8x384xf32> to vector<1x384xf32>
    %20 = vector.extract_strided_slice %8 {offsets = [5, 0], sizes = [1, 256], strides = [1, 1]} : vector<8x384xf32> to vector<1x256xf32>
    %21 = vector.extract_strided_slice %8 {offsets = [6, 0], sizes = [1, 256], strides = [1, 1]} : vector<8x384xf32> to vector<1x256xf32>
    %c0_4 = arith.constant 0 : index
    %c0_5 = arith.constant 0 : index
    %22 = vector.load %arg2[%c0_4, %c0_5] : memref<128x384xbf16, #tpu.memory_space<vmem>>, vector<128x384xbf16>
    %c0_6 = arith.constant 0 : index
    %c0_7 = arith.constant 0 : index
    %23 = vector.load %arg3[%c0_6, %c0_7] : memref<128x128xbf16, #tpu.memory_space<vmem>>, vector<128x128xbf16>
    %c0_8 = arith.constant 0 : index
    %c0_9 = arith.constant 0 : index
    %24 = vector.load %arg4[%c0_8, %c0_9] : memref<128x384xbf16, #tpu.memory_space<vmem>>, vector<128x384xbf16>
    %c0_10 = arith.constant 0 : index
    %c0_11 = arith.constant 0 : index
    %25 = vector.load %arg5[%c0_10, %c0_11] : memref<128x128xbf16, #tpu.memory_space<vmem>>, vector<128x128xbf16>
    %c0_12 = arith.constant 0 : index
    %c0_13 = arith.constant 0 : index
    %26 = vector.load %arg6[%c0_12, %c0_13] : memref<128x256xbf16, #tpu.memory_space<vmem>>, vector<128x256xbf16>
    %c0_14 = arith.constant 0 : index
    %c0_15 = arith.constant 0 : index
    %27 = vector.load %arg7[%c0_14, %c0_15] : memref<256x128xbf16, #tpu.memory_space<vmem>>, vector<256x128xbf16>
    %c0_16 = arith.constant 0 : index
    %c0_17 = arith.constant 0 : index
    %28 = vector.load %arg8[%c0_16, %c0_17] : memref<128x256xbf16, #tpu.memory_space<vmem>>, vector<128x256xbf16>
    %29 = arith.truncf %1 : vector<32x128xf32> to vector<32x128xbf16>
    %cst_18 = arith.constant dense<0.000000e+00> : vector<32x384xf32>
    %30 = tpu.matmul %29, %22, %cst_18 {dimension_numbers = #tpu.dot_dimension_numbers<[1], [0], [0], [1], [0, 0, 1, 1], [], []>} : vector<32x128xbf16>, vector<128x384xbf16>, vector<32x384xf32> -> vector<32x384xf32>
    %31 = vector.broadcast %18 : vector<1x384xf32> to vector<32x384xf32>
    %32 = arith.addf %30, %31 : vector<32x384xf32>
    %33 = vector.extract_strided_slice %32 {offsets = [0, 0], sizes = [32, 128], strides = [1, 1]} : vector<32x384xf32> to vector<32x128xf32>
    %cst_19 = arith.constant 0.176776692 : f32
    %34 = vector.broadcast %cst_19 : f32 to vector<32x128xf32>
    %35 = arith.mulf %33, %34 : vector<32x128xf32>
    %36 = arith.truncf %35 : vector<32x128xf32> to vector<32x128xbf16>
    %37 = vector.extract_strided_slice %32 {offsets = [0, 128], sizes = [32, 128], strides = [1, 1]} : vector<32x384xf32> to vector<32x128xf32>
    %38 = arith.truncf %37 : vector<32x128xf32> to vector<32x128xbf16>
    %39 = vector.extract_strided_slice %32 {offsets = [0, 256], sizes = [32, 128], strides = [1, 1]} : vector<32x384xf32> to vector<32x128xf32>
    %40 = arith.truncf %39 : vector<32x128xf32> to vector<32x128xbf16>
    %41 = vector.extract_strided_slice %36 {offsets = [0, 0], sizes = [16, 32], strides = [1, 1]} : vector<32x128xbf16> to vector<16x32xbf16>
    %42 = vector.extract_strided_slice %38 {offsets = [0, 0], sizes = [16, 32], strides = [1, 1]} : vector<32x128xbf16> to vector<16x32xbf16>
    %cst_20 = arith.constant dense<0.000000e+00> : vector<16x16xf32>
    %43 = tpu.matmul %41, %42, %cst_20 {dimension_numbers = #tpu.dot_dimension_numbers<[1], [1], [0], [0], [0, 0, 1, 0], [], []>} : vector<16x32xbf16>, vector<16x32xbf16>, vector<16x16xf32> -> vector<16x16xf32>
    %44 = arith.addf %43, %7 : vector<16x16xf32>
    %cst_21 = arith.constant dense<0xFF800000> : vector<16xf32>
    %45 = vector.multi_reduction <maximumf>, %44, %cst_21 [1] : vector<16x16xf32> to vector<16xf32>
    %46 = vector.shape_cast %45 : vector<16xf32> to vector<16x1xf32>
    %47 = vector.broadcast %46 : vector<16x1xf32> to vector<16x16xf32>
    %48 = arith.subf %44, %47 : vector<16x16xf32>
    %49 = math.exp %48 : vector<16x16xf32>
    %cst_22 = arith.constant dense<0.000000e+00> : vector<16xf32>
    %50 = vector.multi_reduction <add>, %49, %cst_22 [1] : vector<16x16xf32> to vector<16xf32>
    %51 = vector.shape_cast %50 : vector<16xf32> to vector<16x1xf32>
    %52 = tpu.reciprocal %51 {approx = true} : vector<16x1xf32> -> vector<16x1xf32>
    %53 = vector.broadcast %52 : vector<16x1xf32> to vector<16x16xf32>
    %54 = arith.mulf %49, %53 : vector<16x16xf32>
    %55 = arith.truncf %54 : vector<16x16xf32> to vector<16x16xbf16>
    %56 = vector.extract_strided_slice %40 {offsets = [0, 0], sizes = [16, 32], strides = [1, 1]} : vector<32x128xbf16> to vector<16x32xbf16>
    %cst_23 = arith.constant dense<0.000000e+00> : vector<16x32xf32>
    %57 = tpu.matmul %55, %56, %cst_23 {dimension_numbers = #tpu.dot_dimension_numbers<[1], [0], [0], [1], [0, 0, 1, 1], [], []>} : vector<16x16xbf16>, vector<16x32xbf16>, vector<16x32xf32> -> vector<16x32xf32>
    %58 = arith.truncf %57 : vector<16x32xf32> to vector<16x32xbf16>
    %c0_24 = arith.constant 0 : index
    %c0_25 = arith.constant 0 : index
    %59 = vector.load %arg11[%c0_24, %c0_25] : memref<32x128xbf16, #tpu.memory_space<vmem>>, vector<16x32xbf16>
    tpu.vector_store %arg11[%c0_24, %c0_25], %58 {strides = array<i32>} : memref<32x128xbf16, #tpu.memory_space<vmem>>, vector<16x32xbf16>,
    %60 = vector.extract_strided_slice %36 {offsets = [0, 32], sizes = [16, 32], strides = [1, 1]} : vector<32x128xbf16> to vector<16x32xbf16>
    %61 = vector.extract_strided_slice %38 {offsets = [0, 32], sizes = [16, 32], strides = [1, 1]} : vector<32x128xbf16> to vector<16x32xbf16>
    %cst_26 = arith.constant dense<0.000000e+00> : vector<16x16xf32>
    %62 = tpu.matmul %60, %61, %cst_26 {dimension_numbers = #tpu.dot_dimension_numbers<[1], [1], [0], [0], [0, 0, 1, 0], [], []>} : vector<16x32xbf16>, vector<16x32xbf16>, vector<16x16xf32> -> vector<16x16xf32>
    %63 = arith.addf %62, %7 : vector<16x16xf32>
    %cst_27 = arith.constant dense<0xFF800000> : vector<16xf32>
    %64 = vector.multi_reduction <maximumf>, %63, %cst_27 [1] : vector<16x16xf32> to vector<16xf32>
    %65 = vector.shape_cast %64 : vector<16xf32> to vector<16x1xf32>
    %66 = vector.broadcast %65 : vector<16x1xf32> to vector<16x16xf32>
    %67 = arith.subf %63, %66 : vector<16x16xf32>
    %68 = math.exp %67 : vector<16x16xf32>
    %cst_28 = arith.constant dense<0.000000e+00> : vector<16xf32>
    %69 = vector.multi_reduction <add>, %68, %cst_28 [1] : vector<16x16xf32> to vector<16xf32>
    %70 = vector.shape_cast %69 : vector<16xf32> to vector<16x1xf32>
    %71 = tpu.reciprocal %70 {approx = true} : vector<16x1xf32> -> vector<16x1xf32>
    %72 = vector.broadcast %71 : vector<16x1xf32> to vector<16x16xf32>
    %73 = arith.mulf %68, %72 : vector<16x16xf32>
    %74 = arith.truncf %73 : vector<16x16xf32> to vector<16x16xbf16>
    %75 = vector.extract_strided_slice %40 {offsets = [0, 32], sizes = [16, 32], strides = [1, 1]} : vector<32x128xbf16> to vector<16x32xbf16>
    %cst_29 = arith.constant dense<0.000000e+00> : vector<16x32xf32>
    %76 = tpu.matmul %74, %75, %cst_29 {dimension_numbers = #tpu.dot_dimension_numbers<[1], [0], [0], [1], [0, 0, 1, 1], [], []>} : vector<16x16xbf16>, vector<16x32xbf16>, vector<16x32xf32> -> vector<16x32xf32>
    %77 = arith.truncf %76 : vector<16x32xf32> to vector<16x32xbf16>
    %c0_30 = arith.constant 0 : index
    %c32 = arith.constant 32 : index
    %78 = vector.load %arg11[%c0_30, %c32] : memref<32x128xbf16, #tpu.memory_space<vmem>>, vector<16x32xbf16>
    tpu.vector_store %arg11[%c0_30, %c32], %77 {strides = array<i32>} : memref<32x128xbf16, #tpu.memory_space<vmem>>, vector<16x32xbf16>,
    %79 = vector.extract_strided_slice %36 {offsets = [0, 64], sizes = [16, 32], strides = [1, 1]} : vector<32x128xbf16> to vector<16x32xbf16>
    %80 = vector.extract_strided_slice %38 {offsets = [0, 64], sizes = [16, 32], strides = [1, 1]} : vector<32x128xbf16> to vector<16x32xbf16>
    %cst_31 = arith.constant dense<0.000000e+00> : vector<16x16xf32>
    %81 = tpu.matmul %79, %80, %cst_31 {dimension_numbers = #tpu.dot_dimension_numbers<[1], [1], [0], [0], [0, 0, 1, 0], [], []>} : vector<16x32xbf16>, vector<16x32xbf16>, vector<16x16xf32> -> vector<16x16xf32>
    %82 = arith.addf %81, %7 : vector<16x16xf32>
    %cst_32 = arith.constant dense<0xFF800000> : vector<16xf32>
    %83 = vector.multi_reduction <maximumf>, %82, %cst_32 [1] : vector<16x16xf32> to vector<16xf32>
    %84 = vector.shape_cast %83 : vector<16xf32> to vector<16x1xf32>
    %85 = vector.broadcast %84 : vector<16x1xf32> to vector<16x16xf32>
    %86 = arith.subf %82, %85 : vector<16x16xf32>
    %87 = math.exp %86 : vector<16x16xf32>
    %cst_33 = arith.constant dense<0.000000e+00> : vector<16xf32>
    %88 = vector.multi_reduction <add>, %87, %cst_33 [1] : vector<16x16xf32> to vector<16xf32>
    %89 = vector.shape_cast %88 : vector<16xf32> to vector<16x1xf32>
    %90 = tpu.reciprocal %89 {approx = true} : vector<16x1xf32> -> vector<16x1xf32>
    %91 = vector.broadcast %90 : vector<16x1xf32> to vector<16x16xf32>
    %92 = arith.mulf %87, %91 : vector<16x16xf32>
    %93 = arith.truncf %92 : vector<16x16xf32> to vector<16x16xbf16>
    %94 = vector.extract_strided_slice %40 {offsets = [0, 64], sizes = [16, 32], strides = [1, 1]} : vector<32x128xbf16> to vector<16x32xbf16>
    %cst_34 = arith.constant dense<0.000000e+00> : vector<16x32xf32>
    %95 = tpu.matmul %93, %94, %cst_34 {dimension_numbers = #tpu.dot_dimension_numbers<[1], [0], [0], [1], [0, 0, 1, 1], [], []>} : vector<16x16xbf16>, vector<16x32xbf16>, vector<16x32xf32> -> vector<16x32xf32>
    %96 = arith.truncf %95 : vector<16x32xf32> to vector<16x32xbf16>
    %c0_35 = arith.constant 0 : index
    %c64 = arith.constant 64 : index
    %97 = vector.load %arg11[%c0_35, %c64] : memref<32x128xbf16, #tpu.memory_space<vmem>>, vector<16x32xbf16>
    tpu.vector_store %arg11[%c0_35, %c64], %96 {strides = array<i32>} : memref<32x128xbf16, #tpu.memory_space<vmem>>, vector<16x32xbf16>,
    %98 = vector.extract_strided_slice %36 {offsets = [0, 96], sizes = [16, 32], strides = [1, 1]} : vector<32x128xbf16> to vector<16x32xbf16>
    %99 = vector.extract_strided_slice %38 {offsets = [0, 96], sizes = [16, 32], strides = [1, 1]} : vector<32x128xbf16> to vector<16x32xbf16>
    %cst_36 = arith.constant dense<0.000000e+00> : vector<16x16xf32>
    %100 = tpu.matmul %98, %99, %cst_36 {dimension_numbers = #tpu.dot_dimension_numbers<[1], [1], [0], [0], [0, 0, 1, 0], [], []>} : vector<16x32xbf16>, vector<16x32xbf16>, vector<16x16xf32> -> vector<16x16xf32>
    %101 = arith.addf %100, %7 : vector<16x16xf32>
    %cst_37 = arith.constant dense<0xFF800000> : vector<16xf32>
    %102 = vector.multi_reduction <maximumf>, %101, %cst_37 [1] : vector<16x16xf32> to vector<16xf32>
    %103 = vector.shape_cast %102 : vector<16xf32> to vector<16x1xf32>
    %104 = vector.broadcast %103 : vector<16x1xf32> to vector<16x16xf32>
    %105 = arith.subf %101, %104 : vector<16x16xf32>
    %106 = math.exp %105 : vector<16x16xf32>
    %cst_38 = arith.constant dense<0.000000e+00> : vector<16xf32>
    %107 = vector.multi_reduction <add>, %106, %cst_38 [1] : vector<16x16xf32> to vector<16xf32>
    %108 = vector.shape_cast %107 : vector<16xf32> to vector<16x1xf32>
    %109 = tpu.reciprocal %108 {approx = true} : vector<16x1xf32> -> vector<16x1xf32>
    %110 = vector.broadcast %109 : vector<16x1xf32> to vector<16x16xf32>
    %111 = arith.mulf %106, %110 : vector<16x16xf32>
    %112 = arith.truncf %111 : vector<16x16xf32> to vector<16x16xbf16>
    %113 = vector.extract_strided_slice %40 {offsets = [0, 96], sizes = [16, 32], strides = [1, 1]} : vector<32x128xbf16> to vector<16x32xbf16>
    %cst_39 = arith.constant dense<0.000000e+00> : vector<16x32xf32>
    %114 = tpu.matmul %112, %113, %cst_39 {dimension_numbers = #tpu.dot_dimension_numbers<[1], [0], [0], [1], [0, 0, 1, 1], [], []>} : vector<16x16xbf16>, vector<16x32xbf16>, vector<16x32xf32> -> vector<16x32xf32>
    %115 = arith.truncf %114 : vector<16x32xf32> to vector<16x32xbf16>
    %c0_40 = arith.constant 0 : index
    %c96 = arith.constant 96 : index
    %116 = vector.load %arg11[%c0_40, %c96] : memref<32x128xbf16, #tpu.memory_space<vmem>>, vector<16x32xbf16>
    tpu.vector_store %arg11[%c0_40, %c96], %115 {strides = array<i32>} : memref<32x128xbf16, #tpu.memory_space<vmem>>, vector<16x32xbf16>,
    %117 = vector.extract_strided_slice %36 {offsets = [16, 0], sizes = [16, 32], strides = [1, 1]} : vector<32x128xbf16> to vector<16x32xbf16>
    %118 = vector.extract_strided_slice %38 {offsets = [16, 0], sizes = [16, 32], strides = [1, 1]} : vector<32x128xbf16> to vector<16x32xbf16>
    %cst_41 = arith.constant dense<0.000000e+00> : vector<16x16xf32>
    %119 = tpu.matmul %117, %118, %cst_41 {dimension_numbers = #tpu.dot_dimension_numbers<[1], [1], [0], [0], [0, 0, 1, 0], [], []>} : vector<16x32xbf16>, vector<16x32xbf16>, vector<16x16xf32> -> vector<16x16xf32>
    %120 = arith.addf %119, %7 : vector<16x16xf32>
    %cst_42 = arith.constant dense<0xFF800000> : vector<16xf32>
    %121 = vector.multi_reduction <maximumf>, %120, %cst_42 [1] : vector<16x16xf32> to vector<16xf32>
    %122 = vector.shape_cast %121 : vector<16xf32> to vector<16x1xf32>
    %123 = vector.broadcast %122 : vector<16x1xf32> to vector<16x16xf32>
    %124 = arith.subf %120, %123 : vector<16x16xf32>
    %125 = math.exp %124 : vector<16x16xf32>
    %cst_43 = arith.constant dense<0.000000e+00> : vector<16xf32>
    %126 = vector.multi_reduction <add>, %125, %cst_43 [1] : vector<16x16xf32> to vector<16xf32>
    %127 = vector.shape_cast %126 : vector<16xf32> to vector<16x1xf32>
    %128 = tpu.reciprocal %127 {approx = true} : vector<16x1xf32> -> vector<16x1xf32>
    %129 = vector.broadcast %128 : vector<16x1xf32> to vector<16x16xf32>
    %130 = arith.mulf %125, %129 : vector<16x16xf32>
    %131 = arith.truncf %130 : vector<16x16xf32> to vector<16x16xbf16>
    %132 = vector.extract_strided_slice %40 {offsets = [16, 0], sizes = [16, 32], strides = [1, 1]} : vector<32x128xbf16> to vector<16x32xbf16>
    %cst_44 = arith.constant dense<0.000000e+00> : vector<16x32xf32>
    %133 = tpu.matmul %131, %132, %cst_44 {dimension_numbers = #tpu.dot_dimension_numbers<[1], [0], [0], [1], [0, 0, 1, 1], [], []>} : vector<16x16xbf16>, vector<16x32xbf16>, vector<16x32xf32> -> vector<16x32xf32>
    %134 = arith.truncf %133 : vector<16x32xf32> to vector<16x32xbf16>
    %c16 = arith.constant 16 : index
    %c0_45 = arith.constant 0 : index
    %135 = vector.load %arg11[%c16, %c0_45] : memref<32x128xbf16, #tpu.memory_space<vmem>>, vector<16x32xbf16>
    tpu.vector_store %arg11[%c16, %c0_45], %134 {strides = array<i32>} : memref<32x128xbf16, #tpu.memory_space<vmem>>, vector<16x32xbf16>,
    %136 = vector.extract_strided_slice %36 {offsets = [16, 32], sizes = [16, 32], strides = [1, 1]} : vector<32x128xbf16> to vector<16x32xbf16>
    %137 = vector.extract_strided_slice %38 {offsets = [16, 32], sizes = [16, 32], strides = [1, 1]} : vector<32x128xbf16> to vector<16x32xbf16>
    %cst_46 = arith.constant dense<0.000000e+00> : vector<16x16xf32>
    %138 = tpu.matmul %136, %137, %cst_46 {dimension_numbers = #tpu.dot_dimension_numbers<[1], [1], [0], [0], [0, 0, 1, 0], [], []>} : vector<16x32xbf16>, vector<16x32xbf16>, vector<16x16xf32> -> vector<16x16xf32>
    %139 = arith.addf %138, %7 : vector<16x16xf32>
    %cst_47 = arith.constant dense<0xFF800000> : vector<16xf32>
    %140 = vector.multi_reduction <maximumf>, %139, %cst_47 [1] : vector<16x16xf32> to vector<16xf32>
    %141 = vector.shape_cast %140 : vector<16xf32> to vector<16x1xf32>
    %142 = vector.broadcast %141 : vector<16x1xf32> to vector<16x16xf32>
    %143 = arith.subf %139, %142 : vector<16x16xf32>
    %144 = math.exp %143 : vector<16x16xf32>
    %cst_48 = arith.constant dense<0.000000e+00> : vector<16xf32>
    %145 = vector.multi_reduction <add>, %144, %cst_48 [1] : vector<16x16xf32> to vector<16xf32>
    %146 = vector.shape_cast %145 : vector<16xf32> to vector<16x1xf32>
    %147 = tpu.reciprocal %146 {approx = true} : vector<16x1xf32> -> vector<16x1xf32>
    %148 = vector.broadcast %147 : vector<16x1xf32> to vector<16x16xf32>
    %149 = arith.mulf %144, %148 : vector<16x16xf32>
    %150 = arith.truncf %149 : vector<16x16xf32> to vector<16x16xbf16>
    %151 = vector.extract_strided_slice %40 {offsets = [16, 32], sizes = [16, 32], strides = [1, 1]} : vector<32x128xbf16> to vector<16x32xbf16>
    %cst_49 = arith.constant dense<0.000000e+00> : vector<16x32xf32>
    %152 = tpu.matmul %150, %151, %cst_49 {dimension_numbers = #tpu.dot_dimension_numbers<[1], [0], [0], [1], [0, 0, 1, 1], [], []>} : vector<16x16xbf16>, vector<16x32xbf16>, vector<16x32xf32> -> vector<16x32xf32>
    %153 = arith.truncf %152 : vector<16x32xf32> to vector<16x32xbf16>
    %c16_50 = arith.constant 16 : index
    %c32_51 = arith.constant 32 : index
    %154 = vector.load %arg11[%c16_50, %c32_51] : memref<32x128xbf16, #tpu.memory_space<vmem>>, vector<16x32xbf16>
    tpu.vector_store %arg11[%c16_50, %c32_51], %153 {strides = array<i32>} : memref<32x128xbf16, #tpu.memory_space<vmem>>, vector<16x32xbf16>,
    %155 = vector.extract_strided_slice %36 {offsets = [16, 64], sizes = [16, 32], strides = [1, 1]} : vector<32x128xbf16> to vector<16x32xbf16>
    %156 = vector.extract_strided_slice %38 {offsets = [16, 64], sizes = [16, 32], strides = [1, 1]} : vector<32x128xbf16> to vector<16x32xbf16>
    %cst_52 = arith.constant dense<0.000000e+00> : vector<16x16xf32>
    %157 = tpu.matmul %155, %156, %cst_52 {dimension_numbers = #tpu.dot_dimension_numbers<[1], [1], [0], [0], [0, 0, 1, 0], [], []>} : vector<16x32xbf16>, vector<16x32xbf16>, vector<16x16xf32> -> vector<16x16xf32>
    %158 = arith.addf %157, %7 : vector<16x16xf32>
    %cst_53 = arith.constant dense<0xFF800000> : vector<16xf32>
    %159 = vector.multi_reduction <maximumf>, %158, %cst_53 [1] : vector<16x16xf32> to vector<16xf32>
    %160 = vector.shape_cast %159 : vector<16xf32> to vector<16x1xf32>
    %161 = vector.broadcast %160 : vector<16x1xf32> to vector<16x16xf32>
    %162 = arith.subf %158, %161 : vector<16x16xf32>
    %163 = math.exp %162 : vector<16x16xf32>
    %cst_54 = arith.constant dense<0.000000e+00> : vector<16xf32>
    %164 = vector.multi_reduction <add>, %163, %cst_54 [1] : vector<16x16xf32> to vector<16xf32>
    %165 = vector.shape_cast %164 : vector<16xf32> to vector<16x1xf32>
    %166 = tpu.reciprocal %165 {approx = true} : vector<16x1xf32> -> vector<16x1xf32>
    %167 = vector.broadcast %166 : vector<16x1xf32> to vector<16x16xf32>
    %168 = arith.mulf %163, %167 : vector<16x16xf32>
    %169 = arith.truncf %168 : vector<16x16xf32> to vector<16x16xbf16>
    %170 = vector.extract_strided_slice %40 {offsets = [16, 64], sizes = [16, 32], strides = [1, 1]} : vector<32x128xbf16> to vector<16x32xbf16>
    %cst_55 = arith.constant dense<0.000000e+00> : vector<16x32xf32>
    %171 = tpu.matmul %169, %170, %cst_55 {dimension_numbers = #tpu.dot_dimension_numbers<[1], [0], [0], [1], [0, 0, 1, 1], [], []>} : vector<16x16xbf16>, vector<16x32xbf16>, vector<16x32xf32> -> vector<16x32xf32>
    %172 = arith.truncf %171 : vector<16x32xf32> to vector<16x32xbf16>
    %c16_56 = arith.constant 16 : index
    %c64_57 = arith.constant 64 : index
    %173 = vector.load %arg11[%c16_56, %c64_57] : memref<32x128xbf16, #tpu.memory_space<vmem>>, vector<16x32xbf16>
    tpu.vector_store %arg11[%c16_56, %c64_57], %172 {strides = array<i32>} : memref<32x128xbf16, #tpu.memory_space<vmem>>, vector<16x32xbf16>,
    %174 = vector.extract_strided_slice %36 {offsets = [16, 96], sizes = [16, 32], strides = [1, 1]} : vector<32x128xbf16> to vector<16x32xbf16>
    %175 = vector.extract_strided_slice %38 {offsets = [16, 96], sizes = [16, 32], strides = [1, 1]} : vector<32x128xbf16> to vector<16x32xbf16>
    %cst_58 = arith.constant dense<0.000000e+00> : vector<16x16xf32>
    %176 = tpu.matmul %174, %175, %cst_58 {dimension_numbers = #tpu.dot_dimension_numbers<[1], [1], [0], [0], [0, 0, 1, 0], [], []>} : vector<16x32xbf16>, vector<16x32xbf16>, vector<16x16xf32> -> vector<16x16xf32>
    %177 = arith.addf %176, %7 : vector<16x16xf32>
    %cst_59 = arith.constant dense<0xFF800000> : vector<16xf32>
    %178 = vector.multi_reduction <maximumf>, %177, %cst_59 [1] : vector<16x16xf32> to vector<16xf32>
    %179 = vector.shape_cast %178 : vector<16xf32> to vector<16x1xf32>
    %180 = vector.broadcast %179 : vector<16x1xf32> to vector<16x16xf32>
    %181 = arith.subf %177, %180 : vector<16x16xf32>
    %182 = math.exp %181 : vector<16x16xf32>
    %cst_60 = arith.constant dense<0.000000e+00> : vector<16xf32>
    %183 = vector.multi_reduction <add>, %182, %cst_60 [1] : vector<16x16xf32> to vector<16xf32>
    %184 = vector.shape_cast %183 : vector<16xf32> to vector<16x1xf32>
    %185 = tpu.reciprocal %184 {approx = true} : vector<16x1xf32> -> vector<16x1xf32>
    %186 = vector.broadcast %185 : vector<16x1xf32> to vector<16x16xf32>
    %187 = arith.mulf %182, %186 : vector<16x16xf32>
    %188 = arith.truncf %187 : vector<16x16xf32> to vector<16x16xbf16>
    %189 = vector.extract_strided_slice %40 {offsets = [16, 96], sizes = [16, 32], strides = [1, 1]} : vector<32x128xbf16> to vector<16x32xbf16>
    %cst_61 = arith.constant dense<0.000000e+00> : vector<16x32xf32>
    %190 = tpu.matmul %188, %189, %cst_61 {dimension_numbers = #tpu.dot_dimension_numbers<[1], [0], [0], [1], [0, 0, 1, 1], [], []>} : vector<16x16xbf16>, vector<16x32xbf16>, vector<16x32xf32> -> vector<16x32xf32>
    %191 = arith.truncf %190 : vector<16x32xf32> to vector<16x32xbf16>
    %c16_62 = arith.constant 16 : index
    %c96_63 = arith.constant 96 : index
    %192 = vector.load %arg11[%c16_62, %c96_63] : memref<32x128xbf16, #tpu.memory_space<vmem>>, vector<16x32xbf16>
    tpu.vector_store %arg11[%c16_62, %c96_63], %191 {strides = array<i32>} : memref<32x128xbf16, #tpu.memory_space<vmem>>, vector<16x32xbf16>,
    %c0_64 = arith.constant 0 : index
    %c0_65 = arith.constant 0 : index
    %193 = vector.load %arg11[%c0_64, %c0_65] : memref<32x128xbf16, #tpu.memory_space<vmem>>, vector<32x128xbf16>
    %cst_66 = arith.constant dense<0.000000e+00> : vector<32x128xf32>
    %194 = tpu.matmul %193, %23, %cst_66 {dimension_numbers = #tpu.dot_dimension_numbers<[1], [0], [0], [1], [0, 0, 1, 1], [], []>} : vector<32x128xbf16>, vector<128x128xbf16>, vector<32x128xf32> -> vector<32x128xf32>
    %195 = vector.broadcast %15 : vector<1x128xf32> to vector<32x128xf32>
    %196 = arith.addf %194, %195 : vector<32x128xf32>
    %197 = arith.addf %1, %196 : vector<32x128xf32>
    %cst_67 = arith.constant dense<0.000000e+00> : vector<32xf32>
    %198 = vector.multi_reduction <add>, %197, %cst_67 [1] : vector<32x128xf32> to vector<32xf32>
    %199 = vector.shape_cast %198 : vector<32xf32> to vector<32x1xf32>
    %cst_68 = arith.constant 1.280000e+02 : f32
    %200 = vector.broadcast %cst_68 : f32 to vector<32x1xf32>
    %201 = arith.divf %199, %200 : vector<32x1xf32>
    %202 = vector.broadcast %201 : vector<32x1xf32> to vector<32x128xf32>
    %203 = arith.subf %197, %202 : vector<32x128xf32>
    %204 = arith.mulf %203, %203 : vector<32x128xf32>
    %cst_69 = arith.constant dense<0.000000e+00> : vector<32xf32>
    %205 = vector.multi_reduction <add>, %204, %cst_69 [1] : vector<32x128xf32> to vector<32xf32>
    %206 = vector.shape_cast %205 : vector<32xf32> to vector<32x1xf32>
    %cst_70 = arith.constant 1.280000e+02 : f32
    %207 = vector.broadcast %cst_70 : f32 to vector<32x1xf32>
    %208 = arith.divf %206, %207 : vector<32x1xf32>
    %209 = vector.broadcast %201 : vector<32x1xf32> to vector<32x128xf32>
    %210 = arith.subf %197, %209 : vector<32x128xf32>
    %cst_71 = arith.constant 9.99999974E-6 : f32
    %211 = vector.broadcast %cst_71 : f32 to vector<32x1xf32>
    %212 = arith.addf %208, %211 : vector<32x1xf32>
    %213 = math.rsqrt %212 : vector<32x1xf32>
    %214 = vector.broadcast %213 : vector<32x1xf32> to vector<32x128xf32>
    %215 = arith.mulf %210, %214 : vector<32x128xf32>
    %216 = vector.broadcast %9 : vector<1x128xf32> to vector<32x128xf32>
    %217 = arith.mulf %215, %216 : vector<32x128xf32>
    %218 = vector.broadcast %10 : vector<1x128xf32> to vector<32x128xf32>
    %219 = arith.addf %217, %218 : vector<32x128xf32>
    %220 = arith.truncf %219 : vector<32x128xf32> to vector<32x128xbf16>
    %221 = vector.extract_strided_slice %24 {offsets = [0, 0], sizes = [128, 128], strides = [1, 1]} : vector<128x384xbf16> to vector<128x128xbf16>
    %cst_72 = arith.constant dense<0.000000e+00> : vector<32x128xf32>
    %222 = tpu.matmul %220, %221, %cst_72 {dimension_numbers = #tpu.dot_dimension_numbers<[1], [0], [0], [1], [0, 0, 1, 1], [], []>} : vector<32x128xbf16>, vector<128x128xbf16>, vector<32x128xf32> -> vector<32x128xf32>
    %223 = vector.extract_strided_slice %19 {offsets = [0, 0], sizes = [1, 128], strides = [1, 1]} : vector<1x384xf32> to vector<1x128xf32>
    %224 = vector.broadcast %223 : vector<1x128xf32> to vector<32x128xf32>
    %225 = arith.addf %222, %224 : vector<32x128xf32>
    %226 = vector.extract_strided_slice %24 {offsets = [0, 128], sizes = [128, 256], strides = [1, 1]} : vector<128x384xbf16> to vector<128x256xbf16>
    %cst_73 = arith.constant dense<0.000000e+00> : vector<32x256xf32>
    %227 = tpu.matmul %29, %226, %cst_73 {dimension_numbers = #tpu.dot_dimension_numbers<[1], [0], [0], [1], [0, 0, 1, 1], [], []>} : vector<32x128xbf16>, vector<128x256xbf16>, vector<32x256xf32> -> vector<32x256xf32>
    %228 = vector.extract_strided_slice %19 {offsets = [0, 128], sizes = [1, 256], strides = [1, 1]} : vector<1x384xf32> to vector<1x256xf32>
    %229 = vector.broadcast %228 : vector<1x256xf32> to vector<32x256xf32>
    %230 = arith.addf %227, %229 : vector<32x256xf32>
    %cst_74 = arith.constant 0.176776692 : f32
    %231 = vector.broadcast %cst_74 : f32 to vector<32x128xf32>
    %232 = arith.mulf %225, %231 : vector<32x128xf32>
    %233 = arith.truncf %232 : vector<32x128xf32> to vector<32x128xbf16>
    %234 = vector.extract_strided_slice %230 {offsets = [0, 0], sizes = [32, 128], strides = [1, 1]} : vector<32x256xf32> to vector<32x128xf32>
    %235 = arith.truncf %234 : vector<32x128xf32> to vector<32x128xbf16>
    %236 = vector.extract_strided_slice %230 {offsets = [0, 128], sizes = [32, 128], strides = [1, 1]} : vector<32x256xf32> to vector<32x128xf32>
    %237 = arith.truncf %236 : vector<32x128xf32> to vector<32x128xbf16>
    %238 = vector.extract_strided_slice %233 {offsets = [0, 0], sizes = [16, 32], strides = [1, 1]} : vector<32x128xbf16> to vector<16x32xbf16>
    %239 = vector.extract_strided_slice %235 {offsets = [0, 0], sizes = [16, 32], strides = [1, 1]} : vector<32x128xbf16> to vector<16x32xbf16>
    %cst_75 = arith.constant dense<0.000000e+00> : vector<16x16xf32>
    %240 = tpu.matmul %238, %239, %cst_75 {dimension_numbers = #tpu.dot_dimension_numbers<[1], [1], [0], [0], [0, 0, 1, 0], [], []>} : vector<16x32xbf16>, vector<16x32xbf16>, vector<16x16xf32> -> vector<16x16xf32>
    %cst_76 = arith.constant dense<0xFF800000> : vector<16xf32>
    %241 = vector.multi_reduction <maximumf>, %240, %cst_76 [1] : vector<16x16xf32> to vector<16xf32>
    %242 = vector.shape_cast %241 : vector<16xf32> to vector<16x1xf32>
    %243 = vector.broadcast %242 : vector<16x1xf32> to vector<16x16xf32>
    %244 = arith.subf %240, %243 : vector<16x16xf32>
    %245 = math.exp %244 : vector<16x16xf32>
    %cst_77 = arith.constant dense<0.000000e+00> : vector<16xf32>
    %246 = vector.multi_reduction <add>, %245, %cst_77 [1] : vector<16x16xf32> to vector<16xf32>
    %247 = vector.shape_cast %246 : vector<16xf32> to vector<16x1xf32>
    %248 = tpu.reciprocal %247 {approx = true} : vector<16x1xf32> -> vector<16x1xf32>
    %249 = vector.broadcast %248 : vector<16x1xf32> to vector<16x16xf32>
    %250 = arith.mulf %245, %249 : vector<16x16xf32>
    %251 = arith.truncf %250 : vector<16x16xf32> to vector<16x16xbf16>
    %252 = vector.extract_strided_slice %237 {offsets = [0, 0], sizes = [16, 32], strides = [1, 1]} : vector<32x128xbf16> to vector<16x32xbf16>
    %cst_78 = arith.constant dense<0.000000e+00> : vector<16x32xf32>
    %253 = tpu.matmul %251, %252, %cst_78 {dimension_numbers = #tpu.dot_dimension_numbers<[1], [0], [0], [1], [0, 0, 1, 1], [], []>} : vector<16x16xbf16>, vector<16x32xbf16>, vector<16x32xf32> -> vector<16x32xf32>
    %254 = arith.truncf %253 : vector<16x32xf32> to vector<16x32xbf16>
    %c0_79 = arith.constant 0 : index
    %c0_80 = arith.constant 0 : index
    %255 = vector.load %arg11[%c0_79, %c0_80] : memref<32x128xbf16, #tpu.memory_space<vmem>>, vector<16x32xbf16>
    tpu.vector_store %arg11[%c0_79, %c0_80], %254 {strides = array<i32>} : memref<32x128xbf16, #tpu.memory_space<vmem>>, vector<16x32xbf16>,
    %256 = vector.extract_strided_slice %233 {offsets = [0, 32], sizes = [16, 32], strides = [1, 1]} : vector<32x128xbf16> to vector<16x32xbf16>
    %257 = vector.extract_strided_slice %235 {offsets = [0, 32], sizes = [16, 32], strides = [1, 1]} : vector<32x128xbf16> to vector<16x32xbf16>
    %cst_81 = arith.constant dense<0.000000e+00> : vector<16x16xf32>
    %258 = tpu.matmul %256, %257, %cst_81 {dimension_numbers = #tpu.dot_dimension_numbers<[1], [1], [0], [0], [0, 0, 1, 0], [], []>} : vector<16x32xbf16>, vector<16x32xbf16>, vector<16x16xf32> -> vector<16x16xf32>
    %cst_82 = arith.constant dense<0xFF800000> : vector<16xf32>
    %259 = vector.multi_reduction <maximumf>, %258, %cst_82 [1] : vector<16x16xf32> to vector<16xf32>
    %260 = vector.shape_cast %259 : vector<16xf32> to vector<16x1xf32>
    %261 = vector.broadcast %260 : vector<16x1xf32> to vector<16x16xf32>
    %262 = arith.subf %258, %261 : vector<16x16xf32>
    %263 = math.exp %262 : vector<16x16xf32>
    %cst_83 = arith.constant dense<0.000000e+00> : vector<16xf32>
    %264 = vector.multi_reduction <add>, %263, %cst_83 [1] : vector<16x16xf32> to vector<16xf32>
    %265 = vector.shape_cast %264 : vector<16xf32> to vector<16x1xf32>
    %266 = tpu.reciprocal %265 {approx = true} : vector<16x1xf32> -> vector<16x1xf32>
    %267 = vector.broadcast %266 : vector<16x1xf32> to vector<16x16xf32>
    %268 = arith.mulf %263, %267 : vector<16x16xf32>
    %269 = arith.truncf %268 : vector<16x16xf32> to vector<16x16xbf16>
    %270 = vector.extract_strided_slice %237 {offsets = [0, 32], sizes = [16, 32], strides = [1, 1]} : vector<32x128xbf16> to vector<16x32xbf16>
    %cst_84 = arith.constant dense<0.000000e+00> : vector<16x32xf32>
    %271 = tpu.matmul %269, %270, %cst_84 {dimension_numbers = #tpu.dot_dimension_numbers<[1], [0], [0], [1], [0, 0, 1, 1], [], []>} : vector<16x16xbf16>, vector<16x32xbf16>, vector<16x32xf32> -> vector<16x32xf32>
    %272 = arith.truncf %271 : vector<16x32xf32> to vector<16x32xbf16>
    %c0_85 = arith.constant 0 : index
    %c32_86 = arith.constant 32 : index
    %273 = vector.load %arg11[%c0_85, %c32_86] : memref<32x128xbf16, #tpu.memory_space<vmem>>, vector<16x32xbf16>
    tpu.vector_store %arg11[%c0_85, %c32_86], %272 {strides = array<i32>} : memref<32x128xbf16, #tpu.memory_space<vmem>>, vector<16x32xbf16>,
    %274 = vector.extract_strided_slice %233 {offsets = [0, 64], sizes = [16, 32], strides = [1, 1]} : vector<32x128xbf16> to vector<16x32xbf16>
    %275 = vector.extract_strided_slice %235 {offsets = [0, 64], sizes = [16, 32], strides = [1, 1]} : vector<32x128xbf16> to vector<16x32xbf16>
    %cst_87 = arith.constant dense<0.000000e+00> : vector<16x16xf32>
    %276 = tpu.matmul %274, %275, %cst_87 {dimension_numbers = #tpu.dot_dimension_numbers<[1], [1], [0], [0], [0, 0, 1, 0], [], []>} : vector<16x32xbf16>, vector<16x32xbf16>, vector<16x16xf32> -> vector<16x16xf32>
    %cst_88 = arith.constant dense<0xFF800000> : vector<16xf32>
    %277 = vector.multi_reduction <maximumf>, %276, %cst_88 [1] : vector<16x16xf32> to vector<16xf32>
    %278 = vector.shape_cast %277 : vector<16xf32> to vector<16x1xf32>
    %279 = vector.broadcast %278 : vector<16x1xf32> to vector<16x16xf32>
    %280 = arith.subf %276, %279 : vector<16x16xf32>
    %281 = math.exp %280 : vector<16x16xf32>
    %cst_89 = arith.constant dense<0.000000e+00> : vector<16xf32>
    %282 = vector.multi_reduction <add>, %281, %cst_89 [1] : vector<16x16xf32> to vector<16xf32>
    %283 = vector.shape_cast %282 : vector<16xf32> to vector<16x1xf32>
    %284 = tpu.reciprocal %283 {approx = true} : vector<16x1xf32> -> vector<16x1xf32>
    %285 = vector.broadcast %284 : vector<16x1xf32> to vector<16x16xf32>
    %286 = arith.mulf %281, %285 : vector<16x16xf32>
    %287 = arith.truncf %286 : vector<16x16xf32> to vector<16x16xbf16>
    %288 = vector.extract_strided_slice %237 {offsets = [0, 64], sizes = [16, 32], strides = [1, 1]} : vector<32x128xbf16> to vector<16x32xbf16>
    %cst_90 = arith.constant dense<0.000000e+00> : vector<16x32xf32>
    %289 = tpu.matmul %287, %288, %cst_90 {dimension_numbers = #tpu.dot_dimension_numbers<[1], [0], [0], [1], [0, 0, 1, 1], [], []>} : vector<16x16xbf16>, vector<16x32xbf16>, vector<16x32xf32> -> vector<16x32xf32>
    %290 = arith.truncf %289 : vector<16x32xf32> to vector<16x32xbf16>
    %c0_91 = arith.constant 0 : index
    %c64_92 = arith.constant 64 : index
    %291 = vector.load %arg11[%c0_91, %c64_92] : memref<32x128xbf16, #tpu.memory_space<vmem>>, vector<16x32xbf16>
    tpu.vector_store %arg11[%c0_91, %c64_92], %290 {strides = array<i32>} : memref<32x128xbf16, #tpu.memory_space<vmem>>, vector<16x32xbf16>,
    %292 = vector.extract_strided_slice %233 {offsets = [0, 96], sizes = [16, 32], strides = [1, 1]} : vector<32x128xbf16> to vector<16x32xbf16>
    %293 = vector.extract_strided_slice %235 {offsets = [0, 96], sizes = [16, 32], strides = [1, 1]} : vector<32x128xbf16> to vector<16x32xbf16>
    %cst_93 = arith.constant dense<0.000000e+00> : vector<16x16xf32>
    %294 = tpu.matmul %292, %293, %cst_93 {dimension_numbers = #tpu.dot_dimension_numbers<[1], [1], [0], [0], [0, 0, 1, 0], [], []>} : vector<16x32xbf16>, vector<16x32xbf16>, vector<16x16xf32> -> vector<16x16xf32>
    %cst_94 = arith.constant dense<0xFF800000> : vector<16xf32>
    %295 = vector.multi_reduction <maximumf>, %294, %cst_94 [1] : vector<16x16xf32> to vector<16xf32>
    %296 = vector.shape_cast %295 : vector<16xf32> to vector<16x1xf32>
    %297 = vector.broadcast %296 : vector<16x1xf32> to vector<16x16xf32>
    %298 = arith.subf %294, %297 : vector<16x16xf32>
    %299 = math.exp %298 : vector<16x16xf32>
    %cst_95 = arith.constant dense<0.000000e+00> : vector<16xf32>
    %300 = vector.multi_reduction <add>, %299, %cst_95 [1] : vector<16x16xf32> to vector<16xf32>
    %301 = vector.shape_cast %300 : vector<16xf32> to vector<16x1xf32>
    %302 = tpu.reciprocal %301 {approx = true} : vector<16x1xf32> -> vector<16x1xf32>
    %303 = vector.broadcast %302 : vector<16x1xf32> to vector<16x16xf32>
    %304 = arith.mulf %299, %303 : vector<16x16xf32>
    %305 = arith.truncf %304 : vector<16x16xf32> to vector<16x16xbf16>
    %306 = vector.extract_strided_slice %237 {offsets = [0, 96], sizes = [16, 32], strides = [1, 1]} : vector<32x128xbf16> to vector<16x32xbf16>
    %cst_96 = arith.constant dense<0.000000e+00> : vector<16x32xf32>
    %307 = tpu.matmul %305, %306, %cst_96 {dimension_numbers = #tpu.dot_dimension_numbers<[1], [0], [0], [1], [0, 0, 1, 1], [], []>} : vector<16x16xbf16>, vector<16x32xbf16>, vector<16x32xf32> -> vector<16x32xf32>
    %308 = arith.truncf %307 : vector<16x32xf32> to vector<16x32xbf16>
    %c0_97 = arith.constant 0 : index
    %c96_98 = arith.constant 96 : index
    %309 = vector.load %arg11[%c0_97, %c96_98] : memref<32x128xbf16, #tpu.memory_space<vmem>>, vector<16x32xbf16>
    tpu.vector_store %arg11[%c0_97, %c96_98], %308 {strides = array<i32>} : memref<32x128xbf16, #tpu.memory_space<vmem>>, vector<16x32xbf16>,
    %310 = vector.extract_strided_slice %233 {offsets = [16, 0], sizes = [16, 32], strides = [1, 1]} : vector<32x128xbf16> to vector<16x32xbf16>
    %311 = vector.extract_strided_slice %235 {offsets = [16, 0], sizes = [16, 32], strides = [1, 1]} : vector<32x128xbf16> to vector<16x32xbf16>
    %cst_99 = arith.constant dense<0.000000e+00> : vector<16x16xf32>
    %312 = tpu.matmul %310, %311, %cst_99 {dimension_numbers = #tpu.dot_dimension_numbers<[1], [1], [0], [0], [0, 0, 1, 0], [], []>} : vector<16x32xbf16>, vector<16x32xbf16>, vector<16x16xf32> -> vector<16x16xf32>
    %cst_100 = arith.constant dense<0xFF800000> : vector<16xf32>
    %313 = vector.multi_reduction <maximumf>, %312, %cst_100 [1] : vector<16x16xf32> to vector<16xf32>
    %314 = vector.shape_cast %313 : vector<16xf32> to vector<16x1xf32>
    %315 = vector.broadcast %314 : vector<16x1xf32> to vector<16x16xf32>
    %316 = arith.subf %312, %315 : vector<16x16xf32>
    %317 = math.exp %316 : vector<16x16xf32>
    %cst_101 = arith.constant dense<0.000000e+00> : vector<16xf32>
    %318 = vector.multi_reduction <add>, %317, %cst_101 [1] : vector<16x16xf32> to vector<16xf32>
    %319 = vector.shape_cast %318 : vector<16xf32> to vector<16x1xf32>
    %320 = tpu.reciprocal %319 {approx = true} : vector<16x1xf32> -> vector<16x1xf32>
    %321 = vector.broadcast %320 : vector<16x1xf32> to vector<16x16xf32>
    %322 = arith.mulf %317, %321 : vector<16x16xf32>
    %323 = arith.truncf %322 : vector<16x16xf32> to vector<16x16xbf16>
    %324 = vector.extract_strided_slice %237 {offsets = [16, 0], sizes = [16, 32], strides = [1, 1]} : vector<32x128xbf16> to vector<16x32xbf16>
    %cst_102 = arith.constant dense<0.000000e+00> : vector<16x32xf32>
    %325 = tpu.matmul %323, %324, %cst_102 {dimension_numbers = #tpu.dot_dimension_numbers<[1], [0], [0], [1], [0, 0, 1, 1], [], []>} : vector<16x16xbf16>, vector<16x32xbf16>, vector<16x32xf32> -> vector<16x32xf32>
    %326 = arith.truncf %325 : vector<16x32xf32> to vector<16x32xbf16>
    %c16_103 = arith.constant 16 : index
    %c0_104 = arith.constant 0 : index
    %327 = vector.load %arg11[%c16_103, %c0_104] : memref<32x128xbf16, #tpu.memory_space<vmem>>, vector<16x32xbf16>
    tpu.vector_store %arg11[%c16_103, %c0_104], %326 {strides = array<i32>} : memref<32x128xbf16, #tpu.memory_space<vmem>>, vector<16x32xbf16>,
    %328 = vector.extract_strided_slice %233 {offsets = [16, 32], sizes = [16, 32], strides = [1, 1]} : vector<32x128xbf16> to vector<16x32xbf16>
    %329 = vector.extract_strided_slice %235 {offsets = [16, 32], sizes = [16, 32], strides = [1, 1]} : vector<32x128xbf16> to vector<16x32xbf16>
    %cst_105 = arith.constant dense<0.000000e+00> : vector<16x16xf32>
    %330 = tpu.matmul %328, %329, %cst_105 {dimension_numbers = #tpu.dot_dimension_numbers<[1], [1], [0], [0], [0, 0, 1, 0], [], []>} : vector<16x32xbf16>, vector<16x32xbf16>, vector<16x16xf32> -> vector<16x16xf32>
    %cst_106 = arith.constant dense<0xFF800000> : vector<16xf32>
    %331 = vector.multi_reduction <maximumf>, %330, %cst_106 [1] : vector<16x16xf32> to vector<16xf32>
    %332 = vector.shape_cast %331 : vector<16xf32> to vector<16x1xf32>
    %333 = vector.broadcast %332 : vector<16x1xf32> to vector<16x16xf32>
    %334 = arith.subf %330, %333 : vector<16x16xf32>
    %335 = math.exp %334 : vector<16x16xf32>
    %cst_107 = arith.constant dense<0.000000e+00> : vector<16xf32>
    %336 = vector.multi_reduction <add>, %335, %cst_107 [1] : vector<16x16xf32> to vector<16xf32>
    %337 = vector.shape_cast %336 : vector<16xf32> to vector<16x1xf32>
    %338 = tpu.reciprocal %337 {approx = true} : vector<16x1xf32> -> vector<16x1xf32>
    %339 = vector.broadcast %338 : vector<16x1xf32> to vector<16x16xf32>
    %340 = arith.mulf %335, %339 : vector<16x16xf32>
    %341 = arith.truncf %340 : vector<16x16xf32> to vector<16x16xbf16>
    %342 = vector.extract_strided_slice %237 {offsets = [16, 32], sizes = [16, 32], strides = [1, 1]} : vector<32x128xbf16> to vector<16x32xbf16>
    %cst_108 = arith.constant dense<0.000000e+00> : vector<16x32xf32>
    %343 = tpu.matmul %341, %342, %cst_108 {dimension_numbers = #tpu.dot_dimension_numbers<[1], [0], [0], [1], [0, 0, 1, 1], [], []>} : vector<16x16xbf16>, vector<16x32xbf16>, vector<16x32xf32> -> vector<16x32xf32>
    %344 = arith.truncf %343 : vector<16x32xf32> to vector<16x32xbf16>
    %c16_109 = arith.constant 16 : index
    %c32_110 = arith.constant 32 : index
    %345 = vector.load %arg11[%c16_109, %c32_110] : memref<32x128xbf16, #tpu.memory_space<vmem>>, vector<16x32xbf16>
    tpu.vector_store %arg11[%c16_109, %c32_110], %344 {strides = array<i32>} : memref<32x128xbf16, #tpu.memory_space<vmem>>, vector<16x32xbf16>,
    %346 = vector.extract_strided_slice %233 {offsets = [16, 64], sizes = [16, 32], strides = [1, 1]} : vector<32x128xbf16> to vector<16x32xbf16>
    %347 = vector.extract_strided_slice %235 {offsets = [16, 64], sizes = [16, 32], strides = [1, 1]} : vector<32x128xbf16> to vector<16x32xbf16>
    %cst_111 = arith.constant dense<0.000000e+00> : vector<16x16xf32>
    %348 = tpu.matmul %346, %347, %cst_111 {dimension_numbers = #tpu.dot_dimension_numbers<[1], [1], [0], [0], [0, 0, 1, 0], [], []>} : vector<16x32xbf16>, vector<16x32xbf16>, vector<16x16xf32> -> vector<16x16xf32>
    %cst_112 = arith.constant dense<0xFF800000> : vector<16xf32>
    %349 = vector.multi_reduction <maximumf>, %348, %cst_112 [1] : vector<16x16xf32> to vector<16xf32>
    %350 = vector.shape_cast %349 : vector<16xf32> to vector<16x1xf32>
    %351 = vector.broadcast %350 : vector<16x1xf32> to vector<16x16xf32>
    %352 = arith.subf %348, %351 : vector<16x16xf32>
    %353 = math.exp %352 : vector<16x16xf32>
    %cst_113 = arith.constant dense<0.000000e+00> : vector<16xf32>
    %354 = vector.multi_reduction <add>, %353, %cst_113 [1] : vector<16x16xf32> to vector<16xf32>
    %355 = vector.shape_cast %354 : vector<16xf32> to vector<16x1xf32>
    %356 = tpu.reciprocal %355 {approx = true} : vector<16x1xf32> -> vector<16x1xf32>
    %357 = vector.broadcast %356 : vector<16x1xf32> to vector<16x16xf32>
    %358 = arith.mulf %353, %357 : vector<16x16xf32>
    %359 = arith.truncf %358 : vector<16x16xf32> to vector<16x16xbf16>
    %360 = vector.extract_strided_slice %237 {offsets = [16, 64], sizes = [16, 32], strides = [1, 1]} : vector<32x128xbf16> to vector<16x32xbf16>
    %cst_114 = arith.constant dense<0.000000e+00> : vector<16x32xf32>
    %361 = tpu.matmul %359, %360, %cst_114 {dimension_numbers = #tpu.dot_dimension_numbers<[1], [0], [0], [1], [0, 0, 1, 1], [], []>} : vector<16x16xbf16>, vector<16x32xbf16>, vector<16x32xf32> -> vector<16x32xf32>
    %362 = arith.truncf %361 : vector<16x32xf32> to vector<16x32xbf16>
    %c16_115 = arith.constant 16 : index
    %c64_116 = arith.constant 64 : index
    %363 = vector.load %arg11[%c16_115, %c64_116] : memref<32x128xbf16, #tpu.memory_space<vmem>>, vector<16x32xbf16>
    tpu.vector_store %arg11[%c16_115, %c64_116], %362 {strides = array<i32>} : memref<32x128xbf16, #tpu.memory_space<vmem>>, vector<16x32xbf16>,
    %364 = vector.extract_strided_slice %233 {offsets = [16, 96], sizes = [16, 32], strides = [1, 1]} : vector<32x128xbf16> to vector<16x32xbf16>
    %365 = vector.extract_strided_slice %235 {offsets = [16, 96], sizes = [16, 32], strides = [1, 1]} : vector<32x128xbf16> to vector<16x32xbf16>
    %cst_117 = arith.constant dense<0.000000e+00> : vector<16x16xf32>
    %366 = tpu.matmul %364, %365, %cst_117 {dimension_numbers = #tpu.dot_dimension_numbers<[1], [1], [0], [0], [0, 0, 1, 0], [], []>} : vector<16x32xbf16>, vector<16x32xbf16>, vector<16x16xf32> -> vector<16x16xf32>
    %cst_118 = arith.constant dense<0xFF800000> : vector<16xf32>
    %367 = vector.multi_reduction <maximumf>, %366, %cst_118 [1] : vector<16x16xf32> to vector<16xf32>
    %368 = vector.shape_cast %367 : vector<16xf32> to vector<16x1xf32>
    %369 = vector.broadcast %368 : vector<16x1xf32> to vector<16x16xf32>
    %370 = arith.subf %366, %369 : vector<16x16xf32>
    %371 = math.exp %370 : vector<16x16xf32>
    %cst_119 = arith.constant dense<0.000000e+00> : vector<16xf32>
    %372 = vector.multi_reduction <add>, %371, %cst_119 [1] : vector<16x16xf32> to vector<16xf32>
    %373 = vector.shape_cast %372 : vector<16xf32> to vector<16x1xf32>
    %374 = tpu.reciprocal %373 {approx = true} : vector<16x1xf32> -> vector<16x1xf32>
    %375 = vector.broadcast %374 : vector<16x1xf32> to vector<16x16xf32>
    %376 = arith.mulf %371, %375 : vector<16x16xf32>
    %377 = arith.truncf %376 : vector<16x16xf32> to vector<16x16xbf16>
    %378 = vector.extract_strided_slice %237 {offsets = [16, 96], sizes = [16, 32], strides = [1, 1]} : vector<32x128xbf16> to vector<16x32xbf16>
    %cst_120 = arith.constant dense<0.000000e+00> : vector<16x32xf32>
    %379 = tpu.matmul %377, %378, %cst_120 {dimension_numbers = #tpu.dot_dimension_numbers<[1], [0], [0], [1], [0, 0, 1, 1], [], []>} : vector<16x16xbf16>, vector<16x32xbf16>, vector<16x32xf32> -> vector<16x32xf32>
    %380 = arith.truncf %379 : vector<16x32xf32> to vector<16x32xbf16>
    %c16_121 = arith.constant 16 : index
    %c96_122 = arith.constant 96 : index
    %381 = vector.load %arg11[%c16_121, %c96_122] : memref<32x128xbf16, #tpu.memory_space<vmem>>, vector<16x32xbf16>
    tpu.vector_store %arg11[%c16_121, %c96_122], %380 {strides = array<i32>} : memref<32x128xbf16, #tpu.memory_space<vmem>>, vector<16x32xbf16>,
    %c0_123 = arith.constant 0 : index
    %c0_124 = arith.constant 0 : index
    %382 = vector.load %arg11[%c0_123, %c0_124] : memref<32x128xbf16, #tpu.memory_space<vmem>>, vector<32x128xbf16>
    %cst_125 = arith.constant dense<0.000000e+00> : vector<32x128xf32>
    %383 = tpu.matmul %382, %25, %cst_125 {dimension_numbers = #tpu.dot_dimension_numbers<[1], [0], [0], [1], [0, 0, 1, 1], [], []>} : vector<32x128xbf16>, vector<128x128xbf16>, vector<32x128xf32> -> vector<32x128xf32>
    %384 = vector.broadcast %16 : vector<1x128xf32> to vector<32x128xf32>
    %385 = arith.addf %383, %384 : vector<32x128xf32>
    %386 = arith.addf %219, %385 : vector<32x128xf32>
    %cst_126 = arith.constant dense<0.000000e+00> : vector<32xf32>
    %387 = vector.multi_reduction <add>, %386, %cst_126 [1] : vector<32x128xf32> to vector<32xf32>
    %388 = vector.shape_cast %387 : vector<32xf32> to vector<32x1xf32>
    %cst_127 = arith.constant 1.280000e+02 : f32
    %389 = vector.broadcast %cst_127 : f32 to vector<32x1xf32>
    %390 = arith.divf %388, %389 : vector<32x1xf32>
    %391 = vector.broadcast %390 : vector<32x1xf32> to vector<32x128xf32>
    %392 = arith.subf %386, %391 : vector<32x128xf32>
    %393 = arith.mulf %392, %392 : vector<32x128xf32>
    %cst_128 = arith.constant dense<0.000000e+00> : vector<32xf32>
    %394 = vector.multi_reduction <add>, %393, %cst_128 [1] : vector<32x128xf32> to vector<32xf32>
    %395 = vector.shape_cast %394 : vector<32xf32> to vector<32x1xf32>
    %cst_129 = arith.constant 1.280000e+02 : f32
    %396 = vector.broadcast %cst_129 : f32 to vector<32x1xf32>
    %397 = arith.divf %395, %396 : vector<32x1xf32>
    %398 = vector.broadcast %390 : vector<32x1xf32> to vector<32x128xf32>
    %399 = arith.subf %386, %398 : vector<32x128xf32>
    %cst_130 = arith.constant 9.99999974E-6 : f32
    %400 = vector.broadcast %cst_130 : f32 to vector<32x1xf32>
    %401 = arith.addf %397, %400 : vector<32x1xf32>
    %402 = math.rsqrt %401 : vector<32x1xf32>
    %403 = vector.broadcast %402 : vector<32x1xf32> to vector<32x128xf32>
    %404 = arith.mulf %399, %403 : vector<32x128xf32>
    %405 = vector.broadcast %11 : vector<1x128xf32> to vector<32x128xf32>
    %406 = arith.mulf %404, %405 : vector<32x128xf32>
    %407 = vector.broadcast %12 : vector<1x128xf32> to vector<32x128xf32>
    %408 = arith.addf %406, %407 : vector<32x128xf32>
    %409 = arith.truncf %408 : vector<32x128xf32> to vector<32x128xbf16>
    %cst_131 = arith.constant dense<0.000000e+00> : vector<32x256xf32>
    %410 = tpu.matmul %409, %26, %cst_131 {dimension_numbers = #tpu.dot_dimension_numbers<[1], [0], [0], [1], [0, 0, 1, 1], [], []>} : vector<32x128xbf16>, vector<128x256xbf16>, vector<32x256xf32> -> vector<32x256xf32>
    %411 = vector.broadcast %20 : vector<1x256xf32> to vector<32x256xf32>
    %412 = arith.addf %410, %411 : vector<32x256xf32>
    %cst_132 = arith.constant 0.000000e+00 : f32
    %413 = vector.broadcast %cst_132 : f32 to vector<32x256xf32>
    %414 = arith.maximumf %412, %413 : vector<32x256xf32>
    %415 = arith.truncf %414 : vector<32x256xf32> to vector<32x256xbf16>
    %cst_133 = arith.constant dense<0.000000e+00> : vector<32x128xf32>
    %416 = tpu.matmul %415, %27, %cst_133 {dimension_numbers = #tpu.dot_dimension_numbers<[1], [0], [0], [1], [0, 0, 1, 1], [], []>} : vector<32x256xbf16>, vector<256x128xbf16>, vector<32x128xf32> -> vector<32x128xf32>
    %417 = vector.broadcast %17 : vector<1x128xf32> to vector<32x128xf32>
    %418 = arith.addf %416, %417 : vector<32x128xf32>
    %419 = arith.addf %408, %418 : vector<32x128xf32>
    %cst_134 = arith.constant dense<0.000000e+00> : vector<32xf32>
    %420 = vector.multi_reduction <add>, %419, %cst_134 [1] : vector<32x128xf32> to vector<32xf32>
    %421 = vector.shape_cast %420 : vector<32xf32> to vector<32x1xf32>
    %cst_135 = arith.constant 1.280000e+02 : f32
    %422 = vector.broadcast %cst_135 : f32 to vector<32x1xf32>
    %423 = arith.divf %421, %422 : vector<32x1xf32>
    %424 = vector.broadcast %423 : vector<32x1xf32> to vector<32x128xf32>
    %425 = arith.subf %419, %424 : vector<32x128xf32>
    %426 = arith.mulf %425, %425 : vector<32x128xf32>
    %cst_136 = arith.constant dense<0.000000e+00> : vector<32xf32>
    %427 = vector.multi_reduction <add>, %426, %cst_136 [1] : vector<32x128xf32> to vector<32xf32>
    %428 = vector.shape_cast %427 : vector<32xf32> to vector<32x1xf32>
    %cst_137 = arith.constant 1.280000e+02 : f32
    %429 = vector.broadcast %cst_137 : f32 to vector<32x1xf32>
    %430 = arith.divf %428, %429 : vector<32x1xf32>
    %431 = vector.broadcast %423 : vector<32x1xf32> to vector<32x128xf32>
    %432 = arith.subf %419, %431 : vector<32x128xf32>
    %cst_138 = arith.constant 9.99999974E-6 : f32
    %433 = vector.broadcast %cst_138 : f32 to vector<32x1xf32>
    %434 = arith.addf %430, %433 : vector<32x1xf32>
    %435 = math.rsqrt %434 : vector<32x1xf32>
    %436 = vector.broadcast %435 : vector<32x1xf32> to vector<32x128xf32>
    %437 = arith.mulf %432, %436 : vector<32x128xf32>
    %438 = vector.broadcast %13 : vector<1x128xf32> to vector<32x128xf32>
    %439 = arith.mulf %437, %438 : vector<32x128xf32>
    %440 = vector.broadcast %14 : vector<1x128xf32> to vector<32x128xf32>
    %441 = arith.addf %439, %440 : vector<32x128xf32>
    %442 = arith.truncf %441 : vector<32x128xf32> to vector<32x128xbf16>
    %cst_139 = arith.constant dense<0.000000e+00> : vector<32x384xf32>
    %443 = tpu.matmul %442, %22, %cst_139 {dimension_numbers = #tpu.dot_dimension_numbers<[1], [0], [0], [1], [0, 0, 1, 1], [], []>} : vector<32x128xbf16>, vector<128x384xbf16>, vector<32x384xf32> -> vector<32x384xf32>
    %444 = vector.broadcast %18 : vector<1x384xf32> to vector<32x384xf32>
    %445 = arith.addf %443, %444 : vector<32x384xf32>
    %446 = vector.extract_strided_slice %445 {offsets = [0, 0], sizes = [32, 128], strides = [1, 1]} : vector<32x384xf32> to vector<32x128xf32>
    %cst_140 = arith.constant 0.176776692 : f32
    %447 = vector.broadcast %cst_140 : f32 to vector<32x128xf32>
    %448 = arith.mulf %446, %447 : vector<32x128xf32>
    %449 = arith.truncf %448 : vector<32x128xf32> to vector<32x128xbf16>
    %450 = vector.extract_strided_slice %445 {offsets = [0, 128], sizes = [32, 128], strides = [1, 1]} : vector<32x384xf32> to vector<32x128xf32>
    %451 = arith.truncf %450 : vector<32x128xf32> to vector<32x128xbf16>
    %452 = vector.extract_strided_slice %445 {offsets = [0, 256], sizes = [32, 128], strides = [1, 1]} : vector<32x384xf32> to vector<32x128xf32>
    %453 = arith.truncf %452 : vector<32x128xf32> to vector<32x128xbf16>
    %454 = vector.extract_strided_slice %449 {offsets = [0, 0], sizes = [16, 32], strides = [1, 1]} : vector<32x128xbf16> to vector<16x32xbf16>
    %455 = vector.extract_strided_slice %451 {offsets = [0, 0], sizes = [16, 32], strides = [1, 1]} : vector<32x128xbf16> to vector<16x32xbf16>
    %cst_141 = arith.constant dense<0.000000e+00> : vector<16x16xf32>
    %456 = tpu.matmul %454, %455, %cst_141 {dimension_numbers = #tpu.dot_dimension_numbers<[1], [1], [0], [0], [0, 0, 1, 0], [], []>} : vector<16x32xbf16>, vector<16x32xbf16>, vector<16x16xf32> -> vector<16x16xf32>
    %457 = arith.addf %456, %7 : vector<16x16xf32>
    %cst_142 = arith.constant dense<0xFF800000> : vector<16xf32>
    %458 = vector.multi_reduction <maximumf>, %457, %cst_142 [1] : vector<16x16xf32> to vector<16xf32>
    %459 = vector.shape_cast %458 : vector<16xf32> to vector<16x1xf32>
    %460 = vector.broadcast %459 : vector<16x1xf32> to vector<16x16xf32>
    %461 = arith.subf %457, %460 : vector<16x16xf32>
    %462 = math.exp %461 : vector<16x16xf32>
    %cst_143 = arith.constant dense<0.000000e+00> : vector<16xf32>
    %463 = vector.multi_reduction <add>, %462, %cst_143 [1] : vector<16x16xf32> to vector<16xf32>
    %464 = vector.shape_cast %463 : vector<16xf32> to vector<16x1xf32>
    %465 = tpu.reciprocal %464 {approx = true} : vector<16x1xf32> -> vector<16x1xf32>
    %466 = vector.broadcast %465 : vector<16x1xf32> to vector<16x16xf32>
    %467 = arith.mulf %462, %466 : vector<16x16xf32>
    %468 = arith.truncf %467 : vector<16x16xf32> to vector<16x16xbf16>
    %469 = vector.extract_strided_slice %453 {offsets = [0, 0], sizes = [16, 32], strides = [1, 1]} : vector<32x128xbf16> to vector<16x32xbf16>
    %cst_144 = arith.constant dense<0.000000e+00> : vector<16x32xf32>
    %470 = tpu.matmul %468, %469, %cst_144 {dimension_numbers = #tpu.dot_dimension_numbers<[1], [0], [0], [1], [0, 0, 1, 1], [], []>} : vector<16x16xbf16>, vector<16x32xbf16>, vector<16x32xf32> -> vector<16x32xf32>
    %471 = arith.truncf %470 : vector<16x32xf32> to vector<16x32xbf16>
    %c0_145 = arith.constant 0 : index
    %c0_146 = arith.constant 0 : index
    %472 = vector.load %arg11[%c0_145, %c0_146] : memref<32x128xbf16, #tpu.memory_space<vmem>>, vector<16x32xbf16>
    tpu.vector_store %arg11[%c0_145, %c0_146], %471 {strides = array<i32>} : memref<32x128xbf16, #tpu.memory_space<vmem>>, vector<16x32xbf16>,
    %473 = vector.extract_strided_slice %449 {offsets = [0, 32], sizes = [16, 32], strides = [1, 1]} : vector<32x128xbf16> to vector<16x32xbf16>
    %474 = vector.extract_strided_slice %451 {offsets = [0, 32], sizes = [16, 32], strides = [1, 1]} : vector<32x128xbf16> to vector<16x32xbf16>
    %cst_147 = arith.constant dense<0.000000e+00> : vector<16x16xf32>
    %475 = tpu.matmul %473, %474, %cst_147 {dimension_numbers = #tpu.dot_dimension_numbers<[1], [1], [0], [0], [0, 0, 1, 0], [], []>} : vector<16x32xbf16>, vector<16x32xbf16>, vector<16x16xf32> -> vector<16x16xf32>
    %476 = arith.addf %475, %7 : vector<16x16xf32>
    %cst_148 = arith.constant dense<0xFF800000> : vector<16xf32>
    %477 = vector.multi_reduction <maximumf>, %476, %cst_148 [1] : vector<16x16xf32> to vector<16xf32>
    %478 = vector.shape_cast %477 : vector<16xf32> to vector<16x1xf32>
    %479 = vector.broadcast %478 : vector<16x1xf32> to vector<16x16xf32>
    %480 = arith.subf %476, %479 : vector<16x16xf32>
    %481 = math.exp %480 : vector<16x16xf32>
    %cst_149 = arith.constant dense<0.000000e+00> : vector<16xf32>
    %482 = vector.multi_reduction <add>, %481, %cst_149 [1] : vector<16x16xf32> to vector<16xf32>
    %483 = vector.shape_cast %482 : vector<16xf32> to vector<16x1xf32>
    %484 = tpu.reciprocal %483 {approx = true} : vector<16x1xf32> -> vector<16x1xf32>
    %485 = vector.broadcast %484 : vector<16x1xf32> to vector<16x16xf32>
    %486 = arith.mulf %481, %485 : vector<16x16xf32>
    %487 = arith.truncf %486 : vector<16x16xf32> to vector<16x16xbf16>
    %488 = vector.extract_strided_slice %453 {offsets = [0, 32], sizes = [16, 32], strides = [1, 1]} : vector<32x128xbf16> to vector<16x32xbf16>
    %cst_150 = arith.constant dense<0.000000e+00> : vector<16x32xf32>
    %489 = tpu.matmul %487, %488, %cst_150 {dimension_numbers = #tpu.dot_dimension_numbers<[1], [0], [0], [1], [0, 0, 1, 1], [], []>} : vector<16x16xbf16>, vector<16x32xbf16>, vector<16x32xf32> -> vector<16x32xf32>
    %490 = arith.truncf %489 : vector<16x32xf32> to vector<16x32xbf16>
    %c0_151 = arith.constant 0 : index
    %c32_152 = arith.constant 32 : index
    %491 = vector.load %arg11[%c0_151, %c32_152] : memref<32x128xbf16, #tpu.memory_space<vmem>>, vector<16x32xbf16>
    tpu.vector_store %arg11[%c0_151, %c32_152], %490 {strides = array<i32>} : memref<32x128xbf16, #tpu.memory_space<vmem>>, vector<16x32xbf16>,
    %492 = vector.extract_strided_slice %449 {offsets = [0, 64], sizes = [16, 32], strides = [1, 1]} : vector<32x128xbf16> to vector<16x32xbf16>
    %493 = vector.extract_strided_slice %451 {offsets = [0, 64], sizes = [16, 32], strides = [1, 1]} : vector<32x128xbf16> to vector<16x32xbf16>
    %cst_153 = arith.constant dense<0.000000e+00> : vector<16x16xf32>
    %494 = tpu.matmul %492, %493, %cst_153 {dimension_numbers = #tpu.dot_dimension_numbers<[1], [1], [0], [0], [0, 0, 1, 0], [], []>} : vector<16x32xbf16>, vector<16x32xbf16>, vector<16x16xf32> -> vector<16x16xf32>
    %495 = arith.addf %494, %7 : vector<16x16xf32>
    %cst_154 = arith.constant dense<0xFF800000> : vector<16xf32>
    %496 = vector.multi_reduction <maximumf>, %495, %cst_154 [1] : vector<16x16xf32> to vector<16xf32>
    %497 = vector.shape_cast %496 : vector<16xf32> to vector<16x1xf32>
    %498 = vector.broadcast %497 : vector<16x1xf32> to vector<16x16xf32>
    %499 = arith.subf %495, %498 : vector<16x16xf32>
    %500 = math.exp %499 : vector<16x16xf32>
    %cst_155 = arith.constant dense<0.000000e+00> : vector<16xf32>
    %501 = vector.multi_reduction <add>, %500, %cst_155 [1] : vector<16x16xf32> to vector<16xf32>
    %502 = vector.shape_cast %501 : vector<16xf32> to vector<16x1xf32>
    %503 = tpu.reciprocal %502 {approx = true} : vector<16x1xf32> -> vector<16x1xf32>
    %504 = vector.broadcast %503 : vector<16x1xf32> to vector<16x16xf32>
    %505 = arith.mulf %500, %504 : vector<16x16xf32>
    %506 = arith.truncf %505 : vector<16x16xf32> to vector<16x16xbf16>
    %507 = vector.extract_strided_slice %453 {offsets = [0, 64], sizes = [16, 32], strides = [1, 1]} : vector<32x128xbf16> to vector<16x32xbf16>
    %cst_156 = arith.constant dense<0.000000e+00> : vector<16x32xf32>
    %508 = tpu.matmul %506, %507, %cst_156 {dimension_numbers = #tpu.dot_dimension_numbers<[1], [0], [0], [1], [0, 0, 1, 1], [], []>} : vector<16x16xbf16>, vector<16x32xbf16>, vector<16x32xf32> -> vector<16x32xf32>
    %509 = arith.truncf %508 : vector<16x32xf32> to vector<16x32xbf16>
    %c0_157 = arith.constant 0 : index
    %c64_158 = arith.constant 64 : index
    %510 = vector.load %arg11[%c0_157, %c64_158] : memref<32x128xbf16, #tpu.memory_space<vmem>>, vector<16x32xbf16>
    tpu.vector_store %arg11[%c0_157, %c64_158], %509 {strides = array<i32>} : memref<32x128xbf16, #tpu.memory_space<vmem>>, vector<16x32xbf16>,
    %511 = vector.extract_strided_slice %449 {offsets = [0, 96], sizes = [16, 32], strides = [1, 1]} : vector<32x128xbf16> to vector<16x32xbf16>
    %512 = vector.extract_strided_slice %451 {offsets = [0, 96], sizes = [16, 32], strides = [1, 1]} : vector<32x128xbf16> to vector<16x32xbf16>
    %cst_159 = arith.constant dense<0.000000e+00> : vector<16x16xf32>
    %513 = tpu.matmul %511, %512, %cst_159 {dimension_numbers = #tpu.dot_dimension_numbers<[1], [1], [0], [0], [0, 0, 1, 0], [], []>} : vector<16x32xbf16>, vector<16x32xbf16>, vector<16x16xf32> -> vector<16x16xf32>
    %514 = arith.addf %513, %7 : vector<16x16xf32>
    %cst_160 = arith.constant dense<0xFF800000> : vector<16xf32>
    %515 = vector.multi_reduction <maximumf>, %514, %cst_160 [1] : vector<16x16xf32> to vector<16xf32>
    %516 = vector.shape_cast %515 : vector<16xf32> to vector<16x1xf32>
    %517 = vector.broadcast %516 : vector<16x1xf32> to vector<16x16xf32>
    %518 = arith.subf %514, %517 : vector<16x16xf32>
    %519 = math.exp %518 : vector<16x16xf32>
    %cst_161 = arith.constant dense<0.000000e+00> : vector<16xf32>
    %520 = vector.multi_reduction <add>, %519, %cst_161 [1] : vector<16x16xf32> to vector<16xf32>
    %521 = vector.shape_cast %520 : vector<16xf32> to vector<16x1xf32>
    %522 = tpu.reciprocal %521 {approx = true} : vector<16x1xf32> -> vector<16x1xf32>
    %523 = vector.broadcast %522 : vector<16x1xf32> to vector<16x16xf32>
    %524 = arith.mulf %519, %523 : vector<16x16xf32>
    %525 = arith.truncf %524 : vector<16x16xf32> to vector<16x16xbf16>
    %526 = vector.extract_strided_slice %453 {offsets = [0, 96], sizes = [16, 32], strides = [1, 1]} : vector<32x128xbf16> to vector<16x32xbf16>
    %cst_162 = arith.constant dense<0.000000e+00> : vector<16x32xf32>
    %527 = tpu.matmul %525, %526, %cst_162 {dimension_numbers = #tpu.dot_dimension_numbers<[1], [0], [0], [1], [0, 0, 1, 1], [], []>} : vector<16x16xbf16>, vector<16x32xbf16>, vector<16x32xf32> -> vector<16x32xf32>
    %528 = arith.truncf %527 : vector<16x32xf32> to vector<16x32xbf16>
    %c0_163 = arith.constant 0 : index
    %c96_164 = arith.constant 96 : index
    %529 = vector.load %arg11[%c0_163, %c96_164] : memref<32x128xbf16, #tpu.memory_space<vmem>>, vector<16x32xbf16>
    tpu.vector_store %arg11[%c0_163, %c96_164], %528 {strides = array<i32>} : memref<32x128xbf16, #tpu.memory_space<vmem>>, vector<16x32xbf16>,
    %530 = vector.extract_strided_slice %449 {offsets = [16, 0], sizes = [16, 32], strides = [1, 1]} : vector<32x128xbf16> to vector<16x32xbf16>
    %531 = vector.extract_strided_slice %451 {offsets = [16, 0], sizes = [16, 32], strides = [1, 1]} : vector<32x128xbf16> to vector<16x32xbf16>
    %cst_165 = arith.constant dense<0.000000e+00> : vector<16x16xf32>
    %532 = tpu.matmul %530, %531, %cst_165 {dimension_numbers = #tpu.dot_dimension_numbers<[1], [1], [0], [0], [0, 0, 1, 0], [], []>} : vector<16x32xbf16>, vector<16x32xbf16>, vector<16x16xf32> -> vector<16x16xf32>
    %533 = arith.addf %532, %7 : vector<16x16xf32>
    %cst_166 = arith.constant dense<0xFF800000> : vector<16xf32>
    %534 = vector.multi_reduction <maximumf>, %533, %cst_166 [1] : vector<16x16xf32> to vector<16xf32>
    %535 = vector.shape_cast %534 : vector<16xf32> to vector<16x1xf32>
    %536 = vector.broadcast %535 : vector<16x1xf32> to vector<16x16xf32>
    %537 = arith.subf %533, %536 : vector<16x16xf32>
    %538 = math.exp %537 : vector<16x16xf32>
    %cst_167 = arith.constant dense<0.000000e+00> : vector<16xf32>
    %539 = vector.multi_reduction <add>, %538, %cst_167 [1] : vector<16x16xf32> to vector<16xf32>
    %540 = vector.shape_cast %539 : vector<16xf32> to vector<16x1xf32>
    %541 = tpu.reciprocal %540 {approx = true} : vector<16x1xf32> -> vector<16x1xf32>
    %542 = vector.broadcast %541 : vector<16x1xf32> to vector<16x16xf32>
    %543 = arith.mulf %538, %542 : vector<16x16xf32>
    %544 = arith.truncf %543 : vector<16x16xf32> to vector<16x16xbf16>
    %545 = vector.extract_strided_slice %453 {offsets = [16, 0], sizes = [16, 32], strides = [1, 1]} : vector<32x128xbf16> to vector<16x32xbf16>
    %cst_168 = arith.constant dense<0.000000e+00> : vector<16x32xf32>
    %546 = tpu.matmul %544, %545, %cst_168 {dimension_numbers = #tpu.dot_dimension_numbers<[1], [0], [0], [1], [0, 0, 1, 1], [], []>} : vector<16x16xbf16>, vector<16x32xbf16>, vector<16x32xf32> -> vector<16x32xf32>
    %547 = arith.truncf %546 : vector<16x32xf32> to vector<16x32xbf16>
    %c16_169 = arith.constant 16 : index
    %c0_170 = arith.constant 0 : index
    %548 = vector.load %arg11[%c16_169, %c0_170] : memref<32x128xbf16, #tpu.memory_space<vmem>>, vector<16x32xbf16>
    tpu.vector_store %arg11[%c16_169, %c0_170], %547 {strides = array<i32>} : memref<32x128xbf16, #tpu.memory_space<vmem>>, vector<16x32xbf16>,
    %549 = vector.extract_strided_slice %449 {offsets = [16, 32], sizes = [16, 32], strides = [1, 1]} : vector<32x128xbf16> to vector<16x32xbf16>
    %550 = vector.extract_strided_slice %451 {offsets = [16, 32], sizes = [16, 32], strides = [1, 1]} : vector<32x128xbf16> to vector<16x32xbf16>
    %cst_171 = arith.constant dense<0.000000e+00> : vector<16x16xf32>
    %551 = tpu.matmul %549, %550, %cst_171 {dimension_numbers = #tpu.dot_dimension_numbers<[1], [1], [0], [0], [0, 0, 1, 0], [], []>} : vector<16x32xbf16>, vector<16x32xbf16>, vector<16x16xf32> -> vector<16x16xf32>
    %552 = arith.addf %551, %7 : vector<16x16xf32>
    %cst_172 = arith.constant dense<0xFF800000> : vector<16xf32>
    %553 = vector.multi_reduction <maximumf>, %552, %cst_172 [1] : vector<16x16xf32> to vector<16xf32>
    %554 = vector.shape_cast %553 : vector<16xf32> to vector<16x1xf32>
    %555 = vector.broadcast %554 : vector<16x1xf32> to vector<16x16xf32>
    %556 = arith.subf %552, %555 : vector<16x16xf32>
    %557 = math.exp %556 : vector<16x16xf32>
    %cst_173 = arith.constant dense<0.000000e+00> : vector<16xf32>
    %558 = vector.multi_reduction <add>, %557, %cst_173 [1] : vector<16x16xf32> to vector<16xf32>
    %559 = vector.shape_cast %558 : vector<16xf32> to vector<16x1xf32>
    %560 = tpu.reciprocal %559 {approx = true} : vector<16x1xf32> -> vector<16x1xf32>
    %561 = vector.broadcast %560 : vector<16x1xf32> to vector<16x16xf32>
    %562 = arith.mulf %557, %561 : vector<16x16xf32>
    %563 = arith.truncf %562 : vector<16x16xf32> to vector<16x16xbf16>
    %564 = vector.extract_strided_slice %453 {offsets = [16, 32], sizes = [16, 32], strides = [1, 1]} : vector<32x128xbf16> to vector<16x32xbf16>
    %cst_174 = arith.constant dense<0.000000e+00> : vector<16x32xf32>
    %565 = tpu.matmul %563, %564, %cst_174 {dimension_numbers = #tpu.dot_dimension_numbers<[1], [0], [0], [1], [0, 0, 1, 1], [], []>} : vector<16x16xbf16>, vector<16x32xbf16>, vector<16x32xf32> -> vector<16x32xf32>
    %566 = arith.truncf %565 : vector<16x32xf32> to vector<16x32xbf16>
    %c16_175 = arith.constant 16 : index
    %c32_176 = arith.constant 32 : index
    %567 = vector.load %arg11[%c16_175, %c32_176] : memref<32x128xbf16, #tpu.memory_space<vmem>>, vector<16x32xbf16>
    tpu.vector_store %arg11[%c16_175, %c32_176], %566 {strides = array<i32>} : memref<32x128xbf16, #tpu.memory_space<vmem>>, vector<16x32xbf16>,
    %568 = vector.extract_strided_slice %449 {offsets = [16, 64], sizes = [16, 32], strides = [1, 1]} : vector<32x128xbf16> to vector<16x32xbf16>
    %569 = vector.extract_strided_slice %451 {offsets = [16, 64], sizes = [16, 32], strides = [1, 1]} : vector<32x128xbf16> to vector<16x32xbf16>
    %cst_177 = arith.constant dense<0.000000e+00> : vector<16x16xf32>
    %570 = tpu.matmul %568, %569, %cst_177 {dimension_numbers = #tpu.dot_dimension_numbers<[1], [1], [0], [0], [0, 0, 1, 0], [], []>} : vector<16x32xbf16>, vector<16x32xbf16>, vector<16x16xf32> -> vector<16x16xf32>
    %571 = arith.addf %570, %7 : vector<16x16xf32>
    %cst_178 = arith.constant dense<0xFF800000> : vector<16xf32>
    %572 = vector.multi_reduction <maximumf>, %571, %cst_178 [1] : vector<16x16xf32> to vector<16xf32>
    %573 = vector.shape_cast %572 : vector<16xf32> to vector<16x1xf32>
    %574 = vector.broadcast %573 : vector<16x1xf32> to vector<16x16xf32>
    %575 = arith.subf %571, %574 : vector<16x16xf32>
    %576 = math.exp %575 : vector<16x16xf32>
    %cst_179 = arith.constant dense<0.000000e+00> : vector<16xf32>
    %577 = vector.multi_reduction <add>, %576, %cst_179 [1] : vector<16x16xf32> to vector<16xf32>
    %578 = vector.shape_cast %577 : vector<16xf32> to vector<16x1xf32>
    %579 = tpu.reciprocal %578 {approx = true} : vector<16x1xf32> -> vector<16x1xf32>
    %580 = vector.broadcast %579 : vector<16x1xf32> to vector<16x16xf32>
    %581 = arith.mulf %576, %580 : vector<16x16xf32>
    %582 = arith.truncf %581 : vector<16x16xf32> to vector<16x16xbf16>
    %583 = vector.extract_strided_slice %453 {offsets = [16, 64], sizes = [16, 32], strides = [1, 1]} : vector<32x128xbf16> to vector<16x32xbf16>
    %cst_180 = arith.constant dense<0.000000e+00> : vector<16x32xf32>
    %584 = tpu.matmul %582, %583, %cst_180 {dimension_numbers = #tpu.dot_dimension_numbers<[1], [0], [0], [1], [0, 0, 1, 1], [], []>} : vector<16x16xbf16>, vector<16x32xbf16>, vector<16x32xf32> -> vector<16x32xf32>
    %585 = arith.truncf %584 : vector<16x32xf32> to vector<16x32xbf16>
    %c16_181 = arith.constant 16 : index
    %c64_182 = arith.constant 64 : index
    %586 = vector.load %arg11[%c16_181, %c64_182] : memref<32x128xbf16, #tpu.memory_space<vmem>>, vector<16x32xbf16>
    tpu.vector_store %arg11[%c16_181, %c64_182], %585 {strides = array<i32>} : memref<32x128xbf16, #tpu.memory_space<vmem>>, vector<16x32xbf16>,
    %587 = vector.extract_strided_slice %449 {offsets = [16, 96], sizes = [16, 32], strides = [1, 1]} : vector<32x128xbf16> to vector<16x32xbf16>
    %588 = vector.extract_strided_slice %451 {offsets = [16, 96], sizes = [16, 32], strides = [1, 1]} : vector<32x128xbf16> to vector<16x32xbf16>
    %cst_183 = arith.constant dense<0.000000e+00> : vector<16x16xf32>
    %589 = tpu.matmul %587, %588, %cst_183 {dimension_numbers = #tpu.dot_dimension_numbers<[1], [1], [0], [0], [0, 0, 1, 0], [], []>} : vector<16x32xbf16>, vector<16x32xbf16>, vector<16x16xf32> -> vector<16x16xf32>
    %590 = arith.addf %589, %7 : vector<16x16xf32>
    %cst_184 = arith.constant dense<0xFF800000> : vector<16xf32>
    %591 = vector.multi_reduction <maximumf>, %590, %cst_184 [1] : vector<16x16xf32> to vector<16xf32>
    %592 = vector.shape_cast %591 : vector<16xf32> to vector<16x1xf32>
    %593 = vector.broadcast %592 : vector<16x1xf32> to vector<16x16xf32>
    %594 = arith.subf %590, %593 : vector<16x16xf32>
    %595 = math.exp %594 : vector<16x16xf32>
    %cst_185 = arith.constant dense<0.000000e+00> : vector<16xf32>
    %596 = vector.multi_reduction <add>, %595, %cst_185 [1] : vector<16x16xf32> to vector<16xf32>
    %597 = vector.shape_cast %596 : vector<16xf32> to vector<16x1xf32>
    %598 = tpu.reciprocal %597 {approx = true} : vector<16x1xf32> -> vector<16x1xf32>
    %599 = vector.broadcast %598 : vector<16x1xf32> to vector<16x16xf32>
    %600 = arith.mulf %595, %599 : vector<16x16xf32>
    %601 = arith.truncf %600 : vector<16x16xf32> to vector<16x16xbf16>
    %602 = vector.extract_strided_slice %453 {offsets = [16, 96], sizes = [16, 32], strides = [1, 1]} : vector<32x128xbf16> to vector<16x32xbf16>
    %cst_186 = arith.constant dense<0.000000e+00> : vector<16x32xf32>
    %603 = tpu.matmul %601, %602, %cst_186 {dimension_numbers = #tpu.dot_dimension_numbers<[1], [0], [0], [1], [0, 0, 1, 1], [], []>} : vector<16x16xbf16>, vector<16x32xbf16>, vector<16x32xf32> -> vector<16x32xf32>
    %604 = arith.truncf %603 : vector<16x32xf32> to vector<16x32xbf16>
    %c16_187 = arith.constant 16 : index
    %c96_188 = arith.constant 96 : index
    %605 = vector.load %arg11[%c16_187, %c96_188] : memref<32x128xbf16, #tpu.memory_space<vmem>>, vector<16x32xbf16>
    tpu.vector_store %arg11[%c16_187, %c96_188], %604 {strides = array<i32>} : memref<32x128xbf16, #tpu.memory_space<vmem>>, vector<16x32xbf16>,
    %c0_189 = arith.constant 0 : index
    %c0_190 = arith.constant 0 : index
    %606 = vector.load %arg11[%c0_189, %c0_190] : memref<32x128xbf16, #tpu.memory_space<vmem>>, vector<32x128xbf16>
    %cst_191 = arith.constant dense<0.000000e+00> : vector<32x128xf32>
    %607 = tpu.matmul %606, %23, %cst_191 {dimension_numbers = #tpu.dot_dimension_numbers<[1], [0], [0], [1], [0, 0, 1, 1], [], []>} : vector<32x128xbf16>, vector<128x128xbf16>, vector<32x128xf32> -> vector<32x128xf32>
    %608 = vector.broadcast %15 : vector<1x128xf32> to vector<32x128xf32>
    %609 = arith.addf %607, %608 : vector<32x128xf32>
    %610 = arith.addf %441, %609 : vector<32x128xf32>
    %cst_192 = arith.constant dense<0.000000e+00> : vector<32xf32>
    %611 = vector.multi_reduction <add>, %610, %cst_192 [1] : vector<32x128xf32> to vector<32xf32>
    %612 = vector.shape_cast %611 : vector<32xf32> to vector<32x1xf32>
    %cst_193 = arith.constant 1.280000e+02 : f32
    %613 = vector.broadcast %cst_193 : f32 to vector<32x1xf32>
    %614 = arith.divf %612, %613 : vector<32x1xf32>
    %615 = vector.broadcast %614 : vector<32x1xf32> to vector<32x128xf32>
    %616 = arith.subf %610, %615 : vector<32x128xf32>
    %617 = arith.mulf %616, %616 : vector<32x128xf32>
    %cst_194 = arith.constant dense<0.000000e+00> : vector<32xf32>
    %618 = vector.multi_reduction <add>, %617, %cst_194 [1] : vector<32x128xf32> to vector<32xf32>
    %619 = vector.shape_cast %618 : vector<32xf32> to vector<32x1xf32>
    %cst_195 = arith.constant 1.280000e+02 : f32
    %620 = vector.broadcast %cst_195 : f32 to vector<32x1xf32>
    %621 = arith.divf %619, %620 : vector<32x1xf32>
    %622 = vector.broadcast %614 : vector<32x1xf32> to vector<32x128xf32>
    %623 = arith.subf %610, %622 : vector<32x128xf32>
    %cst_196 = arith.constant 9.99999974E-6 : f32
    %624 = vector.broadcast %cst_196 : f32 to vector<32x1xf32>
    %625 = arith.addf %621, %624 : vector<32x1xf32>
    %626 = math.rsqrt %625 : vector<32x1xf32>
    %627 = vector.broadcast %626 : vector<32x1xf32> to vector<32x128xf32>
    %628 = arith.mulf %623, %627 : vector<32x128xf32>
    %629 = vector.broadcast %9 : vector<1x128xf32> to vector<32x128xf32>
    %630 = arith.mulf %628, %629 : vector<32x128xf32>
    %631 = vector.broadcast %10 : vector<1x128xf32> to vector<32x128xf32>
    %632 = arith.addf %630, %631 : vector<32x128xf32>
    %633 = arith.truncf %632 : vector<32x128xf32> to vector<32x128xbf16>
    %634 = vector.extract_strided_slice %24 {offsets = [0, 0], sizes = [128, 128], strides = [1, 1]} : vector<128x384xbf16> to vector<128x128xbf16>
    %cst_197 = arith.constant dense<0.000000e+00> : vector<32x128xf32>
    %635 = tpu.matmul %633, %634, %cst_197 {dimension_numbers = #tpu.dot_dimension_numbers<[1], [0], [0], [1], [0, 0, 1, 1], [], []>} : vector<32x128xbf16>, vector<128x128xbf16>, vector<32x128xf32> -> vector<32x128xf32>
    %636 = vector.extract_strided_slice %19 {offsets = [0, 0], sizes = [1, 128], strides = [1, 1]} : vector<1x384xf32> to vector<1x128xf32>
    %637 = vector.broadcast %636 : vector<1x128xf32> to vector<32x128xf32>
    %638 = arith.addf %635, %637 : vector<32x128xf32>
    %639 = vector.extract_strided_slice %24 {offsets = [0, 128], sizes = [128, 256], strides = [1, 1]} : vector<128x384xbf16> to vector<128x256xbf16>
    %cst_198 = arith.constant dense<0.000000e+00> : vector<32x256xf32>
    %640 = tpu.matmul %442, %639, %cst_198 {dimension_numbers = #tpu.dot_dimension_numbers<[1], [0], [0], [1], [0, 0, 1, 1], [], []>} : vector<32x128xbf16>, vector<128x256xbf16>, vector<32x256xf32> -> vector<32x256xf32>
    %641 = vector.extract_strided_slice %19 {offsets = [0, 128], sizes = [1, 256], strides = [1, 1]} : vector<1x384xf32> to vector<1x256xf32>
    %642 = vector.broadcast %641 : vector<1x256xf32> to vector<32x256xf32>
    %643 = arith.addf %640, %642 : vector<32x256xf32>
    %cst_199 = arith.constant 0.176776692 : f32
    %644 = vector.broadcast %cst_199 : f32 to vector<32x128xf32>
    %645 = arith.mulf %638, %644 : vector<32x128xf32>
    %646 = arith.truncf %645 : vector<32x128xf32> to vector<32x128xbf16>
    %647 = vector.extract_strided_slice %643 {offsets = [0, 0], sizes = [32, 128], strides = [1, 1]} : vector<32x256xf32> to vector<32x128xf32>
    %648 = arith.truncf %647 : vector<32x128xf32> to vector<32x128xbf16>
    %649 = vector.extract_strided_slice %643 {offsets = [0, 128], sizes = [32, 128], strides = [1, 1]} : vector<32x256xf32> to vector<32x128xf32>
    %650 = arith.truncf %649 : vector<32x128xf32> to vector<32x128xbf16>
    %651 = vector.extract_strided_slice %646 {offsets = [0, 0], sizes = [16, 32], strides = [1, 1]} : vector<32x128xbf16> to vector<16x32xbf16>
    %652 = vector.extract_strided_slice %648 {offsets = [0, 0], sizes = [16, 32], strides = [1, 1]} : vector<32x128xbf16> to vector<16x32xbf16>
    %cst_200 = arith.constant dense<0.000000e+00> : vector<16x16xf32>
    %653 = tpu.matmul %651, %652, %cst_200 {dimension_numbers = #tpu.dot_dimension_numbers<[1], [1], [0], [0], [0, 0, 1, 0], [], []>} : vector<16x32xbf16>, vector<16x32xbf16>, vector<16x16xf32> -> vector<16x16xf32>
    %cst_201 = arith.constant dense<0xFF800000> : vector<16xf32>
    %654 = vector.multi_reduction <maximumf>, %653, %cst_201 [1] : vector<16x16xf32> to vector<16xf32>
    %655 = vector.shape_cast %654 : vector<16xf32> to vector<16x1xf32>
    %656 = vector.broadcast %655 : vector<16x1xf32> to vector<16x16xf32>
    %657 = arith.subf %653, %656 : vector<16x16xf32>
    %658 = math.exp %657 : vector<16x16xf32>
    %cst_202 = arith.constant dense<0.000000e+00> : vector<16xf32>
    %659 = vector.multi_reduction <add>, %658, %cst_202 [1] : vector<16x16xf32> to vector<16xf32>
    %660 = vector.shape_cast %659 : vector<16xf32> to vector<16x1xf32>
    %661 = tpu.reciprocal %660 {approx = true} : vector<16x1xf32> -> vector<16x1xf32>
    %662 = vector.broadcast %661 : vector<16x1xf32> to vector<16x16xf32>
    %663 = arith.mulf %658, %662 : vector<16x16xf32>
    %664 = arith.truncf %663 : vector<16x16xf32> to vector<16x16xbf16>
    %665 = vector.extract_strided_slice %650 {offsets = [0, 0], sizes = [16, 32], strides = [1, 1]} : vector<32x128xbf16> to vector<16x32xbf16>
    %cst_203 = arith.constant dense<0.000000e+00> : vector<16x32xf32>
    %666 = tpu.matmul %664, %665, %cst_203 {dimension_numbers = #tpu.dot_dimension_numbers<[1], [0], [0], [1], [0, 0, 1, 1], [], []>} : vector<16x16xbf16>, vector<16x32xbf16>, vector<16x32xf32> -> vector<16x32xf32>
    %667 = arith.truncf %666 : vector<16x32xf32> to vector<16x32xbf16>
    %c0_204 = arith.constant 0 : index
    %c0_205 = arith.constant 0 : index
    %668 = vector.load %arg11[%c0_204, %c0_205] : memref<32x128xbf16, #tpu.memory_space<vmem>>, vector<16x32xbf16>
    tpu.vector_store %arg11[%c0_204, %c0_205], %667 {strides = array<i32>} : memref<32x128xbf16, #tpu.memory_space<vmem>>, vector<16x32xbf16>,
    %669 = vector.extract_strided_slice %646 {offsets = [0, 32], sizes = [16, 32], strides = [1, 1]} : vector<32x128xbf16> to vector<16x32xbf16>
    %670 = vector.extract_strided_slice %648 {offsets = [0, 32], sizes = [16, 32], strides = [1, 1]} : vector<32x128xbf16> to vector<16x32xbf16>
    %cst_206 = arith.constant dense<0.000000e+00> : vector<16x16xf32>
    %671 = tpu.matmul %669, %670, %cst_206 {dimension_numbers = #tpu.dot_dimension_numbers<[1], [1], [0], [0], [0, 0, 1, 0], [], []>} : vector<16x32xbf16>, vector<16x32xbf16>, vector<16x16xf32> -> vector<16x16xf32>
    %cst_207 = arith.constant dense<0xFF800000> : vector<16xf32>
    %672 = vector.multi_reduction <maximumf>, %671, %cst_207 [1] : vector<16x16xf32> to vector<16xf32>
    %673 = vector.shape_cast %672 : vector<16xf32> to vector<16x1xf32>
    %674 = vector.broadcast %673 : vector<16x1xf32> to vector<16x16xf32>
    %675 = arith.subf %671, %674 : vector<16x16xf32>
    %676 = math.exp %675 : vector<16x16xf32>
    %cst_208 = arith.constant dense<0.000000e+00> : vector<16xf32>
    %677 = vector.multi_reduction <add>, %676, %cst_208 [1] : vector<16x16xf32> to vector<16xf32>
    %678 = vector.shape_cast %677 : vector<16xf32> to vector<16x1xf32>
    %679 = tpu.reciprocal %678 {approx = true} : vector<16x1xf32> -> vector<16x1xf32>
    %680 = vector.broadcast %679 : vector<16x1xf32> to vector<16x16xf32>
    %681 = arith.mulf %676, %680 : vector<16x16xf32>
    %682 = arith.truncf %681 : vector<16x16xf32> to vector<16x16xbf16>
    %683 = vector.extract_strided_slice %650 {offsets = [0, 32], sizes = [16, 32], strides = [1, 1]} : vector<32x128xbf16> to vector<16x32xbf16>
    %cst_209 = arith.constant dense<0.000000e+00> : vector<16x32xf32>
    %684 = tpu.matmul %682, %683, %cst_209 {dimension_numbers = #tpu.dot_dimension_numbers<[1], [0], [0], [1], [0, 0, 1, 1], [], []>} : vector<16x16xbf16>, vector<16x32xbf16>, vector<16x32xf32> -> vector<16x32xf32>
    %685 = arith.truncf %684 : vector<16x32xf32> to vector<16x32xbf16>
    %c0_210 = arith.constant 0 : index
    %c32_211 = arith.constant 32 : index
    %686 = vector.load %arg11[%c0_210, %c32_211] : memref<32x128xbf16, #tpu.memory_space<vmem>>, vector<16x32xbf16>
    tpu.vector_store %arg11[%c0_210, %c32_211], %685 {strides = array<i32>} : memref<32x128xbf16, #tpu.memory_space<vmem>>, vector<16x32xbf16>,
    %687 = vector.extract_strided_slice %646 {offsets = [0, 64], sizes = [16, 32], strides = [1, 1]} : vector<32x128xbf16> to vector<16x32xbf16>
    %688 = vector.extract_strided_slice %648 {offsets = [0, 64], sizes = [16, 32], strides = [1, 1]} : vector<32x128xbf16> to vector<16x32xbf16>
    %cst_212 = arith.constant dense<0.000000e+00> : vector<16x16xf32>
    %689 = tpu.matmul %687, %688, %cst_212 {dimension_numbers = #tpu.dot_dimension_numbers<[1], [1], [0], [0], [0, 0, 1, 0], [], []>} : vector<16x32xbf16>, vector<16x32xbf16>, vector<16x16xf32> -> vector<16x16xf32>
    %cst_213 = arith.constant dense<0xFF800000> : vector<16xf32>
    %690 = vector.multi_reduction <maximumf>, %689, %cst_213 [1] : vector<16x16xf32> to vector<16xf32>
    %691 = vector.shape_cast %690 : vector<16xf32> to vector<16x1xf32>
    %692 = vector.broadcast %691 : vector<16x1xf32> to vector<16x16xf32>
    %693 = arith.subf %689, %692 : vector<16x16xf32>
    %694 = math.exp %693 : vector<16x16xf32>
    %cst_214 = arith.constant dense<0.000000e+00> : vector<16xf32>
    %695 = vector.multi_reduction <add>, %694, %cst_214 [1] : vector<16x16xf32> to vector<16xf32>
    %696 = vector.shape_cast %695 : vector<16xf32> to vector<16x1xf32>
    %697 = tpu.reciprocal %696 {approx = true} : vector<16x1xf32> -> vector<16x1xf32>
    %698 = vector.broadcast %697 : vector<16x1xf32> to vector<16x16xf32>
    %699 = arith.mulf %694, %698 : vector<16x16xf32>
    %700 = arith.truncf %699 : vector<16x16xf32> to vector<16x16xbf16>
    %701 = vector.extract_strided_slice %650 {offsets = [0, 64], sizes = [16, 32], strides = [1, 1]} : vector<32x128xbf16> to vector<16x32xbf16>
    %cst_215 = arith.constant dense<0.000000e+00> : vector<16x32xf32>
    %702 = tpu.matmul %700, %701, %cst_215 {dimension_numbers = #tpu.dot_dimension_numbers<[1], [0], [0], [1], [0, 0, 1, 1], [], []>} : vector<16x16xbf16>, vector<16x32xbf16>, vector<16x32xf32> -> vector<16x32xf32>
    %703 = arith.truncf %702 : vector<16x32xf32> to vector<16x32xbf16>
    %c0_216 = arith.constant 0 : index
    %c64_217 = arith.constant 64 : index
    %704 = vector.load %arg11[%c0_216, %c64_217] : memref<32x128xbf16, #tpu.memory_space<vmem>>, vector<16x32xbf16>
    tpu.vector_store %arg11[%c0_216, %c64_217], %703 {strides = array<i32>} : memref<32x128xbf16, #tpu.memory_space<vmem>>, vector<16x32xbf16>,
    %705 = vector.extract_strided_slice %646 {offsets = [0, 96], sizes = [16, 32], strides = [1, 1]} : vector<32x128xbf16> to vector<16x32xbf16>
    %706 = vector.extract_strided_slice %648 {offsets = [0, 96], sizes = [16, 32], strides = [1, 1]} : vector<32x128xbf16> to vector<16x32xbf16>
    %cst_218 = arith.constant dense<0.000000e+00> : vector<16x16xf32>
    %707 = tpu.matmul %705, %706, %cst_218 {dimension_numbers = #tpu.dot_dimension_numbers<[1], [1], [0], [0], [0, 0, 1, 0], [], []>} : vector<16x32xbf16>, vector<16x32xbf16>, vector<16x16xf32> -> vector<16x16xf32>
    %cst_219 = arith.constant dense<0xFF800000> : vector<16xf32>
    %708 = vector.multi_reduction <maximumf>, %707, %cst_219 [1] : vector<16x16xf32> to vector<16xf32>
    %709 = vector.shape_cast %708 : vector<16xf32> to vector<16x1xf32>
    %710 = vector.broadcast %709 : vector<16x1xf32> to vector<16x16xf32>
    %711 = arith.subf %707, %710 : vector<16x16xf32>
    %712 = math.exp %711 : vector<16x16xf32>
    %cst_220 = arith.constant dense<0.000000e+00> : vector<16xf32>
    %713 = vector.multi_reduction <add>, %712, %cst_220 [1] : vector<16x16xf32> to vector<16xf32>
    %714 = vector.shape_cast %713 : vector<16xf32> to vector<16x1xf32>
    %715 = tpu.reciprocal %714 {approx = true} : vector<16x1xf32> -> vector<16x1xf32>
    %716 = vector.broadcast %715 : vector<16x1xf32> to vector<16x16xf32>
    %717 = arith.mulf %712, %716 : vector<16x16xf32>
    %718 = arith.truncf %717 : vector<16x16xf32> to vector<16x16xbf16>
    %719 = vector.extract_strided_slice %650 {offsets = [0, 96], sizes = [16, 32], strides = [1, 1]} : vector<32x128xbf16> to vector<16x32xbf16>
    %cst_221 = arith.constant dense<0.000000e+00> : vector<16x32xf32>
    %720 = tpu.matmul %718, %719, %cst_221 {dimension_numbers = #tpu.dot_dimension_numbers<[1], [0], [0], [1], [0, 0, 1, 1], [], []>} : vector<16x16xbf16>, vector<16x32xbf16>, vector<16x32xf32> -> vector<16x32xf32>
    %721 = arith.truncf %720 : vector<16x32xf32> to vector<16x32xbf16>
    %c0_222 = arith.constant 0 : index
    %c96_223 = arith.constant 96 : index
    %722 = vector.load %arg11[%c0_222, %c96_223] : memref<32x128xbf16, #tpu.memory_space<vmem>>, vector<16x32xbf16>
    tpu.vector_store %arg11[%c0_222, %c96_223], %721 {strides = array<i32>} : memref<32x128xbf16, #tpu.memory_space<vmem>>, vector<16x32xbf16>,
    %723 = vector.extract_strided_slice %646 {offsets = [16, 0], sizes = [16, 32], strides = [1, 1]} : vector<32x128xbf16> to vector<16x32xbf16>
    %724 = vector.extract_strided_slice %648 {offsets = [16, 0], sizes = [16, 32], strides = [1, 1]} : vector<32x128xbf16> to vector<16x32xbf16>
    %cst_224 = arith.constant dense<0.000000e+00> : vector<16x16xf32>
    %725 = tpu.matmul %723, %724, %cst_224 {dimension_numbers = #tpu.dot_dimension_numbers<[1], [1], [0], [0], [0, 0, 1, 0], [], []>} : vector<16x32xbf16>, vector<16x32xbf16>, vector<16x16xf32> -> vector<16x16xf32>
    %cst_225 = arith.constant dense<0xFF800000> : vector<16xf32>
    %726 = vector.multi_reduction <maximumf>, %725, %cst_225 [1] : vector<16x16xf32> to vector<16xf32>
    %727 = vector.shape_cast %726 : vector<16xf32> to vector<16x1xf32>
    %728 = vector.broadcast %727 : vector<16x1xf32> to vector<16x16xf32>
    %729 = arith.subf %725, %728 : vector<16x16xf32>
    %730 = math.exp %729 : vector<16x16xf32>
    %cst_226 = arith.constant dense<0.000000e+00> : vector<16xf32>
    %731 = vector.multi_reduction <add>, %730, %cst_226 [1] : vector<16x16xf32> to vector<16xf32>
    %732 = vector.shape_cast %731 : vector<16xf32> to vector<16x1xf32>
    %733 = tpu.reciprocal %732 {approx = true} : vector<16x1xf32> -> vector<16x1xf32>
    %734 = vector.broadcast %733 : vector<16x1xf32> to vector<16x16xf32>
    %735 = arith.mulf %730, %734 : vector<16x16xf32>
    %736 = arith.truncf %735 : vector<16x16xf32> to vector<16x16xbf16>
    %737 = vector.extract_strided_slice %650 {offsets = [16, 0], sizes = [16, 32], strides = [1, 1]} : vector<32x128xbf16> to vector<16x32xbf16>
    %cst_227 = arith.constant dense<0.000000e+00> : vector<16x32xf32>
    %738 = tpu.matmul %736, %737, %cst_227 {dimension_numbers = #tpu.dot_dimension_numbers<[1], [0], [0], [1], [0, 0, 1, 1], [], []>} : vector<16x16xbf16>, vector<16x32xbf16>, vector<16x32xf32> -> vector<16x32xf32>
    %739 = arith.truncf %738 : vector<16x32xf32> to vector<16x32xbf16>
    %c16_228 = arith.constant 16 : index
    %c0_229 = arith.constant 0 : index
    %740 = vector.load %arg11[%c16_228, %c0_229] : memref<32x128xbf16, #tpu.memory_space<vmem>>, vector<16x32xbf16>
    tpu.vector_store %arg11[%c16_228, %c0_229], %739 {strides = array<i32>} : memref<32x128xbf16, #tpu.memory_space<vmem>>, vector<16x32xbf16>,
    %741 = vector.extract_strided_slice %646 {offsets = [16, 32], sizes = [16, 32], strides = [1, 1]} : vector<32x128xbf16> to vector<16x32xbf16>
    %742 = vector.extract_strided_slice %648 {offsets = [16, 32], sizes = [16, 32], strides = [1, 1]} : vector<32x128xbf16> to vector<16x32xbf16>
    %cst_230 = arith.constant dense<0.000000e+00> : vector<16x16xf32>
    %743 = tpu.matmul %741, %742, %cst_230 {dimension_numbers = #tpu.dot_dimension_numbers<[1], [1], [0], [0], [0, 0, 1, 0], [], []>} : vector<16x32xbf16>, vector<16x32xbf16>, vector<16x16xf32> -> vector<16x16xf32>
    %cst_231 = arith.constant dense<0xFF800000> : vector<16xf32>
    %744 = vector.multi_reduction <maximumf>, %743, %cst_231 [1] : vector<16x16xf32> to vector<16xf32>
    %745 = vector.shape_cast %744 : vector<16xf32> to vector<16x1xf32>
    %746 = vector.broadcast %745 : vector<16x1xf32> to vector<16x16xf32>
    %747 = arith.subf %743, %746 : vector<16x16xf32>
    %748 = math.exp %747 : vector<16x16xf32>
    %cst_232 = arith.constant dense<0.000000e+00> : vector<16xf32>
    %749 = vector.multi_reduction <add>, %748, %cst_232 [1] : vector<16x16xf32> to vector<16xf32>
    %750 = vector.shape_cast %749 : vector<16xf32> to vector<16x1xf32>
    %751 = tpu.reciprocal %750 {approx = true} : vector<16x1xf32> -> vector<16x1xf32>
    %752 = vector.broadcast %751 : vector<16x1xf32> to vector<16x16xf32>
    %753 = arith.mulf %748, %752 : vector<16x16xf32>
    %754 = arith.truncf %753 : vector<16x16xf32> to vector<16x16xbf16>
    %755 = vector.extract_strided_slice %650 {offsets = [16, 32], sizes = [16, 32], strides = [1, 1]} : vector<32x128xbf16> to vector<16x32xbf16>
    %cst_233 = arith.constant dense<0.000000e+00> : vector<16x32xf32>
    %756 = tpu.matmul %754, %755, %cst_233 {dimension_numbers = #tpu.dot_dimension_numbers<[1], [0], [0], [1], [0, 0, 1, 1], [], []>} : vector<16x16xbf16>, vector<16x32xbf16>, vector<16x32xf32> -> vector<16x32xf32>
    %757 = arith.truncf %756 : vector<16x32xf32> to vector<16x32xbf16>
    %c16_234 = arith.constant 16 : index
    %c32_235 = arith.constant 32 : index
    %758 = vector.load %arg11[%c16_234, %c32_235] : memref<32x128xbf16, #tpu.memory_space<vmem>>, vector<16x32xbf16>
    tpu.vector_store %arg11[%c16_234, %c32_235], %757 {strides = array<i32>} : memref<32x128xbf16, #tpu.memory_space<vmem>>, vector<16x32xbf16>,
    %759 = vector.extract_strided_slice %646 {offsets = [16, 64], sizes = [16, 32], strides = [1, 1]} : vector<32x128xbf16> to vector<16x32xbf16>
    %760 = vector.extract_strided_slice %648 {offsets = [16, 64], sizes = [16, 32], strides = [1, 1]} : vector<32x128xbf16> to vector<16x32xbf16>
    %cst_236 = arith.constant dense<0.000000e+00> : vector<16x16xf32>
    %761 = tpu.matmul %759, %760, %cst_236 {dimension_numbers = #tpu.dot_dimension_numbers<[1], [1], [0], [0], [0, 0, 1, 0], [], []>} : vector<16x32xbf16>, vector<16x32xbf16>, vector<16x16xf32> -> vector<16x16xf32>
    %cst_237 = arith.constant dense<0xFF800000> : vector<16xf32>
    %762 = vector.multi_reduction <maximumf>, %761, %cst_237 [1] : vector<16x16xf32> to vector<16xf32>
    %763 = vector.shape_cast %762 : vector<16xf32> to vector<16x1xf32>
    %764 = vector.broadcast %763 : vector<16x1xf32> to vector<16x16xf32>
    %765 = arith.subf %761, %764 : vector<16x16xf32>
    %766 = math.exp %765 : vector<16x16xf32>
    %cst_238 = arith.constant dense<0.000000e+00> : vector<16xf32>
    %767 = vector.multi_reduction <add>, %766, %cst_238 [1] : vector<16x16xf32> to vector<16xf32>
    %768 = vector.shape_cast %767 : vector<16xf32> to vector<16x1xf32>
    %769 = tpu.reciprocal %768 {approx = true} : vector<16x1xf32> -> vector<16x1xf32>
    %770 = vector.broadcast %769 : vector<16x1xf32> to vector<16x16xf32>
    %771 = arith.mulf %766, %770 : vector<16x16xf32>
    %772 = arith.truncf %771 : vector<16x16xf32> to vector<16x16xbf16>
    %773 = vector.extract_strided_slice %650 {offsets = [16, 64], sizes = [16, 32], strides = [1, 1]} : vector<32x128xbf16> to vector<16x32xbf16>
    %cst_239 = arith.constant dense<0.000000e+00> : vector<16x32xf32>
    %774 = tpu.matmul %772, %773, %cst_239 {dimension_numbers = #tpu.dot_dimension_numbers<[1], [0], [0], [1], [0, 0, 1, 1], [], []>} : vector<16x16xbf16>, vector<16x32xbf16>, vector<16x32xf32> -> vector<16x32xf32>
    %775 = arith.truncf %774 : vector<16x32xf32> to vector<16x32xbf16>
    %c16_240 = arith.constant 16 : index
    %c64_241 = arith.constant 64 : index
    %776 = vector.load %arg11[%c16_240, %c64_241] : memref<32x128xbf16, #tpu.memory_space<vmem>>, vector<16x32xbf16>
    tpu.vector_store %arg11[%c16_240, %c64_241], %775 {strides = array<i32>} : memref<32x128xbf16, #tpu.memory_space<vmem>>, vector<16x32xbf16>,
    %777 = vector.extract_strided_slice %646 {offsets = [16, 96], sizes = [16, 32], strides = [1, 1]} : vector<32x128xbf16> to vector<16x32xbf16>
    %778 = vector.extract_strided_slice %648 {offsets = [16, 96], sizes = [16, 32], strides = [1, 1]} : vector<32x128xbf16> to vector<16x32xbf16>
    %cst_242 = arith.constant dense<0.000000e+00> : vector<16x16xf32>
    %779 = tpu.matmul %777, %778, %cst_242 {dimension_numbers = #tpu.dot_dimension_numbers<[1], [1], [0], [0], [0, 0, 1, 0], [], []>} : vector<16x32xbf16>, vector<16x32xbf16>, vector<16x16xf32> -> vector<16x16xf32>
    %cst_243 = arith.constant dense<0xFF800000> : vector<16xf32>
    %780 = vector.multi_reduction <maximumf>, %779, %cst_243 [1] : vector<16x16xf32> to vector<16xf32>
    %781 = vector.shape_cast %780 : vector<16xf32> to vector<16x1xf32>
    %782 = vector.broadcast %781 : vector<16x1xf32> to vector<16x16xf32>
    %783 = arith.subf %779, %782 : vector<16x16xf32>
    %784 = math.exp %783 : vector<16x16xf32>
    %cst_244 = arith.constant dense<0.000000e+00> : vector<16xf32>
    %785 = vector.multi_reduction <add>, %784, %cst_244 [1] : vector<16x16xf32> to vector<16xf32>
    %786 = vector.shape_cast %785 : vector<16xf32> to vector<16x1xf32>
    %787 = tpu.reciprocal %786 {approx = true} : vector<16x1xf32> -> vector<16x1xf32>
    %788 = vector.broadcast %787 : vector<16x1xf32> to vector<16x16xf32>
    %789 = arith.mulf %784, %788 : vector<16x16xf32>
    %790 = arith.truncf %789 : vector<16x16xf32> to vector<16x16xbf16>
    %791 = vector.extract_strided_slice %650 {offsets = [16, 96], sizes = [16, 32], strides = [1, 1]} : vector<32x128xbf16> to vector<16x32xbf16>
    %cst_245 = arith.constant dense<0.000000e+00> : vector<16x32xf32>
    %792 = tpu.matmul %790, %791, %cst_245 {dimension_numbers = #tpu.dot_dimension_numbers<[1], [0], [0], [1], [0, 0, 1, 1], [], []>} : vector<16x16xbf16>, vector<16x32xbf16>, vector<16x32xf32> -> vector<16x32xf32>
    %793 = arith.truncf %792 : vector<16x32xf32> to vector<16x32xbf16>
    %c16_246 = arith.constant 16 : index
    %c96_247 = arith.constant 96 : index
    %794 = vector.load %arg11[%c16_246, %c96_247] : memref<32x128xbf16, #tpu.memory_space<vmem>>, vector<16x32xbf16>
    tpu.vector_store %arg11[%c16_246, %c96_247], %793 {strides = array<i32>} : memref<32x128xbf16, #tpu.memory_space<vmem>>, vector<16x32xbf16>,
    %c0_248 = arith.constant 0 : index
    %c0_249 = arith.constant 0 : index
    %795 = vector.load %arg11[%c0_248, %c0_249] : memref<32x128xbf16, #tpu.memory_space<vmem>>, vector<32x128xbf16>
    %cst_250 = arith.constant dense<0.000000e+00> : vector<32x128xf32>
    %796 = tpu.matmul %795, %25, %cst_250 {dimension_numbers = #tpu.dot_dimension_numbers<[1], [0], [0], [1], [0, 0, 1, 1], [], []>} : vector<32x128xbf16>, vector<128x128xbf16>, vector<32x128xf32> -> vector<32x128xf32>
    %797 = vector.broadcast %16 : vector<1x128xf32> to vector<32x128xf32>
    %798 = arith.addf %796, %797 : vector<32x128xf32>
    %799 = arith.addf %632, %798 : vector<32x128xf32>
    %cst_251 = arith.constant dense<0.000000e+00> : vector<32xf32>
    %800 = vector.multi_reduction <add>, %799, %cst_251 [1] : vector<32x128xf32> to vector<32xf32>
    %801 = vector.shape_cast %800 : vector<32xf32> to vector<32x1xf32>
    %cst_252 = arith.constant 1.280000e+02 : f32
    %802 = vector.broadcast %cst_252 : f32 to vector<32x1xf32>
    %803 = arith.divf %801, %802 : vector<32x1xf32>
    %804 = vector.broadcast %803 : vector<32x1xf32> to vector<32x128xf32>
    %805 = arith.subf %799, %804 : vector<32x128xf32>
    %806 = arith.mulf %805, %805 : vector<32x128xf32>
    %cst_253 = arith.constant dense<0.000000e+00> : vector<32xf32>
    %807 = vector.multi_reduction <add>, %806, %cst_253 [1] : vector<32x128xf32> to vector<32xf32>
    %808 = vector.shape_cast %807 : vector<32xf32> to vector<32x1xf32>
    %cst_254 = arith.constant 1.280000e+02 : f32
    %809 = vector.broadcast %cst_254 : f32 to vector<32x1xf32>
    %810 = arith.divf %808, %809 : vector<32x1xf32>
    %811 = vector.broadcast %803 : vector<32x1xf32> to vector<32x128xf32>
    %812 = arith.subf %799, %811 : vector<32x128xf32>
    %cst_255 = arith.constant 9.99999974E-6 : f32
    %813 = vector.broadcast %cst_255 : f32 to vector<32x1xf32>
    %814 = arith.addf %810, %813 : vector<32x1xf32>
    %815 = math.rsqrt %814 : vector<32x1xf32>
    %816 = vector.broadcast %815 : vector<32x1xf32> to vector<32x128xf32>
    %817 = arith.mulf %812, %816 : vector<32x128xf32>
    %818 = vector.broadcast %11 : vector<1x128xf32> to vector<32x128xf32>
    %819 = arith.mulf %817, %818 : vector<32x128xf32>
    %820 = vector.broadcast %12 : vector<1x128xf32> to vector<32x128xf32>
    %821 = arith.addf %819, %820 : vector<32x128xf32>
    %822 = arith.truncf %821 : vector<32x128xf32> to vector<32x128xbf16>
    %cst_256 = arith.constant dense<0.000000e+00> : vector<32x256xf32>
    %823 = tpu.matmul %822, %26, %cst_256 {dimension_numbers = #tpu.dot_dimension_numbers<[1], [0], [0], [1], [0, 0, 1, 1], [], []>} : vector<32x128xbf16>, vector<128x256xbf16>, vector<32x256xf32> -> vector<32x256xf32>
    %824 = vector.broadcast %20 : vector<1x256xf32> to vector<32x256xf32>
    %825 = arith.addf %823, %824 : vector<32x256xf32>
    %cst_257 = arith.constant 0.000000e+00 : f32
    %826 = vector.broadcast %cst_257 : f32 to vector<32x256xf32>
    %827 = arith.maximumf %825, %826 : vector<32x256xf32>
    %828 = arith.truncf %827 : vector<32x256xf32> to vector<32x256xbf16>
    %cst_258 = arith.constant dense<0.000000e+00> : vector<32x128xf32>
    %829 = tpu.matmul %828, %27, %cst_258 {dimension_numbers = #tpu.dot_dimension_numbers<[1], [0], [0], [1], [0, 0, 1, 1], [], []>} : vector<32x256xbf16>, vector<256x128xbf16>, vector<32x128xf32> -> vector<32x128xf32>
    %830 = vector.broadcast %17 : vector<1x128xf32> to vector<32x128xf32>
    %831 = arith.addf %829, %830 : vector<32x128xf32>
    %832 = arith.addf %821, %831 : vector<32x128xf32>
    %cst_259 = arith.constant dense<0.000000e+00> : vector<32xf32>
    %833 = vector.multi_reduction <add>, %832, %cst_259 [1] : vector<32x128xf32> to vector<32xf32>
    %834 = vector.shape_cast %833 : vector<32xf32> to vector<32x1xf32>
    %cst_260 = arith.constant 1.280000e+02 : f32
    %835 = vector.broadcast %cst_260 : f32 to vector<32x1xf32>
    %836 = arith.divf %834, %835 : vector<32x1xf32>
    %837 = vector.broadcast %836 : vector<32x1xf32> to vector<32x128xf32>
    %838 = arith.subf %832, %837 : vector<32x128xf32>
    %839 = arith.mulf %838, %838 : vector<32x128xf32>
    %cst_261 = arith.constant dense<0.000000e+00> : vector<32xf32>
    %840 = vector.multi_reduction <add>, %839, %cst_261 [1] : vector<32x128xf32> to vector<32xf32>
    %841 = vector.shape_cast %840 : vector<32xf32> to vector<32x1xf32>
    %cst_262 = arith.constant 1.280000e+02 : f32
    %842 = vector.broadcast %cst_262 : f32 to vector<32x1xf32>
    %843 = arith.divf %841, %842 : vector<32x1xf32>
    %844 = vector.broadcast %836 : vector<32x1xf32> to vector<32x128xf32>
    %845 = arith.subf %832, %844 : vector<32x128xf32>
    %cst_263 = arith.constant 9.99999974E-6 : f32
    %846 = vector.broadcast %cst_263 : f32 to vector<32x1xf32>
    %847 = arith.addf %843, %846 : vector<32x1xf32>
    %848 = math.rsqrt %847 : vector<32x1xf32>
    %849 = vector.broadcast %848 : vector<32x1xf32> to vector<32x128xf32>
    %850 = arith.mulf %845, %849 : vector<32x128xf32>
    %851 = vector.broadcast %13 : vector<1x128xf32> to vector<32x128xf32>
    %852 = arith.mulf %850, %851 : vector<32x128xf32>
    %853 = vector.broadcast %14 : vector<1x128xf32> to vector<32x128xf32>
    %854 = arith.addf %852, %853 : vector<32x128xf32>
    %855 = arith.truncf %854 : vector<32x128xf32> to vector<32x128xbf16>
    %cst_264 = arith.constant dense<0.000000e+00> : vector<32x256xf32>
    %856 = tpu.matmul %855, %28, %cst_264 {dimension_numbers = #tpu.dot_dimension_numbers<[1], [0], [0], [1], [0, 0, 1, 1], [], []>} : vector<32x128xbf16>, vector<128x256xbf16>, vector<32x256xf32> -> vector<32x256xf32>
    %857 = vector.broadcast %21 : vector<1x256xf32> to vector<32x256xf32>
    %858 = arith.addf %856, %857 : vector<32x256xf32>
    %c0_265 = arith.constant 0 : index
    %c0_266 = arith.constant 0 : index
    %859 = vector.load %arg10[%c0_265, %c0_266] : memref<32x256xf32, #tpu.memory_space<vmem>>, vector<32x256xf32>
    tpu.vector_store %arg10[%c0_265, %c0_266], %858 {strides = array<i32>} : memref<32x256xf32, #tpu.memory_space<vmem>>, vector<32x256xf32>,
    return
  }
  func.func @transform_0(%arg0: i32) -> (i32, i32) {
    %c0_i32 = arith.constant 0 : i32
    %c0_i32_0 = arith.constant 0 : i32
    return %arg0, %c0_i32 : i32, i32
  }
  func.func @transform_1(%arg0: i32) -> (i32, i32) {
    %c0_i32 = arith.constant 0 : i32
    %c0_i32_0 = arith.constant 0 : i32
    %c0_i32_1 = arith.constant 0 : i32
    return %c0_i32, %c0_i32_0 : i32, i32
  }
  func.func @transform_2(%arg0: i32) -> (i32, i32) {
    %c0_i32 = arith.constant 0 : i32
    %c0_i32_0 = arith.constant 0 : i32
    %c0_i32_1 = arith.constant 0 : i32
    return %c0_i32, %c0_i32_0 : i32, i32
  }
  func.func @transform_3(%arg0: i32) -> (i32, i32) {
    %c0_i32 = arith.constant 0 : i32
    %c0_i32_0 = arith.constant 0 : i32
    %c0_i32_1 = arith.constant 0 : i32
    return %c0_i32, %c0_i32_0 : i32, i32
  }
  func.func @transform_4(%arg0: i32) -> (i32, i32) {
    %c0_i32 = arith.constant 0 : i32
    %c0_i32_0 = arith.constant 0 : i32
    %c0_i32_1 = arith.constant 0 : i32
    return %c0_i32, %c0_i32_0 : i32, i32
  }
  func.func @transform_5(%arg0: i32) -> (i32, i32) {
    %c0_i32 = arith.constant 0 : i32
    %c0_i32_0 = arith.constant 0 : i32
    %c0_i32_1 = arith.constant 0 : i32
    return %c0_i32, %c0_i32_0 : i32, i32
  }
  func.func @transform_6(%arg0: i32) -> (i32, i32) {
    %c0_i32 = arith.constant 0 : i32
    %c0_i32_0 = arith.constant 0 : i32
    %c0_i32_1 = arith.constant 0 : i32
    return %c0_i32, %c0_i32_0 : i32, i32
  }
  func.func @transform_7(%arg0: i32) -> (i32, i32) {
    %c0_i32 = arith.constant 0 : i32
    %c0_i32_0 = arith.constant 0 : i32
    %c0_i32_1 = arith.constant 0 : i32
    return %c0_i32, %c0_i32_0 : i32, i32
  }
  func.func @transform_8(%arg0: i32) -> (i32, i32) {
    %c0_i32 = arith.constant 0 : i32
    %c0_i32_0 = arith.constant 0 : i32
    %c0_i32_1 = arith.constant 0 : i32
    return %c0_i32, %c0_i32_0 : i32, i32
  }
  func.func @transform_9(%arg0: i32) -> (i32, i32) {
    %c0_i32 = arith.constant 0 : i32
    %c0_i32_0 = arith.constant 0 : i32
    return %arg0, %c0_i32 : i32, i32
  }
}

</mosaic_0001>

<bundles_post_ra>
// kernel: tpu_custom_call.1
= control target key start
LH: loop header
LB: loop body
LE: loop exit
PB: predicated region body
PF: predicated region fallthrough
CT: control target
= control target key end

     0   :  { %14 = vsyncpa [#allocation4], 0  ;;  %s9789_s0 = inlined_call_operand.hbm [shape: bf16[32,128], index: 0, kind: input, shape index: {}]   ;;  %s9790_s1 = inlined_call_operand.hbm [shape: bf16[128,384], index: 1, kind: input, shape index: {}]   ;;  %s9791_s2 = inlined_call_operand.hbm [shape: bf16[128,128], index: 2, kind: input, shape index: {}]   ;;  %s9792_s3 = inlined_call_operand.hbm [shape: bf16[128,384], index: 3, kind: input, shape index: {}]   ;;  %s9793_s4 = inlined_call_operand.hbm [shape: bf16[128,128], index: 4, kind: input, shape index: {}]   ;;  %s9794_s5 = inlined_call_operand.hbm [shape: bf16[128,256], index: 5, kind: input, shape index: {}]   ;;  %s9795_s6 = inlined_call_operand.hbm [shape: bf16[256,128], index: 6, kind: input, shape index: {}]   ;;  %s9796_s7 = inlined_call_operand.hbm [shape: bf16[128,256], index: 7, kind: input, shape index: {}]   ;;  %s9797_s8 = inlined_call_operand.vmem [shape: f32[8,384], index: 8, kind: input, shape index: {}]   ;;  %s9798_s9 = inlined_call_operand.hbm [shape: f32[32,256], index: 9, kind: output, shape index: {}]  }
   0x1   :  { %15 = vsyncpa [#allocation7], 0 }
   0x2   :  { %16 = vsyncpa [#allocation10], 0 }
   0x3   :  { %17 = vsyncpa [#allocation13], 0 }
   0x4   :  { %18 = vsyncpa [#allocation16], 0 }
   0x5   :  { %19 = vsyncpa [#allocation5], 0  ;;  %s8111_s30 = smov [#allocation6]   ;;  %s7901_s13 = scalar_lea.hbm %s9790_s1, 3072 }
   0x6   :  { %s37_s10 = sshll.u32 %s8111_s30, 4  ;;  %p7902_p0 = scmp.ne.s32.totalorder %s9790_s1, %s7901_s13  ;;  %s38_s10 = int_to_ptr.vmem [resolvable:$true] %s37_s10 }
   0x7   :  { %p7905_p1 = scmp.lt.u32.totalorder %s7901_s13, %s9790_s1 }
   0x9   :  { %p7907_p2 = pnand %p7905_p1, %p7902_p0 }
   0xb   :  { %7910 = shalt.err (!%p7907_p2)
}
   0xc   :  { %s7911_s18 = scalar_lea.vmem %s38_s10, 3072  ;;  %p7916_p4 = scmp.lt.s32.totalorder %s38_s10, %s38_s10 }
   0xd   :  { %p7912_p3 = scmp.ne.s32.totalorder %s38_s10, %s7911_s18  ;;  %p7917_p5 = scmp.lt.s32.totalorder %s7911_s18, %s7911_s18 }
   0xf   :  { %p7918_p6 = por %p7917_p5, %p7916_p4 }
  0x11   :  { %p7919_p7 = pnand %p7918_p6, %p7912_p3 }
  0x13   :  { %7922 = shalt.err (!%p7919_p7)
}
  0x14   :  { %s8112_s19 = smov 192   ;;  %s8113_s20 = smov 12  }
  0x15   :  { %43 = dma.hbm_to_vmem [thread:$0]  %s9790_s1, 3072, %s38_s10, [#allocation7], %s8112_s19, %s8112_s19, %s8113_s20  }
  0x16   :  { %s8114_s23 = smov [#allocation9]   ;;  %s8115_s25 = smov [#allocation12]  }
  0x17   :  { %s61_s24 = sshll.u32 %s8114_s23, 4  ;;  %s85_s26 = sshll.u32 %s8115_s25, 4  ;;  %s62_s24 = int_to_ptr.vmem [resolvable:$true] %s61_s24  ;;  %s86_s26 = int_to_ptr.vmem [resolvable:$true] %s85_s26 }
  0x18   :  { %s7923_s29 = scalar_lea.hbm %s9792_s3, 3072 }
  0x19   :  { %p7924_p8 = scmp.ne.s32.totalorder %s9792_s3, %s7923_s29  ;;  %p7927_p9 = scmp.lt.u32.totalorder %s7923_s29, %s9792_s3 }
  0x1b   :  { %p7929_p10 = pnand %p7927_p9, %p7924_p8 }
  0x1d   :  { %7932 = shalt.err (!%p7929_p10)
}
  0x1e   :  { %s7933_s1 = scalar_lea.vmem %s62_s24, 3072  ;;  %p7938_p12 = scmp.lt.s32.totalorder %s62_s24, %s62_s24 }
  0x1f   :  { %p7934_p11 = scmp.ne.s32.totalorder %s62_s24, %s7933_s1  ;;  %p7939_p13 = scmp.lt.s32.totalorder %s7933_s1, %s7933_s1 }
  0x21   :  { %p7940_p0 = por %p7939_p13, %p7938_p12 }
  0x23   :  { %p7941_p1 = pnand %p7940_p0, %p7934_p11 }
  0x25   :  { %7944 = shalt.err (!%p7941_p1)
}
  0x26   :  { %67 = dma.hbm_to_vmem [thread:$0]  %s9792_s3, 3072, %s62_s24, [#allocation10], %s8112_s19, %s8112_s19, %s8113_s20  }
  0x27   :  { %s7945_s17 = scalar_lea.hbm %s9794_s5, 2048 }
  0x28   :  { %p7946_p2 = scmp.ne.s32.totalorder %s9794_s5, %s7945_s17  ;;  %p7949_p3 = scmp.lt.u32.totalorder %s7945_s17, %s9794_s5 }
  0x2a   :  { %p7951_p4 = pnand %p7949_p3, %p7946_p2 }
  0x2c   :  { %7954 = shalt.err (!%p7951_p4)
}
  0x2d   :  { %s7955_s25 = scalar_lea.vmem %s86_s26, 2048  ;;  %p7960_p6 = scmp.lt.s32.totalorder %s86_s26, %s86_s26 }
  0x2e   :  { %p7956_p5 = scmp.ne.s32.totalorder %s86_s26, %s7955_s25  ;;  %p7961_p7 = scmp.lt.s32.totalorder %s7955_s25, %s7955_s25 }
  0x30   :  { %p7962_p8 = por %p7961_p7, %p7960_p6 }
  0x32   :  { %p7963_p9 = pnand %p7962_p8, %p7956_p5 }
  0x34   :  { %7966 = shalt.err (!%p7963_p9)
}
  0x35   :  { %s8116_s3 = smov 128   ;;  %s8117_s19 = smov 8  }
  0x36   :  { %91 = dma.hbm_to_vmem [thread:$0]  %s9794_s5, 2048, %s86_s26, [#allocation13], %s8116_s3, %s8116_s3, %s8117_s19  }
  0x37   :  { %s8118_s27 = smov [#allocation3]   ;;  %s7967_s11 = scalar_lea.hbm %s9789_s0, 256 }
  0x38   :  { %s25_s28 = sshll.u32 %s8118_s27, 4  ;;  %p7968_p10 = scmp.ne.s32.totalorder %s9789_s0, %s7967_s11  ;;  %s26_s28 = int_to_ptr.vmem [resolvable:$true] %s25_s28 }
  0x39   :  { %p7971_p11 = scmp.lt.u32.totalorder %s7967_s11, %s9789_s0 }
  0x3b   :  { %p7973_p12 = pnand %p7971_p11, %p7968_p10 }
  0x3d   :  { %7976 = shalt.err (!%p7973_p12)
}
  0x3e   :  { %s7977_s14 = scalar_lea.vmem %s26_s28, 256  ;;  %p7982_p0 = scmp.lt.s32.totalorder %s26_s28, %s26_s28 }
  0x3f   :  { %p7978_p13 = scmp.ne.s32.totalorder %s26_s28, %s7977_s14  ;;  %p7983_p1 = scmp.lt.s32.totalorder %s7977_s14, %s7977_s14 }
  0x41   :  { %p7984_p2 = por %p7983_p1, %p7982_p0 }
  0x43   :  { %p7985_p3 = pnand %p7984_p2, %p7978_p13 }
  0x45   :  { %7988 = shalt.err (!%p7985_p3)
}
  0x46   :  { %s8119_s5 = smov 64   ;;  %s8120_s26 = smov 4  }
  0x47   :  { %31 = dma.hbm_to_vmem [thread:$0]  %s9789_s0, 256, %s26_s28, [#allocation4], %s8119_s5, %s8119_s5, %s8120_s26  }
  0x48   :  { %s8121_s17 = smov [#allocation8]   ;;  %s8122_s21 = smov [#allocation11]  }
  0x49   :  { %s49_s18 = sshll.u32 %s8121_s17, 4  ;;  %s73_s22 = sshll.u32 %s8122_s21, 4  ;;  %s50_s18 = int_to_ptr.vmem [resolvable:$true] %s49_s18  ;;  %s8237_s22 = int_to_ptr.vmem [resolvable:$true] %s73_s22 }
  0x4a   :  { %s7989_s20 = scalar_lea.hbm %s9791_s2, 1024 }
  0x4b   :  { %p7990_p4 = scmp.ne.s32.totalorder %s9791_s2, %s7989_s20  ;;  %p7993_p5 = scmp.lt.u32.totalorder %s7989_s20, %s9791_s2 }
  0x4d   :  { %p7995_p6 = pnand %p7993_p5, %p7990_p4 }
  0x4f   :  { %7998 = shalt.err (!%p7995_p6)
}
  0x50   :  { %s7999_s0 = scalar_lea.vmem %s50_s18, 1024  ;;  %p8004_p8 = scmp.lt.s32.totalorder %s50_s18, %s50_s18 }
  0x51   :  { %p8000_p7 = scmp.ne.s32.totalorder %s50_s18, %s7999_s0  ;;  %p8005_p9 = scmp.lt.s32.totalorder %s7999_s0, %s7999_s0 }
  0x53   :  { %p8006_p10 = por %p8005_p9, %p8004_p8 }
  0x55   :  { %p8007_p11 = pnand %p8006_p10, %p8000_p7 }
  0x57   :  { %8010 = shalt.err (!%p8007_p11)
}
  0x58   :  { %55 = dma.hbm_to_vmem [thread:$0]  %s9791_s2, 1024, %s50_s18, [#allocation7], %s8119_s5, %s8119_s5, %s8120_s26  }
  0x59   :  { %s8011_s1 = scalar_lea.hbm %s9793_s4, 1024 }
  0x5a   :  { %p8012_p12 = scmp.ne.s32.totalorder %s9793_s4, %s8011_s1  ;;  %p8015_p13 = scmp.lt.u32.totalorder %s8011_s1, %s9793_s4 }
  0x5c   :  { %p8017_p0 = pnand %p8015_p13, %p8012_p12 }
  0x5e   :  { %8020 = shalt.err (!%p8017_p0)
}
  0x5f   :  { %s8021_s17 = scalar_lea.vmem %s8237_s22, 1024  ;;  %p8026_p2 = scmp.lt.s32.totalorder %s8237_s22, %s8237_s22 }
  0x60   :  { %p8022_p1 = scmp.ne.s32.totalorder %s8237_s22, %s8021_s17  ;;  %p8027_p3 = scmp.lt.s32.totalorder %s8021_s17, %s8021_s17 }
  0x62   :  { %p8028_p4 = por %p8027_p3, %p8026_p2 }
  0x64   :  { %p8029_p5 = pnand %p8028_p4, %p8022_p1 }
  0x66   :  { %8032 = shalt.err (!%p8029_p5)
}
  0x67   :  { %79 = dma.hbm_to_vmem [thread:$0]  %s9793_s4, 1024, %s8237_s22, [#allocation10], %s8119_s5, %s8119_s5, %s8120_s26  }
  0x68   :  { %s8123_s21 = smov [#allocation14]   ;;  %s8124_s25 = smov [#allocation15]  }
  0x69   :  { %s97_s23 = sshll.u32 %s8123_s21, 4  ;;  %s109_s20 = sshll.u32 %s8124_s25, 4  ;;  %s98_s23 = int_to_ptr.vmem [resolvable:$true] %s97_s23  ;;  %s8274_s20 = int_to_ptr.vmem [resolvable:$true] %s109_s20 }
  0x6a   :  { %s8033_s29 = scalar_lea.hbm %s9795_s6, 2048 }
  0x6b   :  { %p8034_p6 = scmp.ne.s32.totalorder %s9795_s6, %s8033_s29  ;;  %p8037_p7 = scmp.lt.u32.totalorder %s8033_s29, %s9795_s6 }
  0x6d   :  { %p8039_p8 = pnand %p8037_p7, %p8034_p6 }
  0x6f   :  { %8042 = shalt.err (!%p8039_p8)
}
  0x70   :  { %s8043_s4 = scalar_lea.vmem %s98_s23, 2048  ;;  %p8048_p10 = scmp.lt.s32.totalorder %s98_s23, %s98_s23 }
  0x71   :  { %p8044_p9 = scmp.ne.s32.totalorder %s98_s23, %s8043_s4  ;;  %p8049_p11 = scmp.lt.s32.totalorder %s8043_s4, %s8043_s4 }
  0x73   :  { %p8050_p12 = por %p8049_p11, %p8048_p10 }
  0x75   :  { %p8051_p13 = pnand %p8050_p12, %p8044_p9 }
  0x77   :  { %8054 = shalt.err (!%p8051_p13)
}
  0x78   :  { %103 = dma.hbm_to_vmem [thread:$0]  %s9795_s6, 2048, %s98_s23, [#allocation13], %s8119_s5, %s8119_s5, %s8120_s26  }
  0x79   :  { %s8055_s10 = scalar_lea.hbm %s9796_s7, 2048 }
  0x7a   :  { %p8056_p0 = scmp.ne.s32.totalorder %s9796_s7, %s8055_s10  ;;  %p8059_p1 = scmp.lt.u32.totalorder %s8055_s10, %s9796_s7 }
  0x7c   :  { %p8061_p2 = pnand %p8059_p1, %p8056_p0 }
  0x7e   :  { %8064 = shalt.err (!%p8061_p2)
}
  0x7f   :  { %s8065_s2 = scalar_lea.vmem %s8274_s20, 2048  ;;  %p8070_p4 = scmp.lt.s32.totalorder %s8274_s20, %s8274_s20 }
  0x80   :  { %p8066_p3 = scmp.ne.s32.totalorder %s8274_s20, %s8065_s2  ;;  %p8071_p5 = scmp.lt.s32.totalorder %s8065_s2, %s8065_s2 }
  0x82   :  { %p8072_p6 = por %p8071_p5, %p8070_p4 }
  0x84   :  { %p8073_p7 = pnand %p8072_p6, %p8066_p3 }
  0x86   :  { %8076 = shalt.err (!%p8073_p7)
}
  0x87   :  { %115 = dma.hbm_to_vmem [thread:$0]  %s9796_s7, 2048, %s8274_s20, [#allocation16], %s8116_s3, %s8116_s3, %s8117_s19  }
  0x88   :  { %8099 = dma.done.wait [#allocation4], 256  }
  0x89   :  { %8100 = vsyncadd [#allocation4], 4294967040 }
  0x8a   :  { %8101 = dma.done.wait [#allocation7], 4096  }
  0x8b   :  { %8102 = vsyncadd [#allocation7], 4294963200 }
  0x8c   :  { %8103 = dma.done.wait [#allocation10], 4096  }
  0x8d   :  { %8104 = vsyncadd [#allocation10], 4294963200 }
  0x8e   :  { %8105 = dma.done.wait [#allocation13], 4096  }
  0x8f   :  { %8106 = vsyncadd [#allocation13], 4294963200 }
  0x90   :  { %8107 = dma.done.wait [#allocation16], 2048  }
  0x91   :  { %8108 = vsyncadd [#allocation16], 4294965248  ;;  %v8125_v0 = vmov 0   ;;  %v7343_v1 = vld [vmem:[#allocation6 + $0x4] ss:$12 sps:$4 sm:$0xff]   ;;  %v8315_v25 = vld [vmem:[#allocation3 + $0x8] sm:$0xff]   ;;  %v151_v28 = vlaneseq }
  0x92   :  { %507 = vmatprep.mubr.bf16.mxu0 %v8125_v0  ;;  %v7345_v2 = vld [vmem:[#allocation6] ss:$12 sps:$4 sm:$0xff]   ;;  %475 = vmatprep.subr.bf16.mxu0 %v7343_v1  ;;  %v7346_v3 = vld [vmem:[#allocation6 + $0x1c] ss:$12 sps:$4 sm:$0xff]   ;;  %v7348_v4 = vld [vmem:[#allocation6 + $0x18] ss:$12 sps:$4 sm:$0xff]  }
  0x93   :  { %476 = vmatpush1.bf16.msra.mxu0 %v7345_v2  ;;  %v7349_v5 = vld [vmem:[#allocation6 + $0x34] ss:$12 sps:$4 sm:$0xff]   ;;  %v7351_v6 = vld [vmem:[#allocation6 + $0x30] ss:$12 sps:$4 sm:$0xff]   ;;  %v7352_v7 = vld [vmem:[#allocation6 + $0x4c] ss:$12 sps:$4 sm:$0xff]  }
  0x94   :  { %477 = vmatprep.subr.bf16.mxu0 %v7346_v3  ;;  %v7354_v8 = vld [vmem:[#allocation6 + $0x48] ss:$12 sps:$4 sm:$0xff]   ;;  %v7355_v10 = vld [vmem:[#allocation6 + $0x64] ss:$12 sps:$4 sm:$0xff]   ;;  %v7370_v12 = vld [vmem:[#allocation6 + $0x20] ss:$12 sps:$4 sm:$0xff]  }
  0x95   :  { %v8312_v9 = vld [vmem:[#allocation3] sm:$0xff]   ;;  %v7357_v13 = vld [vmem:[#allocation6 + $0x60] ss:$12 sps:$4 sm:$0xff]   ;;  %v7358_v14 = vld [vmem:[#allocation6 + $0x7c] ss:$12 sps:$4 sm:$0xff]   ;;  %v8126_v27 = vmov 0.0  }
  0x96   :  { %v7369_v11 = vld [vmem:[#allocation6 + $0x8] ss:$12 sps:$4 sm:$0xff]   ;;  %6793 = vmatprep.mubr.bf16.mxu1 %v8312_v9  ;;  %v7371_v15 = vld [vmem:[#allocation6 + $0x38] ss:$12 sps:$4 sm:$0xff]   ;;  %v7372_v18 = vld [vmem:[#allocation6 + $0x50] ss:$12 sps:$4 sm:$0xff]  }
  0x97   :  { %478 = vmatpush1.bf16.msra.mxu0 %v7348_v4  ;;  %6777 = vmatprep.subr.bf16.mxu1 %v7369_v11  ;;  %v7360_v16 = vld [vmem:[#allocation6 + $0x78] ss:$12 sps:$4 sm:$0xff]   ;;  %v7361_v17 = vld [vmem:[#allocation6 + $0x94] ss:$12 sps:$4 sm:$0xff]   ;;  %v7363_v19 = vld [vmem:[#allocation6 + $0x90] ss:$12 sps:$4 sm:$0xff]  }
  0x98   :  { %479 = vmatprep.subr.bf16.mxu0 %v7349_v5  ;;  %6778 = vmatpush3.bf16.msra.mxu1 %v7369_v11  ;;  %v7364_v20 = vld [vmem:[#allocation6 + $0xac] ss:$12 sps:$4 sm:$0xff]   ;;  %v7373_v21 = vld [vmem:[#allocation6 + $0x68] ss:$12 sps:$4 sm:$0xff]   ;;  %v7376_v26 = vld [vmem:[#allocation6 + $0xb0] ss:$12 sps:$4 sm:$0xff]  }
  0x99   :  { %6779 = vmatprep.subr.bf16.mxu1 %v7370_v12  ;;  %v7366_v22 = vld [vmem:[#allocation6 + $0xa8] ss:$12 sps:$4 sm:$0xff]   ;;  %v7374_v23 = vld [vmem:[#allocation6 + $0x80] ss:$12 sps:$4 sm:$0xff]   ;;  %v7375_v24 = vld [vmem:[#allocation6 + $0x98] ss:$12 sps:$4 sm:$0xff]  }
  0x9a   :  { %vm8127_vm0 = vmmov 0   ;;  %v8328_v29 = vshrl.u32 %v151_v28, 7  ;;  %v8334_v31 = vld [vmem:[%s9797_s8] sm:$0xff]  ;;  %v161_v33 = vld [vmem:[%s9797_s8 + $0x8] sm:$0xff]  ;;  %vm587_vm1 = vcmask 261120   ;;  %s8128_s21 = smov 96  }
  0x9b   :  { %480 = vmatpush1.bf16.msra.mxu0 %v7351_v6  ;;  %s8129_s23 = smov 32   ;;  %v162_v60 = vld [vmem:[%s9797_s8 + $0x10] sm:$0xff]  ;;  %vm635_vm4 = vcmask 130048   ;;  %vm834_vm5 = vcmask 523520   ;;  %vm962_vm6 = vcmask 785920   ;;  %vm1090_vm7 = vcmask 1048320  }
  0x9c   :  { %481 = vmatprep.subr.bf16.mxu0 %v7352_v7  ;;  %6780 = vmatpush3.bf16.msra.mxu1 %v7370_v12  ;;  %v325_v30 = vsub.s32 3, %v8328_v29  ;;  %s8130_s16 = smov [#allocation17]  }
  0x9d   :  { %6781 = vmatprep.subr.bf16.mxu1 %v7371_v15  ;;  %s6319_s17 = sshll.u32 %s8130_s16, 4  ;;  %s6320_s17 = int_to_ptr.vmem [resolvable:$true] %s6319_s17 }
  0x9e   :  { %v8337_v32 = vrot.slane %v8334_v31, %v325_v30  ;;  %v8342_v35 = vrot.slane %v161_v33, %v325_v30  ;;  %v8372_v62 = vrot.slane %v162_v60, %v325_v30  ;;  %p8082_p9 = scmp.lt.s32.totalorder %s6320_s17, %s6320_s17 }
  0x9f   :  { %482 = vmatpush1.bf16.msra.mxu0 %v7354_v8 }
  0xa0   :  { %483 = vmatprep.subr.bf16.mxu0 %v7355_v10  ;;  %6782 = vmatpush3.bf16.msra.mxu1 %v7371_v15 }
  0xa1   :  { %6783 = vmatprep.subr.bf16.mxu1 %v7372_v18 }
  0xa3   :  { %484 = vmatpush1.bf16.msra.mxu0 %v7357_v13 }
  0xa4   :  { %485 = vmatprep.subr.bf16.mxu0 %v7358_v14  ;;  %6784 = vmatpush3.bf16.msra.mxu1 %v7372_v18 }
  0xa5   :  { %6785 = vmatprep.subr.bf16.mxu1 %v7373_v21 }
  0xa7   :  { %486 = vmatpush1.bf16.msra.mxu0 %v7360_v16 }
  0xa8   :  { %487 = vmatprep.subr.bf16.mxu0 %v7361_v17  ;;  %6786 = vmatpush3.bf16.msra.mxu1 %v7373_v21 }
  0xa9   :  { %6787 = vmatprep.subr.bf16.mxu1 %v7374_v23 }
  0xab   :  { %488 = vmatpush1.bf16.msra.mxu0 %v7363_v19 }
  0xac   :  { %489 = vmatprep.subr.bf16.mxu0 %v7364_v20  ;;  %6788 = vmatpush3.bf16.msra.mxu1 %v7374_v23 }
  0xad   :  { %6789 = vmatprep.subr.bf16.mxu1 %v7375_v24 }
  0xaf   :  { %490 = vmatpush1.bf16.msra.mxu0 %v7366_v22 }
  0xb0   :  { %6790 = vmatpush3.bf16.msra.mxu1 %v7375_v24  ;;  %6803 = vmatprep.subr.bf16.mxu0 %v8126_v27 }
  0xb1   :  { %6791 = vmatprep.subr.bf16.mxu1 %v7376_v26 }
  0xb2   :  { %508 = vmatmul.mubr.bf16.vlgmr.msra.gmra.mrb[0].mxu0 %v8312_v9 }
  0xb3   :  { %517 = vmatprep.mubr.bf16.mxu0 %v8125_v0 }
  0xb4   :  { %6792 = vmatpush3.bf16.msra.mxu1 %v7376_v26 }
  0xb5   :  { %6797 = vmatprep.subr.bf16.mxu1 %v8126_v27 }
  0xb7   :  { %6794 = vmatmul.mubr.bf16.vlgmr.msra.gmra.mrb[0].mxu1 %v8315_v25 }
  0xb8   :  { %6799 = vmatprep.mubr.msk.bf16.mxu1 %vm8127_vm0, %v8126_v27 }
  0xba   :  { %518 = vmatmul.mubr.bf16.gmra.mrb[4].mxu0 %v8315_v25 }
  0xbb   :  { %6805 = vmatprep.mubr.msk.bf16.mxu0 %vm8127_vm0, %v8126_v27 }
 0x185   :  { %v509_v34 = vpop.f32.mrb[0].mxu0 }
 0x186   :  { %v510_v36 = vadd.f32 %v509_v34, %v8337_v32  ;;  %v511_v37 = vpop.f32.mrb[1].mxu0 }
 0x187   :  { %v513_v38 = vpop.f32.mrb[2].mxu0  ;;  %v512_v41 = vadd.f32 %v511_v37, %v8342_v35  ;;  %v153_v37 = vadd.s32 8, %v8328_v29 }
 0x188   :  { %v514_v39 = vadd.f32 %v513_v38, %v8337_v32  ;;  %v515_v40 = vpop.f32.mrb[3].mxu0  ;;  %v577_v43 = vmul.f32 0.17677669, %v510_v36  ;;  %v155_v36 = vand.u32 127, %v151_v28 }
 0x189   :  { %v516_v42 = vadd.f32 %v515_v40, %v8342_v35 }
 0x18a   :  { %v578_v44 = vmul.f32 0.17677669, %v514_v39  ;;  %v6795_v61 = vpop.f32.mrb[0].mxu1  ;;  %vm156_vm2 = vcmp.gt.s32.totalorder %v155_v36, %v8328_v29  ;;  %vm157_vm3 = vcmp.gt.s32.totalorder %v155_v36, %v153_v37 }
 0x18b   :  { %v583_v45 = vpack.c.bf16 %v516_v42, %v512_v41  ;;  %v562_v63 = vpop.f32.mrb[1].mxu1  ;;  %v571_v2 = vadd.f32 %v6795_v61, %v8372_v62  ;;  %v8420_v38 = vsel %vm156_vm2, -1e+30, %v8126_v27  ;;  %v8423_v40 = vsel %vm157_vm3, -1e+30, %v8126_v27 }
 0x18c   :  { %v581_v46 = vpack.c.bf16 %v578_v44, %v577_v43  ;;  %v6796_v1 = vpop.f32.mrb[2].mxu1  ;;  %v563_v3 = vadd.f32 %v562_v63, %v8372_v62 }
 0x18d   :  { %838 = vrot.lane.b32.xlu1 %v583_v45, %s8119_s5  ;;  %709 = vrot.lane.b32.xlu0 %v583_v45, %s8128_s21  ;;  %v592_v47 = vsel %vm587_vm1, %v583_v45, 0  ;;  %v519_v48 = vpop.f32.mrb[4].mxu0  ;;  %v574_v4 = vadd.f32 %v6796_v1, %v8372_v62  ;;  %v565_v5 = vpop.f32.mrb[3].mxu1 }
 0x18e   :  { %6798 = vmatpush3.bf16.xpose.msra.mxu1 %v592_v47  ;;  %v520_v49 = vadd.f32 %v519_v48, %v8337_v32  ;;  %v521_v50 = vpop.f32.mrb[5].mxu0  ;;  %v566_v6 = vadd.f32 %v565_v5, %v8372_v62 }
 0x18f   :  { %v522_v51 = vadd.f32 %v521_v50, %v8342_v35  ;;  %v523_v52 = vpop.f32.mrb[6].mxu0  ;;  %6809 = vmatprep.subr.bf16.mxu1 %v8126_v27  ;;  %v8378_v7 = vpack.c.bf16 %v574_v4, %v571_v2 }
 0x190   :  { %v579_v53 = vmul.f32 0.17677669, %v520_v49  ;;  %v524_v54 = vadd.f32 %v523_v52, %v8337_v32  ;;  %v525_v55 = vpop.f32.mrb[7].mxu0  ;;  %v8380_v8 = vpack.c.bf16 %v566_v6, %v563_v3 }
 0x191   :  { %836 = vrot.lane.b32.xlu1 %v581_v46, %s8119_s5  ;;  %706 = vrot.lane.b32.xlu0 %v581_v46, %s8128_s21  ;;  %v526_v56 = vadd.f32 %v525_v55, %v8342_v35 }
 0x192   :  { %v580_v57 = vmul.f32 0.17677669, %v524_v54  ;;  %6804 = vmatpush3.bf16.msra.mxu0 %v8380_v8 }
 0x193   :  { %v584_v58 = vpack.c.bf16 %v526_v56, %v522_v51  ;;  %6815 = vmatprep.subr.bf16.mxu0 %v8126_v27 }
 0x194   :  { %v582_v59 = vpack.c.bf16 %v580_v57, %v579_v53 }
 0x195   :  { %964 = vrot.lane.b32.xlu1 %v581_v46, %s8129_s23  ;;  %966 = vrot.lane.b32.xlu0 %v583_v45, %s8129_s23  ;;  %v1096_v19 = vsel %vm587_vm1, %v584_v58, 0 }
 0x196   :  { %6800 = vmatmul.mubr.msk.bf16.vlgmr.msra.gmra.mrb[4].mxu1 %vm587_vm1, %v581_v46 }
 0x197   :  { %6811 = vmatprep.mubr.msk.bf16.mxu1 %vm8127_vm0, %v8126_v27 }
 0x199   :  { %1212 = vrot.lane.b32.xlu0 %v584_v58, %s8128_s21  ;;  %1209 = vrot.lane.b32.xlu1 %v582_v59, %s8128_s21 }
 0x19d   :  { %1340 = vrot.lane.b32.xlu0 %v584_v58, %s8119_s5  ;;  %1338 = vrot.lane.b32.xlu1 %v582_v59, %s8119_s5 }
 0x1a1   :  { %1467 = vrot.lane.b32.xlu0 %v584_v58, %s8129_s23  ;;  %1465 = vrot.lane.b32.xlu1 %v582_v59, %s8129_s23 }
 0x1ff   :  { %v710_v10 = vpop.permute.xlu0 %709  ;;  %v839_v12 = vpop.permute.xlu1 %838 }
 0x200   :  { %v715_v11 = vsel %vm587_vm1, %v710_v10, 0  ;;  %v844_v14 = vsel %vm587_vm1, %v839_v12, 0 }
 0x201   :  { %6810 = vmatpush3.bf16.xpose.msra.mxu1 %v715_v11 }
 0x202   :  { %6821 = vmatprep.subr.bf16.mxu1 %v8126_v27 }
 0x203   :  { %v707_v13 = vpop.permute.xlu0 %706  ;;  %v837_v16 = vpop.permute.xlu1 %836 }
 0x207   :  { %v967_v15 = vpop.permute.xlu0 %966  ;;  %v965_v18 = vpop.permute.xlu1 %964 }
 0x208   :  { %6812 = vmatmul.mubr.msk.bf16.vlgmr.msra.gmra.mrb[8].mxu1 %vm587_vm1, %v707_v13  ;;  %v972_v17 = vsel %vm587_vm1, %v967_v15, 0 }
 0x209   :  { %6822 = vmatpush3.bf16.xpose.msra.mxu1 %v844_v14  ;;  %6823 = vmatprep.mubr.msk.bf16.mxu1 %vm8127_vm0, %v8126_v27 }
 0x20a   :  { %6833 = vmatprep.subr.bf16.mxu1 %v8126_v27 }
 0x20b   :  { %v1213_v20 = vpop.permute.xlu0 %1212  ;;  %v1210_v23 = vpop.permute.xlu1 %1209 }
 0x20c   :  { %v1218_v21 = vsel %vm587_vm1, %v1213_v20, 0 }
 0x20f   :  { %v1341_v22 = vpop.permute.xlu0 %1340  ;;  %v1339_v30 = vpop.permute.xlu1 %1338 }
 0x210   :  { %6824 = vmatmul.mubr.msk.bf16.vlgmr.msra.gmra.mrb[12].mxu1 %vm587_vm1, %v837_v16  ;;  %v1346_v24 = vsel %vm587_vm1, %v1341_v22, 0 }
 0x211   :  { %6834 = vmatpush3.bf16.xpose.msra.mxu1 %v972_v17  ;;  %6835 = vmatprep.mubr.msk.bf16.mxu1 %vm8127_vm0, %v8126_v27 }
 0x212   :  { %6845 = vmatprep.subr.bf16.mxu1 %v8126_v27 }
 0x213   :  { %v1468_v26 = vpop.permute.xlu0 %1467  ;;  %v1466_v34 = vpop.permute.xlu1 %1465 }
 0x214   :  { %v1473_v33 = vsel %vm587_vm1, %v1468_v26, 0 }
 0x218   :  { %6836 = vmatmul.mubr.msk.bf16.vlgmr.msra.gmra.mrb[16].mxu1 %vm587_vm1, %v965_v18 }
 0x219   :  { %6846 = vmatpush3.bf16.xpose.msra.mxu1 %v1096_v19  ;;  %6847 = vmatprep.mubr.msk.bf16.mxu1 %vm8127_vm0, %v8126_v27 }
 0x21a   :  { %6857 = vmatprep.subr.bf16.mxu1 %v8126_v27 }
 0x220   :  { %6848 = vmatmul.mubr.msk.bf16.vlgmr.msra.gmra.mrb[20].mxu1 %vm587_vm1, %v582_v59 }
 0x221   :  { %6858 = vmatpush3.bf16.xpose.msra.mxu1 %v1218_v21  ;;  %6859 = vmatprep.mubr.msk.bf16.mxu1 %vm8127_vm0, %v8126_v27 }
 0x222   :  { %6869 = vmatprep.subr.bf16.mxu1 %v8126_v27 }
 0x228   :  { %6860 = vmatmul.mubr.msk.bf16.vlgmr.msra.gmra.mrb[24].mxu1 %vm587_vm1, %v1210_v23 }
 0x229   :  { %6870 = vmatpush3.bf16.xpose.msra.mxu1 %v1346_v24  ;;  %6871 = vmatprep.mubr.msk.bf16.mxu1 %vm8127_vm0, %v8126_v27 }
 0x22a   :  { %6881 = vmatprep.subr.bf16.mxu1 %v8126_v27 }
 0x230   :  { %6872 = vmatmul.mubr.msk.bf16.vlgmr.msra.gmra.mrb[28].mxu1 %vm587_vm1, %v1339_v30 }
 0x231   :  { %6882 = vmatpush3.bf16.xpose.msra.mxu1 %v1473_v33  ;;  %6883 = vmatprep.mubr.msk.bf16.mxu1 %vm8127_vm0, %v8126_v27 }
 0x238   :  { %6884 = vmatmul.mubr.msk.bf16.vlgmr.msra.gmra.mrb[32].mxu1 %vm587_vm1, %v1466_v34 }
 0x269   :  { %v628_v39 = vpop.f32.mrb[4].mxu1 }
 0x26a   :  { %v8426_v41 = vadd.f32 %v628_v39, %v8420_v38  ;;  %v6801_v42 = vpop.f32.mrb[5].mxu1 }
 0x26b   :  { %v631_v43 = vpop.f32.mrb[6].mxu1 }
 0x26c   :  { %v632_v28 = vadd.f32 %v631_v43, %v8423_v40  ;;  %v6802_v44 = vpop.f32.mrb[7].mxu1  ;;  %v636_v45 = vsel %vm635_vm4, %v8426_v41, -inf }
 0x26d   :  { %637 = vmax.xlane.f32.xlu0 %v636_v45 }
 0x26e   :  { %v639_v46 = vsel %vm635_vm4, %v632_v28, -inf }
 0x26f   :  { %640 = vmax.xlane.f32.xlu1 %v639_v46 }
 0x2db   :  { %v751_v47 = vpop.f32.mrb[8].mxu1 }
 0x2dc   :  { %v8433_v48 = vadd.f32 %v751_v47, %v8420_v38  ;;  %v6813_v49 = vpop.f32.mrb[9].mxu1 }
 0x2dd   :  { %v754_v50 = vpop.f32.mrb[10].mxu1 }
 0x2de   :  { %v8436_v51 = vadd.f32 %v754_v50, %v8423_v40  ;;  %v6814_v52 = vpop.f32.mrb[11].mxu1  ;;  %v758_v53 = vsel %vm635_vm4, %v8433_v48, -inf }
 0x2df   :  { %759 = vmax.xlane.f32.xlu0 %v758_v53 }
 0x2e0   :  { %v761_v54 = vsel %vm635_vm4, %v8436_v51, -inf }
 0x2e3   :  { %762 = vmax.xlane.f32.xlu0 %v761_v54  ;;  %v880_v55 = vpop.f32.mrb[12].mxu1 }
 0x2e4   :  { %v8443_v56 = vadd.f32 %v880_v55, %v8420_v38  ;;  %v6825_v57 = vpop.f32.mrb[13].mxu1 }
 0x2e5   :  { %v883_v58 = vpop.f32.mrb[14].mxu1 }
 0x2e6   :  { %v8446_v59 = vadd.f32 %v883_v58, %v8423_v40  ;;  %v6826_v60 = vpop.f32.mrb[15].mxu1  ;;  %v887_v61 = vsel %vm635_vm4, %v8443_v56, -inf }
 0x2e7   :  { %888 = vmax.xlane.f32.xlu1 %v887_v61 }
 0x2e8   :  { %v890_v63 = vsel %vm635_vm4, %v8446_v59, -inf }
 0x2e9   :  { %891 = vmax.xlane.f32.xlu0 %v890_v63 }
 0x2eb   :  { %v1008_v1 = vpop.f32.mrb[16].mxu1 }
 0x2ec   :  { %v8453_v2 = vadd.f32 %v1008_v1, %v8420_v38  ;;  %v6837_v3 = vpop.f32.mrb[17].mxu1 }
 0x2ed   :  { %v1011_v4 = vpop.f32.mrb[18].mxu1 }
 0x2ee   :  { %v8456_v5 = vadd.f32 %v1011_v4, %v8423_v40  ;;  %v6838_v6 = vpop.f32.mrb[19].mxu1  ;;  %v1015_v10 = vsel %vm635_vm4, %v8453_v2, -inf }
 0x2ef   :  { %1016 = vmax.xlane.f32.xlu1 %v1015_v10 }
 0x2f0   :  { %v1018_v11 = vsel %vm635_vm4, %v8456_v5, -inf }
 0x2f1   :  { %1019 = vmax.xlane.f32.xlu0 %v1018_v11 }
 0x2f3   :  { %v1132_v12 = vpop.f32.mrb[20].mxu1 }
 0x2f4   :  { %v6849_v13 = vpop.f32.mrb[21].mxu1  ;;  %v8490_v55 = vadd.f32 %v1132_v12, %v8420_v38 }
 0x2f5   :  { %v1135_v14 = vpop.f32.mrb[22].mxu1 }
 0x2f6   :  { %v8463_v15 = vadd.f32 %v1135_v14, %v8423_v40  ;;  %v6850_v16 = vpop.f32.mrb[23].mxu1  ;;  %v1139_v58 = vsel %vm635_vm4, %v8490_v55, -inf }
 0x2f8   :  { %v1142_v17 = vsel %vm635_vm4, %v8463_v15, -inf }
 0x2f9   :  { %1143 = vmax.xlane.f32.xlu0 %v1142_v17 }
 0x2fa   :  { %v638_v52 = vpop.xlane.xlu0 %637 }
 0x2fb   :  { %v1254_v18 = vpop.f32.mrb[24].mxu1  ;;  %v642_v53 = vsub.f32 %v8426_v41, %v638_v52 }
 0x2fc   :  { %v641_v19 = vpop.xlane.xlu1 %640  ;;  %v6861_v20 = vpop.f32.mrb[25].mxu1  ;;  %v8493_v57 = vadd.f32 %v1254_v18, %v8420_v38 }
 0x2fd   :  { %v643_v21 = vsub.f32 %v632_v28, %v641_v19  ;;  %v1257_v22 = vpop.f32.mrb[26].mxu1  ;;  %v644_v54 = vmul.f32 1.442695, %v642_v53 }
 0x2fe   :  { %v8468_v23 = vadd.f32 %v1257_v22, %v8423_v40  ;;  %v6862_v24 = vpop.f32.mrb[27].mxu1  ;;  %v1261_v61 = vsel %vm635_vm4, %v8493_v57, -inf }
 0x2ff   :  { %v646_v26 = vmul.f32 1.442695, %v643_v21 }
 0x300   :  { %782 = vrot.lane.b32.xlu1 %v8380_v8, %s8128_s21  ;;  %v1264_v30 = vsel %vm635_vm4, %v8468_v23, -inf }
 0x301   :  { %7491 = vpow2.f32 %v646_v26  ;;  %1265 = vmax.xlane.f32.xlu0 %v1264_v30 }
 0x302   :  { %7493 = vpow2.f32 %v644_v54 }
 0x303   :  { %v1382_v33 = vpop.f32.mrb[28].mxu1 }
 0x304   :  { %v6873_v34 = vpop.f32.mrb[29].mxu1  ;;  %v8498_v60 = vadd.f32 %v1382_v33, %v8420_v38 }
 0x305   :  { %v1385_v36 = vpop.f32.mrb[30].mxu1 }
 0x306   :  { %v8475_v37 = vadd.f32 %v1385_v36, %v8423_v40  ;;  %v6874_v39 = vpop.f32.mrb[31].mxu1  ;;  %v1389_v41 = vsel %vm635_vm4, %v8498_v60, -inf }
 0x308   :  { %v1392_v42 = vsel %vm635_vm4, %v8475_v37, -inf }
 0x309   :  { %1393 = vmax.xlane.f32.xlu0 %v1392_v42 }
 0x30b   :  { %v8479_v43 = vpop.eup %7491  ;;  %v1509_v28 = vpop.f32.mrb[32].mxu1 }
 0x30c   :  { %v6885_v44 = vpop.f32.mrb[33].mxu1  ;;  %v651_v45 = vsel %vm635_vm4, %v8479_v43, 0.0  ;;  %v8504_v63 = vpop.eup %7493  ;;  %v8507_v1 = vadd.f32 %v1509_v28, %v8420_v38 }
 0x30d   :  { %652 = vadd.xlane.f32.xlu0 %v651_v45  ;;  %v1512_v46 = vpop.f32.mrb[34].mxu1  ;;  %v648_v3 = vsel %vm635_vm4, %v8504_v63, 0.0 }
 0x30e   :  { %v8484_v47 = vadd.f32 %v1512_v46, %v8423_v40  ;;  %v6886_v49 = vpop.f32.mrb[35].mxu1  ;;  %v1516_v4 = vsel %vm635_vm4, %v8507_v1, -inf }
 0x310   :  { %v1519_v50 = vsel %vm635_vm4, %v8484_v47, -inf }
 0x311   :  { %1520 = vmax.xlane.f32.xlu0 %v1519_v50 }
 0x324   :  { %1140 = vmax.xlane.f32.xlu1 %v1139_v58 }
 0x328   :  { %1262 = vmax.xlane.f32.xlu1 %v1261_v61 }
 0x32c   :  { %1390 = vmax.xlane.f32.xlu1 %v1389_v41 }
 0x330   :  { %649 = vadd.xlane.f32.xlu1 %v648_v3 }
 0x334   :  { %1517 = vmax.xlane.f32.xlu1 %v1516_v4 }
 0x36c   :  { %v760_v6 = vpop.xlane.xlu0 %759 }
 0x36d   :  { %v764_v10 = vsub.f32 %v8433_v48, %v760_v6 }
 0x36f   :  { %v766_v11 = vmul.f32 1.442695, %v764_v10 }
 0x370   :  { %v763_v12 = vpop.xlane.xlu0 %762 }
 0x371   :  { %7495 = vpow2.f32 %v766_v11  ;;  %v765_v13 = vsub.f32 %v8436_v51, %v763_v12 }
 0x373   :  { %v768_v14 = vmul.f32 1.442695, %v765_v13 }
 0x374   :  { %v889_v48 = vpop.xlane.xlu1 %888 }
 0x375   :  { %7497 = vpow2.f32 %v768_v14  ;;  %v893_v51 = vsub.f32 %v8443_v56, %v889_v48 }
 0x376   :  { %v892_v20 = vpop.xlane.xlu0 %891 }
 0x377   :  { %v894_v22 = vsub.f32 %v8446_v59, %v892_v20  ;;  %v895_v24 = vmul.f32 1.442695, %v893_v51 }
 0x379   :  { %v897_v33 = vmul.f32 1.442695, %v894_v22  ;;  %7499 = vpow2.f32 %v895_v24 }
 0x37b   :  { %v8515_v16 = vpop.eup %7495  ;;  %7501 = vpow2.f32 %v897_v33 }
 0x37c   :  { %v770_v17 = vsel %vm635_vm4, %v8515_v16, 0.0  ;;  %v1017_v21 = vpop.xlane.xlu1 %1016 }
 0x37d   :  { %771 = vadd.xlane.f32.xlu1 %v770_v17  ;;  %v1021_v26 = vsub.f32 %v8453_v2, %v1017_v21 }
 0x37e   :  { %v1020_v30 = vpop.xlane.xlu0 %1019 }
 0x37f   :  { %v8519_v18 = vpop.eup %7497  ;;  %v1023_v34 = vmul.f32 1.442695, %v1021_v26  ;;  %v1022_v36 = vsub.f32 %v8456_v5, %v1020_v30 }
 0x380   :  { %v773_v19 = vsel %vm635_vm4, %v8519_v18, 0.0  ;;  %v8532_v28 = vpop.permute.xlu1 %782 }
 0x381   :  { %774 = vadd.xlane.f32.xlu0 %v773_v19  ;;  %7503 = vpow2.f32 %v1023_v34 }
 0x383   :  { %v8534_v44 = vpop.eup %7499 }
 0x384   :  { %v899_v5 = vsel %vm635_vm4, %v8534_v44, 0.0 }
 0x385   :  { %v8536_v2 = vpop.eup %7501 }
 0x386   :  { %v1144_v39 = vpop.xlane.xlu0 %1143  ;;  %v902_v58 = vsel %vm635_vm4, %v8536_v2, 0.0 }
 0x387   :  { %v1146_v42 = vsub.f32 %v8463_v15, %v1144_v39 }
 0x389   :  { %v1149_v56 = vmul.f32 1.442695, %v1146_v42 }
 0x38b   :  { %v8540_v49 = vpop.eup %7503 }
 0x38c   :  { %v1027_v54 = vsel %vm635_vm4, %v8540_v49, 0.0 }
 0x38e   :  { %1038 = vrot.lane.b32.xlu1 %v8380_v8, %s8129_s23  ;;  %v1266_v59 = vpop.xlane.xlu0 %1265 }
 0x38f   :  { %v1268_v15 = vsub.f32 %v8468_v23, %v1266_v59 }
 0x396   :  { %v1394_v45 = vpop.xlane.xlu0 %1393 }
 0x397   :  { %910 = vrot.lane.b32.xlu0 %v8380_v8, %s8119_s5  ;;  %v1025_v8 = vmul.f32 1.442695, %v1022_v36  ;;  %v1396_v4 = vsub.f32 %v8475_v37, %v1394_v45 }
 0x399   :  { %7505 = vpow2.f32 %v1025_v8  ;;  %v1399_v12 = vmul.f32 1.442695, %v1396_v4 }
 0x39a   :  { %7507 = vpow2.f32 %v1149_v56  ;;  %v653_v3 = vpop.xlane.xlu0 %652 }
 0x39e   :  { %v1521_v13 = vpop.xlane.xlu0 %1520 }
 0x39f   :  { %v1523_v17 = vsub.f32 %v8484_v47, %v1521_v13 }
 0x3a1   :  { %v1526_v21 = vmul.f32 1.442695, %v1523_v17 }
 0x3a3   :  { %v8548_v61 = vpop.eup %7505 }
 0x3a4   :  { %v1030_v10 = vsel %vm635_vm4, %v8548_v61, 0.0  ;;  %v8554_v11 = vpop.eup %7507 }
 0x3a5   :  { %v1154_v14 = vsel %vm635_vm4, %v8554_v11, 0.0 }
 0x3b1   :  { %v1141_v46 = vpop.xlane.xlu1 %1140 }
 0x3b2   :  { %v1145_v50 = vsub.f32 %v8490_v55, %v1141_v46  ;;  %900 = vadd.xlane.f32.xlu1 %v899_v5  ;;  %v1271_v55 = vmul.f32 1.442695, %v1268_v15 }
 0x3b4   :  { %v1147_v52 = vmul.f32 1.442695, %v1145_v50 }
 0x3b5   :  { %v1263_v53 = vpop.xlane.xlu1 %1262 }
 0x3b6   :  { %7509 = vpow2.f32 %v1147_v52  ;;  %v1267_v41 = vsub.f32 %v8493_v57, %v1263_v53  ;;  %1028 = vadd.xlane.f32.xlu1 %v1027_v54  ;;  %903 = vadd.xlane.f32.xlu0 %v902_v58 }
 0x3b8   :  { %v1269_v23 = vmul.f32 1.442695, %v1267_v41 }
 0x3b9   :  { %v1391_v6 = vpop.xlane.xlu1 %1390 }
 0x3ba   :  { %7511 = vpow2.f32 %v1269_v23  ;;  %1031 = vadd.xlane.f32.xlu0 %v1030_v10 }
 0x3bb   :  { %7513 = vpow2.f32 %v1271_v55 }
 0x3bc   :  { %7515 = vrcp.f32 %v653_v3 }
 0x3bd   :  { %v650_v57 = vpop.xlane.xlu1 %649 }
 0x3be   :  { %1155 = vadd.xlane.f32.xlu0 %v1154_v14  ;;  %7517 = vrcp.f32 %v650_v57 }
 0x3bf   :  { %7519 = vpow2.f32 %v1399_v12 }
 0x3c0   :  { %v8558_v37 = vpop.eup %7509 }
 0x3c1   :  { %v1518_v19 = vpop.xlane.xlu1 %1517  ;;  %v1151_v48 = vsel %vm635_vm4, %v8558_v37, 0.0 }
 0x3c2   :  { %v1522_v51 = vsub.f32 %v8507_v1, %v1518_v19  ;;  %1152 = vadd.xlane.f32.xlu1 %v1151_v48 }
 0x3c4   :  { %v8564_v20 = vpop.eup %7511  ;;  %v1524_v22 = vmul.f32 1.442695, %v1522_v51 }
 0x3c5   :  { %v1273_v24 = vsel %vm635_vm4, %v8564_v20, 0.0  ;;  %v8568_v26 = vpop.eup %7513 }
 0x3c6   :  { %7521 = vpow2.f32 %v1524_v22  ;;  %1274 = vadd.xlane.f32.xlu0 %v1273_v24  ;;  %v7516_v30 = vpop.eup %7515  ;;  %v1276_v33 = vsel %vm635_vm4, %v8568_v26, 0.0 }
 0x3c7   :  { %7523 = vpow2.f32 %v1526_v21  ;;  %v657_v1 = vmul.f32 %v7516_v30, %v8479_v43 }
 0x3c8   :  { %v7518_v47 = vpop.eup %7517 }
 0x3c9   :  { %v8572_v34 = vpop.eup %7519  ;;  %v656_v36 = vmul.f32 %v7518_v47, %v8504_v63 }
 0x3ca   :  { %1277 = vadd.xlane.f32.xlu0 %v1276_v33  ;;  %v1404_v8 = vsel %vm635_vm4, %v8572_v34, 0.0 }
 0x3cb   :  { %v658_v39 = vpack.c.bf16 %v657_v1, %v656_v36 }
 0x3cd   :  { %6806 = vmatmul.mubr.msk.bf16.vlgmr.msra.gmra.mrb[8].mxu0 %vm635_vm4, %v658_v39 }
 0x3ce   :  { %1405 = vadd.xlane.f32.xlu0 %v1404_v8  ;;  %6816 = vmatpush3.bf16.msra.mxu0 %v8532_v28  ;;  %v1395_v28 = vsub.f32 %v8498_v60, %v1391_v6 }
 0x3cf   :  { %6817 = vmatprep.mubr.msk.bf16.mxu0 %vm8127_vm0, %v8126_v27  ;;  %6827 = vmatprep.subr.bf16.mxu0 %v8126_v27 }
 0x3d0   :  { %v8582_v42 = vpop.eup %7521  ;;  %v1397_v59 = vmul.f32 1.442695, %v1395_v28 }
 0x3d1   :  { %v1528_v43 = vsel %vm635_vm4, %v8582_v42, 0.0  ;;  %v8587_v63 = vpop.eup %7523 }
 0x3d2   :  { %1529 = vadd.xlane.f32.xlu0 %v1528_v43  ;;  %v1531_v56 = vsel %vm635_vm4, %v8587_v63, 0.0  ;;  %7525 = vpow2.f32 %v1397_v59 }
 0x3d3   :  { %1285 = vrot.lane.b32.xlu1 %v8378_v7, %s8128_s21 }
 0x3d6   :  { %1532 = vadd.xlane.f32.xlu0 %v1531_v56 }
 0x3dc   :  { %v8596_v45 = vpop.eup %7525 }
 0x3dd   :  { %v1401_v46 = vsel %vm635_vm4, %v8596_v45, 0.0 }
 0x3ec   :  { %1412 = vrot.lane.b32.xlu0 %v8378_v7, %s8119_s5 }
 0x3f7   :  { %1402 = vadd.xlane.f32.xlu1 %v1401_v46 }
 0x408   :  { %1539 = vrot.lane.b32.xlu1 %v8378_v7, %s8129_s23 }
 0x40a   :  { %v772_v5 = vpop.xlane.xlu1 %771 }
 0x40b   :  { %7527 = vrcp.f32 %v772_v5 }
 0x40e   :  { %v775_v50 = vpop.xlane.xlu0 %774  ;;  %v1039_v41 = vpop.permute.xlu1 %1038 }
 0x40f   :  { %7529 = vrcp.f32 %v775_v50 }
 0x412   :  { %v911_v58 = vpop.permute.xlu0 %910 }
 0x415   :  { %v7528_v15 = vpop.eup %7527 }
 0x416   :  { %v778_v52 = vmul.f32 %v7528_v15, %v8515_v16 }
 0x419   :  { %v7530_v60 = vpop.eup %7529 }
 0x41a   :  { %v779_v53 = vmul.f32 %v7530_v60, %v8519_v18 }
 0x41c   :  { %v780_v54 = vpack.c.bf16 %v779_v53, %v778_v52 }
 0x41e   :  { %6818 = vmatmul.mubr.msk.bf16.vlgmr.msra.gmra.mrb[12].mxu0 %vm635_vm4, %v780_v54 }
 0x41f   :  { %6828 = vmatpush3.bf16.msra.mxu0 %v911_v58  ;;  %6829 = vmatprep.mubr.msk.bf16.mxu0 %vm8127_vm0, %v8126_v27 }
 0x420   :  { %6839 = vmatprep.subr.bf16.mxu0 %v8126_v27 }
 0x43f   :  { %v901_v3 = vpop.xlane.xlu1 %900 }
 0x440   :  { %7531 = vrcp.f32 %v901_v3 }
 0x443   :  { %v904_v55 = vpop.xlane.xlu0 %903  ;;  %v1029_v23 = vpop.xlane.xlu1 %1028 }
 0x444   :  { %7533 = vrcp.f32 %v904_v55 }
 0x447   :  { %v1032_v4 = vpop.xlane.xlu0 %1031 }
 0x448   :  { %7535 = vrcp.f32 %v1032_v4 }
 0x449   :  { %7537 = vrcp.f32 %v1029_v23 }
 0x44a   :  { %v7532_v16 = vpop.eup %7531 }
 0x44b   :  { %v1156_v6 = vpop.xlane.xlu0 %1155  ;;  %v907_v12 = vmul.f32 %v7532_v16, %v8534_v44 }
 0x44e   :  { %v7534_v18 = vpop.eup %7533 }
 0x44f   :  { %v1153_v10 = vpop.xlane.xlu1 %1152  ;;  %v908_v13 = vmul.f32 %v7534_v18, %v8536_v2 }
 0x450   :  { %7539 = vrcp.f32 %v1153_v10 }
 0x451   :  { %v909_v57 = vpack.c.bf16 %v908_v13, %v907_v12  ;;  %7541 = vrcp.f32 %v1156_v6 }
 0x452   :  { %v7536_v14 = vpop.eup %7535 }
 0x453   :  { %v1275_v17 = vpop.xlane.xlu0 %1274  ;;  %6830 = vmatmul.mubr.msk.bf16.vlgmr.msra.gmra.mrb[16].mxu0 %vm635_vm4, %v909_v57  ;;  %v7538_v19 = vpop.eup %7537  ;;  %v1036_v48 = vmul.f32 %v7536_v14, %v8548_v61 }
 0x454   :  { %6840 = vmatpush3.bf16.msra.mxu0 %v1039_v41  ;;  %6841 = vmatprep.mubr.msk.bf16.mxu0 %vm8127_vm0, %v8126_v27  ;;  %v1035_v44 = vmul.f32 %v7538_v19, %v8540_v49  ;;  %v1286_v1 = vpop.permute.xlu1 %1285  ;;  %v7377_v19 = vld [vmem:[#allocation8] sm:$0xff]  }
 0x455   :  { %6851 = vmatprep.subr.bf16.mxu0 %v8126_v27  ;;  %6893 = vmatprep.subr.bf16.mxu1 %v7377_v19 }
 0x456   :  { %v1037_v2 = vpack.c.bf16 %v1036_v48, %v1035_v44  ;;  %v7378_v48 = vld [vmem:[#allocation8 + $0x8] sm:$0xff]   ;;  %6894 = vmatpush3.bf16.msra.mxu1 %v7377_v19 }
 0x457   :  { %v1278_v51 = vpop.xlane.xlu0 %1277  ;;  %6895 = vmatprep.subr.bf16.mxu1 %v7378_v48 }
 0x458   :  { %7543 = vrcp.f32 %v1278_v51 }
 0x459   :  { %7545 = vrcp.f32 %v1275_v17 }
 0x45a   :  { %v7540_v21 = vpop.eup %7539  ;;  %6896 = vmatpush3.bf16.msra.mxu1 %v7378_v48  ;;  %v7385_v48 = vld [vmem:[#allocation9 + $0x8] ss:$12 sps:$4 sm:$0xff]  }
 0x45b   :  { %v1406_v22 = vpop.xlane.xlu0 %1405  ;;  %6842 = vmatmul.mubr.msk.bf16.vlgmr.msra.gmra.mrb[20].mxu0 %vm635_vm4, %v1037_v2  ;;  %v7542_v24 = vpop.eup %7541  ;;  %v1159_v61 = vmul.f32 %v7540_v21, %v8558_v37 }
 0x45c   :  { %6852 = vmatpush3.bf16.msra.mxu0 %v8378_v7  ;;  %6853 = vmatprep.mubr.msk.bf16.mxu0 %vm8127_vm0, %v8126_v27  ;;  %v1160_v30 = vmul.f32 %v7542_v24, %v8554_v11  ;;  %7547 = vrcp.f32 %v1406_v22  ;;  %v7379_v22 = vld [vmem:[#allocation8 + $0x10] sm:$0xff]  }
 0x45d   :  { %6863 = vmatprep.subr.bf16.mxu0 %v8126_v27  ;;  %6897 = vmatprep.subr.bf16.mxu1 %v7379_v22 }
 0x45e   :  { %v1161_v47 = vpack.c.bf16 %v1160_v30, %v1159_v61  ;;  %v7380_v61 = vld [vmem:[#allocation8 + $0x18] sm:$0xff]   ;;  %6898 = vmatpush3.bf16.msra.mxu1 %v7379_v22 }
 0x45f   :  { %v1530_v49 = vpop.xlane.xlu0 %1529  ;;  %6899 = vmatprep.subr.bf16.mxu1 %v7380_v61  ;;  %v7392_v22 = vld [vmem:[#allocation9 + $0x38] ss:$12 sps:$4 sm:$0xff]  }
 0x462   :  { %v7544_v33 = vpop.eup %7543  ;;  %6900 = vmatpush3.bf16.msra.mxu1 %v7380_v61 }
 0x463   :  { %6854 = vmatmul.mubr.msk.bf16.vlgmr.msra.gmra.mrb[24].mxu0 %vm635_vm4, %v1161_v47  ;;  %v7546_v36 = vpop.eup %7545  ;;  %v1282_v7 = vmul.f32 %v7544_v33, %v8568_v26  ;;  %v1533_v39 = vpop.xlane.xlu0 %1532 }
 0x464   :  { %6864 = vmatpush3.bf16.msra.mxu0 %v1286_v1  ;;  %6865 = vmatprep.mubr.msk.bf16.mxu0 %vm8127_vm0, %v8126_v27  ;;  %v1281_v37 = vmul.f32 %v7546_v36, %v8564_v20  ;;  %v7381_v1 = vld [vmem:[#allocation8 + $0x20] sm:$0xff]   ;;  %v7382_v36 = vld [vmem:[#allocation8 + $0x28] sm:$0xff]  }
 0x465   :  { %6875 = vmatprep.subr.bf16.mxu0 %v8126_v27  ;;  %6901 = vmatprep.subr.bf16.mxu1 %v7381_v1 }
 0x466   :  { %v1283_v8 = vpack.c.bf16 %v1282_v7, %v1281_v37  ;;  %v7548_v26 = vpop.eup %7547  ;;  %6902 = vmatpush3.bf16.msra.mxu1 %v7381_v1  ;;  %v7384_v37 = vld [vmem:[#allocation8 + $0x38] sm:$0xff]  }
 0x467   :  { %v1413_v11 = vpop.permute.xlu0 %1412  ;;  %v1410_v28 = vmul.f32 %v7548_v26, %v8572_v34  ;;  %6903 = vmatprep.subr.bf16.mxu1 %v7382_v36 }
 0x46a   :  { %6904 = vmatpush3.bf16.msra.mxu1 %v7382_v36 }
 0x46b   :  { %6866 = vmatmul.mubr.msk.bf16.vlgmr.msra.gmra.mrb[28].mxu0 %vm635_vm4, %v1283_v8 }
 0x46c   :  { %6876 = vmatpush3.bf16.msra.mxu0 %v1413_v11  ;;  %6877 = vmatprep.mubr.msk.bf16.mxu0 %vm8127_vm0, %v8126_v27 }
 0x46d   :  { %6887 = vmatprep.subr.bf16.mxu0 %v8126_v27 }
 0x484   :  { %v1403_v43 = vpop.xlane.xlu1 %1402 }
 0x485   :  { %7549 = vrcp.f32 %v1403_v43 }
 0x486   :  { %7551 = vrcp.f32 %v1533_v39  ;;  %v7383_v39 = vld [vmem:[#allocation8 + $0x30] sm:$0xff]  }
 0x487   :  { %7553 = vrcp.f32 %v1530_v49  ;;  %6905 = vmatprep.subr.bf16.mxu1 %v7383_v39 }
 0x488   :  { %v1540_v5 = vpop.permute.xlu1 %1539  ;;  %6906 = vmatpush3.bf16.msra.mxu1 %v7383_v39 }
 0x489   :  { %6907 = vmatprep.subr.bf16.mxu1 %v7384_v37 }
 0x48c   :  { %6908 = vmatpush3.bf16.msra.mxu1 %v7384_v37 }
 0x48d   :  { %1951 = vmatprep.subr.bf16.mxu1 %v7385_v48 }
 0x48f   :  { %v7550_v56 = vpop.eup %7549 }
 0x490   :  { %v1409_v20 = vmul.f32 %v7550_v56, %v8596_v45  ;;  %v7552_v46 = vpop.eup %7551 }
 0x491   :  { %v7554_v50 = vpop.eup %7553  ;;  %v1537_v15 = vmul.f32 %v7552_v46, %v8587_v63 }
 0x492   :  { %v1411_v59 = vpack.c.bf16 %v1410_v28, %v1409_v20  ;;  %v1536_v60 = vmul.f32 %v7554_v50, %v8582_v42 }
 0x494   :  { %6878 = vmatmul.mubr.msk.bf16.vlgmr.msra.gmra.mrb[32].mxu0 %vm635_vm4, %v1411_v59  ;;  %v1538_v52 = vpack.c.bf16 %v1537_v15, %v1536_v60 }
 0x495   :  { %6888 = vmatpush3.bf16.msra.mxu0 %v1540_v5  ;;  %6889 = vmatprep.mubr.msk.bf16.mxu0 %vm8127_vm0, %v8126_v27 }
 0x49c   :  { %6890 = vmatmul.mubr.msk.bf16.vlgmr.msra.gmra.mrb[36].mxu0 %vm635_vm4, %v1538_v52 }
 0x4a0   :  { %v696_v34 = vpop.f32.mrb[8].mxu0 }
 0x4a1   :  { %v6807_v53 = vpop.f32.mrb[9].mxu0 }
 0x4a2   :  { %v699_v45 = vpop.f32.mrb[10].mxu0 }
 0x4a3   :  { %v703_v54 = vpack.c.bf16 %v699_v45, %v696_v34  ;;  %v6808_v58 = vpop.f32.mrb[11].mxu0 }
 0x4a5   :  { %704 = vst.msk [vmem:[#allocation2] sm:$0xff] %vm587_vm1, %v703_v54  ;;  %v8657_v54 = vsub.s32 2, %v8328_v29 }
 0x4a7   :  { %v8661_v58 = vrot.slane %v8334_v31, %v8657_v54 }
 0x4f1   :  { %v822_v41 = vpop.f32.mrb[12].mxu0 }
 0x4f2   :  { %v6819_v3 = vpop.f32.mrb[13].mxu0 }
 0x4f3   :  { %v825_v55 = vpop.f32.mrb[14].mxu0  ;;  %v7795_v3 = vld [vmem:[#allocation3] sm:$0xff]  }
 0x4f4   :  { %v829_v4 = vpack.c.bf16 %v825_v55, %v822_v41  ;;  %v6820_v23 = vpop.f32.mrb[15].mxu0  ;;  %v147_v55 = vunpack.c.l.bf16 %v7795_v3 }
 0x4f6   :  { %831 = vrot.lane.b32.xlu1 %v829_v4, %s8129_s23 }
 0x526   :  { %v950_v63 = vpop.f32.mrb[16].mxu0 }
 0x527   :  { %v6831_v16 = vpop.f32.mrb[17].mxu0 }
 0x528   :  { %v953_v42 = vpop.f32.mrb[18].mxu0  ;;  %v148_v16 = vunpack.c.h.bf16 %v7795_v3  ;;  %v7411_v3 = vld [vmem:[#allocation9 + $0x78] ss:$12 sps:$4 sm:$0xff]  }
 0x529   :  { %v957_v18 = vpack.c.bf16 %v953_v42, %v950_v63  ;;  %v6832_v6 = vpop.f32.mrb[19].mxu0 }
 0x52b   :  { %959 = vrot.lane.b32.xlu1 %v957_v18, %s8119_s5 }
 0x52e   :  { %v1078_v10 = vpop.f32.mrb[20].mxu0 }
 0x52f   :  { %v6843_v12 = vpop.f32.mrb[21].mxu0 }
 0x530   :  { %v1081_v13 = vpop.f32.mrb[22].mxu0  ;;  %v7796_v12 = vld [vmem:[#allocation3 + $0x8] sm:$0xff]  }
 0x531   :  { %v1085_v57 = vpack.c.bf16 %v1081_v13, %v1078_v10  ;;  %v6844_v14 = vpop.f32.mrb[23].mxu0  ;;  %v149_v13 = vunpack.c.l.bf16 %v7796_v12 }
 0x533   :  { %1087 = vrot.lane.b32.xlu1 %v1085_v57, %s8128_s21 }
 0x536   :  { %v1199_v17 = vpop.f32.mrb[24].mxu0 }
 0x537   :  { %v6855_v51 = vpop.f32.mrb[25].mxu0 }
 0x538   :  { %v1202_v44 = vpop.f32.mrb[26].mxu0  ;;  %v7386_v51 = vld [vmem:[#allocation9 + $0x4] ss:$12 sps:$4 sm:$0xff]  }
 0x539   :  { %v1206_v2 = vpack.c.bf16 %v1202_v44, %v1199_v17  ;;  %v6856_v21 = vpop.f32.mrb[27].mxu0  ;;  %v150_v17 = vunpack.c.h.bf16 %v7796_v12  ;;  %v7388_v44 = vld [vmem:[#allocation9 + $0x20] ss:$12 sps:$4 sm:$0xff]  }
 0x53a   :  { %v7389_v21 = vld [vmem:[#allocation9 + $0x1c] ss:$12 sps:$4 sm:$0xff]  }
 0x53b   :  { %1207 = vst.msk [vmem:[#allocation2 + $0x8] sm:$0xff] %vm587_vm1, %v1206_v2  ;;  %v7391_v2 = vld [vmem:[#allocation9] ss:$12 sps:$4 sm:$0xff]  }
 0x53c   :  { %6913 = vmatprep.subr.bf16.mxu0 %v7391_v2 }
 0x53d   :  { %6914 = vmatpush3.bf16.msra.mxu0 %v7391_v2 }
 0x53e   :  { %v1325_v24 = vpop.f32.mrb[28].mxu0 }
 0x53f   :  { %v6867_v30 = vpop.f32.mrb[29].mxu0 }
 0x540   :  { %v1328_v49 = vpop.f32.mrb[30].mxu0 }
 0x541   :  { %v1332_v47 = vpack.c.bf16 %v1328_v49, %v1325_v24  ;;  %v6868_v33 = vpop.f32.mrb[31].mxu0 }
 0x543   :  { %1334 = vrot.lane.b32.xlu1 %v1332_v47, %s8129_s23 }
 0x567   :  { %v1452_v7 = vpop.f32.mrb[32].mxu0 }
 0x568   :  { %v832_v8 = vpop.permute.xlu1 %831  ;;  %v6879_v11 = vpop.f32.mrb[33].mxu0 }
 0x569   :  { %835 = vst.msk [vmem:[#allocation2] sm:$0xff] %vm834_vm5, %v832_v8  ;;  %v1455_v43 = vpop.f32.mrb[34].mxu0 }
 0x56a   :  { %v1459_v26 = vpack.c.bf16 %v1455_v43, %v1452_v7  ;;  %v6880_v56 = vpop.f32.mrb[35].mxu0 }
 0x56c   :  { %1461 = vrot.lane.b32.xlu0 %v1459_v26, %s8119_s5 }
 0x56f   :  { %v1579_v28 = vpop.f32.mrb[36].mxu0 }
 0x570   :  { %v6891_v20 = vpop.f32.mrb[37].mxu0 }
 0x571   :  { %v1582_v59 = vpop.f32.mrb[38].mxu0  ;;  %v7395_v20 = vld [vmem:[#allocation9 + $0x18] ss:$12 sps:$4 sm:$0xff]  }
 0x572   :  { %v1586_v46 = vpack.c.bf16 %v1582_v59, %v1579_v28  ;;  %v6892_v5 = vpop.f32.mrb[39].mxu0  ;;  %v7393_v28 = vld [vmem:[#allocation9 + $0x34] ss:$12 sps:$4 sm:$0xff]   ;;  %v7396_v59 = vld [vmem:[#allocation9 + $0x50] ss:$12 sps:$4 sm:$0xff]   ;;  %6915 = vmatprep.subr.bf16.mxu0 %v7395_v20 }
 0x573   :  { %6916 = vmatpush3.bf16.msra.mxu0 %v7395_v20  ;;  %v7399_v5 = vld [vmem:[#allocation9 + $0x30] ss:$12 sps:$4 sm:$0xff]  }
 0x574   :  { %1588 = vrot.lane.b32.xlu1 %v1586_v46, %s8128_s21  ;;  %v7397_v46 = vld [vmem:[#allocation9 + $0x4c] ss:$12 sps:$4 sm:$0xff]   ;;  %6917 = vmatprep.subr.bf16.mxu0 %v7399_v5 }
 0x575   :  { %v7799_v20 = vld [vmem:[%s9797_s8 + $0x10] sm:$0xff] }
 0x577   :  { %6918 = vmatpush3.bf16.msra.mxu0 %v7399_v5 }
 0x59d   :  { %v960_v50 = vpop.permute.xlu1 %959 }
 0x59e   :  { %963 = vst.msk [vmem:[#allocation2] sm:$0xff] %vm962_vm6, %v960_v50  ;;  %v7400_v50 = vld [vmem:[#allocation9 + $0x68] ss:$12 sps:$4 sm:$0xff]  }
 0x5a5   :  { %v1088_v15 = vpop.permute.xlu1 %1087 }
 0x5a6   :  { %1091 = vst.msk [vmem:[#allocation2] sm:$0xff] %vm1090_vm7, %v1088_v15  ;;  %v7401_v15 = vld [vmem:[#allocation9 + $0x64] ss:$12 sps:$4 sm:$0xff]  }
 0x5ad   :  { %v1592_v60 = vld [vmem:[#allocation2] sm:$0xff] }
 0x5ae   :  { %6909 = vmatprep.mubr.bf16.mxu1 %v1592_v60  ;;  %v7403_v60 = vld [vmem:[#allocation9 + $0x48] ss:$12 sps:$4 sm:$0xff]  }
 0x5af   :  { %6919 = vmatprep.subr.bf16.mxu0 %v7403_v60 }
 0x5b0   :  { %6920 = vmatpush3.bf16.msra.mxu0 %v7403_v60 }
 0x5b5   :  { %v1335_v52 = vpop.permute.xlu1 %1334 }
 0x5b6   :  { %1337 = vst.msk [vmem:[#allocation2 + $0x8] sm:$0xff] %vm834_vm5, %v1335_v52  ;;  %v7404_v52 = vld [vmem:[#allocation9 + $0x80] ss:$12 sps:$4 sm:$0xff]  }
 0x5de   :  { %v1462_v34 = vpop.permute.xlu0 %1461 }
 0x5df   :  { %1464 = vst.msk [vmem:[#allocation2 + $0x8] sm:$0xff] %vm962_vm6, %v1462_v34  ;;  %v7405_v34 = vld [vmem:[#allocation9 + $0x7c] ss:$12 sps:$4 sm:$0xff]  }
 0x5e6   :  { %v1589_v53 = vpop.permute.xlu1 %1588 }
 0x5e7   :  { %1591 = vst.msk [vmem:[#allocation2 + $0x8] sm:$0xff] %vm1090_vm7, %v1589_v53  ;;  %v7407_v53 = vld [vmem:[#allocation9 + $0x60] ss:$12 sps:$4 sm:$0xff]  }
 0x5e8   :  { %6921 = vmatprep.subr.bf16.mxu0 %v7407_v53 }
 0x5e9   :  { %6922 = vmatpush3.bf16.msra.mxu0 %v7407_v53 }
 0x5ea   :  { %6923 = vmatprep.subr.bf16.mxu0 %v7411_v3 }
 0x5ed   :  { %6924 = vmatpush3.bf16.msra.mxu0 %v7411_v3 }
 0x5ee   :  { %v1593_v45 = vld [vmem:[#allocation2 + $0x8] sm:$0xff] }
 0x5ef   :  { %6910 = vmatmul.mubr.bf16.vlgmr.msra.gmra.mrb[36].mxu1 %v1593_v45  ;;  %v7408_v45 = vld [vmem:[#allocation9 + $0x98] ss:$12 sps:$4 sm:$0xff]  }
 0x5f0   :  { %1983 = vmatprep.mubr.bf16.mxu1 %v8125_v0  ;;  %1952 = vmatpush1.bf16.msra.mxu1 %v7386_v51 }
 0x5f1   :  { %1953 = vmatprep.subr.bf16.mxu1 %v7388_v44 }
 0x5f4   :  { %1954 = vmatpush1.bf16.msra.mxu1 %v7389_v21 }
 0x5f5   :  { %1955 = vmatprep.subr.bf16.mxu1 %v7392_v22 }
 0x5f8   :  { %1956 = vmatpush1.bf16.msra.mxu1 %v7393_v28 }
 0x5f9   :  { %1957 = vmatprep.subr.bf16.mxu1 %v7396_v59 }
 0x5fc   :  { %1958 = vmatpush1.bf16.msra.mxu1 %v7397_v46 }
 0x5fd   :  { %1959 = vmatprep.subr.bf16.mxu1 %v7400_v50 }
 0x600   :  { %1960 = vmatpush1.bf16.msra.mxu1 %v7401_v15 }
 0x601   :  { %1961 = vmatprep.subr.bf16.mxu1 %v7404_v52 }
 0x604   :  { %1962 = vmatpush1.bf16.msra.mxu1 %v7405_v34 }
 0x605   :  { %1963 = vmatprep.subr.bf16.mxu1 %v7408_v45 }
 0x6c2   :  { %v6911_v41 = vpop.f32.mrb[36].mxu1 }
 0x6c3   :  { %v1680_v4 = vpop.f32.mrb[37].mxu1  ;;  %v1689_v18 = vadd.f32 %v6911_v41, %v8661_v58  ;;  %v7409_v41 = vld [vmem:[#allocation9 + $0x94] ss:$12 sps:$4 sm:$0xff]  }
 0x6c4   :  { %v1681_v23 = vadd.f32 %v1680_v4, %v8661_v58  ;;  %v6912_v63 = vpop.f32.mrb[38].mxu1  ;;  %1964 = vmatpush1.bf16.msra.mxu1 %v7409_v41  ;;  %v7413_v4 = vld [vmem:[#allocation9 + $0xac] ss:$12 sps:$4 sm:$0xff]  }
 0x6c5   :  { %v1683_v42 = vpop.f32.mrb[39].mxu1  ;;  %v1692_v31 = vadd.f32 %v6912_v63, %v8661_v58  ;;  %v1697_v14 = vadd.f32 %v1689_v18, %v149_v13  ;;  %v7416_v63 = vld [vmem:[#allocation9 + $0xa8] ss:$12 sps:$4 sm:$0xff]  }
 0x6c6   :  { %v1684_v6 = vadd.f32 %v1683_v42, %v8661_v58  ;;  %v1695_v10 = vadd.f32 %v1681_v23, %v147_v55  ;;  %v7412_v55 = vld [vmem:[#allocation9 + $0xb0] ss:$12 sps:$4 sm:$0xff]  }
 0x6c7   :  { %v1698_v19 = vadd.f32 %v1692_v31, %v150_v17  ;;  %1965 = vmatprep.subr.bf16.mxu1 %v7412_v55  ;;  %v7415_v23 = vld [vmem:[#allocation9 + $0x90] ss:$12 sps:$4 sm:$0xff]   ;;  %v8691_v17 = vsub.s32 0, %v8328_v29 }
 0x6c8   :  { %1699 = vadd.xlane.f32.xlu0 %v1695_v10  ;;  %v1696_v57 = vadd.f32 %v1684_v6, %v148_v16  ;;  %1966 = vmatpush1.bf16.msra.mxu1 %v7413_v4 }
 0x6c9   :  { %6925 = vmatprep.subr.bf16.mxu0 %v7415_v23  ;;  %6963 = vmatprep.subr.bf16.mxu1 %v8126_v27 }
 0x6ca   :  { %1701 = vadd.xlane.f32.xlu1 %v1696_v57  ;;  %6926 = vmatpush3.bf16.msra.mxu0 %v7415_v23 }
 0x6cb   :  { %1984 = vmatmul.mubr.bf16.vlgmr.msra.gmra.mrb[40].mxu1 %v8312_v9  ;;  %6927 = vmatprep.subr.bf16.mxu0 %v7416_v63 }
 0x6cc   :  { %1703 = vadd.xlane.f32.xlu0 %v1697_v14  ;;  %1993 = vmatprep.mubr.bf16.mxu1 %v8125_v0 }
 0x6ce   :  { %6928 = vmatpush3.bf16.msra.mxu0 %v7416_v63 }
 0x6cf   :  { %6933 = vmatprep.subr.bf16.mxu0 %v8126_v27 }
 0x6d0   :  { %1705 = vadd.xlane.f32.xlu0 %v1698_v19 }
 0x6d3   :  { %1994 = vmatmul.mubr.bf16.gmra.mrb[44].mxu1 %v8315_v25 }
 0x6d4   :  { %6965 = vmatprep.mubr.msk.bf16.mxu1 %vm8127_vm0, %v8126_v27 }
 0x755   :  { %v1700_v24 = vpop.xlane.xlu0 %1699 }
 0x756   :  { %v1708_v61 = vmul.f32 0.0078125, %v1700_v24  ;;  %v8705_v24 = vld [vmem:[%s9797_s8 + $0x8] sm:$0xff] }
 0x757   :  { %v1702_v30 = vpop.xlane.xlu1 %1701 }
 0x758   :  { %v1709_v49 = vmul.f32 0.0078125, %v1702_v30  ;;  %v8667_v47 = vsub.f32 %v1695_v10, %v1708_v61  ;;  %v8709_v61 = vrot.slane %v8705_v24, %v8691_v17 }
 0x759   :  { %v1704_v33 = vpop.xlane.xlu0 %1703 }
 0x75a   :  { %v1710_v1 = vmul.f32 0.0078125, %v1704_v33  ;;  %v1716_v36 = vmul.f32 %v8667_v47, %v8667_v47  ;;  %v8671_v7 = vsub.f32 %v1696_v57, %v1709_v49 }
 0x75c   :  { %1720 = vadd.xlane.f32.xlu1 %v1716_v36  ;;  %v1717_v39 = vmul.f32 %v8671_v7, %v8671_v7  ;;  %v8675_v37 = vsub.f32 %v1697_v14, %v1710_v1 }
 0x75d   :  { %v1706_v8 = vpop.xlane.xlu0 %1705 }
 0x75e   :  { %v1711_v11 = vmul.f32 0.0078125, %v1706_v8  ;;  %1722 = vadd.xlane.f32.xlu0 %v1717_v39  ;;  %v1718_v43 = vmul.f32 %v8675_v37, %v8675_v37 }
 0x760   :  { %1724 = vadd.xlane.f32.xlu1 %v1718_v43  ;;  %v8679_v26 = vsub.f32 %v1698_v19, %v1711_v11  ;;  %v7797_v19 = vld [vmem:[%s9797_s8] sm:$0xff] }
 0x761   :  { %v8697_v48 = vrot.slane %v7797_v19, %v8691_v17 }
 0x762   :  { %v1719_v56 = vmul.f32 %v8679_v26, %v8679_v26 }
 0x764   :  { %1726 = vadd.xlane.f32.xlu0 %v1719_v56 }
 0x79e   :  { %v1985_v46 = vpop.f32.mrb[40].mxu1 }
 0x79f   :  { %v1987_v50 = vpop.f32.mrb[41].mxu1 }
 0x7a0   :  { %v1989_v60 = vpop.f32.mrb[42].mxu1 }
 0x7a1   :  { %v1991_v34 = vpop.f32.mrb[43].mxu1 }
 0x7e9   :  { %v1721_v16 = vpop.xlane.xlu1 %1720 }
 0x7ea   :  { %v1728_v42 = vmul.f32 0.0078125, %v1721_v16 }
 0x7eb   :  { %v1723_v18 = vpop.xlane.xlu0 %1722 }
 0x7ec   :  { %v1732_v6 = vadd.f32 1e-05, %v1728_v42  ;;  %v1729_v10 = vmul.f32 0.0078125, %v1723_v18 }
 0x7ed   :  { %v1725_v12 = vpop.xlane.xlu1 %1724 }
 0x7ee   :  { %7555 = vrsqrt.f32 %v1732_v6  ;;  %v1733_v9 = vadd.f32 1e-05, %v1729_v10  ;;  %v1730_v13 = vmul.f32 0.0078125, %v1725_v12 }
 0x7f0   :  { %7557 = vrsqrt.f32 %v1733_v9  ;;  %v1734_v57 = vadd.f32 1e-05, %v1730_v13 }
 0x7f1   :  { %v1727_v31 = vpop.xlane.xlu0 %1726 }
 0x7f2   :  { %7559 = vrsqrt.f32 %v1734_v57  ;;  %v1731_v14 = vmul.f32 0.0078125, %v1727_v31 }
 0x7f4   :  { %v1735_v25 = vadd.f32 1e-05, %v1731_v14 }
 0x7f6   :  { %7561 = vrsqrt.f32 %v1735_v25 }
 0x7f8   :  { %v7556_v51 = vpop.eup %7555 }
 0x7f9   :  { %v1740_v44 = vmul.f32 %v7556_v51, %v8667_v47 }
 0x7fa   :  { %v7558_v2 = vpop.eup %7557 }
 0x7fb   :  { %v1741_v21 = vmul.f32 %v7558_v2, %v8671_v7  ;;  %v1748_v22 = vmul.f32 %v8697_v48, %v1740_v44 }
 0x7fc   :  { %v7560_v30 = vpop.eup %7559 }
 0x7fd   :  { %v1749_v49 = vmul.f32 %v8697_v48, %v1741_v21  ;;  %v1742_v33 = vmul.f32 %v7560_v30, %v8675_v37  ;;  %v8714_v47 = vadd.f32 %v8709_v61, %v1748_v22 }
 0x7ff   :  { %v8717_v1 = vadd.f32 %v8709_v61, %v1749_v49  ;;  %v1750_v8 = vmul.f32 %v8697_v48, %v1742_v33 }
 0x800   :  { %v7562_v36 = vpop.eup %7561 }
 0x801   :  { %v1760_v7 = vpack.c.bf16 %v8717_v1, %v8714_v47  ;;  %v1743_v39 = vmul.f32 %v7562_v36, %v8679_v26  ;;  %v8725_v43 = vadd.f32 %v8709_v61, %v1750_v8  ;;  %v1764_v26 = vsub.s32 4, %v8328_v29 }
 0x803   :  { %6929 = vmatprep.mubr.bf16.mxu0 %v1760_v7  ;;  %v1751_v11 = vmul.f32 %v8697_v48, %v1743_v39  ;;  %v8736_v28 = vrot.slane %v8705_v24, %v1764_v26  ;;  %v8741_v59 = vrot.slane %v7799_v20, %v1764_v26  ;;  %v8754_v55 = vrot.slane %v7797_v19, %v1764_v26 }
 0x805   :  { %v8728_v37 = vadd.f32 %v8709_v61, %v1751_v11  ;;  %v1986_v5 = vadd.f32 %v1985_v46, %v8736_v28  ;;  %v1988_v15 = vadd.f32 %v1987_v50, %v8741_v59  ;;  %v1990_v52 = vadd.f32 %v1989_v60, %v8736_v28 }
 0x806   :  { %v1992_v53 = vadd.f32 %v1991_v34, %v8741_v59 }
 0x807   :  { %v1761_v56 = vpack.c.bf16 %v8728_v37, %v8725_v43  ;;  %v8747_v45 = vpack.c.bf16 %v1990_v52, %v1986_v5 }
 0x808   :  { %v8749_v41 = vpack.c.bf16 %v1992_v53, %v1988_v15 }
 0x809   :  { %6930 = vmatmul.mubr.bf16.vlgmr.msra.gmra.mrb[40].mxu0 %v1761_v56  ;;  %v2018_v3 = vsel %vm587_vm1, %v8747_v45, 0 }
 0x80a   :  { %6935 = vmatprep.mubr.msk.bf16.mxu0 %vm8127_vm0, %v8126_v27  ;;  %6934 = vmatpush3.bf16.xpose.msra.mxu0 %v2018_v3 }
 0x80b   :  { %6939 = vmatprep.subr.bf16.mxu0 %v8126_v27 }
 0x8dc   :  { %v6931_v4 = vpop.f32.mrb[40].mxu0 }
 0x8dd   :  { %v1857_v23 = vadd.f32 %v6931_v4, %v8754_v55  ;;  %v1848_v63 = vpop.f32.mrb[41].mxu0 }
 0x8de   :  { %v1849_v16 = vadd.f32 %v1848_v63, %v8754_v55  ;;  %v6932_v42 = vpop.f32.mrb[42].mxu0 }
 0x8df   :  { %v1860_v18 = vadd.f32 %v6932_v42, %v8754_v55  ;;  %v1851_v6 = vpop.f32.mrb[43].mxu0  ;;  %v2006_v12 = vmul.f32 0.17677669, %v1857_v23 }
 0x8e0   :  { %v1852_v10 = vadd.f32 %v1851_v6, %v8754_v55  ;;  %v2004_v13 = vmul.f32 0.17677669, %v1849_v16 }
 0x8e1   :  { %v2007_v9 = vmul.f32 0.17677669, %v1860_v18 }
 0x8e2   :  { %v2005_v57 = vmul.f32 0.17677669, %v1852_v10 }
 0x8e3   :  { %v8760_v31 = vpack.c.bf16 %v2007_v9, %v2006_v12 }
 0x8e4   :  { %v8762_v14 = vpack.c.bf16 %v2005_v57, %v2004_v13  ;;  %v1995_v13 = vpop.f32.mrb[44].mxu1 }
 0x8e5   :  { %v1996_v57 = vadd.f32 %v1995_v13, %v8736_v28 }
 0x8e6   :  { %6936 = vmatmul.mubr.msk.bf16.vlgmr.msra.gmra.mrb[44].mxu0 %vm587_vm1, %v8762_v14 }
 0x8e7   :  { %6940 = vmatpush3.bf16.msra.mxu0 %v8749_v41  ;;  %6941 = vmatprep.mubr.msk.bf16.mxu0 %vm8127_vm0, %v8126_v27 }
 0x8e8   :  { %6945 = vmatprep.subr.bf16.mxu0 %v8126_v27 }
 0x9b9   :  { %v2054_v25 = vpop.f32.mrb[44].mxu0 }
 0x9ba   :  { %v6937_v19 = vpop.f32.mrb[45].mxu0  ;;  %v2061_v51 = vsel %vm635_vm4, %v2054_v25, -inf }
 0x9bb   :  { %2062 = vmax.xlane.f32.xlu1 %v2061_v51  ;;  %v2057_v44 = vpop.f32.mrb[46].mxu0 }
 0x9bc   :  { %v6938_v2 = vpop.f32.mrb[47].mxu0  ;;  %v2064_v21 = vsel %vm635_vm4, %v2057_v44, -inf }
 0x9bd   :  { %2065 = vmax.xlane.f32.xlu0 %v2064_v21 }
 0xa48   :  { %v2063_v22 = vpop.xlane.xlu1 %2062 }
 0xa49   :  { %v2067_v30 = vsub.f32 %v2054_v25, %v2063_v22  ;;  %v1997_v25 = vpop.f32.mrb[45].mxu1 }
 0xa4a   :  { %v2066_v49 = vpop.xlane.xlu0 %2065  ;;  %v1998_v19 = vadd.f32 %v1997_v25, %v8741_v59  ;;  %v1999_v51 = vpop.f32.mrb[46].mxu1 }
 0xa4b   :  { %v2069_v33 = vmul.f32 1.442695, %v2067_v30  ;;  %v2068_v36 = vsub.f32 %v2057_v44, %v2066_v49  ;;  %v2000_v44 = vadd.f32 %v1999_v51, %v8736_v28  ;;  %v2001_v2 = vpop.f32.mrb[47].mxu1 }
 0xa4c   :  { %v2002_v21 = vadd.f32 %v2001_v2, %v8741_v59 }
 0xa4d   :  { %7563 = vpow2.f32 %v2069_v33  ;;  %v2071_v7 = vmul.f32 1.442695, %v2068_v36  ;;  %v2011_v22 = vpack.c.bf16 %v2000_v44, %v1996_v57 }
 0xa4e   :  { %v8795_v30 = vpack.c.bf16 %v2002_v21, %v1998_v19 }
 0xa4f   :  { %7565 = vpow2.f32 %v2071_v7 }
 0xa57   :  { %v7564_v39 = vpop.eup %7563 }
 0xa58   :  { %v2073_v8 = vsel %vm635_vm4, %v7564_v39, 0.0 }
 0xa59   :  { %v7566_v11 = vpop.eup %7565  ;;  %2074 = vadd.xlane.f32.xlu1 %v2073_v8 }
 0xa5a   :  { %v2076_v56 = vsel %vm635_vm4, %v7566_v11, 0.0 }
 0xa5b   :  { %2077 = vadd.xlane.f32.xlu0 %v2076_v56 }
 0xa6a   :  { %2134 = vrot.lane.b32.xlu1 %v8747_v45, %s8128_s21 }
 0xa71   :  { %2131 = vrot.lane.b32.xlu0 %v8762_v14, %s8128_s21 }
 0xae6   :  { %v2075_v26 = vpop.xlane.xlu1 %2074 }
 0xae7   :  { %7567 = vrcp.f32 %v2075_v26 }
 0xae8   :  { %v2078_v20 = vpop.xlane.xlu0 %2077 }
 0xae9   :  { %7569 = vrcp.f32 %v2078_v20 }
 0xaea   :  { %v2135_v60 = vpop.permute.xlu1 %2134 }
 0xaeb   :  { %v2140_v34 = vsel %vm587_vm1, %v2135_v60, 0 }
 0xaec   :  { %v2132_v53 = vpop.permute.xlu0 %2131 }
 0xaf1   :  { %v7568_v46 = vpop.eup %7567 }
 0xaf2   :  { %v2081_v50 = vmul.f32 %v7568_v46, %v7564_v39 }
 0xaf3   :  { %v7570_v5 = vpop.eup %7569 }
 0xaf4   :  { %v2082_v15 = vmul.f32 %v7570_v5, %v7566_v11 }
 0xaf6   :  { %v2083_v52 = vpack.c.bf16 %v2082_v15, %v2081_v50 }
 0xaf8   :  { %6942 = vmatmul.mubr.msk.bf16.vlgmr.msra.gmra.mrb[48].mxu0 %vm635_vm4, %v2083_v52 }
 0xaf9   :  { %6946 = vmatpush3.bf16.xpose.msra.mxu0 %v2140_v34  ;;  %6947 = vmatprep.mubr.msk.bf16.mxu0 %vm8127_vm0, %v8126_v27 }
 0xafa   :  { %6951 = vmatprep.subr.bf16.mxu0 %v8126_v27 }
 0xb00   :  { %6948 = vmatmul.mubr.msk.bf16.vlgmr.msra.gmra.mrb[52].mxu0 %vm587_vm1, %v2132_v53 }
 0xb01   :  { %6953 = vmatprep.mubr.msk.bf16.mxu0 %vm8127_vm0, %v8126_v27 }
 0xbcb   :  { %v2121_v3 = vpop.f32.mrb[48].mxu0 }
 0xbcc   :  { %v6943_v4 = vpop.f32.mrb[49].mxu0 }
 0xbcd   :  { %v2124_v23 = vpop.f32.mrb[50].mxu0 }
 0xbce   :  { %v2128_v63 = vpack.c.bf16 %v2124_v23, %v2121_v3  ;;  %v6944_v16 = vpop.f32.mrb[51].mxu0 }
 0xbcf   :  { %v2518_v16 = vsel %vm587_vm1, %v2011_v22, 0 }
 0xbd0   :  { %2129 = vst.msk [vmem:[#allocation2] sm:$0xff] %vm587_vm1, %v2128_v63 }
 0xbd3   :  { %v2176_v42 = vpop.f32.mrb[52].mxu0 }
 0xbd4   :  { %v6949_v18 = vpop.f32.mrb[53].mxu0  ;;  %v2183_v6 = vsel %vm635_vm4, %v2176_v42, -inf }
 0xbd5   :  { %2184 = vmax.xlane.f32.xlu1 %v2183_v6  ;;  %v2179_v10 = vpop.f32.mrb[54].mxu0 }
 0xbd6   :  { %v6950_v12 = vpop.f32.mrb[55].mxu0  ;;  %v2186_v9 = vsel %vm635_vm4, %v2179_v10, -inf }
 0xbd7   :  { %2187 = vmax.xlane.f32.xlu0 %v2186_v9 }
 0xbe6   :  { %2207 = vrot.lane.b32.xlu1 %v8749_v41, %s8128_s21 }
 0xc62   :  { %v2185_v49 = vpop.xlane.xlu1 %2184 }
 0xc63   :  { %v2189_v33 = vsub.f32 %v2176_v42, %v2185_v49 }
 0xc64   :  { %v2188_v36 = vpop.xlane.xlu0 %2187 }
 0xc65   :  { %v2191_v7 = vmul.f32 1.442695, %v2189_v33  ;;  %v2190_v39 = vsub.f32 %v2179_v10, %v2188_v36 }
 0xc66   :  { %v2208_v8 = vpop.permute.xlu1 %2207 }
 0xc67   :  { %7571 = vpow2.f32 %v2191_v7  ;;  %v2193_v11 = vmul.f32 1.442695, %v2190_v39  ;;  %6952 = vmatpush3.bf16.msra.mxu0 %v2208_v8 }
 0xc68   :  { %6957 = vmatprep.subr.bf16.mxu0 %v8126_v27 }
 0xc69   :  { %7573 = vpow2.f32 %v2193_v11 }
 0xc71   :  { %v7572_v56 = vpop.eup %7571 }
 0xc72   :  { %v2195_v26 = vsel %vm635_vm4, %v7572_v56, 0.0 }
 0xc73   :  { %v7574_v20 = vpop.eup %7573  ;;  %2196 = vadd.xlane.f32.xlu1 %v2195_v26 }
 0xc74   :  { %v2198_v46 = vsel %vm635_vm4, %v7574_v20, 0.0 }
 0xc75   :  { %2199 = vadd.xlane.f32.xlu0 %v2198_v46 }
 0xc84   :  { %2260 = vrot.lane.b32.xlu1 %v8762_v14, %s8119_s5 }
 0xc88   :  { %2389 = vrot.lane.b32.xlu1 %v8747_v45, %s8129_s23 }
 0xc8b   :  { %2262 = vrot.lane.b32.xlu0 %v8747_v45, %s8119_s5 }
 0xc8c   :  { %2634 = vrot.lane.b32.xlu1 %v2011_v22, %s8128_s21 }
 0xc8f   :  { %2387 = vrot.lane.b32.xlu0 %v8762_v14, %s8129_s23 }
 0xc90   :  { %2762 = vrot.lane.b32.xlu1 %v2011_v22, %s8119_s5 }
 0xc93   :  { %2631 = vrot.lane.b32.xlu0 %v8760_v31, %s8128_s21 }
 0xc94   :  { %2889 = vrot.lane.b32.xlu1 %v2011_v22, %s8129_s23 }
 0xc97   :  { %2760 = vrot.lane.b32.xlu0 %v8760_v31, %s8119_s5 }
 0xc9b   :  { %2887 = vrot.lane.b32.xlu0 %v8760_v31, %s8129_s23 }
 0xd00   :  { %v2197_v5 = vpop.xlane.xlu1 %2196 }
 0xd01   :  { %7575 = vrcp.f32 %v2197_v5 }
 0xd02   :  { %v2200_v45 = vpop.xlane.xlu0 %2199 }
 0xd03   :  { %7577 = vrcp.f32 %v2200_v45 }
 0xd04   :  { %v2261_v53 = vpop.permute.xlu1 %2260 }
 0xd06   :  { %v2263_v52 = vpop.permute.xlu0 %2262 }
 0xd07   :  { %v2268_v3 = vsel %vm587_vm1, %v2263_v52, 0 }
 0xd08   :  { %v2390_v4 = vpop.permute.xlu1 %2389 }
 0xd09   :  { %v2395_v23 = vsel %vm587_vm1, %v2390_v4, 0 }
 0xd0a   :  { %v2388_v63 = vpop.permute.xlu0 %2387 }
 0xd0b   :  { %v7576_v50 = vpop.eup %7575 }
 0xd0c   :  { %v2203_v14 = vmul.f32 %v7576_v50, %v7572_v56  ;;  %v2635_v42 = vpop.permute.xlu1 %2634 }
 0xd0d   :  { %v7578_v15 = vpop.eup %7577  ;;  %v2640_v18 = vsel %vm587_vm1, %v2635_v42, 0 }
 0xd0e   :  { %v2204_v60 = vmul.f32 %v7578_v15, %v7574_v20  ;;  %v2632_v6 = vpop.permute.xlu0 %2631 }
 0xd10   :  { %v2205_v34 = vpack.c.bf16 %v2204_v60, %v2203_v14  ;;  %v2763_v10 = vpop.permute.xlu1 %2762 }
 0xd11   :  { %v2768_v12 = vsel %vm587_vm1, %v2763_v10, 0 }
 0xd12   :  { %6954 = vmatmul.mubr.msk.bf16.vlgmr.msra.gmra.mrb[56].mxu0 %vm635_vm4, %v2205_v34 }
 0xd13   :  { %6958 = vmatpush3.bf16.xpose.msra.mxu0 %v2268_v3  ;;  %6959 = vmatprep.mubr.msk.bf16.mxu0 %vm8127_vm0, %v8126_v27 }
 0xd14   :  { %6969 = vmatprep.subr.bf16.mxu0 %v8126_v27  ;;  %v2890_v9 = vpop.permute.xlu1 %2889 }
 0xd15   :  { %v2895_v13 = vsel %vm587_vm1, %v2890_v9, 0 }
 0xd1a   :  { %6960 = vmatmul.mubr.msk.bf16.vlgmr.msra.gmra.mrb[60].mxu0 %vm587_vm1, %v2261_v53 }
 0xd1b   :  { %6970 = vmatpush3.bf16.xpose.msra.mxu0 %v2395_v23  ;;  %6971 = vmatprep.mubr.msk.bf16.mxu0 %vm8127_vm0, %v8126_v27 }
 0xd1c   :  { %6981 = vmatprep.subr.bf16.mxu0 %v8126_v27 }
 0xd22   :  { %6972 = vmatmul.mubr.msk.bf16.vlgmr.msra.gmra.mrb[64].mxu0 %vm587_vm1, %v2388_v63 }
 0xd23   :  { %6982 = vmatpush3.bf16.xpose.msra.mxu0 %v2518_v16  ;;  %6983 = vmatprep.mubr.msk.bf16.mxu0 %vm8127_vm0, %v8126_v27 }
 0xd24   :  { %6993 = vmatprep.subr.bf16.mxu0 %v8126_v27 }
 0xd2a   :  { %6984 = vmatmul.mubr.msk.bf16.vlgmr.msra.gmra.mrb[68].mxu0 %vm587_vm1, %v8760_v31  ;;  %v2761_v31 = vpop.permute.xlu0 %2760 }
 0xd2b   :  { %6994 = vmatpush3.bf16.xpose.msra.mxu0 %v2640_v18  ;;  %6995 = vmatprep.mubr.msk.bf16.mxu0 %vm8127_vm0, %v8126_v27 }
 0xd2c   :  { %7005 = vmatprep.subr.bf16.mxu0 %v8126_v27 }
 0xd2e   :  { %v2888_v57 = vpop.permute.xlu0 %2887 }
 0xd32   :  { %6996 = vmatmul.mubr.msk.bf16.vlgmr.msra.gmra.mrb[72].mxu0 %vm587_vm1, %v2632_v6 }
 0xd33   :  { %7006 = vmatpush3.bf16.xpose.msra.mxu0 %v2768_v12  ;;  %7007 = vmatprep.mubr.msk.bf16.mxu0 %vm8127_vm0, %v8126_v27 }
 0xd34   :  { %7017 = vmatprep.subr.bf16.mxu0 %v8126_v27 }
 0xd3a   :  { %7008 = vmatmul.mubr.msk.bf16.vlgmr.msra.gmra.mrb[76].mxu0 %vm587_vm1, %v2761_v31 }
 0xd3b   :  { %7018 = vmatpush3.bf16.xpose.msra.mxu0 %v2895_v13  ;;  %7019 = vmatprep.mubr.msk.bf16.mxu0 %vm8127_vm0, %v8126_v27 }
 0xd42   :  { %7020 = vmatmul.mubr.msk.bf16.vlgmr.msra.gmra.mrb[80].mxu0 %vm587_vm1, %v2888_v57 }
 0xde5   :  { %v8848_v25 = vpop.f32.mrb[56].mxu0 }
 0xde6   :  { %v6955_v19 = vpop.f32.mrb[57].mxu0 }
 0xde7   :  { %v8850_v51 = vpop.f32.mrb[58].mxu0 }
 0xde8   :  { %v2254_v44 = vpack.c.bf16 %v8850_v51, %v8848_v25  ;;  %v6956_v2 = vpop.f32.mrb[59].mxu0 }
 0xded   :  { %v2304_v21 = vpop.f32.mrb[60].mxu0 }
 0xdee   :  { %v6961_v22 = vpop.f32.mrb[61].mxu0  ;;  %v2311_v49 = vsel %vm635_vm4, %v2304_v21, -inf }
 0xdef   :  { %2312 = vmax.xlane.f32.xlu1 %v2311_v49  ;;  %v2307_v33 = vpop.f32.mrb[62].mxu0 }
 0xdf0   :  { %v6962_v36 = vpop.f32.mrb[63].mxu0  ;;  %v2314_v7 = vsel %vm635_vm4, %v2307_v33, -inf }
 0xdf1   :  { %2315 = vmax.xlane.f32.xlu0 %v2314_v7 }
 0xdf5   :  { %v2431_v39 = vpop.f32.mrb[64].mxu0 }
 0xdf6   :  { %v6973_v8 = vpop.f32.mrb[65].mxu0  ;;  %v2438_v11 = vsel %vm635_vm4, %v2431_v39, -inf }
 0xdf7   :  { %2439 = vmax.xlane.f32.xlu0 %v2438_v11  ;;  %v2434_v56 = vpop.f32.mrb[66].mxu0 }
 0xdf8   :  { %v6974_v26 = vpop.f32.mrb[67].mxu0  ;;  %v2441_v20 = vsel %vm635_vm4, %v2434_v56, -inf }
 0xdf9   :  { %2442 = vmax.xlane.f32.xlu1 %v2441_v20 }
 0xdfd   :  { %v2554_v46 = vpop.f32.mrb[68].mxu0 }
 0xdfe   :  { %v6985_v5 = vpop.f32.mrb[69].mxu0  ;;  %v2561_v45 = vsel %vm635_vm4, %v2554_v46, -inf }
 0xdff   :  { %2562 = vmax.xlane.f32.xlu0 %v2561_v45  ;;  %v2557_v50 = vpop.f32.mrb[70].mxu0 }
 0xe00   :  { %v6986_v15 = vpop.f32.mrb[71].mxu0  ;;  %v2564_v14 = vsel %vm635_vm4, %v2557_v50, -inf }
 0xe01   :  { %2565 = vmax.xlane.f32.xlu1 %v2564_v14 }
 0xe05   :  { %v8860_v60 = vpop.f32.mrb[72].mxu0 }
 0xe06   :  { %v6997_v52 = vpop.f32.mrb[73].mxu0  ;;  %v2683_v34 = vsel %vm635_vm4, %v8860_v60, -inf }
 0xe07   :  { %2684 = vmax.xlane.f32.xlu0 %v2683_v34  ;;  %v8864_v53 = vpop.f32.mrb[74].mxu0 }
 0xe08   :  { %v6998_v3 = vpop.f32.mrb[75].mxu0  ;;  %v2686_v4 = vsel %vm635_vm4, %v8864_v53, -inf }
 0xe09   :  { %2687 = vmax.xlane.f32.xlu1 %v2686_v4 }
 0xe0d   :  { %v8868_v23 = vpop.f32.mrb[76].mxu0 }
 0xe0e   :  { %v7009_v63 = vpop.f32.mrb[77].mxu0  ;;  %v2811_v16 = vsel %vm635_vm4, %v8868_v23, -inf }
 0xe0f   :  { %2812 = vmax.xlane.f32.xlu0 %v2811_v16  ;;  %v8872_v42 = vpop.f32.mrb[78].mxu0 }
 0xe10   :  { %v7010_v18 = vpop.f32.mrb[79].mxu0  ;;  %v2814_v6 = vsel %vm635_vm4, %v8872_v42, -inf }
 0xe11   :  { %2815 = vmax.xlane.f32.xlu1 %v2814_v6 }
 0xe15   :  { %v8876_v10 = vpop.f32.mrb[80].mxu0 }
 0xe16   :  { %v7021_v12 = vpop.f32.mrb[81].mxu0  ;;  %v2938_v9 = vsel %vm635_vm4, %v8876_v10, -inf }
 0xe17   :  { %2939 = vmax.xlane.f32.xlu0 %v2938_v9  ;;  %v8880_v31 = vpop.f32.mrb[82].mxu0 }
 0xe18   :  { %v7022_v13 = vpop.f32.mrb[83].mxu0  ;;  %v2941_v57 = vsel %vm635_vm4, %v8880_v31, -inf }
 0xe19   :  { %2942 = vmax.xlane.f32.xlu1 %v2941_v57 }
 0xe2a   :  { %2461 = vrot.lane.b32.xlu1 %v8749_v41, %s8129_s23 }
 0xe2d   :  { %2334 = vrot.lane.b32.xlu0 %v8749_v41, %s8119_s5 }
 0xe7c   :  { %v2313_v19 = vpop.xlane.xlu1 %2312 }
 0xe7d   :  { %v2317_v2 = vsub.f32 %v2304_v21, %v2313_v19 }
 0xe7e   :  { %v2316_v22 = vpop.xlane.xlu0 %2315 }
 0xe7f   :  { %v2319_v49 = vmul.f32 1.442695, %v2317_v2  ;;  %v2318_v36 = vsub.f32 %v2307_v33, %v2316_v22 }
 0xe81   :  { %7579 = vpow2.f32 %v2319_v49  ;;  %v2321_v7 = vmul.f32 1.442695, %v2318_v36 }
 0xe83   :  { %7581 = vpow2.f32 %v2321_v7 }
 0xe84   :  { %v2440_v8 = vpop.xlane.xlu0 %2439 }
 0xe85   :  { %v2444_v11 = vsub.f32 %v2431_v39, %v2440_v8 }
 0xe86   :  { %v2443_v26 = vpop.xlane.xlu1 %2442 }
 0xe87   :  { %v2446_v20 = vmul.f32 1.442695, %v2444_v11  ;;  %v2445_v5 = vsub.f32 %v2434_v56, %v2443_v26 }
 0xe89   :  { %7583 = vpow2.f32 %v2446_v20  ;;  %v2448_v45 = vmul.f32 1.442695, %v2445_v5 }
 0xe8b   :  { %v8888_v15 = vpop.eup %7579  ;;  %7585 = vpow2.f32 %v2448_v45 }
 0xe8c   :  { %v2563_v14 = vpop.xlane.xlu0 %2562  ;;  %v2323_v41 = vsel %vm635_vm4, %v8888_v15, 0.0 }
 0xe8d   :  { %v8892_v21 = vpop.eup %7581  ;;  %v2567_v33 = vsub.f32 %v2554_v46, %v2563_v14  ;;  %2324 = vadd.xlane.f32.xlu0 %v2323_v41 }
 0xe8e   :  { %v2566_v52 = vpop.xlane.xlu1 %2565  ;;  %v2326_v39 = vsel %vm635_vm4, %v8892_v21, 0.0 }
 0xe8f   :  { %v2569_v34 = vmul.f32 1.442695, %v2567_v33  ;;  %v2568_v3 = vsub.f32 %v2557_v50, %v2566_v52  ;;  %2327 = vadd.xlane.f32.xlu1 %v2326_v39 }
 0xe91   :  { %7587 = vpow2.f32 %v2569_v34  ;;  %v2571_v56 = vmul.f32 1.442695, %v2568_v3 }
 0xe93   :  { %v8896_v4 = vpop.eup %7583  ;;  %7589 = vpow2.f32 %v2571_v56 }
 0xe94   :  { %v2685_v63 = vpop.xlane.xlu0 %2684  ;;  %v2450_v16 = vsel %vm635_vm4, %v8896_v4, 0.0 }
 0xe95   :  { %v8900_v18 = vpop.eup %7585  ;;  %v2689_v46 = vsub.f32 %v8860_v60, %v2685_v63  ;;  %2451 = vadd.xlane.f32.xlu0 %v2450_v16 }
 0xe96   :  { %v2688_v6 = vpop.xlane.xlu1 %2687  ;;  %v2453_v12 = vsel %vm635_vm4, %v8900_v18, 0.0 }
 0xe97   :  { %v2691_v50 = vmul.f32 1.442695, %v2689_v46  ;;  %v2690_v9 = vsub.f32 %v8864_v53, %v2688_v6  ;;  %2454 = vadd.xlane.f32.xlu1 %v2453_v12 }
 0xe99   :  { %7591 = vpow2.f32 %v2691_v50  ;;  %v2693_v13 = vmul.f32 1.442695, %v2690_v9 }
 0xe9b   :  { %v8906_v57 = vpop.eup %7587  ;;  %7593 = vpow2.f32 %v2693_v13 }
 0xe9c   :  { %v2813_v19 = vpop.xlane.xlu0 %2812  ;;  %v2573_v2 = vsel %vm635_vm4, %v8906_v57, 0.0 }
 0xe9d   :  { %v8910_v22 = vpop.eup %7589  ;;  %v2817_v60 = vsub.f32 %v8868_v23, %v2813_v19  ;;  %2574 = vadd.xlane.f32.xlu0 %v2573_v2 }
 0xe9e   :  { %v2816_v49 = vpop.xlane.xlu1 %2815  ;;  %v2576_v36 = vsel %vm635_vm4, %v8910_v22, 0.0 }
 0xe9f   :  { %v2819_v53 = vmul.f32 1.442695, %v2817_v60  ;;  %v2818_v7 = vsub.f32 %v8872_v42, %v2816_v49  ;;  %2577 = vadd.xlane.f32.xlu1 %v2576_v36 }
 0xea1   :  { %7595 = vpow2.f32 %v2819_v53  ;;  %v2821_v8 = vmul.f32 1.442695, %v2818_v7 }
 0xea3   :  { %v8916_v11 = vpop.eup %7591  ;;  %7597 = vpow2.f32 %v2821_v8 }
 0xea4   :  { %v2940_v26 = vpop.xlane.xlu0 %2939  ;;  %v2695_v20 = vsel %vm635_vm4, %v8916_v11, 0.0 }
 0xea5   :  { %v8920_v5 = vpop.eup %7593  ;;  %2696 = vadd.xlane.f32.xlu0 %v2695_v20  ;;  %v2944_v56 = vsub.f32 %v8876_v10, %v2940_v26 }
 0xea6   :  { %v2943_v23 = vpop.xlane.xlu1 %2942  ;;  %v2698_v45 = vsel %vm635_vm4, %v8920_v5, 0.0 }
 0xea7   :  { %v2945_v14 = vsub.f32 %v8880_v31, %v2943_v23  ;;  %2699 = vadd.xlane.f32.xlu1 %v2698_v45  ;;  %v2946_v63 = vmul.f32 1.442695, %v2944_v56 }
 0xea8   :  { %v2335_v42 = vpop.permute.xlu0 %2334 }
 0xea9   :  { %v2948_v41 = vmul.f32 1.442695, %v2945_v14  ;;  %6964 = vmatpush3.bf16.msra.mxu1 %v2335_v42 }
 0xeaa   :  { %6975 = vmatprep.subr.bf16.mxu1 %v8126_v27  ;;  %v2462_v10 = vpop.permute.xlu1 %2461 }
 0xeab   :  { %v8926_v33 = vpop.eup %7595  ;;  %7599 = vpow2.f32 %v2948_v41 }
 0xeac   :  { %v2823_v52 = vsel %vm635_vm4, %v8926_v33, 0.0  ;;  %7601 = vpow2.f32 %v2946_v63 }
 0xead   :  { %v8930_v39 = vpop.eup %7597  ;;  %2824 = vadd.xlane.f32.xlu1 %v2823_v52 }
 0xeae   :  { %v2826_v34 = vsel %vm635_vm4, %v8930_v39, 0.0 }
 0xeb1   :  { %2827 = vadd.xlane.f32.xlu1 %v2826_v34 }
 0xeb5   :  { %v8934_v31 = vpop.eup %7599 }
 0xeb6   :  { %v2953_v3 = vsel %vm635_vm4, %v8934_v31, 0.0  ;;  %v8943_v16 = vpop.eup %7601 }
 0xeb7   :  { %2954 = vadd.xlane.f32.xlu1 %v2953_v3  ;;  %v2950_v46 = vsel %vm635_vm4, %v8943_v16, 0.0 }
 0xebb   :  { %2707 = vrot.lane.b32.xlu0 %v8795_v30, %s8128_s21 }
 0xec8   :  { %2834 = vrot.lane.b32.xlu1 %v8795_v30, %s8119_s5 }
 0xeda   :  { %2951 = vadd.xlane.f32.xlu0 %v2950_v46 }
 0xef0   :  { %2961 = vrot.lane.b32.xlu0 %v8795_v30, %s8129_s23 }
 0xef4   :  { %2256 = vrot.lane.b32.xlu0 %v2254_v44, %s8129_s23 }
 0xf1a   :  { %v2325_v6 = vpop.xlane.xlu0 %2324 }
 0xf1b   :  { %7603 = vrcp.f32 %v2325_v6 }
 0xf1c   :  { %v2328_v12 = vpop.xlane.xlu1 %2327 }
 0xf1d   :  { %7605 = vrcp.f32 %v2328_v12 }
 0xf22   :  { %v2452_v50 = vpop.xlane.xlu0 %2451 }
 0xf23   :  { %7607 = vrcp.f32 %v2452_v50 }
 0xf24   :  { %v2455_v9 = vpop.xlane.xlu1 %2454 }
 0xf25   :  { %v7604_v13 = vpop.eup %7603  ;;  %7609 = vrcp.f32 %v2455_v9 }
 0xf26   :  { %v2331_v2 = vmul.f32 %v7604_v13, %v8888_v15 }
 0xf27   :  { %v7606_v19 = vpop.eup %7605 }
 0xf28   :  { %v2332_v60 = vmul.f32 %v7606_v19, %v8892_v21 }
 0xf2a   :  { %v2333_v49 = vpack.c.bf16 %v2332_v60, %v2331_v2  ;;  %v2575_v36 = vpop.xlane.xlu0 %2574 }
 0xf2b   :  { %7611 = vrcp.f32 %v2575_v36 }
 0xf2c   :  { %6966 = vmatmul.mubr.msk.bf16.vlgmr.msra.gmra.mrb[48].mxu1 %vm635_vm4, %v2333_v49  ;;  %v2578_v25 = vpop.xlane.xlu1 %2577 }
 0xf2d   :  { %v7608_v51 = vpop.eup %7607  ;;  %6976 = vmatpush3.bf16.msra.mxu1 %v2462_v10  ;;  %7613 = vrcp.f32 %v2578_v25  ;;  %6977 = vmatprep.mubr.msk.bf16.mxu1 %vm8127_vm0, %v8126_v27 }
 0xf2e   :  { %6987 = vmatprep.subr.bf16.mxu1 %v8126_v27  ;;  %v2458_v53 = vmul.f32 %v7608_v51, %v8896_v4 }
 0xf2f   :  { %v7610_v44 = vpop.eup %7609 }
 0xf30   :  { %v2459_v15 = vmul.f32 %v7610_v44, %v8900_v18 }
 0xf32   :  { %v2697_v21 = vpop.xlane.xlu0 %2696  ;;  %v2460_v7 = vpack.c.bf16 %v2459_v15, %v2458_v53 }
 0xf33   :  { %7615 = vrcp.f32 %v2697_v21 }
 0xf34   :  { %6978 = vmatmul.mubr.msk.bf16.vlgmr.msra.gmra.mrb[52].mxu1 %vm635_vm4, %v2460_v7  ;;  %v2700_v8 = vpop.xlane.xlu1 %2699 }
 0xf35   :  { %v7612_v26 = vpop.eup %7611  ;;  %6988 = vmatpush3.bf16.msra.mxu1 %v8795_v30  ;;  %7617 = vrcp.f32 %v2700_v8  ;;  %6989 = vmatprep.mubr.msk.bf16.mxu1 %vm8127_vm0, %v8126_v27 }
 0xf36   :  { %6999 = vmatprep.subr.bf16.mxu1 %v8126_v27  ;;  %v2581_v4 = vmul.f32 %v7612_v26, %v8906_v57  ;;  %v2708_v14 = vpop.permute.xlu0 %2707 }
 0xf37   :  { %v7614_v20 = vpop.eup %7613 }
 0xf38   :  { %v2582_v18 = vmul.f32 %v7614_v20, %v8910_v22 }
 0xf3a   :  { %v2825_v23 = vpop.xlane.xlu1 %2824  ;;  %v2583_v45 = vpack.c.bf16 %v2582_v18, %v2581_v4  ;;  %v7417_v18 = vld [vmem:[#allocation11] sm:$0xff]  }
 0xf3b   :  { %7619 = vrcp.f32 %v2825_v23  ;;  %v7418_v23 = vld [vmem:[#allocation11 + $0x8] sm:$0xff]   ;;  %7029 = vmatprep.subr.bf16.mxu0 %v7417_v18 }
 0xf3c   :  { %6990 = vmatmul.mubr.msk.bf16.vlgmr.msra.gmra.mrb[56].mxu1 %vm635_vm4, %v2583_v45  ;;  %7030 = vmatpush3.bf16.msra.mxu0 %v7417_v18 }
 0xf3d   :  { %v7616_v42 = vpop.eup %7615  ;;  %7000 = vmatpush3.bf16.msra.mxu1 %v2708_v14  ;;  %7001 = vmatprep.mubr.msk.bf16.mxu1 %vm8127_vm0, %v8126_v27 }
 0xf3e   :  { %v2828_v30 = vpop.xlane.xlu1 %2827  ;;  %7011 = vmatprep.subr.bf16.mxu1 %v8126_v27  ;;  %v2703_v57 = vmul.f32 %v7616_v42, %v8916_v11  ;;  %7031 = vmatprep.subr.bf16.mxu0 %v7418_v23  ;;  %v7419_v42 = vld [vmem:[#allocation11 + $0x10] sm:$0xff]  }
 0xf3f   :  { %v7618_v41 = vpop.eup %7617  ;;  %7621 = vrcp.f32 %v2828_v30 }
 0xf40   :  { %v2704_v22 = vmul.f32 %v7618_v41, %v8920_v5  ;;  %7032 = vmatpush3.bf16.msra.mxu0 %v7418_v23  ;;  %v7420_v41 = vld [vmem:[#allocation11 + $0x18] sm:$0xff]  }
 0xf41   :  { %7033 = vmatprep.subr.bf16.mxu0 %v7419_v42 }
 0xf42   :  { %v2705_v52 = vpack.c.bf16 %v2704_v22, %v2703_v57 }
 0xf44   :  { %7002 = vmatmul.mubr.msk.bf16.vlgmr.msra.gmra.mrb[60].mxu1 %vm635_vm4, %v2705_v52  ;;  %v2955_v34 = vpop.xlane.xlu1 %2954  ;;  %7034 = vmatpush3.bf16.msra.mxu0 %v7419_v42 }
 0xf45   :  { %7013 = vmatprep.mubr.msk.bf16.mxu1 %vm8127_vm0, %v8126_v27  ;;  %v7620_v3 = vpop.eup %7619  ;;  %7623 = vrcp.f32 %v2955_v34  ;;  %7035 = vmatprep.subr.bf16.mxu0 %v7420_v41 }
 0xf46   :  { %v2831_v46 = vmul.f32 %v7620_v3, %v8926_v33  ;;  %v7421_v3 = vld [vmem:[#allocation11 + $0x20] sm:$0xff]  }
 0xf48   :  { %v2835_v56 = vpop.permute.xlu1 %2834  ;;  %7036 = vmatpush3.bf16.msra.mxu0 %v7420_v41 }
 0xf49   :  { %v7622_v63 = vpop.eup %7621  ;;  %7012 = vmatpush3.bf16.msra.mxu1 %v2835_v56  ;;  %7037 = vmatprep.subr.bf16.mxu0 %v7421_v3  ;;  %v7422_v56 = vld [vmem:[#allocation11 + $0x28] sm:$0xff]  }
 0xf4a   :  { %v2832_v10 = vmul.f32 %v7622_v63, %v8930_v39  ;;  %7023 = vmatprep.subr.bf16.mxu1 %v8126_v27  ;;  %v7423_v63 = vld [vmem:[#allocation11 + $0x30] sm:$0xff]  }
 0xf4c   :  { %v2833_v11 = vpack.c.bf16 %v2832_v10, %v2831_v46  ;;  %7038 = vmatpush3.bf16.msra.mxu0 %v7421_v3  ;;  %v7424_v46 = vld [vmem:[#allocation11 + $0x38] sm:$0xff]  }
 0xf4d   :  { %7039 = vmatprep.subr.bf16.mxu0 %v7422_v56  ;;  %v7436_v3 = vld [vmem:[#allocation12 + $0x34] ss:$8 sps:$4 sm:$0xff]  }
 0xf4e   :  { %7014 = vmatmul.mubr.msk.bf16.vlgmr.msra.gmra.mrb[64].mxu1 %vm635_vm4, %v2833_v11 }
 0xf4f   :  { %7025 = vmatprep.mubr.msk.bf16.mxu1 %vm8127_vm0, %v8126_v27  ;;  %v7624_v50 = vpop.eup %7623 }
 0xf50   :  { %v2959_v39 = vmul.f32 %v7624_v50, %v8934_v31  ;;  %7040 = vmatpush3.bf16.msra.mxu0 %v7422_v56  ;;  %v7434_v56 = vld [vmem:[#allocation12 + $0x30] ss:$8 sps:$4 sm:$0xff]  }
 0xf51   :  { %7041 = vmatprep.subr.bf16.mxu0 %v7423_v63 }
 0xf54   :  { %7042 = vmatpush3.bf16.msra.mxu0 %v7423_v63  ;;  %v7437_v63 = vld [vmem:[#allocation12 + $0x40] ss:$8 sps:$4 sm:$0xff]  }
 0xf55   :  { %7043 = vmatprep.subr.bf16.mxu0 %v7424_v46 }
 0xf58   :  { %7044 = vmatpush3.bf16.msra.mxu0 %v7424_v46  ;;  %v7439_v46 = vld [vmem:[#allocation12 + $0x44] ss:$8 sps:$4 sm:$0xff]  }
 0xf67   :  { %v2952_v5 = vpop.xlane.xlu0 %2951 }
 0xf68   :  { %7625 = vrcp.f32 %v2952_v5 }
 0xf6b   :  { %v2962_v6 = vpop.permute.xlu0 %2961 }
 0xf6c   :  { %7024 = vmatpush3.bf16.msra.mxu1 %v2962_v6 }
 0xf6f   :  { %v2257_v12 = vpop.permute.xlu0 %2256 }
 0xf70   :  { %2259 = vst.msk [vmem:[#allocation2] sm:$0xff] %vm834_vm5, %v2257_v12 }
 0xf72   :  { %v7626_v33 = vpop.eup %7625 }
 0xf73   :  { %v2958_v9 = vmul.f32 %v7626_v33, %v8943_v16 }
 0xf75   :  { %v2960_v13 = vpack.c.bf16 %v2959_v39, %v2958_v9 }
 0xf77   :  { %7026 = vmatmul.mubr.msk.bf16.vlgmr.msra.gmra.mrb[68].mxu1 %vm635_vm4, %v2960_v13 }
 0xf78   :  { %3303 = vmatprep.mubr.bf16.mxu1 %v8125_v0 }
 0xfff   :  { %v2374_v19 = vpop.f32.mrb[48].mxu1 }
0x1000   :  { %v6967_v2 = vpop.f32.mrb[49].mxu1 }
0x1001   :  { %v2377_v60 = vpop.f32.mrb[50].mxu1 }
0x1002   :  { %v2381_v49 = vpack.c.bf16 %v2377_v60, %v2374_v19  ;;  %v6968_v36 = vpop.f32.mrb[51].mxu1  ;;  %v9001_v60 = vrot.slane %v8705_v24, %v8657_v54  ;;  %v7425_v24 = vld [vmem:[#allocation12] ss:$8 sps:$4 sm:$0xff]  }
0x1004   :  { %2383 = vrot.lane.b32.xlu1 %v2381_v49, %s8119_s5 }
0x1007   :  { %v2501_v25 = vpop.f32.mrb[52].mxu1 }
0x1008   :  { %v6979_v51 = vpop.f32.mrb[53].mxu1 }
0x1009   :  { %v2504_v44 = vpop.f32.mrb[54].mxu1 }
0x100a   :  { %v2508_v53 = vpack.c.bf16 %v2504_v44, %v2501_v25  ;;  %v6980_v15 = vpop.f32.mrb[55].mxu1 }
0x100c   :  { %2510 = vrot.lane.b32.xlu1 %v2508_v53, %s8128_s21 }
0x100f   :  { %v2621_v31 = vpop.f32.mrb[56].mxu1 }
0x1010   :  { %v6991_v16 = vpop.f32.mrb[57].mxu1 }
0x1011   :  { %v2624_v21 = vpop.f32.mrb[58].mxu1 }
0x1012   :  { %v2628_v7 = vpack.c.bf16 %v2624_v21, %v2621_v31  ;;  %v6992_v8 = vpop.f32.mrb[59].mxu1 }
0x1013   :  { %v7430_v8 = vld [vmem:[#allocation12 + $0x14] ss:$8 sps:$4 sm:$0xff]  }
0x1014   :  { %2629 = vst.msk [vmem:[#allocation2 + $0x8] sm:$0xff] %vm587_vm1, %v2628_v7  ;;  %v7427_v7 = vld [vmem:[#allocation12 + $0x4] ss:$8 sps:$4 sm:$0xff]  }
0x1015   :  { %3271 = vmatprep.subr.bf16.mxu1 %v7427_v7 }
0x1016   :  { %3272 = vmatpush1.bf16.msra.mxu1 %v7425_v24 }
0x1017   :  { %v2747_v26 = vpop.f32.mrb[60].mxu1  ;;  %3273 = vmatprep.subr.bf16.mxu1 %v7430_v8  ;;  %v9035_v8 = vld [vmem:[%s9797_s8] sm:$0xff] }
0x1018   :  { %v7003_v20 = vpop.f32.mrb[61].mxu1 }
0x1019   :  { %v2750_v4 = vpop.f32.mrb[62].mxu1 }
0x101a   :  { %v2754_v45 = vpack.c.bf16 %v2750_v4, %v2747_v26  ;;  %v7004_v14 = vpop.f32.mrb[63].mxu1  ;;  %v7428_v26 = vld [vmem:[#allocation12 + $0x10] ss:$8 sps:$4 sm:$0xff]  }
0x101b   :  { %3274 = vmatpush1.bf16.msra.mxu1 %v7428_v26 }
0x101c   :  { %2756 = vrot.lane.b32.xlu0 %v2754_v45, %s8129_s23 }
0x1021   :  { %v2874_v30 = vpop.f32.mrb[64].mxu1 }
0x1022   :  { %v7015_v57 = vpop.f32.mrb[65].mxu1 }
0x1023   :  { %v2877_v22 = vpop.f32.mrb[66].mxu1 }
0x1024   :  { %v2881_v52 = vpack.c.bf16 %v2877_v22, %v2874_v30  ;;  %v7016_v34 = vpop.f32.mrb[67].mxu1 }
0x1025   :  { %v7431_v34 = vld [vmem:[#allocation12 + $0x20] ss:$8 sps:$4 sm:$0xff]  }
0x1026   :  { %2883 = vrot.lane.b32.xlu0 %v2881_v52, %s8119_s5  ;;  %v7433_v52 = vld [vmem:[#allocation12 + $0x24] ss:$8 sps:$4 sm:$0xff]  }
0x1027   :  { %3275 = vmatprep.subr.bf16.mxu1 %v7433_v52  ;;  %v7813_v52 = vld [vmem:[#allocation6 + $0x78] ss:$12 sps:$4 sm:$0xff]  }
0x1028   :  { %3276 = vmatpush1.bf16.msra.mxu1 %v7431_v34  ;;  %v7814_v34 = vld [vmem:[#allocation6 + $0x94] ss:$12 sps:$4 sm:$0xff]  }
0x1029   :  { %3277 = vmatprep.subr.bf16.mxu1 %v7436_v3  ;;  %v7449_v3 = vld [vmem:[#allocation14 + $0x40] sm:$0xff]  }
0x102a   :  { %6617 = vmatprep.subr.bf16.mxu0 %v7449_v3 }
0x102c   :  { %3278 = vmatpush1.bf16.msra.mxu1 %v7434_v56  ;;  %v7450_v56 = vld [vmem:[#allocation14] sm:$0xff]  }
0x102d   :  { %3279 = vmatprep.subr.bf16.mxu1 %v7439_v46  ;;  %v7815_v46 = vld [vmem:[#allocation6 + $0x90] ss:$12 sps:$4 sm:$0xff]  }
0x1030   :  { %3280 = vmatpush1.bf16.msra.mxu1 %v7437_v63  ;;  %v7451_v63 = vld [vmem:[#allocation14 + $0x48] sm:$0xff]  }
0x104a   :  { %v3001_v10 = vpop.f32.mrb[68].mxu1 }
0x104b   :  { %v7027_v11 = vpop.f32.mrb[69].mxu1 }
0x104c   :  { %v3004_v5 = vpop.f32.mrb[70].mxu1  ;;  %v7442_v11 = vld [vmem:[#allocation12 + $0x54] ss:$8 sps:$4 sm:$0xff]  }
0x104d   :  { %v3008_v6 = vpack.c.bf16 %v3004_v5, %v3001_v10  ;;  %v7028_v12 = vpop.f32.mrb[71].mxu1  ;;  %v7440_v10 = vld [vmem:[#allocation12 + $0x50] ss:$8 sps:$4 sm:$0xff]   ;;  %v7445_v5 = vld [vmem:[#allocation12 + $0x64] ss:$8 sps:$4 sm:$0xff]   ;;  %3281 = vmatprep.subr.bf16.mxu1 %v7442_v11 }
0x104e   :  { %3282 = vmatpush1.bf16.msra.mxu1 %v7440_v10  ;;  %v7446_v12 = vld [vmem:[#allocation12 + $0x70] ss:$8 sps:$4 sm:$0xff]   ;;  %v7452_v11 = vld [vmem:[#allocation14 + $0x8] sm:$0xff]  }
0x104f   :  { %3010 = vrot.lane.b32.xlu1 %v3008_v6, %s8128_s21  ;;  %3283 = vmatprep.subr.bf16.mxu1 %v7445_v5  ;;  %v7448_v6 = vld [vmem:[#allocation12 + $0x74] ss:$8 sps:$4 sm:$0xff]   ;;  %v7816_v10 = vld [vmem:[#allocation6 + $0xac] ss:$12 sps:$4 sm:$0xff]  }
0x1050   :  { %v7453_v5 = vld [vmem:[#allocation14 + $0x50] sm:$0xff]  }
0x1076   :  { %v2384_v50 = vpop.permute.xlu1 %2383 }
0x1077   :  { %2386 = vst.msk [vmem:[#allocation2] sm:$0xff] %vm962_vm6, %v2384_v50  ;;  %v7800_v50 = vld [vmem:[#allocation6 + $0x4] ss:$12 sps:$4 sm:$0xff]  }
0x107e   :  { %v2511_v33 = vpop.permute.xlu1 %2510 }
0x107f   :  { %2513 = vst.msk [vmem:[#allocation2] sm:$0xff] %vm1090_vm7, %v2511_v33 }
0x1086   :  { %v3014_v39 = vld [vmem:[#allocation2] sm:$0xff] }
0x1087   :  { %7045 = vmatprep.mubr.bf16.mxu0 %v3014_v39 }
0x108e   :  { %v2757_v9 = vpop.permute.xlu0 %2756 }
0x108f   :  { %2759 = vst.msk [vmem:[#allocation2 + $0x8] sm:$0xff] %vm834_vm5, %v2757_v9 }
0x1098   :  { %v2884_v13 = vpop.permute.xlu0 %2883 }
0x1099   :  { %2886 = vst.msk [vmem:[#allocation2 + $0x8] sm:$0xff] %vm962_vm6, %v2884_v13 }
0x10c1   :  { %v3011_v19 = vpop.permute.xlu1 %3010 }
0x10c2   :  { %3013 = vst.msk [vmem:[#allocation2 + $0x8] sm:$0xff] %vm1090_vm7, %v3011_v19 }
0x10c9   :  { %v3015_v2 = vld [vmem:[#allocation2 + $0x8] sm:$0xff] }
0x10ca   :  { %7046 = vmatmul.mubr.bf16.vlgmr.msra.gmra.mrb[84].mxu0 %v3015_v2 }
0x10cb   :  { %6618 = vmatpush3.bf16.msra.mxu0 %v7450_v56 }
0x10cc   :  { %6619 = vmatprep.subr.bf16.mxu0 %v7451_v63 }
0x10cf   :  { %6620 = vmatpush3.bf16.msra.mxu0 %v7452_v11 }
0x10d0   :  { %6621 = vmatprep.subr.bf16.mxu0 %v7453_v5 }
0x119d   :  { %v7047_v49 = vpop.f32.mrb[84].mxu0 }
0x119e   :  { %v3102_v36 = vpop.f32.mrb[85].mxu0  ;;  %v3111_v31 = vadd.f32 %v7047_v49, %v9001_v60 }
0x119f   :  { %v3103_v25 = vadd.f32 %v3102_v36, %v9001_v60  ;;  %v7048_v51 = vpop.f32.mrb[86].mxu0 }
0x11a0   :  { %v3105_v44 = vpop.f32.mrb[87].mxu0  ;;  %v3119_v21 = vadd.f32 %v3111_v31, %v8725_v43  ;;  %v3114_v43 = vadd.f32 %v7048_v51, %v9001_v60  ;;  %v9025_v31 = vld [vmem:[%s9797_s8 + $0x10] sm:$0xff] }
0x11a1   :  { %v3117_v53 = vadd.f32 %v3103_v25, %v8714_v47  ;;  %v3106_v15 = vadd.f32 %v3105_v44, %v9001_v60 }
0x11a2   :  { %v3120_v22 = vadd.f32 %v3114_v43, %v8728_v37  ;;  %v7443_v37 = vld [vmem:[#allocation12 + $0x60] ss:$8 sps:$4 sm:$0xff]  }
0x11a3   :  { %v3118_v16 = vadd.f32 %v3106_v15, %v8717_v1  ;;  %3121 = vadd.xlane.f32.xlu0 %v3117_v53  ;;  %3284 = vmatpush1.bf16.msra.mxu1 %v7443_v37  ;;  %v7809_v43 = vld [vmem:[#allocation6 + $0x48] ss:$12 sps:$4 sm:$0xff]  }
0x11a4   :  { %3285 = vmatprep.subr.bf16.mxu1 %v7448_v6  ;;  %v7817_v37 = vld [vmem:[#allocation6 + $0xa8] ss:$12 sps:$4 sm:$0xff]  }
0x11a5   :  { %3123 = vadd.xlane.f32.xlu1 %v3118_v16  ;;  %v7454_v6 = vld [vmem:[#allocation14 + $0x10] sm:$0xff]  }
0x11a6   :  { %6622 = vmatpush3.bf16.msra.mxu0 %v7454_v6 }
0x11a7   :  { %3286 = vmatpush1.bf16.msra.mxu1 %v7446_v12  ;;  %v7455_v12 = vld [vmem:[#allocation14 + $0x58] sm:$0xff]  }
0x11a8   :  { %3551 = vmatprep.subr.bf16.mxu1 %v7800_v50  ;;  %v7456_v50 = vld [vmem:[#allocation14 + $0x18] sm:$0xff]   ;;  %6623 = vmatprep.subr.bf16.mxu0 %v7455_v12 }
0x11a9   :  { %3125 = vadd.xlane.f32.xlu1 %v3119_v21 }
0x11aa   :  { %6624 = vmatpush3.bf16.msra.mxu0 %v7456_v50 }
0x1230   :  { %v3122_v47 = vpop.xlane.xlu0 %3121 }
0x1231   :  { %v3129_v20 = vmul.f32 0.0078125, %v3122_v47 }
0x1232   :  { %v3124_v4 = vpop.xlane.xlu1 %3123 }
0x1233   :  { %v3133_v18 = vsub.f32 %v3117_v53, %v3129_v20  ;;  %v3130_v23 = vmul.f32 0.0078125, %v3124_v4  ;;  %v9020_v53 = vsub.s32 1, %v8328_v29 }
0x1235   :  { %v3134_v45 = vsub.f32 %v3118_v16, %v3130_v23  ;;  %v3137_v1 = vmul.f32 %v3133_v18, %v3133_v18  ;;  %v9029_v16 = vrot.slane %v9025_v31, %v8691_v17  ;;  %v9039_v26 = vrot.slane %v9035_v8, %v9020_v53  ;;  %v7804_v23 = vld [vmem:[#allocation6 + $0x1c] ss:$12 sps:$4 sm:$0xff]  }
0x1236   :  { %v3126_v14 = vpop.xlane.xlu1 %3125 }
0x1237   :  { %v3131_v42 = vmul.f32 0.0078125, %v3126_v14  ;;  %3141 = vadd.xlane.f32.xlu0 %v3137_v1  ;;  %v3138_v41 = vmul.f32 %v3134_v45, %v3134_v45  ;;  %v7806_v1 = vld [vmem:[#allocation6 + $0x34] ss:$12 sps:$4 sm:$0xff]   ;;  %v7807_v14 = vld [vmem:[#allocation6 + $0x30] ss:$12 sps:$4 sm:$0xff]  }
0x1239   :  { %v9010_v30 = vsub.f32 %v3119_v21, %v3131_v42  ;;  %v7808_v42 = vld [vmem:[#allocation6 + $0x4c] ss:$12 sps:$4 sm:$0xff]  }
0x123b   :  { %3143 = vadd.xlane.f32.xlu0 %v3138_v41  ;;  %v3139_v57 = vmul.f32 %v9010_v30, %v9010_v30  ;;  %v7810_v41 = vld [vmem:[#allocation6 + $0x64] ss:$12 sps:$4 sm:$0xff]  }
0x123d   :  { %3145 = vadd.xlane.f32.xlu1 %v3139_v57  ;;  %v7811_v57 = vld [vmem:[#allocation6 + $0x60] ss:$12 sps:$4 sm:$0xff]  }
0x123f   :  { %3127 = vadd.xlane.f32.xlu0 %v3120_v22 }
0x12c4   :  { %v3142_v33 = vpop.xlane.xlu0 %3141 }
0x12c5   :  { %v3149_v39 = vmul.f32 0.0078125, %v3142_v33  ;;  %v7457_v33 = vld [vmem:[#allocation14 + $0x60] sm:$0xff]  }
0x12c6   :  { %6625 = vmatprep.subr.bf16.mxu0 %v7457_v33  ;;  %v7820_v33 = vld [vmem:[#allocation6 + $0x20] ss:$12 sps:$4 sm:$0xff]  }
0x12c7   :  { %v3153_v9 = vadd.f32 1e-05, %v3149_v39  ;;  %v7458_v39 = vld [vmem:[#allocation14 + $0x20] sm:$0xff]  }
0x12c8   :  { %v3144_v13 = vpop.xlane.xlu0 %3143  ;;  %6626 = vmatpush3.bf16.msra.mxu0 %v7458_v39  ;;  %v7821_v39 = vld [vmem:[#allocation6 + $0x38] ss:$12 sps:$4 sm:$0xff]  }
0x12c9   :  { %7627 = vrsqrt.f32 %v3153_v9  ;;  %v3150_v19 = vmul.f32 0.0078125, %v3144_v13  ;;  %v7459_v9 = vld [vmem:[#allocation14 + $0x68] sm:$0xff]  }
0x12ca   :  { %6627 = vmatprep.subr.bf16.mxu0 %v7459_v9  ;;  %v7460_v13 = vld [vmem:[#allocation14 + $0x28] sm:$0xff]   ;;  %v7822_v9 = vld [vmem:[#allocation6 + $0x50] ss:$12 sps:$4 sm:$0xff]  }
0x12cb   :  { %v3154_v2 = vadd.f32 1e-05, %v3150_v19  ;;  %v7461_v19 = vld [vmem:[#allocation14 + $0x70] sm:$0xff]  }
0x12cc   :  { %v3128_v49 = vpop.xlane.xlu0 %3127  ;;  %6628 = vmatpush3.bf16.msra.mxu0 %v7460_v13  ;;  %v7823_v13 = vld [vmem:[#allocation6 + $0x68] ss:$12 sps:$4 sm:$0xff]  }
0x12cd   :  { %7629 = vrsqrt.f32 %v3154_v2  ;;  %v3132_v36 = vmul.f32 0.0078125, %v3128_v49  ;;  %v7462_v2 = vld [vmem:[#allocation14 + $0x30] sm:$0xff]   ;;  %6629 = vmatprep.subr.bf16.mxu0 %v7461_v19  ;;  %v7463_v49 = vld [vmem:[#allocation14 + $0x78] sm:$0xff]   ;;  %v7824_v19 = vld [vmem:[#allocation6 + $0x80] ss:$12 sps:$4 sm:$0xff]  }
0x12cf   :  { %v9015_v25 = vsub.f32 %v3120_v22, %v3132_v36  ;;  %v7812_v22 = vld [vmem:[#allocation6 + $0x7c] ss:$12 sps:$4 sm:$0xff]  }
0x12d0   :  { %6630 = vmatpush3.bf16.msra.mxu0 %v7462_v2  ;;  %v7464_v36 = vld [vmem:[#allocation14 + $0x38] sm:$0xff]  }
0x12d1   :  { %v3140_v51 = vmul.f32 %v9015_v25, %v9015_v25  ;;  %6631 = vmatprep.subr.bf16.mxu0 %v7463_v49  ;;  %v7825_v2 = vld [vmem:[#allocation6 + $0x98] ss:$12 sps:$4 sm:$0xff]   ;;  %v7826_v49 = vld [vmem:[#allocation6 + $0xb0] ss:$12 sps:$4 sm:$0xff]  }
0x12d3   :  { %v7628_v44 = vpop.eup %7627  ;;  %3147 = vadd.xlane.f32.xlu0 %v3140_v51  ;;  %v7818_v51 = vld [vmem:[#allocation6 + $0x8] ss:$12 sps:$4 sm:$0xff]  }
0x12d4   :  { %v3161_v15 = vmul.f32 %v7628_v44, %v3133_v18  ;;  %v7803_v18 = vld [vmem:[#allocation6] ss:$12 sps:$4 sm:$0xff]   ;;  %6632 = vmatpush3.bf16.msra.mxu0 %v7464_v36  ;;  %v3146_v44 = vpop.xlane.xlu1 %3145 }
0x12d5   :  { %7049 = vmatprep.subr.bf16.mxu0 %v7818_v51 }
0x12d6   :  { %v3169_v7 = vmul.f32 %v9029_v16, %v3161_v15  ;;  %v3151_v15 = vmul.f32 0.0078125, %v3146_v44 }
0x12d7   :  { %v7630_v21 = vpop.eup %7629 }
0x12d8   :  { %v3162_v24 = vmul.f32 %v7630_v21, %v3134_v45  ;;  %v9043_v20 = vadd.f32 %v9039_v26, %v3169_v7  ;;  %v7805_v45 = vld [vmem:[#allocation6 + $0x18] ss:$12 sps:$4 sm:$0xff]   ;;  %v3155_v21 = vadd.f32 1e-05, %v3151_v15 }
0x12da   :  { %v3170_v47 = vmul.f32 %v9029_v16, %v3162_v24  ;;  %7631 = vrsqrt.f32 %v3155_v21 }
0x12dc   :  { %v9046_v17 = vadd.f32 %v9039_v26, %v3170_v47 }
0x12de   :  { %v3181_v4 = vpack.c.bf16 %v9046_v17, %v9043_v20 }
0x12e0   :  { %3304 = vmatmul.mubr.bf16.vlgmr.msra.gmra.mrb[72].mxu1 %v3181_v4 }
0x12e1   :  { %3313 = vmatprep.mubr.bf16.mxu1 %v8125_v0  ;;  %3552 = vmatpush1.bf16.msra.mxu1 %v7803_v18 }
0x12e2   :  { %3553 = vmatprep.subr.bf16.mxu1 %v7804_v23 }
0x12e4   :  { %v7632_v4 = vpop.eup %7631 }
0x12e5   :  { %3554 = vmatpush1.bf16.msra.mxu1 %v7805_v45  ;;  %v3163_v18 = vmul.f32 %v7632_v4, %v9010_v30  ;;  %v3185_v30 = vsub.s32 5, %v8328_v29 }
0x12e6   :  { %3555 = vmatprep.subr.bf16.mxu1 %v7806_v1 }
0x12e7   :  { %v3171_v1 = vmul.f32 %v9029_v16, %v3163_v18 }
0x12e9   :  { %3556 = vmatpush1.bf16.msra.mxu1 %v7807_v14 }
0x12ea   :  { %3557 = vmatprep.subr.bf16.mxu1 %v7808_v42  ;;  %v9057_v42 = vadd.f32 %v9039_v26, %v3171_v1 }
0x12ed   :  { %3558 = vmatpush1.bf16.msra.mxu1 %v7809_v43 }
0x12ee   :  { %3559 = vmatprep.subr.bf16.mxu1 %v7810_v41 }
0x12f1   :  { %3560 = vmatpush1.bf16.msra.mxu1 %v7811_v57  ;;  %v9072_v57 = vld [vmem:[%s9797_s8 + $0x8] sm:$0xff] }
0x12f2   :  { %3561 = vmatprep.subr.bf16.mxu1 %v7812_v22  ;;  %v9075_v22 = vrot.slane %v9072_v57, %v3185_v30 }
0x12f5   :  { %3562 = vmatpush1.bf16.msra.mxu1 %v7813_v52 }
0x12f6   :  { %3563 = vmatprep.subr.bf16.mxu1 %v7814_v34 }
0x12f9   :  { %3564 = vmatpush1.bf16.msra.mxu1 %v7815_v46 }
0x12fa   :  { %3565 = vmatprep.subr.bf16.mxu1 %v7816_v10 }
0x12fd   :  { %3566 = vmatpush1.bf16.msra.mxu1 %v7817_v37 }
0x12fe   :  { %7069 = vmatprep.subr.bf16.mxu1 %v8126_v27 }
0x1360   :  { %v3148_v24 = vpop.xlane.xlu0 %3147 }
0x1361   :  { %v3152_v7 = vmul.f32 0.0078125, %v3148_v24 }
0x1363   :  { %v3156_v47 = vadd.f32 1e-05, %v3152_v7 }
0x1365   :  { %7633 = vrsqrt.f32 %v3156_v47 }
0x136f   :  { %v7634_v23 = vpop.eup %7633 }
0x1370   :  { %v3164_v45 = vmul.f32 %v7634_v23, %v9015_v25  ;;  %v9067_v25 = vrot.slane %v9035_v8, %v3185_v30  ;;  %v9088_v30 = vrot.slane %v9025_v31, %v8657_v54 }
0x1372   :  { %v3172_v14 = vmul.f32 %v9029_v16, %v3164_v45 }
0x1374   :  { %v9060_v43 = vadd.f32 %v9039_v26, %v3172_v14 }
0x1376   :  { %v3182_v41 = vpack.c.bf16 %v9060_v43, %v9057_v42 }
0x1378   :  { %3314 = vmatmul.mubr.bf16.gmra.mrb[76].mxu1 %v3182_v41 }
0x1379   :  { %3583 = vmatprep.mubr.bf16.mxu1 %v8125_v0 }
0x13b3   :  { %v3305_v52 = vpop.f32.mrb[72].mxu1 }
0x13b4   :  { %v3306_v34 = vadd.f32 %v3305_v52, %v9067_v25  ;;  %v3307_v3 = vpop.f32.mrb[73].mxu1 }
0x13b5   :  { %v3308_v56 = vadd.f32 %v3307_v3, %v9075_v22  ;;  %v3309_v63 = vpop.f32.mrb[74].mxu1 }
0x13b6   :  { %v3310_v46 = vadd.f32 %v3309_v63, %v9067_v25  ;;  %v3311_v10 = vpop.f32.mrb[75].mxu1  ;;  %v3324_v11 = vmax.f32 %v3306_v34, 0.0 }
0x13b7   :  { %v3312_v8 = vadd.f32 %v3311_v10, %v9075_v22  ;;  %v3325_v37 = vmax.f32 %v3308_v56, 0.0 }
0x13b8   :  { %v3326_v5 = vmax.f32 %v3310_v46, 0.0 }
0x13b9   :  { %v3327_v6 = vmax.f32 %v3312_v8, 0.0 }
0x13ba   :  { %v3332_v12 = vpack.c.bf16 %v3326_v5, %v3324_v11 }
0x13bb   :  { %v3333_v50 = vpack.c.bf16 %v3327_v6, %v3325_v37 }
0x13bd   :  { %3468 = vmatprep.mubr.bf16.mxu0 %v3333_v50 }
0x13be   :  { %3469 = vmatmul.mubr.bf16.vlgmr.msra.gmra.mrb[88].mxu0 %v3332_v12 }
0x13bf   :  { %7050 = vmatpush3.bf16.msra.mxu0 %v7818_v51 }
0x13c0   :  { %7051 = vmatprep.subr.bf16.mxu0 %v7820_v33 }
0x13c3   :  { %7052 = vmatpush3.bf16.msra.mxu0 %v7820_v33 }
0x13c4   :  { %7053 = vmatprep.subr.bf16.mxu0 %v7821_v39 }
0x13c7   :  { %7054 = vmatpush3.bf16.msra.mxu0 %v7821_v39 }
0x13c8   :  { %7055 = vmatprep.subr.bf16.mxu0 %v7822_v9 }
0x13cb   :  { %7056 = vmatpush3.bf16.msra.mxu0 %v7822_v9 }
0x13cc   :  { %7057 = vmatprep.subr.bf16.mxu0 %v7823_v13 }
0x13cf   :  { %7058 = vmatpush3.bf16.msra.mxu0 %v7823_v13 }
0x13d0   :  { %7059 = vmatprep.subr.bf16.mxu0 %v7824_v19 }
0x13d3   :  { %7060 = vmatpush3.bf16.msra.mxu0 %v7824_v19 }
0x13d4   :  { %7061 = vmatprep.subr.bf16.mxu0 %v7825_v2 }
0x13d7   :  { %7062 = vmatpush3.bf16.msra.mxu0 %v7825_v2 }
0x13d8   :  { %7063 = vmatprep.subr.bf16.mxu0 %v7826_v49 }
0x13db   :  { %7064 = vmatpush3.bf16.msra.mxu0 %v7826_v49 }
0x13dc   :  { %7087 = vmatprep.subr.bf16.mxu0 %v8126_v27 }
0x144b   :  { %v3315_v36 = vpop.f32.mrb[76].mxu1 }
0x144c   :  { %v3316_v51 = vadd.f32 %v3315_v36, %v9067_v25  ;;  %v3317_v44 = vpop.f32.mrb[77].mxu1 }
0x144d   :  { %v3318_v15 = vadd.f32 %v3317_v44, %v9075_v22  ;;  %v3319_v21 = vpop.f32.mrb[78].mxu1 }
0x144e   :  { %v3320_v24 = vadd.f32 %v3319_v21, %v9067_v25  ;;  %v3321_v7 = vpop.f32.mrb[79].mxu1  ;;  %v3328_v4 = vmax.f32 %v3316_v51, 0.0 }
0x144f   :  { %v3322_v47 = vadd.f32 %v3321_v7, %v9075_v22  ;;  %v3329_v23 = vmax.f32 %v3318_v15, 0.0 }
0x1450   :  { %v3330_v18 = vmax.f32 %v3320_v24, 0.0 }
0x1451   :  { %v3331_v45 = vmax.f32 %v3322_v47, 0.0 }
0x1452   :  { %v3334_v1 = vpack.c.bf16 %v3330_v18, %v3328_v4 }
0x1453   :  { %v3335_v14 = vpack.c.bf16 %v3331_v45, %v3329_v23 }
0x1455   :  { %3476 = vmatprep.mubr.bf16.mxu0 %v3335_v14 }
0x1456   :  { %3477 = vmatmul.mubr.bf16.gmra.mrb[92].mxu0 %v3334_v1 }
0x1491   :  { %v6633_v41 = vpop.f32.mrb[88].mxu0 }
0x1492   :  { %v6634_v52 = vpop.f32.mrb[89].mxu0 }
0x1493   :  { %v6635_v34 = vadd.f32 %v6634_v52, %v6633_v41  ;;  %v6636_v3 = vpop.f32.mrb[90].mxu0 }
0x1494   :  { %v6637_v56 = vpop.f32.mrb[91].mxu0 }
0x1495   :  { %v3471_v63 = vadd.f32 %v6635_v34, %v9088_v30  ;;  %v6638_v46 = vadd.f32 %v6637_v56, %v6636_v3 }
0x1497   :  { %v3474_v10 = vadd.f32 %v6638_v46, %v9088_v30  ;;  %v3485_v8 = vadd.f32 %v3471_v63, %v9043_v20  ;;  %v9104_v63 = vrot.slane %v9025_v31, %v9020_v53 }
0x1499   :  { %3489 = vadd.xlane.f32.xlu1 %v3485_v8  ;;  %v3486_v11 = vadd.f32 %v3474_v10, %v9046_v17 }
0x149b   :  { %3491 = vadd.xlane.f32.xlu0 %v3486_v11 }
0x1526   :  { %v3490_v5 = vpop.xlane.xlu1 %3489 }
0x1527   :  { %v3497_v37 = vmul.f32 0.0078125, %v3490_v5 }
0x1528   :  { %v3492_v6 = vpop.xlane.xlu0 %3491 }
0x1529   :  { %v3501_v54 = vsub.f32 %v3485_v8, %v3497_v37  ;;  %v3498_v12 = vmul.f32 0.0078125, %v3492_v6  ;;  %v6639_v50 = vpop.f32.mrb[92].mxu0 }
0x152a   :  { %v6640_v33 = vpop.f32.mrb[93].mxu0 }
0x152b   :  { %v3502_v39 = vsub.f32 %v3486_v11, %v3498_v12  ;;  %v6641_v9 = vadd.f32 %v6640_v33, %v6639_v50  ;;  %v6642_v13 = vpop.f32.mrb[94].mxu0  ;;  %v3505_v19 = vmul.f32 %v3501_v54, %v3501_v54 }
0x152c   :  { %v6643_v2 = vpop.f32.mrb[95].mxu0 }
0x152d   :  { %v3479_v49 = vadd.f32 %v6641_v9, %v9088_v30  ;;  %v6644_v36 = vadd.f32 %v6643_v2, %v6642_v13  ;;  %3509 = vadd.xlane.f32.xlu1 %v3505_v19  ;;  %v3506_v20 = vmul.f32 %v3502_v39, %v3502_v39 }
0x152f   :  { %v3482_v17 = vadd.f32 %v6644_v36, %v9088_v30  ;;  %3511 = vadd.xlane.f32.xlu0 %v3506_v20  ;;  %v3487_v51 = vadd.f32 %v3479_v49, %v9057_v42 }
0x1531   :  { %3493 = vadd.xlane.f32.xlu1 %v3487_v51  ;;  %v3488_v44 = vadd.f32 %v3482_v17, %v9060_v43  ;;  %v9100_v43 = vrot.slane %v9072_v57, %v9020_v53 }
0x1533   :  { %3495 = vadd.xlane.f32.xlu0 %v3488_v44 }
0x15ba   :  { %v3510_v15 = vpop.xlane.xlu1 %3509 }
0x15bb   :  { %v3517_v21 = vmul.f32 0.0078125, %v3510_v15 }
0x15bc   :  { %v3512_v24 = vpop.xlane.xlu0 %3511 }
0x15bd   :  { %v3521_v7 = vadd.f32 1e-05, %v3517_v21  ;;  %v3518_v47 = vmul.f32 0.0078125, %v3512_v24 }
0x15be   :  { %v3494_v4 = vpop.xlane.xlu1 %3493 }
0x15bf   :  { %7635 = vrsqrt.f32 %v3521_v7  ;;  %v3522_v18 = vadd.f32 1e-05, %v3518_v47  ;;  %v3499_v23 = vmul.f32 0.0078125, %v3494_v4 }
0x15c0   :  { %v3496_v45 = vpop.xlane.xlu0 %3495 }
0x15c1   :  { %7637 = vrsqrt.f32 %v3522_v18  ;;  %v3503_v1 = vsub.f32 %v3487_v51, %v3499_v23  ;;  %v3500_v14 = vmul.f32 0.0078125, %v3496_v45 }
0x15c3   :  { %v3504_v41 = vsub.f32 %v3488_v44, %v3500_v14  ;;  %v3507_v52 = vmul.f32 %v3503_v1, %v3503_v1 }
0x15c5   :  { %3513 = vadd.xlane.f32.xlu1 %v3507_v52  ;;  %v3508_v42 = vmul.f32 %v3504_v41, %v3504_v41 }
0x15c7   :  { %3515 = vadd.xlane.f32.xlu0 %v3508_v42 }
0x15c9   :  { %v7636_v34 = vpop.eup %7635 }
0x15ca   :  { %v3529_v3 = vmul.f32 %v7636_v34, %v3501_v54 }
0x15cb   :  { %v7638_v56 = vpop.eup %7637 }
0x15cc   :  { %v3537_v46 = vmul.f32 %v9100_v43, %v3529_v3  ;;  %v3530_v10 = vmul.f32 %v7638_v56, %v3502_v39 }
0x15ce   :  { %v3538_v8 = vmul.f32 %v9100_v43, %v3530_v10  ;;  %v9109_v11 = vadd.f32 %v9104_v63, %v3537_v46 }
0x15d0   :  { %v9112_v5 = vadd.f32 %v9104_v63, %v3538_v8 }
0x15d2   :  { %v9116_v57 = vpack.c.bf16 %v9112_v5, %v9109_v11 }
0x15d4   :  { %3584 = vmatmul.mubr.bf16.vlgmr.msra.gmra.mrb[80].mxu1 %v9116_v57  ;;  %7065 = vmatprep.mubr.bf16.mxu0 %v9116_v57 }
0x15d5   :  { %3593 = vmatprep.mubr.bf16.mxu1 %v8125_v0 }
0x1652   :  { %v3514_v53 = vpop.xlane.xlu1 %3513 }
0x1653   :  { %v3519_v31 = vmul.f32 0.0078125, %v3514_v53 }
0x1654   :  { %v3516_v37 = vpop.xlane.xlu0 %3515 }
0x1655   :  { %v3523_v6 = vadd.f32 1e-05, %v3519_v31  ;;  %v3520_v54 = vmul.f32 0.0078125, %v3516_v37 }
0x1657   :  { %7639 = vrsqrt.f32 %v3523_v6  ;;  %v3524_v12 = vadd.f32 1e-05, %v3520_v54 }
0x1659   :  { %7641 = vrsqrt.f32 %v3524_v12 }
0x1661   :  { %v7640_v50 = vpop.eup %7639 }
0x1662   :  { %v3531_v33 = vmul.f32 %v7640_v50, %v3503_v1 }
0x1663   :  { %v7642_v39 = vpop.eup %7641 }
0x1664   :  { %v3532_v9 = vmul.f32 %v7642_v39, %v3504_v41  ;;  %v3539_v13 = vmul.f32 %v9100_v43, %v3531_v33 }
0x1666   :  { %v3540_v19 = vmul.f32 %v9100_v43, %v3532_v9  ;;  %v9124_v2 = vadd.f32 %v9104_v63, %v3539_v13 }
0x1668   :  { %v9127_v49 = vadd.f32 %v9104_v63, %v3540_v19 }
0x166a   :  { %v9131_v36 = vpack.c.bf16 %v9127_v49, %v9124_v2 }
0x166c   :  { %3594 = vmatmul.mubr.bf16.gmra.mrb[84].mxu1 %v9131_v36  ;;  %7066 = vmatmul.mubr.bf16.vlgmr.msra.gmra.mrb[96].mxu0 %v9131_v36 }
0x166d   :  { %7071 = vmatprep.mubr.msk.bf16.mxu1 %vm8127_vm0, %v8126_v27  ;;  %7089 = vmatprep.mubr.msk.bf16.mxu0 %vm8127_vm0, %v8126_v27 }
0x16a7   :  { %v3585_v20 = vpop.f32.mrb[80].mxu1 }
0x16a8   :  { %v3586_v17 = vadd.f32 %v3585_v20, %v8337_v32  ;;  %v3587_v51 = vpop.f32.mrb[81].mxu1 }
0x16a9   :  { %v3589_v44 = vpop.f32.mrb[82].mxu1  ;;  %v3588_v24 = vadd.f32 %v3587_v51, %v8342_v35 }
0x16aa   :  { %v3590_v15 = vadd.f32 %v3589_v44, %v8337_v32  ;;  %v3591_v21 = vpop.f32.mrb[83].mxu1  ;;  %v3653_v47 = vmul.f32 0.17677669, %v3586_v17 }
0x16ab   :  { %v3592_v7 = vadd.f32 %v3591_v21, %v8342_v35 }
0x16ac   :  { %v3654_v4 = vmul.f32 0.17677669, %v3590_v15 }
0x16ad   :  { %v3659_v18 = vpack.c.bf16 %v3592_v7, %v3588_v24 }
0x16ae   :  { %v3657_v23 = vpack.c.bf16 %v3654_v4, %v3653_v47 }
0x16af   :  { %v3667_v45 = vsel %vm587_vm1, %v3659_v18, 0 }
0x16b0   :  { %7070 = vmatpush3.bf16.xpose.msra.mxu1 %v3667_v45 }
0x16b1   :  { %7075 = vmatprep.subr.bf16.mxu1 %v8126_v27 }
0x16b7   :  { %7072 = vmatmul.mubr.msk.bf16.vlgmr.msra.gmra.mrb[88].mxu1 %vm587_vm1, %v3657_v23 }
0x16b8   :  { %7077 = vmatprep.mubr.msk.bf16.mxu1 %vm8127_vm0, %v8126_v27 }
0x173f   :  { %v3595_v1 = vpop.f32.mrb[84].mxu1  ;;  %v7067_v14 = vpop.f32.mrb[96].mxu0 }
0x1740   :  { %v3596_v41 = vadd.f32 %v3595_v1, %v8337_v32  ;;  %v3597_v52 = vpop.f32.mrb[85].mxu1  ;;  %v3638_v42 = vpop.f32.mrb[97].mxu0  ;;  %v3647_v56 = vadd.f32 %v7067_v14, %v8372_v62 }
0x1741   :  { %v3599_v34 = vpop.f32.mrb[86].mxu1  ;;  %v7068_v3 = vpop.f32.mrb[98].mxu0  ;;  %v3598_v31 = vadd.f32 %v3597_v52, %v8342_v35  ;;  %v3639_v37 = vadd.f32 %v3638_v42, %v8372_v62 }
0x1742   :  { %v3600_v46 = vadd.f32 %v3599_v34, %v8337_v32  ;;  %v3650_v10 = vadd.f32 %v7068_v3, %v8372_v62  ;;  %v3601_v8 = vpop.f32.mrb[87].mxu1  ;;  %v3641_v53 = vpop.f32.mrb[99].mxu0  ;;  %v3655_v12 = vmul.f32 0.17677669, %v3596_v41 }
0x1743   :  { %v3602_v6 = vadd.f32 %v3601_v8, %v8342_v35  ;;  %v3642_v54 = vadd.f32 %v3641_v53, %v8372_v62 }
0x1744   :  { %v3656_v50 = vmul.f32 0.17677669, %v3600_v46  ;;  %v9156_v33 = vpack.c.bf16 %v3650_v10, %v3647_v56 }
0x1745   :  { %v9158_v39 = vpack.c.bf16 %v3602_v6, %v3598_v31  ;;  %v9160_v9 = vpack.c.bf16 %v3642_v54, %v3639_v37 }
0x1746   :  { %v9162_v32 = vpack.c.bf16 %v3656_v50, %v3655_v12 }
0x1747   :  { %7076 = vmatpush3.bf16.msra.mxu1 %v9160_v9  ;;  %v4167_v50 = vsel %vm587_vm1, %v9158_v39, 0 }
0x1748   :  { %7081 = vmatprep.subr.bf16.mxu1 %v8126_v27 }
0x178a   :  { %v3703_v13 = vpop.f32.mrb[88].mxu1 }
0x178b   :  { %v3704_v19 = vadd.f32 %v3703_v13, %v8420_v38  ;;  %v7073_v35 = vpop.f32.mrb[89].mxu1 }
0x178c   :  { %v3706_v20 = vpop.f32.mrb[90].mxu1 }
0x178d   :  { %v3707_v62 = vadd.f32 %v3706_v20, %v8423_v40  ;;  %v7074_v17 = vpop.f32.mrb[91].mxu1  ;;  %v3710_v51 = vsel %vm635_vm4, %v3704_v19, -inf }
0x178e   :  { %3711 = vmax.xlane.f32.xlu1 %v3710_v51  ;;  %v7827_v51 = vld [vmem:[#allocation8] sm:$0xff]  }
0x178f   :  { %v3713_v44 = vsel %vm635_vm4, %v3707_v62, -inf }
0x1790   :  { %3714 = vmax.xlane.f32.xlu0 %v3713_v44 }
0x181b   :  { %v3712_v15 = vpop.xlane.xlu1 %3711 }
0x181c   :  { %v3716_v21 = vsub.f32 %v3704_v19, %v3712_v15  ;;  %v7828_v15 = vld [vmem:[#allocation8 + $0x8] sm:$0xff]  }
0x181d   :  { %v3715_v24 = vpop.xlane.xlu0 %3714 }
0x181e   :  { %v3718_v7 = vmul.f32 1.442695, %v3716_v21  ;;  %v3717_v47 = vsub.f32 %v3707_v62, %v3715_v24  ;;  %v7829_v21 = vld [vmem:[#allocation8 + $0x10] sm:$0xff]   ;;  %v7830_v24 = vld [vmem:[#allocation8 + $0x18] sm:$0xff]  }
0x1820   :  { %7643 = vpow2.f32 %v3718_v7  ;;  %v3720_v4 = vmul.f32 1.442695, %v3717_v47  ;;  %v7831_v7 = vld [vmem:[#allocation8 + $0x20] sm:$0xff]   ;;  %v7832_v47 = vld [vmem:[#allocation8 + $0x28] sm:$0xff]  }
0x1822   :  { %7645 = vpow2.f32 %v3720_v4  ;;  %v7833_v4 = vld [vmem:[#allocation8 + $0x30] sm:$0xff]  }
0x182a   :  { %v7644_v45 = vpop.eup %7643 }
0x182b   :  { %v3722_v1 = vsel %vm635_vm4, %v7644_v45, 0.0 }
0x182c   :  { %v7646_v14 = vpop.eup %7645  ;;  %3723 = vadd.xlane.f32.xlu1 %v3722_v1  ;;  %v7835_v1 = vld [vmem:[#allocation9 + $0x8] ss:$12 sps:$4 sm:$0xff]  }
0x182d   :  { %v3725_v41 = vsel %vm635_vm4, %v7646_v14, 0.0 }
0x182e   :  { %3726 = vadd.xlane.f32.xlu0 %v3725_v41 }
0x183d   :  { %3783 = vrot.lane.b32.xlu1 %v3659_v18, %s8128_s21 }
0x1841   :  { %3911 = vrot.lane.b32.xlu1 %v3659_v18, %s8119_s5 }
0x1844   :  { %3780 = vrot.lane.b32.xlu0 %v3657_v23, %s8128_s21 }
0x1845   :  { %3909 = vrot.lane.b32.xlu1 %v3657_v23, %s8119_s5 }
0x1848   :  { %4038 = vrot.lane.b32.xlu0 %v3659_v18, %s8129_s23 }
0x1849   :  { %4036 = vrot.lane.b32.xlu1 %v3657_v23, %s8129_s23 }
0x184c   :  { %4283 = vrot.lane.b32.xlu0 %v9158_v39, %s8128_s21 }
0x184d   :  { %4280 = vrot.lane.b32.xlu1 %v9162_v32, %s8128_s21 }
0x1850   :  { %4411 = vrot.lane.b32.xlu0 %v9158_v39, %s8119_s5 }
0x1851   :  { %4409 = vrot.lane.b32.xlu1 %v9162_v32, %s8119_s5 }
0x1854   :  { %4538 = vrot.lane.b32.xlu0 %v9158_v39, %s8129_s23 }
0x1855   :  { %4536 = vrot.lane.b32.xlu1 %v9162_v32, %s8129_s23 }
0x18b9   :  { %v3724_v18 = vpop.xlane.xlu1 %3723 }
0x18ba   :  { %7647 = vrcp.f32 %v3724_v18 }
0x18bb   :  { %v3727_v23 = vpop.xlane.xlu0 %3726 }
0x18bc   :  { %7649 = vrcp.f32 %v3727_v23 }
0x18bd   :  { %v3784_v56 = vpop.permute.xlu1 %3783 }
0x18be   :  { %v3789_v10 = vsel %vm587_vm1, %v3784_v56, 0 }
0x18bf   :  { %v3781_v53 = vpop.permute.xlu0 %3780 }
0x18c1   :  { %v3912_v8 = vpop.permute.xlu1 %3911 }
0x18c2   :  { %v3917_v31 = vsel %vm587_vm1, %v3912_v8, 0 }
0x18c3   :  { %v4039_v37 = vpop.permute.xlu0 %4038 }
0x18c4   :  { %v7648_v52 = vpop.eup %7647  ;;  %v4044_v54 = vsel %vm587_vm1, %v4039_v37, 0 }
0x18c5   :  { %v3730_v34 = vmul.f32 %v7648_v52, %v7644_v45  ;;  %v3910_v6 = vpop.permute.xlu1 %3909  ;;  %v7834_v45 = vld [vmem:[#allocation8 + $0x38] sm:$0xff]  }
0x18c6   :  { %v7650_v42 = vpop.eup %7649 }
0x18c7   :  { %v3731_v3 = vmul.f32 %v7650_v42, %v7646_v14  ;;  %v4284_v13 = vpop.permute.xlu0 %4283 }
0x18c8   :  { %v4289_v19 = vsel %vm587_vm1, %v4284_v13, 0 }
0x18c9   :  { %v3732_v46 = vpack.c.bf16 %v3731_v3, %v3730_v34  ;;  %v4037_v12 = vpop.permute.xlu1 %4036 }
0x18cb   :  { %7078 = vmatmul.mubr.msk.bf16.vlgmr.msra.gmra.mrb[92].mxu1 %vm635_vm4, %v3732_v46  ;;  %v4412_v35 = vpop.permute.xlu0 %4411 }
0x18cc   :  { %7082 = vmatpush3.bf16.xpose.msra.mxu1 %v3789_v10  ;;  %7083 = vmatprep.mubr.msk.bf16.mxu1 %vm8127_vm0, %v8126_v27  ;;  %v4417_v20 = vsel %vm587_vm1, %v4412_v35, 0 }
0x18cd   :  { %7093 = vmatprep.subr.bf16.mxu1 %v8126_v27  ;;  %v4281_v39 = vpop.permute.xlu1 %4280 }
0x18cf   :  { %v4539_v62 = vpop.permute.xlu0 %4538 }
0x18d0   :  { %v4544_v17 = vsel %vm587_vm1, %v4539_v62, 0 }
0x18d3   :  { %7084 = vmatmul.mubr.msk.bf16.vlgmr.msra.gmra.mrb[96].mxu1 %vm587_vm1, %v3781_v53 }
0x18d4   :  { %7094 = vmatpush3.bf16.xpose.msra.mxu1 %v3917_v31  ;;  %7095 = vmatprep.mubr.msk.bf16.mxu1 %vm8127_vm0, %v8126_v27 }
0x18d5   :  { %7105 = vmatprep.subr.bf16.mxu1 %v8126_v27 }
0x18db   :  { %7096 = vmatmul.mubr.msk.bf16.vlgmr.msra.gmra.mrb[100].mxu1 %vm587_vm1, %v3910_v6 }
0x18dc   :  { %7106 = vmatpush3.bf16.xpose.msra.mxu1 %v4044_v54  ;;  %7107 = vmatprep.mubr.msk.bf16.mxu1 %vm8127_vm0, %v8126_v27 }
0x18dd   :  { %7117 = vmatprep.subr.bf16.mxu1 %v8126_v27 }
0x18e3   :  { %7108 = vmatmul.mubr.msk.bf16.vlgmr.msra.gmra.mrb[104].mxu1 %vm587_vm1, %v4037_v12 }
0x18e4   :  { %7118 = vmatpush3.bf16.xpose.msra.mxu1 %v4167_v50  ;;  %7119 = vmatprep.mubr.msk.bf16.mxu1 %vm8127_vm0, %v8126_v27 }
0x18e5   :  { %7129 = vmatprep.subr.bf16.mxu1 %v8126_v27 }
0x18eb   :  { %7120 = vmatmul.mubr.msk.bf16.vlgmr.msra.gmra.mrb[108].mxu1 %vm587_vm1, %v9162_v32  ;;  %v4410_v32 = vpop.permute.xlu1 %4409 }
0x18ec   :  { %7130 = vmatpush3.bf16.xpose.msra.mxu1 %v4289_v19  ;;  %7131 = vmatprep.mubr.msk.bf16.mxu1 %vm8127_vm0, %v8126_v27 }
0x18ed   :  { %7141 = vmatprep.subr.bf16.mxu1 %v8126_v27 }
0x18ef   :  { %v4537_v44 = vpop.permute.xlu1 %4536 }
0x18f3   :  { %7132 = vmatmul.mubr.msk.bf16.vlgmr.msra.gmra.mrb[112].mxu1 %vm587_vm1, %v4281_v39 }
0x18f4   :  { %7142 = vmatpush3.bf16.xpose.msra.mxu1 %v4417_v20  ;;  %7143 = vmatprep.mubr.msk.bf16.mxu1 %vm8127_vm0, %v8126_v27 }
0x18f5   :  { %7153 = vmatprep.subr.bf16.mxu1 %v8126_v27 }
0x18fb   :  { %7144 = vmatmul.mubr.msk.bf16.vlgmr.msra.gmra.mrb[116].mxu1 %vm587_vm1, %v4410_v32 }
0x18fc   :  { %7154 = vmatpush3.bf16.xpose.msra.mxu1 %v4544_v17  ;;  %7155 = vmatprep.mubr.msk.bf16.mxu1 %vm8127_vm0, %v8126_v27 }
0x18fd   :  { %7165 = vmatprep.subr.bf16.mxu1 %v7827_v51 }
0x1903   :  { %7156 = vmatmul.mubr.msk.bf16.vlgmr.msra.gmra.mrb[120].mxu1 %vm587_vm1, %v4537_v44 }
0x1904   :  { %7166 = vmatpush3.bf16.msra.mxu1 %v7827_v51 }
0x1905   :  { %7167 = vmatprep.subr.bf16.mxu1 %v7828_v15 }
0x1908   :  { %7168 = vmatpush3.bf16.msra.mxu1 %v7828_v15 }
0x1909   :  { %7169 = vmatprep.subr.bf16.mxu1 %v7829_v21 }
0x190c   :  { %7170 = vmatpush3.bf16.msra.mxu1 %v7829_v21 }
0x190d   :  { %7171 = vmatprep.subr.bf16.mxu1 %v7830_v24 }
0x1910   :  { %7172 = vmatpush3.bf16.msra.mxu1 %v7830_v24 }
0x1911   :  { %7173 = vmatprep.subr.bf16.mxu1 %v7831_v7 }
0x1914   :  { %7174 = vmatpush3.bf16.msra.mxu1 %v7831_v7 }
0x1915   :  { %7175 = vmatprep.subr.bf16.mxu1 %v7832_v47 }
0x1918   :  { %7176 = vmatpush3.bf16.msra.mxu1 %v7832_v47 }
0x1919   :  { %7177 = vmatprep.subr.bf16.mxu1 %v7833_v4 }
0x191c   :  { %7178 = vmatpush3.bf16.msra.mxu1 %v7833_v4 }
0x191d   :  { %7179 = vmatprep.subr.bf16.mxu1 %v7834_v45 }
0x1920   :  { %7180 = vmatpush3.bf16.msra.mxu1 %v7834_v45 }
0x1921   :  { %4821 = vmatprep.subr.bf16.mxu1 %v7835_v1 }
0x199e   :  { %v3770_v14 = vpop.f32.mrb[92].mxu1 }
0x199f   :  { %v7079_v41 = vpop.f32.mrb[93].mxu1 }
0x19a0   :  { %v3773_v18 = vpop.f32.mrb[94].mxu1 }
0x19a1   :  { %v3777_v23 = vpack.c.bf16 %v3773_v18, %v3770_v14  ;;  %v7080_v52 = vpop.f32.mrb[95].mxu1 }
0x19a3   :  { %3778 = vst.msk [vmem:[#allocation2] sm:$0xff] %vm587_vm1, %v3777_v23 }
0x19a6   :  { %v3825_v42 = vpop.f32.mrb[96].mxu1 }
0x19a7   :  { %v9229_v34 = vadd.f32 %v3825_v42, %v8420_v38  ;;  %v7085_v3 = vpop.f32.mrb[97].mxu1 }
0x19a8   :  { %v3828_v56 = vpop.f32.mrb[98].mxu1 }
0x19a9   :  { %v9232_v46 = vadd.f32 %v3828_v56, %v8423_v40  ;;  %v7086_v10 = vpop.f32.mrb[99].mxu1  ;;  %v3832_v8 = vsel %vm635_vm4, %v9229_v34, -inf }
0x19aa   :  { %3833 = vmax.xlane.f32.xlu0 %v3832_v8 }
0x19ab   :  { %v3835_v53 = vsel %vm635_vm4, %v9232_v46, -inf }
0x19ac   :  { %3836 = vmax.xlane.f32.xlu1 %v3835_v53 }
0x19ae   :  { %v3953_v31 = vpop.f32.mrb[100].mxu1 }
0x19af   :  { %v9239_v37 = vadd.f32 %v3953_v31, %v8420_v38  ;;  %v7097_v6 = vpop.f32.mrb[101].mxu1 }
0x19b0   :  { %v3956_v54 = vpop.f32.mrb[102].mxu1 }
0x19b1   :  { %v9242_v12 = vadd.f32 %v3956_v54, %v8423_v40  ;;  %v7098_v50 = vpop.f32.mrb[103].mxu1  ;;  %v3960_v13 = vsel %vm635_vm4, %v9239_v37, -inf }
0x19b2   :  { %3961 = vmax.xlane.f32.xlu0 %v3960_v13 }
0x19b3   :  { %v3963_v19 = vsel %vm635_vm4, %v9242_v12, -inf }
0x19b6   :  { %v4080_v35 = vpop.f32.mrb[104].mxu1  ;;  %3964 = vmax.xlane.f32.xlu0 %v3963_v19 }
0x19b7   :  { %v9249_v39 = vadd.f32 %v4080_v35, %v8420_v38  ;;  %v7109_v20 = vpop.f32.mrb[105].mxu1 }
0x19b8   :  { %v4083_v62 = vpop.f32.mrb[106].mxu1 }
0x19b9   :  { %v9252_v32 = vadd.f32 %v4083_v62, %v8423_v40  ;;  %v7110_v17 = vpop.f32.mrb[107].mxu1  ;;  %v4087_v51 = vsel %vm635_vm4, %v9249_v39, -inf }
0x19ba   :  { %4088 = vmax.xlane.f32.xlu1 %v4087_v51 }
0x19bb   :  { %v4090_v44 = vsel %vm635_vm4, %v9252_v32, -inf }
0x19bc   :  { %4091 = vmax.xlane.f32.xlu0 %v4090_v44 }
0x19be   :  { %v4203_v15 = vpop.f32.mrb[108].mxu1 }
0x19bf   :  { %v9259_v21 = vadd.f32 %v4203_v15, %v8420_v38  ;;  %v7121_v24 = vpop.f32.mrb[109].mxu1 }
0x19c0   :  { %v4206_v7 = vpop.f32.mrb[110].mxu1 }
0x19c1   :  { %v9262_v47 = vadd.f32 %v4206_v7, %v8423_v40  ;;  %v7122_v4 = vpop.f32.mrb[111].mxu1  ;;  %v4210_v45 = vsel %vm635_vm4, %v9259_v21, -inf }
0x19c2   :  { %4211 = vmax.xlane.f32.xlu1 %v4210_v45 }
0x19c3   :  { %v4213_v1 = vsel %vm635_vm4, %v9262_v47, -inf }
0x19c4   :  { %4214 = vmax.xlane.f32.xlu0 %v4213_v1 }
0x19c6   :  { %v4325_v14 = vpop.f32.mrb[112].mxu1 }
0x19c7   :  { %v7133_v41 = vpop.f32.mrb[113].mxu1  ;;  %v9286_v20 = vadd.f32 %v4325_v14, %v8420_v38 }
0x19c8   :  { %v4328_v18 = vpop.f32.mrb[114].mxu1 }
0x19c9   :  { %v9269_v23 = vadd.f32 %v4328_v18, %v8423_v40  ;;  %v7134_v52 = vpop.f32.mrb[115].mxu1  ;;  %v4332_v17 = vsel %vm635_vm4, %v9286_v20, -inf }
0x19cb   :  { %v4335_v42 = vsel %vm635_vm4, %v9269_v23, -inf }
0x19cc   :  { %4336 = vmax.xlane.f32.xlu0 %v4335_v42 }
0x19ce   :  { %v4453_v3 = vpop.f32.mrb[116].mxu1 }
0x19cf   :  { %v7145_v56 = vpop.f32.mrb[117].mxu1  ;;  %v9289_v62 = vadd.f32 %v4453_v3, %v8420_v38 }
0x19d0   :  { %v4456_v10 = vpop.f32.mrb[118].mxu1 }
0x19d1   :  { %v9274_v8 = vadd.f32 %v4456_v10, %v8423_v40  ;;  %v7146_v53 = vpop.f32.mrb[119].mxu1 }
0x19d3   :  { %3856 = vrot.lane.b32.xlu1 %v9160_v9, %s8128_s21  ;;  %v4463_v31 = vsel %vm635_vm4, %v9274_v8, -inf }
0x19d4   :  { %4464 = vmax.xlane.f32.xlu0 %v4463_v31 }
0x19d6   :  { %v4580_v6 = vpop.f32.mrb[120].mxu1 }
0x19d7   :  { %v7157_v54 = vpop.f32.mrb[121].mxu1  ;;  %v9294_v51 = vadd.f32 %v4580_v6, %v8420_v38 }
0x19d8   :  { %v4583_v50 = vpop.f32.mrb[122].mxu1 }
0x19d9   :  { %v9281_v13 = vadd.f32 %v4583_v50, %v8423_v40  ;;  %v7158_v19 = vpop.f32.mrb[123].mxu1  ;;  %v4460_v40 = vsel %vm635_vm4, %v9289_v62, -inf  ;;  %v4587_v44 = vsel %vm635_vm4, %v9294_v51, -inf }
0x19db   :  { %v4590_v35 = vsel %vm635_vm4, %v9281_v13, -inf }
0x19dc   :  { %4591 = vmax.xlane.f32.xlu0 %v4590_v35 }
0x19f7   :  { %4333 = vmax.xlane.f32.xlu1 %v4332_v17 }
0x19fb   :  { %4461 = vmax.xlane.f32.xlu1 %v4460_v40 }
0x19ff   :  { %4588 = vmax.xlane.f32.xlu1 %v4587_v44 }
0x1a37   :  { %v3834_v15 = vpop.xlane.xlu0 %3833 }
0x1a38   :  { %v3838_v24 = vsub.f32 %v9229_v34, %v3834_v15 }
0x1a39   :  { %v3837_v7 = vpop.xlane.xlu1 %3836 }
0x1a3a   :  { %v3840_v4 = vmul.f32 1.442695, %v3838_v24  ;;  %v3839_v45 = vsub.f32 %v9232_v46, %v3837_v7 }
0x1a3c   :  { %7651 = vpow2.f32 %v3840_v4  ;;  %v3842_v1 = vmul.f32 1.442695, %v3839_v45 }
0x1a3e   :  { %7653 = vpow2.f32 %v3842_v1 }
0x1a3f   :  { %v3962_v46 = vpop.xlane.xlu0 %3961 }
0x1a40   :  { %v3966_v56 = vsub.f32 %v9239_v37, %v3962_v46 }
0x1a42   :  { %v3968_v31 = vmul.f32 1.442695, %v3966_v56 }
0x1a43   :  { %v3965_v3 = vpop.xlane.xlu0 %3964 }
0x1a44   :  { %v3967_v10 = vsub.f32 %v9242_v12, %v3965_v3  ;;  %7655 = vpow2.f32 %v3968_v31 }
0x1a46   :  { %v9302_v38 = vpop.eup %7651  ;;  %v3970_v54 = vmul.f32 1.442695, %v3967_v10 }
0x1a47   :  { %v3844_v14 = vsel %vm635_vm4, %v9302_v38, 0.0  ;;  %v4089_v34 = vpop.xlane.xlu1 %4088 }
0x1a48   :  { %v9306_v41 = vpop.eup %7653  ;;  %3845 = vadd.xlane.f32.xlu1 %v3844_v14  ;;  %v4093_v6 = vsub.f32 %v9249_v39, %v4089_v34  ;;  %7657 = vpow2.f32 %v3970_v54 }
0x1a49   :  { %v3847_v18 = vsel %vm635_vm4, %v9306_v41, 0.0  ;;  %v4092_v53 = vpop.xlane.xlu0 %4091 }
0x1a4a   :  { %3848 = vadd.xlane.f32.xlu0 %v3847_v18  ;;  %v4094_v50 = vsub.f32 %v9252_v32, %v4092_v53  ;;  %v4095_v35 = vmul.f32 1.442695, %v4093_v6 }
0x1a4c   :  { %v4097_v40 = vmul.f32 1.442695, %v4094_v50  ;;  %7659 = vpow2.f32 %v4095_v35 }
0x1a4e   :  { %7661 = vpow2.f32 %v4097_v40  ;;  %v9321_v44 = vpop.eup %7655 }
0x1a4f   :  { %v4212_v52 = vpop.xlane.xlu1 %4211  ;;  %v3972_v32 = vsel %vm635_vm4, %v9321_v44, 0.0 }
0x1a50   :  { %v4216_v17 = vsub.f32 %v9259_v21, %v4212_v52 }
0x1a51   :  { %v4215_v19 = vpop.xlane.xlu0 %4214 }
0x1a52   :  { %v4218_v37 = vmul.f32 1.442695, %v4216_v17  ;;  %v9323_v39 = vpop.eup %7657 }
0x1a53   :  { %v3857_v42 = vpop.permute.xlu1 %3856  ;;  %v3975_v21 = vsel %vm635_vm4, %v9323_v39, 0.0 }
0x1a54   :  { %7088 = vmatpush3.bf16.msra.mxu0 %v3857_v42  ;;  %7663 = vpow2.f32 %v4218_v37 }
0x1a55   :  { %7099 = vmatprep.subr.bf16.mxu0 %v8126_v27 }
0x1a56   :  { %v9327_v15 = vpop.eup %7659 }
0x1a57   :  { %v4099_v7 = vsel %vm635_vm4, %v9327_v15, 0.0 }
0x1a59   :  { %4110 = vrot.lane.b32.xlu1 %v9160_v9, %s8129_s23  ;;  %v4337_v24 = vpop.xlane.xlu0 %4336 }
0x1a5a   :  { %v4339_v14 = vsub.f32 %v9269_v23, %v4337_v24 }
0x1a5c   :  { %v4342_v3 = vmul.f32 1.442695, %v4339_v14 }
0x1a60   :  { %3983 = vrot.lane.b32.xlu0 %v9160_v9, %s8119_s5  ;;  %v4217_v9 = vsub.f32 %v9262_v47, %v4215_v19  ;;  %v9331_v47 = vpop.eup %7661 }
0x1a61   :  { %v9335_v4 = vpop.eup %7663  ;;  %v4102_v45 = vsel %vm635_vm4, %v9331_v47, 0.0  ;;  %v4465_v18 = vpop.xlane.xlu0 %4464 }
0x1a62   :  { %v4220_v12 = vmul.f32 1.442695, %v4217_v9  ;;  %v4222_v52 = vsel %vm635_vm4, %v9335_v4, 0.0  ;;  %v4467_v56 = vsub.f32 %v9274_v8, %v4465_v18 }
0x1a64   :  { %7665 = vpow2.f32 %v4220_v12  ;;  %v4470_v23 = vmul.f32 1.442695, %v4467_v56 }
0x1a69   :  { %v4592_v31 = vpop.xlane.xlu0 %4591 }
0x1a6e   :  { %v9339_v1 = vpop.eup %7665 }
0x1a6f   :  { %v4225_v46 = vsel %vm635_vm4, %v9339_v1, 0.0 }
0x1a7d   :  { %3973 = vadd.xlane.f32.xlu1 %v3972_v32 }
0x1a7f   :  { %3976 = vadd.xlane.f32.xlu0 %v3975_v21 }
0x1a81   :  { %4100 = vadd.xlane.f32.xlu1 %v4099_v7 }
0x1a83   :  { %4103 = vadd.xlane.f32.xlu0 %v4102_v45 }
0x1a84   :  { %v4334_v34 = vpop.xlane.xlu1 %4333 }
0x1a85   :  { %v4338_v42 = vsub.f32 %v9286_v20, %v4334_v34  ;;  %4223 = vadd.xlane.f32.xlu1 %v4222_v52  ;;  %v4594_v20 = vsub.f32 %v9281_v13, %v4592_v31 }
0x1a87   :  { %v4340_v10 = vmul.f32 1.442695, %v4338_v42  ;;  %4226 = vadd.xlane.f32.xlu0 %v4225_v46  ;;  %v4597_v35 = vmul.f32 1.442695, %v4594_v20 }
0x1a88   :  { %v4462_v53 = vpop.xlane.xlu1 %4461 }
0x1a89   :  { %7667 = vpow2.f32 %v4340_v10  ;;  %v4466_v32 = vsub.f32 %v9289_v62, %v4462_v53 }
0x1a8a   :  { %7669 = vpow2.f32 %v4342_v3 }
0x1a8b   :  { %7671 = vpow2.f32 %v4470_v23  ;;  %v4468_v24 = vmul.f32 1.442695, %v4466_v32 }
0x1a8c   :  { %v4589_v6 = vpop.xlane.xlu1 %4588 }
0x1a8d   :  { %v4593_v54 = vsub.f32 %v9294_v51, %v4589_v6 }
0x1a8f   :  { %v4595_v50 = vmul.f32 1.442695, %v4593_v54 }
0x1a91   :  { %7673 = vpow2.f32 %v4595_v50 }
0x1a92   :  { %7675 = vpow2.f32 %v4597_v35 }
0x1a93   :  { %v9350_v19 = vpop.eup %7667  ;;  %7677 = vpow2.f32 %v4468_v24 }
0x1a94   :  { %v4344_v8 = vsel %vm635_vm4, %v9350_v19, 0.0  ;;  %v9354_v17 = vpop.eup %7669 }
0x1a95   :  { %4345 = vadd.xlane.f32.xlu0 %v4344_v8  ;;  %v4347_v51 = vsel %vm635_vm4, %v9354_v17, 0.0  ;;  %v9360_v40 = vpop.eup %7671 }
0x1a96   :  { %4356 = vrot.lane.b32.xlu1 %v9156_v33, %s8128_s21  ;;  %v4475_v13 = vsel %vm635_vm4, %v9360_v40, 0.0 }
0x1a99   :  { %4348 = vadd.xlane.f32.xlu0 %v4347_v51 }
0x1a9b   :  { %v9364_v9 = vpop.eup %7673 }
0x1a9c   :  { %v4599_v37 = vsel %vm635_vm4, %v9364_v9, 0.0  ;;  %v9368_v12 = vpop.eup %7675 }
0x1a9d   :  { %4476 = vadd.xlane.f32.xlu0 %v4475_v13  ;;  %v4602_v21 = vsel %vm635_vm4, %v9368_v12, 0.0  ;;  %v9373_v7 = vpop.eup %7677 }
0x1a9e   :  { %v4472_v45 = vsel %vm635_vm4, %v9373_v7, 0.0 }
0x1aa1   :  { %4600 = vadd.xlane.f32.xlu0 %v4599_v37 }
0x1aa5   :  { %4603 = vadd.xlane.f32.xlu0 %v4602_v21 }
0x1aba   :  { %4473 = vadd.xlane.f32.xlu1 %v4472_v45 }
0x1abb   :  { %4483 = vrot.lane.b32.xlu0 %v9156_v33, %s8119_s5 }
0x1acb   :  { %4610 = vrot.lane.b32.xlu1 %v9156_v33, %s8129_s23 }
0x1ad5   :  { %v3846_v14 = vpop.xlane.xlu1 %3845 }
0x1ad6   :  { %7679 = vrcp.f32 %v3846_v14 }
0x1ad7   :  { %v3849_v62 = vpop.xlane.xlu0 %3848 }
0x1ad8   :  { %7681 = vrcp.f32 %v3849_v62 }
0x1ad9   :  { %v4111_v56 = vpop.permute.xlu1 %4110 }
0x1adb   :  { %v3984_v3 = vpop.permute.xlu0 %3983 }
0x1ae0   :  { %v7680_v18 = vpop.eup %7679 }
0x1ae1   :  { %v3852_v52 = vmul.f32 %v7680_v18, %v9302_v38 }
0x1ae2   :  { %v7682_v34 = vpop.eup %7681 }
0x1ae3   :  { %v3853_v42 = vmul.f32 %v7682_v34, %v9306_v41 }
0x1ae5   :  { %v3854_v46 = vpack.c.bf16 %v3853_v42, %v3852_v52 }
0x1ae7   :  { %7090 = vmatmul.mubr.msk.bf16.vlgmr.msra.gmra.mrb[100].mxu0 %vm635_vm4, %v3854_v46 }
0x1ae8   :  { %7100 = vmatpush3.bf16.msra.mxu0 %v3984_v3  ;;  %7101 = vmatprep.mubr.msk.bf16.mxu0 %vm8127_vm0, %v8126_v27 }
0x1ae9   :  { %7111 = vmatprep.subr.bf16.mxu0 %v8126_v27 }
0x1b0a   :  { %v3974_v10 = vpop.xlane.xlu1 %3973 }
0x1b0b   :  { %7683 = vrcp.f32 %v3974_v10 }
0x1b0c   :  { %v3977_v53 = vpop.xlane.xlu0 %3976 }
0x1b0d   :  { %7685 = vrcp.f32 %v3977_v53 }
0x1b0e   :  { %v4101_v23 = vpop.xlane.xlu1 %4100 }
0x1b10   :  { %v4104_v31 = vpop.xlane.xlu0 %4103 }
0x1b11   :  { %7687 = vrcp.f32 %v4104_v31 }
0x1b12   :  { %7689 = vrcp.f32 %v4101_v23  ;;  %v4224_v50 = vpop.xlane.xlu1 %4223 }
0x1b14   :  { %v4227_v41 = vpop.xlane.xlu0 %4226 }
0x1b15   :  { %v7684_v38 = vpop.eup %7683  ;;  %7691 = vrcp.f32 %v4227_v41 }
0x1b16   :  { %v3980_v54 = vmul.f32 %v7684_v38, %v9321_v44  ;;  %7693 = vrcp.f32 %v4224_v50  ;;  %v4357_v62 = vpop.permute.xlu1 %4356  ;;  %v7839_v50 = vld [vmem:[#allocation9 + $0x48] ss:$12 sps:$4 sm:$0xff]  }
0x1b17   :  { %v7686_v6 = vpop.eup %7685 }
0x1b18   :  { %v3981_v20 = vmul.f32 %v7686_v6, %v9323_v39  ;;  %v7836_v6 = vld [vmem:[#allocation9] ss:$12 sps:$4 sm:$0xff]  }
0x1b1a   :  { %v3982_v35 = vpack.c.bf16 %v3981_v20, %v3980_v54 }
0x1b1b   :  { %v7688_v8 = vpop.eup %7687 }
0x1b1c   :  { %7102 = vmatmul.mubr.msk.bf16.vlgmr.msra.gmra.mrb[104].mxu0 %vm635_vm4, %v3982_v35  ;;  %v7690_v51 = vpop.eup %7689  ;;  %v4108_v13 = vmul.f32 %v7688_v8, %v9331_v47  ;;  %v7840_v35 = vld [vmem:[#allocation9 + $0x60] ss:$12 sps:$4 sm:$0xff]   ;;  %v7843_v8 = vld [vmem:[#allocation9 + $0xa8] ss:$12 sps:$4 sm:$0xff]  }
0x1b1d   :  { %7112 = vmatpush3.bf16.msra.mxu0 %v4111_v56  ;;  %7113 = vmatprep.mubr.msk.bf16.mxu0 %vm8127_vm0, %v8126_v27  ;;  %v4107_v44 = vmul.f32 %v7690_v51, %v9327_v15 }
0x1b1e   :  { %7123 = vmatprep.subr.bf16.mxu0 %v8126_v27 }
0x1b1f   :  { %v4109_v39 = vpack.c.bf16 %v4108_v13, %v4107_v44  ;;  %v7692_v32 = vpop.eup %7691 }
0x1b20   :  { %v7694_v21 = vpop.eup %7693  ;;  %v4231_v24 = vmul.f32 %v7692_v32, %v9339_v1 }
0x1b21   :  { %v4230_v15 = vmul.f32 %v7694_v21, %v9335_v4 }
0x1b22   :  { %v4346_v37 = vpop.xlane.xlu0 %4345 }
0x1b23   :  { %7695 = vrcp.f32 %v4346_v37  ;;  %v4232_v14 = vpack.c.bf16 %v4231_v24, %v4230_v15 }
0x1b24   :  { %7114 = vmatmul.mubr.msk.bf16.vlgmr.msra.gmra.mrb[108].mxu0 %vm635_vm4, %v4109_v39 }
0x1b25   :  { %7124 = vmatpush3.bf16.msra.mxu0 %v9156_v33  ;;  %7125 = vmatprep.mubr.msk.bf16.mxu0 %vm8127_vm0, %v8126_v27 }
0x1b26   :  { %v4349_v45 = vpop.xlane.xlu0 %4348  ;;  %7135 = vmatprep.subr.bf16.mxu0 %v8126_v27 }
0x1b27   :  { %7697 = vrcp.f32 %v4349_v45 }
0x1b2a   :  { %v4477_v47 = vpop.xlane.xlu0 %4476 }
0x1b2b   :  { %7699 = vrcp.f32 %v4477_v47 }
0x1b2c   :  { %7126 = vmatmul.mubr.msk.bf16.vlgmr.msra.gmra.mrb[112].mxu0 %vm635_vm4, %v4232_v14 }
0x1b2d   :  { %7136 = vmatpush3.bf16.msra.mxu0 %v4357_v62  ;;  %7137 = vmatprep.mubr.msk.bf16.mxu0 %vm8127_vm0, %v8126_v27  ;;  %v7696_v18 = vpop.eup %7695 }
0x1b2e   :  { %v4601_v33 = vpop.xlane.xlu0 %4600  ;;  %7147 = vmatprep.subr.bf16.mxu0 %v8126_v27  ;;  %v4352_v34 = vmul.f32 %v7696_v18, %v9350_v19 }
0x1b31   :  { %v7698_v1 = vpop.eup %7697 }
0x1b32   :  { %v4353_v52 = vmul.f32 %v7698_v1, %v9354_v17  ;;  %v4604_v42 = vpop.xlane.xlu0 %4603 }
0x1b34   :  { %v4354_v4 = vpack.c.bf16 %v4353_v52, %v4352_v34 }
0x1b35   :  { %v7700_v56 = vpop.eup %7699 }
0x1b36   :  { %7138 = vmatmul.mubr.msk.bf16.vlgmr.msra.gmra.mrb[116].mxu0 %vm635_vm4, %v4354_v4  ;;  %v4484_v46 = vpop.permute.xlu0 %4483  ;;  %v4481_v17 = vmul.f32 %v7700_v56, %v9360_v40  ;;  %v7837_v40 = vld [vmem:[#allocation9 + $0x18] ss:$12 sps:$4 sm:$0xff]  }
0x1b37   :  { %7148 = vmatpush3.bf16.msra.mxu0 %v4484_v46  ;;  %7149 = vmatprep.mubr.msk.bf16.mxu0 %vm8127_vm0, %v8126_v27 }
0x1b38   :  { %7159 = vmatprep.subr.bf16.mxu0 %v8126_v27 }
0x1b47   :  { %v4474_v3 = vpop.xlane.xlu1 %4473 }
0x1b48   :  { %7701 = vrcp.f32 %v4474_v3 }
0x1b49   :  { %7703 = vrcp.f32 %v4604_v42 }
0x1b4a   :  { %7705 = vrcp.f32 %v4601_v33 }
0x1b4b   :  { %v4611_v31 = vpop.permute.xlu1 %4610 }
0x1b52   :  { %v7702_v19 = vpop.eup %7701 }
0x1b53   :  { %v4480_v10 = vmul.f32 %v7702_v19, %v9373_v7  ;;  %v7704_v23 = vpop.eup %7703  ;;  %v7838_v7 = vld [vmem:[#allocation9 + $0x30] ss:$12 sps:$4 sm:$0xff]  }
0x1b54   :  { %v7706_v38 = vpop.eup %7705  ;;  %v4608_v41 = vmul.f32 %v7704_v23, %v9368_v12  ;;  %v7841_v12 = vld [vmem:[#allocation9 + $0x78] ss:$12 sps:$4 sm:$0xff]  }
0x1b55   :  { %v4482_v53 = vpack.c.bf16 %v4481_v17, %v4480_v10  ;;  %v4607_v54 = vmul.f32 %v7706_v38, %v9364_v9  ;;  %v7842_v9 = vld [vmem:[#allocation9 + $0x90] ss:$12 sps:$4 sm:$0xff]  }
0x1b57   :  { %7150 = vmatmul.mubr.msk.bf16.vlgmr.msra.gmra.mrb[120].mxu0 %vm635_vm4, %v4482_v53  ;;  %v4609_v20 = vpack.c.bf16 %v4608_v41, %v4607_v54 }
0x1b58   :  { %7160 = vmatpush3.bf16.msra.mxu0 %v4611_v31  ;;  %7161 = vmatprep.mubr.msk.bf16.mxu0 %vm8127_vm0, %v8126_v27 }
0x1b59   :  { %7185 = vmatprep.subr.bf16.mxu0 %v7836_v6 }
0x1b5f   :  { %7162 = vmatmul.mubr.msk.bf16.vlgmr.msra.gmra.mrb[124].mxu0 %vm635_vm4, %v4609_v20 }
0x1b60   :  { %7186 = vmatpush3.bf16.msra.mxu0 %v7836_v6 }
0x1b61   :  { %7187 = vmatprep.subr.bf16.mxu0 %v7837_v40 }
0x1b64   :  { %7188 = vmatpush3.bf16.msra.mxu0 %v7837_v40 }
0x1b65   :  { %7189 = vmatprep.subr.bf16.mxu0 %v7838_v7 }
0x1b68   :  { %7190 = vmatpush3.bf16.msra.mxu0 %v7838_v7 }
0x1b69   :  { %7191 = vmatprep.subr.bf16.mxu0 %v7839_v50 }
0x1b6c   :  { %7192 = vmatpush3.bf16.msra.mxu0 %v7839_v50 }
0x1b6d   :  { %7193 = vmatprep.subr.bf16.mxu0 %v7840_v35 }
0x1b70   :  { %7194 = vmatpush3.bf16.msra.mxu0 %v7840_v35 }
0x1b71   :  { %7195 = vmatprep.subr.bf16.mxu0 %v7841_v12 }
0x1b74   :  { %7196 = vmatpush3.bf16.msra.mxu0 %v7841_v12 }
0x1b75   :  { %7197 = vmatprep.subr.bf16.mxu0 %v7842_v9 }
0x1b78   :  { %7198 = vmatpush3.bf16.msra.mxu0 %v7842_v9 }
0x1b79   :  { %7199 = vmatprep.subr.bf16.mxu0 %v7843_v8 }
0x1b7c   :  { %7200 = vmatpush3.bf16.msra.mxu0 %v7843_v8 }
0x1b7d   :  { %7205 = vmatprep.subr.bf16.mxu0 %v8126_v27 }
0x1bba   :  { %v3896_v51 = vpop.f32.mrb[100].mxu0 }
0x1bbb   :  { %v7091_v13 = vpop.f32.mrb[101].mxu0 }
0x1bbc   :  { %v3899_v44 = vpop.f32.mrb[102].mxu0 }
0x1bbd   :  { %v3903_v37 = vpack.c.bf16 %v3899_v44, %v3896_v51  ;;  %v7092_v39 = vpop.f32.mrb[103].mxu0  ;;  %v7844_v44 = vld [vmem:[#allocation9 + $0x4] ss:$12 sps:$4 sm:$0xff]  }
0x1bbe   :  { %v7846_v39 = vld [vmem:[#allocation9 + $0x1c] ss:$12 sps:$4 sm:$0xff]  }
0x1bbf   :  { %3905 = vrot.lane.b32.xlu1 %v3903_v37, %s8129_s23  ;;  %v7845_v37 = vld [vmem:[#allocation9 + $0x20] ss:$12 sps:$4 sm:$0xff]  }
0x1bef   :  { %v4023_v32 = vpop.f32.mrb[104].mxu0 }
0x1bf0   :  { %v7103_v21 = vpop.f32.mrb[105].mxu0 }
0x1bf1   :  { %v4026_v24 = vpop.f32.mrb[106].mxu0  ;;  %v7848_v21 = vld [vmem:[#allocation9 + $0x34] ss:$12 sps:$4 sm:$0xff]  }
0x1bf2   :  { %v4030_v45 = vpack.c.bf16 %v4026_v24, %v4023_v32  ;;  %v7104_v15 = vpop.f32.mrb[107].mxu0  ;;  %v7847_v32 = vld [vmem:[#allocation9 + $0x38] ss:$12 sps:$4 sm:$0xff]   ;;  %v7849_v24 = vld [vmem:[#allocation9 + $0x50] ss:$12 sps:$4 sm:$0xff]  }
0x1bf3   :  { %v7851_v15 = vld [vmem:[#allocation9 + $0x68] ss:$12 sps:$4 sm:$0xff]  }
0x1bf4   :  { %4032 = vrot.lane.b32.xlu1 %v4030_v45, %s8119_s5  ;;  %v7850_v45 = vld [vmem:[#allocation9 + $0x4c] ss:$12 sps:$4 sm:$0xff]  }
0x1bf7   :  { %v4150_v47 = vpop.f32.mrb[108].mxu0 }
0x1bf8   :  { %v7115_v14 = vpop.f32.mrb[109].mxu0 }
0x1bf9   :  { %v4153_v62 = vpop.f32.mrb[110].mxu0  ;;  %v7853_v14 = vld [vmem:[#allocation9 + $0x80] ss:$12 sps:$4 sm:$0xff]  }
0x1bfa   :  { %v4157_v33 = vpack.c.bf16 %v4153_v62, %v4150_v47  ;;  %v7116_v18 = vpop.f32.mrb[111].mxu0  ;;  %v7852_v47 = vld [vmem:[#allocation9 + $0x64] ss:$12 sps:$4 sm:$0xff]   ;;  %v7854_v62 = vld [vmem:[#allocation9 + $0x7c] ss:$12 sps:$4 sm:$0xff]  }
0x1bfb   :  { %v7856_v18 = vld [vmem:[#allocation9 + $0x94] ss:$12 sps:$4 sm:$0xff]  }
0x1bfc   :  { %4159 = vrot.lane.b32.xlu1 %v4157_v33, %s8128_s21  ;;  %v7855_v33 = vld [vmem:[#allocation9 + $0x98] ss:$12 sps:$4 sm:$0xff]  }
0x1bff   :  { %v4270_v1 = vpop.f32.mrb[112].mxu0 }
0x1c00   :  { %v7127_v34 = vpop.f32.mrb[113].mxu0 }
0x1c01   :  { %v4273_v52 = vpop.f32.mrb[114].mxu0  ;;  %v7858_v34 = vld [vmem:[#allocation9 + $0xac] ss:$12 sps:$4 sm:$0xff]  }
0x1c02   :  { %v4277_v42 = vpack.c.bf16 %v4273_v52, %v4270_v1  ;;  %v7128_v4 = vpop.f32.mrb[115].mxu0  ;;  %v7857_v1 = vld [vmem:[#allocation9 + $0xb0] ss:$12 sps:$4 sm:$0xff]  }
0x1c04   :  { %4278 = vst.msk [vmem:[#allocation2 + $0x8] sm:$0xff] %vm587_vm1, %v4277_v42 }
0x1c09   :  { %v4396_v46 = vpop.f32.mrb[116].mxu0 }
0x1c0a   :  { %v7139_v3 = vpop.f32.mrb[117].mxu0 }
0x1c0b   :  { %v4399_v56 = vpop.f32.mrb[118].mxu0 }
0x1c0c   :  { %v4403_v19 = vpack.c.bf16 %v4399_v56, %v4396_v46  ;;  %v7140_v17 = vpop.f32.mrb[119].mxu0 }
0x1c0e   :  { %4405 = vrot.lane.b32.xlu1 %v4403_v19, %s8129_s23 }
0x1c2a   :  { %v4523_v10 = vpop.f32.mrb[120].mxu0 }
0x1c2b   :  { %v7151_v53 = vpop.f32.mrb[121].mxu0 }
0x1c2c   :  { %v4526_v23 = vpop.f32.mrb[122].mxu0 }
0x1c2d   :  { %v4530_v31 = vpack.c.bf16 %v4526_v23, %v4523_v10  ;;  %v7152_v38 = vpop.f32.mrb[123].mxu0 }
0x1c2f   :  { %4532 = vrot.lane.b32.xlu0 %v4530_v31, %s8119_s5 }
0x1c31   :  { %v3906_v41 = vpop.permute.xlu1 %3905 }
0x1c32   :  { %3908 = vst.msk [vmem:[#allocation2] sm:$0xff] %vm834_vm5, %v3906_v41  ;;  %v4650_v6 = vpop.f32.mrb[124].mxu0 }
0x1c33   :  { %v7163_v54 = vpop.f32.mrb[125].mxu0 }
0x1c34   :  { %v4653_v20 = vpop.f32.mrb[126].mxu0 }
0x1c35   :  { %v4657_v40 = vpack.c.bf16 %v4653_v20, %v4650_v6  ;;  %v7164_v7 = vpop.f32.mrb[127].mxu0 }
0x1c37   :  { %4659 = vrot.lane.b32.xlu1 %v4657_v40, %s8128_s21 }
0x1c66   :  { %v4033_v50 = vpop.permute.xlu1 %4032 }
0x1c67   :  { %4035 = vst.msk [vmem:[#allocation2] sm:$0xff] %vm962_vm6, %v4033_v50 }
0x1c6e   :  { %v4160_v35 = vpop.permute.xlu1 %4159 }
0x1c6f   :  { %4162 = vst.msk [vmem:[#allocation2] sm:$0xff] %vm1090_vm7, %v4160_v35 }
0x1c76   :  { %v4663_v12 = vld [vmem:[#allocation2] sm:$0xff] }
0x1c77   :  { %7181 = vmatprep.mubr.bf16.mxu1 %v4663_v12 }
0x1c80   :  { %v4406_v9 = vpop.permute.xlu1 %4405 }
0x1c81   :  { %4408 = vst.msk [vmem:[#allocation2 + $0x8] sm:$0xff] %vm834_vm5, %v4406_v9 }
0x1ca1   :  { %v4533_v8 = vpop.permute.xlu0 %4532 }
0x1ca2   :  { %4535 = vst.msk [vmem:[#allocation2 + $0x8] sm:$0xff] %vm962_vm6, %v4533_v8 }
0x1ca9   :  { %v4660_v51 = vpop.permute.xlu1 %4659 }
0x1caa   :  { %4662 = vst.msk [vmem:[#allocation2 + $0x8] sm:$0xff] %vm1090_vm7, %v4660_v51 }
0x1cb1   :  { %v4664_v13 = vld [vmem:[#allocation2 + $0x8] sm:$0xff] }
0x1cb2   :  { %7182 = vmatmul.mubr.bf16.vlgmr.msra.gmra.mrb[124].mxu1 %v4664_v13 }
0x1cb3   :  { %4822 = vmatpush1.bf16.msra.mxu1 %v7844_v44  ;;  %4853 = vmatprep.mubr.bf16.mxu1 %v8125_v0 }
0x1cb4   :  { %4823 = vmatprep.subr.bf16.mxu1 %v7845_v37 }
0x1cb7   :  { %4824 = vmatpush1.bf16.msra.mxu1 %v7846_v39 }
0x1cb8   :  { %4825 = vmatprep.subr.bf16.mxu1 %v7847_v32 }
0x1cbb   :  { %4826 = vmatpush1.bf16.msra.mxu1 %v7848_v21 }
0x1cbc   :  { %4827 = vmatprep.subr.bf16.mxu1 %v7849_v24 }
0x1cbf   :  { %4828 = vmatpush1.bf16.msra.mxu1 %v7850_v45 }
0x1cc0   :  { %4829 = vmatprep.subr.bf16.mxu1 %v7851_v15 }
0x1cc3   :  { %4830 = vmatpush1.bf16.msra.mxu1 %v7852_v47 }
0x1cc4   :  { %4831 = vmatprep.subr.bf16.mxu1 %v7853_v14 }
0x1cc7   :  { %4832 = vmatpush1.bf16.msra.mxu1 %v7854_v62 }
0x1cc8   :  { %4833 = vmatprep.subr.bf16.mxu1 %v7855_v33 }
0x1ccb   :  { %4834 = vmatpush1.bf16.msra.mxu1 %v7856_v18 }
0x1ccc   :  { %4835 = vmatprep.subr.bf16.mxu1 %v7857_v1 }
0x1ccf   :  { %4836 = vmatpush1.bf16.msra.mxu1 %v7858_v34 }
0x1cd0   :  { %7235 = vmatprep.subr.bf16.mxu1 %v8126_v27 }
0x1cd2   :  { %4854 = vmatmul.mubr.bf16.vlgmr.msra.gmra.mrb[128].mxu1 %v9116_v57 }
0x1cd3   :  { %4863 = vmatprep.mubr.bf16.mxu1 %v8125_v0 }
0x1cda   :  { %4864 = vmatmul.mubr.bf16.gmra.mrb[132].mxu1 %v9131_v36 }
0x1cdb   :  { %7237 = vmatprep.mubr.msk.bf16.mxu1 %vm8127_vm0, %v8126_v27 }
0x1d85   :  { %v7183_v52 = vpop.f32.mrb[124].mxu1 }
0x1d86   :  { %v4699_v42 = vpop.f32.mrb[125].mxu1  ;;  %v4708_v56 = vadd.f32 %v7183_v52, %v8661_v58 }
0x1d87   :  { %v4700_v4 = vadd.f32 %v4699_v42, %v8661_v58  ;;  %v7184_v46 = vpop.f32.mrb[126].mxu1 }
0x1d88   :  { %v4702_v3 = vpop.f32.mrb[127].mxu1  ;;  %v4716_v36 = vadd.f32 %v4708_v56, %v9124_v2  ;;  %v4711_v10 = vadd.f32 %v7184_v46, %v8661_v58 }
0x1d89   :  { %v4714_v19 = vadd.f32 %v4700_v4, %v9109_v11  ;;  %v4703_v17 = vadd.f32 %v4702_v3, %v8661_v58 }
0x1d8a   :  { %v4717_v53 = vadd.f32 %v4711_v10, %v9127_v49 }
0x1d8b   :  { %v4715_v57 = vadd.f32 %v4703_v17, %v9112_v5  ;;  %4718 = vadd.xlane.f32.xlu0 %v4714_v19 }
0x1d8d   :  { %4720 = vadd.xlane.f32.xlu1 %v4715_v57 }
0x1d8f   :  { %4722 = vadd.xlane.f32.xlu0 %v4716_v36 }
0x1d93   :  { %4724 = vadd.xlane.f32.xlu0 %v4717_v53 }
0x1da5   :  { %v4855_v23 = vpop.f32.mrb[128].mxu1 }
0x1da6   :  { %v4857_v31 = vpop.f32.mrb[129].mxu1  ;;  %v4856_v41 = vadd.f32 %v4855_v23, %v8736_v28 }
0x1da7   :  { %v4859_v38 = vpop.f32.mrb[130].mxu1  ;;  %v4858_v5 = vadd.f32 %v4857_v31, %v8741_v59 }
0x1da8   :  { %v4860_v11 = vadd.f32 %v4859_v38, %v8736_v28  ;;  %v4861_v6 = vpop.f32.mrb[131].mxu1 }
0x1da9   :  { %v4862_v54 = vadd.f32 %v4861_v6, %v8741_v59 }
0x1daa   :  { %v9453_v2 = vpack.c.bf16 %v4860_v11, %v4856_v41 }
0x1dab   :  { %v9455_v58 = vpack.c.bf16 %v4862_v54, %v4858_v5 }
0x1dad   :  { %v4865_v20 = vpop.f32.mrb[132].mxu1 }
0x1dae   :  { %v4867_v40 = vpop.f32.mrb[133].mxu1  ;;  %v4866_v7 = vadd.f32 %v4865_v20, %v8736_v28 }
0x1daf   :  { %v4869_v49 = vpop.f32.mrb[134].mxu1  ;;  %v4868_v12 = vadd.f32 %v4867_v40, %v8741_v59 }
0x1db0   :  { %v4870_v50 = vadd.f32 %v4869_v49, %v8736_v28  ;;  %v4871_v35 = vpop.f32.mrb[135].mxu1 }
0x1db1   :  { %v4872_v9 = vadd.f32 %v4871_v35, %v8741_v59 }
0x1db2   :  { %v9461_v8 = vpack.c.bf16 %v4870_v50, %v4866_v7 }
0x1db3   :  { %v9463_v51 = vpack.c.bf16 %v4872_v9, %v4868_v12 }
0x1e18   :  { %v4719_v13 = vpop.xlane.xlu0 %4718 }
0x1e19   :  { %v4726_v44 = vmul.f32 0.0078125, %v4719_v13  ;;  %v4888_v13 = vsel %vm587_vm1, %v9453_v2, 0 }
0x1e1a   :  { %v4721_v37 = vpop.xlane.xlu1 %4720 }
0x1e1b   :  { %v4730_v39 = vsub.f32 %v4714_v19, %v4726_v44  ;;  %v4727_v32 = vmul.f32 0.0078125, %v4721_v37 }
0x1e1c   :  { %v4723_v21 = vpop.xlane.xlu0 %4722 }
0x1e1d   :  { %v4731_v24 = vsub.f32 %v4715_v57, %v4727_v32  ;;  %v4728_v45 = vmul.f32 0.0078125, %v4723_v21  ;;  %v4734_v15 = vmul.f32 %v4730_v39, %v4730_v39 }
0x1e1f   :  { %v4732_v47 = vsub.f32 %v4716_v36, %v4728_v45  ;;  %4738 = vadd.xlane.f32.xlu1 %v4734_v15  ;;  %v4735_v28 = vmul.f32 %v4731_v24, %v4731_v24 }
0x1e20   :  { %v4725_v14 = vpop.xlane.xlu0 %4724 }
0x1e21   :  { %v4729_v62 = vmul.f32 0.0078125, %v4725_v14  ;;  %4740 = vadd.xlane.f32.xlu0 %v4735_v28  ;;  %v4736_v59 = vmul.f32 %v4732_v47, %v4732_v47 }
0x1e23   :  { %v4733_v33 = vsub.f32 %v4717_v53, %v4729_v62  ;;  %4742 = vadd.xlane.f32.xlu1 %v4736_v59 }
0x1e25   :  { %v4737_v18 = vmul.f32 %v4733_v33, %v4733_v33 }
0x1e27   :  { %4744 = vadd.xlane.f32.xlu0 %v4737_v18 }
0x1eac   :  { %v4739_v1 = vpop.xlane.xlu1 %4738 }
0x1ead   :  { %v4746_v34 = vmul.f32 0.0078125, %v4739_v1 }
0x1eae   :  { %v4741_v52 = vpop.xlane.xlu0 %4740 }
0x1eaf   :  { %v4750_v42 = vadd.f32 1e-05, %v4746_v34  ;;  %v4747_v4 = vmul.f32 0.0078125, %v4741_v52 }
0x1eb0   :  { %v4743_v46 = vpop.xlane.xlu1 %4742 }
0x1eb1   :  { %7707 = vrsqrt.f32 %v4750_v42  ;;  %v4751_v3 = vadd.f32 1e-05, %v4747_v4  ;;  %v4748_v56 = vmul.f32 0.0078125, %v4743_v46 }
0x1eb3   :  { %7709 = vrsqrt.f32 %v4751_v3  ;;  %v4752_v19 = vadd.f32 1e-05, %v4748_v56 }
0x1eb4   :  { %v4745_v17 = vpop.xlane.xlu0 %4744 }
0x1eb5   :  { %7711 = vrsqrt.f32 %v4752_v19  ;;  %v4749_v57 = vmul.f32 0.0078125, %v4745_v17 }
0x1eb7   :  { %v4753_v36 = vadd.f32 1e-05, %v4749_v57 }
0x1eb9   :  { %7713 = vrsqrt.f32 %v4753_v36 }
0x1ebb   :  { %v7708_v10 = vpop.eup %7707 }
0x1ebc   :  { %v4758_v53 = vmul.f32 %v7708_v10, %v4730_v39 }
0x1ebd   :  { %v7710_v23 = vpop.eup %7709 }
0x1ebe   :  { %v4759_v31 = vmul.f32 %v7710_v23, %v4731_v24  ;;  %v4762_v38 = vmul.f32 %v4758_v53, %v8697_v48 }
0x1ebf   :  { %v7712_v41 = vpop.eup %7711 }
0x1ec0   :  { %v4760_v11 = vmul.f32 %v7712_v41, %v4732_v47  ;;  %v4763_v6 = vmul.f32 %v4759_v31, %v8697_v48  ;;  %v9468_v5 = vadd.f32 %v4762_v38, %v8709_v61 }
0x1ec2   :  { %v9471_v54 = vadd.f32 %v4763_v6, %v8709_v61  ;;  %v4764_v7 = vmul.f32 %v4760_v11, %v8697_v48 }
0x1ec3   :  { %v7714_v20 = vpop.eup %7713 }
0x1ec4   :  { %v4761_v40 = vmul.f32 %v7714_v20, %v4733_v33  ;;  %v4770_v49 = vpack.c.bf16 %v9471_v54, %v9468_v5  ;;  %v9478_v35 = vadd.f32 %v4764_v7, %v8709_v61 }
0x1ec6   :  { %7201 = vmatprep.mubr.bf16.mxu0 %v4770_v49  ;;  %v4765_v50 = vmul.f32 %v4761_v40, %v8697_v48 }
0x1ec8   :  { %v9481_v12 = vadd.f32 %v4765_v50, %v8709_v61 }
0x1eca   :  { %v4771_v9 = vpack.c.bf16 %v9481_v12, %v9478_v35 }
0x1ecc   :  { %7202 = vmatmul.mubr.bf16.vlgmr.msra.gmra.mrb[128].mxu0 %v4771_v9 }
0x1ecd   :  { %7206 = vmatpush3.bf16.xpose.msra.mxu0 %v4888_v13  ;;  %7207 = vmatprep.mubr.msk.bf16.mxu0 %vm8127_vm0, %v8126_v27 }
0x1ece   :  { %7211 = vmatprep.subr.bf16.mxu0 %v8126_v27 }
0x1f9f   :  { %v7203_v48 = vpop.f32.mrb[128].mxu0 }
0x1fa0   :  { %v4815_v44 = vadd.f32 %v7203_v48, %v8754_v55  ;;  %v4806_v37 = vpop.f32.mrb[129].mxu0 }
0x1fa1   :  { %v4807_v61 = vadd.f32 %v4806_v37, %v8754_v55  ;;  %v7204_v39 = vpop.f32.mrb[130].mxu0 }
0x1fa2   :  { %v4818_v32 = vadd.f32 %v7204_v39, %v8754_v55  ;;  %v4809_v21 = vpop.f32.mrb[131].mxu0  ;;  %v4876_v45 = vmul.f32 0.17677669, %v4815_v44 }
0x1fa3   :  { %v4810_v24 = vadd.f32 %v4809_v21, %v8754_v55  ;;  %v4874_v47 = vmul.f32 0.17677669, %v4807_v61 }
0x1fa4   :  { %v4877_v15 = vmul.f32 0.17677669, %v4818_v32 }
0x1fa5   :  { %v4875_v28 = vmul.f32 0.17677669, %v4810_v24 }
0x1fa6   :  { %v9494_v14 = vpack.c.bf16 %v4877_v15, %v4876_v45 }
0x1fa7   :  { %v9496_v62 = vpack.c.bf16 %v4875_v28, %v4874_v47 }
0x1fa9   :  { %7208 = vmatmul.mubr.msk.bf16.vlgmr.msra.gmra.mrb[132].mxu0 %vm587_vm1, %v9496_v62 }
0x1faa   :  { %7212 = vmatpush3.bf16.msra.mxu0 %v9455_v58  ;;  %7213 = vmatprep.mubr.msk.bf16.mxu0 %vm8127_vm0, %v8126_v27 }
0x1fab   :  { %7217 = vmatprep.subr.bf16.mxu0 %v8126_v27 }
0x207c   :  { %v4924_v59 = vpop.f32.mrb[132].mxu0 }
0x207d   :  { %v7209_v55 = vpop.f32.mrb[133].mxu0  ;;  %v4931_v33 = vsel %vm635_vm4, %v4924_v59, -inf }
0x207e   :  { %4932 = vmax.xlane.f32.xlu1 %v4931_v33  ;;  %v4927_v18 = vpop.f32.mrb[134].mxu0 }
0x207f   :  { %v7210_v1 = vpop.f32.mrb[135].mxu0  ;;  %v4934_v34 = vsel %vm635_vm4, %v4927_v18, -inf }
0x2080   :  { %4935 = vmax.xlane.f32.xlu0 %v4934_v34 }
0x210b   :  { %v4933_v52 = vpop.xlane.xlu1 %4932 }
0x210c   :  { %v4937_v42 = vsub.f32 %v4924_v59, %v4933_v52 }
0x210d   :  { %v4936_v4 = vpop.xlane.xlu0 %4935 }
0x210e   :  { %v4939_v46 = vmul.f32 1.442695, %v4937_v42  ;;  %v4938_v3 = vsub.f32 %v4927_v18, %v4936_v4 }
0x2110   :  { %7715 = vpow2.f32 %v4939_v46  ;;  %v4941_v56 = vmul.f32 1.442695, %v4938_v3 }
0x2112   :  { %7717 = vpow2.f32 %v4941_v56 }
0x211a   :  { %v7716_v19 = vpop.eup %7715 }
0x211b   :  { %v4943_v17 = vsel %vm635_vm4, %v7716_v19, 0.0 }
0x211c   :  { %v7718_v57 = vpop.eup %7717  ;;  %4944 = vadd.xlane.f32.xlu1 %v4943_v17 }
0x211d   :  { %v4946_v36 = vsel %vm635_vm4, %v7718_v57, 0.0 }
0x211e   :  { %4947 = vadd.xlane.f32.xlu0 %v4946_v36 }
0x212d   :  { %5004 = vrot.lane.b32.xlu1 %v9453_v2, %s8128_s21 }
0x2134   :  { %5001 = vrot.lane.b32.xlu0 %v9496_v62, %s8128_s21 }
0x21a9   :  { %v4945_v10 = vpop.xlane.xlu1 %4944 }
0x21aa   :  { %7719 = vrcp.f32 %v4945_v10  ;;  %v5388_v10 = vsel %vm587_vm1, %v9461_v8, 0 }
0x21ab   :  { %v4948_v53 = vpop.xlane.xlu0 %4947 }
0x21ac   :  { %7721 = vrcp.f32 %v4948_v53 }
0x21ad   :  { %v5005_v11 = vpop.permute.xlu1 %5004 }
0x21ae   :  { %v5010_v20 = vsel %vm587_vm1, %v5005_v11, 0 }
0x21af   :  { %v5002_v40 = vpop.permute.xlu0 %5001 }
0x21b4   :  { %v7720_v23 = vpop.eup %7719 }
0x21b5   :  { %v4951_v38 = vmul.f32 %v7720_v23, %v7716_v19 }
0x21b6   :  { %v7722_v31 = vpop.eup %7721 }
0x21b7   :  { %v4952_v41 = vmul.f32 %v7722_v31, %v7718_v57 }
0x21b9   :  { %v4953_v6 = vpack.c.bf16 %v4952_v41, %v4951_v38 }
0x21bb   :  { %7214 = vmatmul.mubr.msk.bf16.vlgmr.msra.gmra.mrb[136].mxu0 %vm635_vm4, %v4953_v6  ;;  %v7859_v6 = vld [vmem:[#allocation11] sm:$0xff]  }
0x21bc   :  { %7218 = vmatpush3.bf16.xpose.msra.mxu0 %v5010_v20  ;;  %7219 = vmatprep.mubr.msk.bf16.mxu0 %vm8127_vm0, %v8126_v27 }
0x21bd   :  { %7223 = vmatprep.subr.bf16.mxu0 %v8126_v27 }
0x21c3   :  { %7220 = vmatmul.mubr.msk.bf16.vlgmr.msra.gmra.mrb[140].mxu0 %vm587_vm1, %v5002_v40  ;;  %v7860_v40 = vld [vmem:[#allocation11 + $0x8] sm:$0xff]  }
0x21c4   :  { %7225 = vmatprep.mubr.msk.bf16.mxu0 %vm8127_vm0, %v8126_v27 }
0x228e   :  { %v4991_v49 = vpop.f32.mrb[136].mxu0 }
0x228f   :  { %v7215_v7 = vpop.f32.mrb[137].mxu0 }
0x2290   :  { %v4994_v50 = vpop.f32.mrb[138].mxu0  ;;  %v7862_v7 = vld [vmem:[#allocation11 + $0x18] sm:$0xff]  }
0x2291   :  { %v4998_v9 = vpack.c.bf16 %v4994_v50, %v4991_v49  ;;  %v7216_v13 = vpop.f32.mrb[139].mxu0  ;;  %v7861_v49 = vld [vmem:[#allocation11 + $0x10] sm:$0xff]   ;;  %v7863_v50 = vld [vmem:[#allocation11 + $0x20] sm:$0xff]  }
0x2292   :  { %v7865_v13 = vld [vmem:[#allocation11 + $0x30] sm:$0xff]  }
0x2293   :  { %4999 = vst.msk [vmem:[#allocation2] sm:$0xff] %vm587_vm1, %v4998_v9  ;;  %v7864_v9 = vld [vmem:[#allocation11 + $0x28] sm:$0xff]  }
0x2296   :  { %v5046_v48 = vpop.f32.mrb[140].mxu0 }
0x2297   :  { %v7221_v44 = vpop.f32.mrb[141].mxu0  ;;  %v5053_v37 = vsel %vm635_vm4, %v5046_v48, -inf }
0x2298   :  { %5054 = vmax.xlane.f32.xlu1 %v5053_v37  ;;  %v5049_v61 = vpop.f32.mrb[142].mxu0  ;;  %v7867_v44 = vld [vmem:[#allocation14 + $0x40] sm:$0xff]  }
0x2299   :  { %v7222_v39 = vpop.f32.mrb[143].mxu0  ;;  %v5056_v32 = vsel %vm635_vm4, %v5049_v61, -inf }
0x229a   :  { %5057 = vmax.xlane.f32.xlu0 %v5056_v32 }
0x22a9   :  { %5077 = vrot.lane.b32.xlu1 %v9455_v58, %s8128_s21 }
0x2325   :  { %v5055_v21 = vpop.xlane.xlu1 %5054 }
0x2326   :  { %v5059_v24 = vsub.f32 %v5046_v48, %v5055_v21  ;;  %v7866_v48 = vld [vmem:[#allocation11 + $0x38] sm:$0xff]  }
0x2327   :  { %v5058_v45 = vpop.xlane.xlu0 %5057 }
0x2328   :  { %v5061_v15 = vmul.f32 1.442695, %v5059_v24  ;;  %v5060_v47 = vsub.f32 %v5049_v61, %v5058_v45 }
0x2329   :  { %v5078_v28 = vpop.permute.xlu1 %5077 }
0x232a   :  { %7723 = vpow2.f32 %v5061_v15  ;;  %v5063_v59 = vmul.f32 1.442695, %v5060_v47  ;;  %7224 = vmatpush3.bf16.msra.mxu0 %v5078_v28 }
0x232b   :  { %7229 = vmatprep.subr.bf16.mxu0 %v8126_v27 }
0x232c   :  { %7725 = vpow2.f32 %v5063_v59 }
0x2334   :  { %v7724_v55 = vpop.eup %7723 }
0x2335   :  { %v5065_v33 = vsel %vm635_vm4, %v7724_v55, 0.0 }
0x2336   :  { %v7726_v18 = vpop.eup %7725  ;;  %5066 = vadd.xlane.f32.xlu1 %v5065_v33 }
0x2337   :  { %v5068_v1 = vsel %vm635_vm4, %v7726_v18, 0.0 }
0x2338   :  { %5069 = vadd.xlane.f32.xlu0 %v5068_v1 }
0x2347   :  { %5130 = vrot.lane.b32.xlu1 %v9496_v62, %s8119_s5 }
0x234b   :  { %5259 = vrot.lane.b32.xlu1 %v9453_v2, %s8129_s23 }
0x234e   :  { %5132 = vrot.lane.b32.xlu0 %v9453_v2, %s8119_s5 }
0x234f   :  { %5504 = vrot.lane.b32.xlu1 %v9461_v8, %s8128_s21 }
0x2352   :  { %5257 = vrot.lane.b32.xlu0 %v9496_v62, %s8129_s23 }
0x2353   :  { %5632 = vrot.lane.b32.xlu1 %v9461_v8, %s8119_s5 }
0x2356   :  { %5501 = vrot.lane.b32.xlu0 %v9494_v14, %s8128_s21 }
0x2357   :  { %5759 = vrot.lane.b32.xlu1 %v9461_v8, %s8129_s23 }
0x235a   :  { %5630 = vrot.lane.b32.xlu0 %v9494_v14, %s8119_s5 }
0x235e   :  { %5757 = vrot.lane.b32.xlu0 %v9494_v14, %s8129_s23 }
0x23c3   :  { %v5067_v2 = vpop.xlane.xlu1 %5066 }
0x23c4   :  { %7727 = vrcp.f32 %v5067_v2 }
0x23c5   :  { %v5070_v34 = vpop.xlane.xlu0 %5069 }
0x23c6   :  { %7729 = vrcp.f32 %v5070_v34 }
0x23c7   :  { %v5131_v56 = vpop.permute.xlu1 %5130 }
0x23c9   :  { %v5133_v46 = vpop.permute.xlu0 %5132 }
0x23ca   :  { %v5138_v19 = vsel %vm587_vm1, %v5133_v46, 0 }
0x23cb   :  { %v5260_v17 = vpop.permute.xlu1 %5259 }
0x23cc   :  { %v5265_v57 = vsel %vm587_vm1, %v5260_v17, 0 }
0x23cd   :  { %v5258_v36 = vpop.permute.xlu0 %5257 }
0x23ce   :  { %v7728_v62 = vpop.eup %7727 }
0x23cf   :  { %v5073_v42 = vmul.f32 %v7728_v62, %v7724_v55  ;;  %v5505_v53 = vpop.permute.xlu1 %5504 }
0x23d0   :  { %v7730_v52 = vpop.eup %7729  ;;  %v5510_v23 = vsel %vm587_vm1, %v5505_v53, 0 }
0x23d1   :  { %v5074_v4 = vmul.f32 %v7730_v52, %v7726_v18  ;;  %v5502_v8 = vpop.permute.xlu0 %5501 }
0x23d3   :  { %v5075_v3 = vpack.c.bf16 %v5074_v4, %v5073_v42  ;;  %v5633_v31 = vpop.permute.xlu1 %5632 }
0x23d4   :  { %v5638_v38 = vsel %vm587_vm1, %v5633_v31, 0 }
0x23d5   :  { %7226 = vmatmul.mubr.msk.bf16.vlgmr.msra.gmra.mrb[144].mxu0 %vm635_vm4, %v5075_v3 }
0x23d6   :  { %7230 = vmatpush3.bf16.xpose.msra.mxu0 %v5138_v19  ;;  %7231 = vmatprep.mubr.msk.bf16.mxu0 %vm8127_vm0, %v8126_v27 }
0x23d7   :  { %7241 = vmatprep.subr.bf16.mxu0 %v8126_v27  ;;  %v5760_v41 = vpop.permute.xlu1 %5759 }
0x23d8   :  { %v5765_v11 = vsel %vm587_vm1, %v5760_v41, 0 }
0x23dd   :  { %7232 = vmatmul.mubr.msk.bf16.vlgmr.msra.gmra.mrb[148].mxu0 %vm587_vm1, %v5131_v56 }
0x23de   :  { %7242 = vmatpush3.bf16.xpose.msra.mxu0 %v5265_v57  ;;  %7243 = vmatprep.mubr.msk.bf16.mxu0 %vm8127_vm0, %v8126_v27 }
0x23df   :  { %7253 = vmatprep.subr.bf16.mxu0 %v8126_v27 }
0x23e5   :  { %7244 = vmatmul.mubr.msk.bf16.vlgmr.msra.gmra.mrb[152].mxu0 %vm587_vm1, %v5258_v36 }
0x23e6   :  { %7254 = vmatpush3.bf16.xpose.msra.mxu0 %v5388_v10  ;;  %7255 = vmatprep.mubr.msk.bf16.mxu0 %vm8127_vm0, %v8126_v27 }
0x23e7   :  { %7265 = vmatprep.subr.bf16.mxu0 %v8126_v27 }
0x23ed   :  { %7256 = vmatmul.mubr.msk.bf16.vlgmr.msra.gmra.mrb[156].mxu0 %vm587_vm1, %v9494_v14  ;;  %v5631_v14 = vpop.permute.xlu0 %5630 }
0x23ee   :  { %7266 = vmatpush3.bf16.xpose.msra.mxu0 %v5510_v23  ;;  %7267 = vmatprep.mubr.msk.bf16.mxu0 %vm8127_vm0, %v8126_v27 }
0x23ef   :  { %7277 = vmatprep.subr.bf16.mxu0 %v8126_v27 }
0x23f1   :  { %v5758_v20 = vpop.permute.xlu0 %5757 }
0x23f5   :  { %7268 = vmatmul.mubr.msk.bf16.vlgmr.msra.gmra.mrb[160].mxu0 %vm587_vm1, %v5502_v8 }
0x23f6   :  { %7278 = vmatpush3.bf16.xpose.msra.mxu0 %v5638_v38  ;;  %7279 = vmatprep.mubr.msk.bf16.mxu0 %vm8127_vm0, %v8126_v27 }
0x23f7   :  { %7289 = vmatprep.subr.bf16.mxu0 %v8126_v27 }
0x23fd   :  { %7280 = vmatmul.mubr.msk.bf16.vlgmr.msra.gmra.mrb[164].mxu0 %vm587_vm1, %v5631_v14 }
0x23fe   :  { %7290 = vmatpush3.bf16.xpose.msra.mxu0 %v5765_v11  ;;  %7291 = vmatprep.mubr.msk.bf16.mxu0 %vm8127_vm0, %v8126_v27 }
0x23ff   :  { %7301 = vmatprep.subr.bf16.mxu0 %v7859_v6 }
0x2405   :  { %7292 = vmatmul.mubr.msk.bf16.vlgmr.msra.gmra.mrb[168].mxu0 %vm587_vm1, %v5758_v20 }
0x2406   :  { %7302 = vmatpush3.bf16.msra.mxu0 %v7859_v6 }
0x2407   :  { %7303 = vmatprep.subr.bf16.mxu0 %v7860_v40 }
0x240a   :  { %7304 = vmatpush3.bf16.msra.mxu0 %v7860_v40 }
0x240b   :  { %7305 = vmatprep.subr.bf16.mxu0 %v7861_v49 }
0x240e   :  { %7306 = vmatpush3.bf16.msra.mxu0 %v7861_v49 }
0x240f   :  { %7307 = vmatprep.subr.bf16.mxu0 %v7862_v7 }
0x2412   :  { %7308 = vmatpush3.bf16.msra.mxu0 %v7862_v7 }
0x2413   :  { %7309 = vmatprep.subr.bf16.mxu0 %v7863_v50 }
0x2416   :  { %7310 = vmatpush3.bf16.msra.mxu0 %v7863_v50 }
0x2417   :  { %7311 = vmatprep.subr.bf16.mxu0 %v7864_v9 }
0x241a   :  { %7312 = vmatpush3.bf16.msra.mxu0 %v7864_v9 }
0x241b   :  { %7313 = vmatprep.subr.bf16.mxu0 %v7865_v13 }
0x241e   :  { %7314 = vmatpush3.bf16.msra.mxu0 %v7865_v13 }
0x241f   :  { %7315 = vmatprep.subr.bf16.mxu0 %v7866_v48 }
0x2422   :  { %7316 = vmatpush3.bf16.msra.mxu0 %v7866_v48 }
0x2423   :  { %6749 = vmatprep.subr.bf16.mxu0 %v7867_v44 }
0x24a8   :  { %v9580_v37 = vpop.f32.mrb[144].mxu0 }
0x24a9   :  { %v7227_v61 = vpop.f32.mrb[145].mxu0 }
0x24aa   :  { %v9582_v39 = vpop.f32.mrb[146].mxu0 }
0x24ab   :  { %v5124_v32 = vpack.c.bf16 %v9582_v39, %v9580_v37  ;;  %v7228_v21 = vpop.f32.mrb[147].mxu0 }
0x24b0   :  { %v5174_v24 = vpop.f32.mrb[148].mxu0 }
0x24b1   :  { %v7233_v45 = vpop.f32.mrb[149].mxu0  ;;  %v5181_v15 = vsel %vm635_vm4, %v5174_v24, -inf }
0x24b2   :  { %5182 = vmax.xlane.f32.xlu1 %v5181_v15  ;;  %v5177_v47 = vpop.f32.mrb[150].mxu0 }
0x24b3   :  { %v7234_v28 = vpop.f32.mrb[151].mxu0  ;;  %v5184_v59 = vsel %vm635_vm4, %v5177_v47, -inf }
0x24b4   :  { %5185 = vmax.xlane.f32.xlu0 %v5184_v59 }
0x24b8   :  { %v5301_v55 = vpop.f32.mrb[152].mxu0 }
0x24b9   :  { %v7245_v33 = vpop.f32.mrb[153].mxu0  ;;  %v5308_v18 = vsel %vm635_vm4, %v5301_v55, -inf }
0x24ba   :  { %5309 = vmax.xlane.f32.xlu0 %v5308_v18  ;;  %v5304_v1 = vpop.f32.mrb[154].mxu0 }
0x24bb   :  { %v7246_v2 = vpop.f32.mrb[155].mxu0  ;;  %v5311_v34 = vsel %vm635_vm4, %v5304_v1, -inf }
0x24bc   :  { %5312 = vmax.xlane.f32.xlu1 %v5311_v34 }
0x24c0   :  { %v5424_v62 = vpop.f32.mrb[156].mxu0 }
0x24c1   :  { %v7257_v52 = vpop.f32.mrb[157].mxu0  ;;  %v5431_v42 = vsel %vm635_vm4, %v5424_v62, -inf }
0x24c2   :  { %5432 = vmax.xlane.f32.xlu0 %v5431_v42  ;;  %v5427_v4 = vpop.f32.mrb[158].mxu0 }
0x24c3   :  { %v7258_v46 = vpop.f32.mrb[159].mxu0  ;;  %v5434_v3 = vsel %vm635_vm4, %v5427_v4, -inf }
0x24c4   :  { %5435 = vmax.xlane.f32.xlu1 %v5434_v3 }
0x24c8   :  { %v9592_v56 = vpop.f32.mrb[160].mxu0 }
0x24c9   :  { %v7269_v19 = vpop.f32.mrb[161].mxu0  ;;  %v5553_v17 = vsel %vm635_vm4, %v9592_v56, -inf }
0x24ca   :  { %5554 = vmax.xlane.f32.xlu0 %v5553_v17  ;;  %v9596_v57 = vpop.f32.mrb[162].mxu0 }
0x24cb   :  { %v7270_v36 = vpop.f32.mrb[163].mxu0  ;;  %v5556_v10 = vsel %vm635_vm4, %v9596_v57, -inf }
0x24cc   :  { %5557 = vmax.xlane.f32.xlu1 %v5556_v10 }
0x24d0   :  { %v9600_v53 = vpop.f32.mrb[164].mxu0 }
0x24d1   :  { %v7281_v23 = vpop.f32.mrb[165].mxu0  ;;  %v5681_v31 = vsel %vm635_vm4, %v9600_v53, -inf }
0x24d2   :  { %5682 = vmax.xlane.f32.xlu0 %v5681_v31  ;;  %v9604_v8 = vpop.f32.mrb[166].mxu0 }
0x24d3   :  { %v7282_v38 = vpop.f32.mrb[167].mxu0  ;;  %v5684_v41 = vsel %vm635_vm4, %v9604_v8, -inf }
0x24d4   :  { %5685 = vmax.xlane.f32.xlu1 %v5684_v41 }
0x24d8   :  { %v9608_v14 = vpop.f32.mrb[168].mxu0 }
0x24d9   :  { %v7293_v11 = vpop.f32.mrb[169].mxu0  ;;  %v5808_v6 = vsel %vm635_vm4, %v9608_v14, -inf }
0x24da   :  { %5809 = vmax.xlane.f32.xlu0 %v5808_v6  ;;  %v9612_v20 = vpop.f32.mrb[170].mxu0 }
0x24db   :  { %v7294_v40 = vpop.f32.mrb[171].mxu0  ;;  %v5811_v49 = vsel %vm635_vm4, %v9612_v20, -inf }
0x24dc   :  { %5812 = vmax.xlane.f32.xlu1 %v5811_v49 }
0x24ed   :  { %5331 = vrot.lane.b32.xlu1 %v9455_v58, %s8129_s23 }
0x24f0   :  { %5204 = vrot.lane.b32.xlu0 %v9455_v58, %s8119_s5 }
0x253f   :  { %v5183_v7 = vpop.xlane.xlu1 %5182 }
0x2540   :  { %v5187_v50 = vsub.f32 %v5174_v24, %v5183_v7 }
0x2541   :  { %v5186_v9 = vpop.xlane.xlu0 %5185 }
0x2542   :  { %v5189_v13 = vmul.f32 1.442695, %v5187_v50  ;;  %v5188_v48 = vsub.f32 %v5177_v47, %v5186_v9 }
0x2544   :  { %7731 = vpow2.f32 %v5189_v13  ;;  %v5191_v44 = vmul.f32 1.442695, %v5188_v48 }
0x2546   :  { %7733 = vpow2.f32 %v5191_v44 }
0x2547   :  { %v5310_v61 = vpop.xlane.xlu0 %5309 }
0x2548   :  { %v5314_v21 = vsub.f32 %v5301_v55, %v5310_v61 }
0x2549   :  { %v5313_v45 = vpop.xlane.xlu1 %5312 }
0x254a   :  { %v5316_v15 = vmul.f32 1.442695, %v5314_v21  ;;  %v5315_v28 = vsub.f32 %v5304_v1, %v5313_v45 }
0x254c   :  { %7735 = vpow2.f32 %v5316_v15  ;;  %v5318_v59 = vmul.f32 1.442695, %v5315_v28 }
0x254e   :  { %v9620_v33 = vpop.eup %7731  ;;  %7737 = vpow2.f32 %v5318_v59 }
0x254f   :  { %v5433_v18 = vpop.xlane.xlu0 %5432  ;;  %v5193_v58 = vsel %vm635_vm4, %v9620_v33, 0.0 }
0x2550   :  { %v9624_v24 = vpop.eup %7733  ;;  %v5437_v47 = vsub.f32 %v5424_v62, %v5433_v18  ;;  %5194 = vadd.xlane.f32.xlu0 %v5193_v58 }
0x2551   :  { %v5436_v2 = vpop.xlane.xlu1 %5435  ;;  %v5196_v55 = vsel %vm635_vm4, %v9624_v24, 0.0 }
0x2552   :  { %v5439_v34 = vmul.f32 1.442695, %v5437_v47  ;;  %v5438_v52 = vsub.f32 %v5427_v4, %v5436_v2  ;;  %5197 = vadd.xlane.f32.xlu1 %v5196_v55 }
0x2554   :  { %7739 = vpow2.f32 %v5439_v34  ;;  %v5441_v1 = vmul.f32 1.442695, %v5438_v52 }
0x2556   :  { %v9628_v42 = vpop.eup %7735  ;;  %7741 = vpow2.f32 %v5441_v1 }
0x2557   :  { %v5555_v46 = vpop.xlane.xlu0 %5554  ;;  %v5320_v3 = vsel %vm635_vm4, %v9628_v42, 0.0 }
0x2558   :  { %v9632_v19 = vpop.eup %7737  ;;  %v5559_v62 = vsub.f32 %v9592_v56, %v5555_v46  ;;  %5321 = vadd.xlane.f32.xlu0 %v5320_v3 }
0x2559   :  { %v5558_v17 = vpop.xlane.xlu1 %5557  ;;  %v5323_v36 = vsel %vm635_vm4, %v9632_v19, 0.0 }
0x255a   :  { %v5561_v4 = vmul.f32 1.442695, %v5559_v62  ;;  %v5560_v10 = vsub.f32 %v9596_v57, %v5558_v17  ;;  %5324 = vadd.xlane.f32.xlu1 %v5323_v36 }
0x255c   :  { %7743 = vpow2.f32 %v5561_v4  ;;  %v5563_v23 = vmul.f32 1.442695, %v5560_v10 }
0x255e   :  { %v9638_v31 = vpop.eup %7739  ;;  %7745 = vpow2.f32 %v5563_v23 }
0x255f   :  { %v5683_v38 = vpop.xlane.xlu0 %5682  ;;  %v5443_v41 = vsel %vm635_vm4, %v9638_v31, 0.0 }
0x2560   :  { %v9642_v11 = vpop.eup %7741  ;;  %v5687_v56 = vsub.f32 %v9600_v53, %v5683_v38  ;;  %5444 = vadd.xlane.f32.xlu0 %v5443_v41 }
0x2561   :  { %v5686_v6 = vpop.xlane.xlu1 %5685  ;;  %v5446_v40 = vsel %vm635_vm4, %v9642_v11, 0.0 }
0x2562   :  { %v5689_v57 = vmul.f32 1.442695, %v5687_v56  ;;  %v5688_v49 = vsub.f32 %v9604_v8, %v5686_v6  ;;  %5447 = vadd.xlane.f32.xlu1 %v5446_v40 }
0x2564   :  { %7747 = vpow2.f32 %v5689_v57  ;;  %v5691_v7 = vmul.f32 1.442695, %v5688_v49 }
0x2566   :  { %v9648_v50 = vpop.eup %7743  ;;  %7749 = vpow2.f32 %v5691_v7 }
0x2567   :  { %v5810_v9 = vpop.xlane.xlu0 %5809  ;;  %v5565_v13 = vsel %vm635_vm4, %v9648_v50, 0.0 }
0x2568   :  { %v9652_v48 = vpop.eup %7745  ;;  %5566 = vadd.xlane.f32.xlu0 %v5565_v13  ;;  %v5814_v58 = vsub.f32 %v9608_v14, %v5810_v9 }
0x2569   :  { %v5813_v53 = vpop.xlane.xlu1 %5812  ;;  %v5568_v44 = vsel %vm635_vm4, %v9652_v48, 0.0 }
0x256a   :  { %v5815_v61 = vsub.f32 %v9612_v20, %v5813_v53  ;;  %5569 = vadd.xlane.f32.xlu1 %v5568_v44  ;;  %v5816_v47 = vmul.f32 1.442695, %v5814_v58 }
0x256b   :  { %v5205_v8 = vpop.permute.xlu0 %5204 }
0x256c   :  { %v5818_v21 = vmul.f32 1.442695, %v5815_v61  ;;  %7236 = vmatpush3.bf16.msra.mxu1 %v5205_v8 }
0x256d   :  { %7247 = vmatprep.subr.bf16.mxu1 %v8126_v27  ;;  %v5332_v14 = vpop.permute.xlu1 %5331 }
0x256e   :  { %v9658_v45 = vpop.eup %7747  ;;  %7751 = vpow2.f32 %v5818_v21 }
0x256f   :  { %v5693_v15 = vsel %vm635_vm4, %v9658_v45, 0.0  ;;  %7753 = vpow2.f32 %v5816_v47 }
0x2570   :  { %v9662_v28 = vpop.eup %7749  ;;  %5694 = vadd.xlane.f32.xlu1 %v5693_v15 }
0x2571   :  { %v5696_v59 = vsel %vm635_vm4, %v9662_v28, 0.0 }
0x2574   :  { %5697 = vadd.xlane.f32.xlu1 %v5696_v59 }
0x2578   :  { %v9666_v20 = vpop.eup %7751 }
0x2579   :  { %v5823_v18 = vsel %vm635_vm4, %v9666_v20, 0.0  ;;  %v9675_v2 = vpop.eup %7753 }
0x257a   :  { %5824 = vadd.xlane.f32.xlu1 %v5823_v18  ;;  %v5820_v55 = vsel %vm635_vm4, %v9675_v2, 0.0  ;;  %v7868_v18 = vld [vmem:[#allocation12 + $0x4] ss:$8 sps:$4 sm:$0xff]  }
0x257e   :  { %5577 = vrot.lane.b32.xlu0 %v9463_v51, %s8128_s21 }
0x258b   :  { %5704 = vrot.lane.b32.xlu1 %v9463_v51, %s8119_s5 }
0x259d   :  { %5821 = vadd.xlane.f32.xlu0 %v5820_v55 }
0x25b3   :  { %5831 = vrot.lane.b32.xlu0 %v9463_v51, %s8129_s23 }
0x25b7   :  { %5126 = vrot.lane.b32.xlu0 %v5124_v32, %s8129_s23 }
0x25dd   :  { %v5195_v34 = vpop.xlane.xlu0 %5194 }
0x25de   :  { %7755 = vrcp.f32 %v5195_v34  ;;  %v7870_v34 = vld [vmem:[#allocation12 + $0x14] ss:$8 sps:$4 sm:$0xff]  }
0x25df   :  { %v5198_v52 = vpop.xlane.xlu1 %5197 }
0x25e0   :  { %7757 = vrcp.f32 %v5198_v52  ;;  %v7871_v52 = vld [vmem:[#allocation12 + $0x10] ss:$8 sps:$4 sm:$0xff]  }
0x25e5   :  { %v5322_v1 = vpop.xlane.xlu0 %5321 }
0x25e6   :  { %7759 = vrcp.f32 %v5322_v1  ;;  %v7872_v1 = vld [vmem:[#allocation12 + $0x24] ss:$8 sps:$4 sm:$0xff]  }
0x25e7   :  { %v5325_v46 = vpop.xlane.xlu1 %5324 }
0x25e8   :  { %v7756_v3 = vpop.eup %7755  ;;  %7761 = vrcp.f32 %v5325_v46  ;;  %v7873_v46 = vld [vmem:[#allocation12 + $0x20] ss:$8 sps:$4 sm:$0xff]  }
0x25e9   :  { %v5201_v17 = vmul.f32 %v7756_v3, %v9620_v33  ;;  %v7874_v3 = vld [vmem:[#allocation12 + $0x34] ss:$8 sps:$4 sm:$0xff]  }
0x25ea   :  { %v7758_v62 = vpop.eup %7757 }
0x25eb   :  { %v5202_v36 = vmul.f32 %v7758_v62, %v9624_v24  ;;  %v7877_v62 = vld [vmem:[#allocation12 + $0x40] ss:$8 sps:$4 sm:$0xff]  }
0x25ed   :  { %v5203_v4 = vpack.c.bf16 %v5202_v36, %v5201_v17  ;;  %v5445_v10 = vpop.xlane.xlu0 %5444  ;;  %v7878_v17 = vld [vmem:[#allocation12 + $0x54] ss:$8 sps:$4 sm:$0xff]   ;;  %v7879_v36 = vld [vmem:[#allocation12 + $0x50] ss:$8 sps:$4 sm:$0xff]  }
0x25ee   :  { %7763 = vrcp.f32 %v5445_v10  ;;  %v7881_v10 = vld [vmem:[#allocation12 + $0x60] ss:$8 sps:$4 sm:$0xff]  }
0x25ef   :  { %7238 = vmatmul.mubr.msk.bf16.vlgmr.msra.gmra.mrb[136].mxu1 %vm635_vm4, %v5203_v4  ;;  %v5448_v37 = vpop.xlane.xlu1 %5447  ;;  %v7880_v4 = vld [vmem:[#allocation12 + $0x64] ss:$8 sps:$4 sm:$0xff]  }
0x25f0   :  { %v7760_v39 = vpop.eup %7759  ;;  %7248 = vmatpush3.bf16.msra.mxu1 %v5332_v14  ;;  %7765 = vrcp.f32 %v5448_v37  ;;  %7249 = vmatprep.mubr.msk.bf16.mxu1 %vm8127_vm0, %v8126_v27  ;;  %v7882_v37 = vld [vmem:[#allocation12 + $0x74] ss:$8 sps:$4 sm:$0xff]  }
0x25f1   :  { %7259 = vmatprep.subr.bf16.mxu1 %v8126_v27  ;;  %v5328_v23 = vmul.f32 %v7760_v39, %v9628_v42  ;;  %v7883_v39 = vld [vmem:[#allocation12 + $0x70] ss:$8 sps:$4 sm:$0xff]  }
0x25f2   :  { %v7762_v32 = vpop.eup %7761 }
0x25f3   :  { %v5329_v33 = vmul.f32 %v7762_v32, %v9632_v19 }
0x25f5   :  { %v5567_v24 = vpop.xlane.xlu0 %5566  ;;  %v5330_v38 = vpack.c.bf16 %v5329_v33, %v5328_v23 }
0x25f6   :  { %7767 = vrcp.f32 %v5567_v24 }
0x25f7   :  { %7250 = vmatmul.mubr.msk.bf16.vlgmr.msra.gmra.mrb[140].mxu1 %vm635_vm4, %v5330_v38  ;;  %v5570_v41 = vpop.xlane.xlu1 %5569 }
0x25f8   :  { %v7764_v56 = vpop.eup %7763  ;;  %7260 = vmatpush3.bf16.msra.mxu1 %v9463_v51  ;;  %7769 = vrcp.f32 %v5570_v41  ;;  %7261 = vmatprep.mubr.msk.bf16.mxu1 %vm8127_vm0, %v8126_v27 }
0x25f9   :  { %7271 = vmatprep.subr.bf16.mxu1 %v8126_v27  ;;  %v5451_v42 = vmul.f32 %v7764_v56, %v9638_v31  ;;  %v5578_v49 = vpop.permute.xlu0 %5577 }
0x25fa   :  { %v7766_v6 = vpop.eup %7765 }
0x25fb   :  { %v5452_v19 = vmul.f32 %v7766_v6, %v9642_v11 }
0x25fd   :  { %v5695_v40 = vpop.xlane.xlu1 %5694  ;;  %v5453_v57 = vpack.c.bf16 %v5452_v19, %v5451_v42 }
0x25fe   :  { %7771 = vrcp.f32 %v5695_v40 }
0x25ff   :  { %7262 = vmatmul.mubr.msk.bf16.vlgmr.msra.gmra.mrb[144].mxu1 %vm635_vm4, %v5453_v57 }
0x2600   :  { %v7768_v7 = vpop.eup %7767  ;;  %7272 = vmatpush3.bf16.msra.mxu1 %v5578_v49  ;;  %7273 = vmatprep.mubr.msk.bf16.mxu1 %vm8127_vm0, %v8126_v27 }
0x2601   :  { %v5698_v51 = vpop.xlane.xlu1 %5697  ;;  %7283 = vmatprep.subr.bf16.mxu1 %v8126_v27  ;;  %v5573_v31 = vmul.f32 %v7768_v7, %v9648_v50 }
0x2602   :  { %v7770_v9 = vpop.eup %7769  ;;  %7773 = vrcp.f32 %v5698_v51 }
0x2603   :  { %v5574_v11 = vmul.f32 %v7770_v9, %v9652_v48 }
0x2605   :  { %v5575_v13 = vpack.c.bf16 %v5574_v11, %v5573_v31 }
0x2607   :  { %7274 = vmatmul.mubr.msk.bf16.vlgmr.msra.gmra.mrb[148].mxu1 %vm635_vm4, %v5575_v13  ;;  %v5825_v53 = vpop.xlane.xlu1 %5824 }
0x2608   :  { %7285 = vmatprep.mubr.msk.bf16.mxu1 %vm8127_vm0, %v8126_v27  ;;  %v7772_v44 = vpop.eup %7771  ;;  %7775 = vrcp.f32 %v5825_v53 }
0x2609   :  { %v5701_v21 = vmul.f32 %v7772_v44, %v9658_v45 }
0x260b   :  { %v5705_v61 = vpop.permute.xlu1 %5704 }
0x260c   :  { %v7774_v8 = vpop.eup %7773  ;;  %7284 = vmatpush3.bf16.msra.mxu1 %v5705_v61 }
0x260d   :  { %v5702_v15 = vmul.f32 %v7774_v8, %v9662_v28  ;;  %7295 = vmatprep.subr.bf16.mxu1 %v8126_v27 }
0x260f   :  { %v5703_v50 = vpack.c.bf16 %v5702_v15, %v5701_v21 }
0x2611   :  { %7286 = vmatmul.mubr.msk.bf16.vlgmr.msra.gmra.mrb[152].mxu1 %vm635_vm4, %v5703_v50 }
0x2612   :  { %7297 = vmatprep.mubr.msk.bf16.mxu1 %vm8127_vm0, %v8126_v27  ;;  %v7776_v47 = vpop.eup %7775  ;;  %v7869_v27 = vld [vmem:[#allocation12] ss:$8 sps:$4 sm:$0xff]  }
0x2613   :  { %v5829_v28 = vmul.f32 %v7776_v47, %v9666_v20  ;;  %v7875_v20 = vld [vmem:[#allocation12 + $0x30] ss:$8 sps:$4 sm:$0xff]  }
0x262a   :  { %v5822_v48 = vpop.xlane.xlu0 %5821 }
0x262b   :  { %7777 = vrcp.f32 %v5822_v48 }
0x262e   :  { %v5832_v59 = vpop.permute.xlu0 %5831 }
0x262f   :  { %7296 = vmatpush3.bf16.msra.mxu1 %v5832_v59 }
0x2630   :  { %5993 = vmatprep.subr.bf16.mxu1 %v7868_v18 }
0x2632   :  { %v5127_v58 = vpop.permute.xlu0 %5126 }
0x2633   :  { %5129 = vst.msk [vmem:[#allocation2] sm:$0xff] %vm834_vm5, %v5127_v58 }
0x2635   :  { %v7778_v45 = vpop.eup %7777 }
0x2636   :  { %v5828_v55 = vmul.f32 %v7778_v45, %v9675_v2  ;;  %v7876_v2 = vld [vmem:[#allocation12 + $0x44] ss:$8 sps:$4 sm:$0xff]  }
0x2638   :  { %v5830_v14 = vpack.c.bf16 %v5829_v28, %v5828_v55 }
0x263a   :  { %7298 = vmatmul.mubr.msk.bf16.vlgmr.msra.gmra.mrb[156].mxu1 %vm635_vm4, %v5830_v14 }
0x263b   :  { %5994 = vmatpush1.bf16.msra.mxu1 %v7869_v27  ;;  %6025 = vmatprep.mubr.bf16.mxu1 %v8125_v0 }
0x263c   :  { %5995 = vmatprep.subr.bf16.mxu1 %v7870_v34 }
0x263f   :  { %5996 = vmatpush1.bf16.msra.mxu1 %v7871_v52  ;;  %v7884_v52 = vld [vmem:[#allocation14] sm:$0xff]  }
0x2640   :  { %5997 = vmatprep.subr.bf16.mxu1 %v7872_v1  ;;  %v7885_v1 = vld [vmem:[#allocation14 + $0x48] sm:$0xff]  }
0x2643   :  { %5998 = vmatpush1.bf16.msra.mxu1 %v7873_v46  ;;  %v7886_v46 = vld [vmem:[#allocation14 + $0x8] sm:$0xff]  }
0x2644   :  { %5999 = vmatprep.subr.bf16.mxu1 %v7874_v3  ;;  %v7887_v3 = vld [vmem:[#allocation14 + $0x50] sm:$0xff]  }
0x2647   :  { %6000 = vmatpush1.bf16.msra.mxu1 %v7875_v20  ;;  %v7888_v20 = vld [vmem:[#allocation14 + $0x10] sm:$0xff]  }
0x2648   :  { %6001 = vmatprep.subr.bf16.mxu1 %v7876_v2  ;;  %v7889_v2 = vld [vmem:[#allocation14 + $0x58] sm:$0xff]  }
0x264b   :  { %6002 = vmatpush1.bf16.msra.mxu1 %v7877_v62  ;;  %v7890_v62 = vld [vmem:[#allocation14 + $0x18] sm:$0xff]  }
0x264c   :  { %6003 = vmatprep.subr.bf16.mxu1 %v7878_v17  ;;  %v7891_v17 = vld [vmem:[#allocation14 + $0x60] sm:$0xff]  }
0x264f   :  { %6004 = vmatpush1.bf16.msra.mxu1 %v7879_v36  ;;  %v7892_v36 = vld [vmem:[#allocation14 + $0x20] sm:$0xff]  }
0x2650   :  { %6005 = vmatprep.subr.bf16.mxu1 %v7880_v4  ;;  %v7893_v4 = vld [vmem:[#allocation14 + $0x68] sm:$0xff]  }
0x2653   :  { %6006 = vmatpush1.bf16.msra.mxu1 %v7881_v10  ;;  %v7894_v10 = vld [vmem:[#allocation14 + $0x28] sm:$0xff]  }
0x2654   :  { %6007 = vmatprep.subr.bf16.mxu1 %v7882_v37  ;;  %v7895_v37 = vld [vmem:[#allocation14 + $0x70] sm:$0xff]  }
0x2657   :  { %6008 = vmatpush1.bf16.msra.mxu1 %v7883_v39  ;;  %v7896_v39 = vld [vmem:[#allocation14 + $0x30] sm:$0xff]  }
0x26c2   :  { %v5244_v32 = vpop.f32.mrb[136].mxu1 }
0x26c3   :  { %v7239_v23 = vpop.f32.mrb[137].mxu1 }
0x26c4   :  { %v5247_v33 = vpop.f32.mrb[138].mxu1  ;;  %v7898_v23 = vld [vmem:[#allocation14 + $0x38] sm:$0xff]  }
0x26c5   :  { %v5251_v24 = vpack.c.bf16 %v5247_v33, %v5244_v32  ;;  %v7240_v38 = vpop.f32.mrb[139].mxu1  ;;  %v7897_v32 = vld [vmem:[#allocation14 + $0x78] sm:$0xff]  }
0x26c7   :  { %5253 = vrot.lane.b32.xlu1 %v5251_v24, %s8119_s5 }
0x26ca   :  { %v5371_v41 = vpop.f32.mrb[140].mxu1 }
0x26cb   :  { %v7251_v56 = vpop.f32.mrb[141].mxu1 }
0x26cc   :  { %v5374_v6 = vpop.f32.mrb[142].mxu1 }
0x26cd   :  { %v5378_v42 = vpack.c.bf16 %v5374_v6, %v5371_v41  ;;  %v7252_v19 = vpop.f32.mrb[143].mxu1 }
0x26cf   :  { %5380 = vrot.lane.b32.xlu1 %v5378_v42, %s8128_s21 }
0x26d2   :  { %v5491_v40 = vpop.f32.mrb[144].mxu1 }
0x26d3   :  { %v7263_v57 = vpop.f32.mrb[145].mxu1 }
0x26d4   :  { %v5494_v49 = vpop.f32.mrb[146].mxu1 }
0x26d5   :  { %v5498_v7 = vpack.c.bf16 %v5494_v49, %v5491_v40  ;;  %v7264_v51 = vpop.f32.mrb[147].mxu1 }
0x26d7   :  { %5499 = vst.msk [vmem:[#allocation2 + $0x8] sm:$0xff] %vm587_vm1, %v5498_v7 }
0x26da   :  { %v5617_v9 = vpop.f32.mrb[148].mxu1 }
0x26db   :  { %v7275_v31 = vpop.f32.mrb[149].mxu1 }
0x26dc   :  { %v5620_v11 = vpop.f32.mrb[150].mxu1 }
0x26dd   :  { %v5624_v13 = vpack.c.bf16 %v5620_v11, %v5617_v9  ;;  %v7276_v53 = vpop.f32.mrb[151].mxu1 }
0x26df   :  { %5626 = vrot.lane.b32.xlu0 %v5624_v13, %s8129_s23 }
0x26e4   :  { %v5744_v44 = vpop.f32.mrb[152].mxu1 }
0x26e5   :  { %v7287_v61 = vpop.f32.mrb[153].mxu1 }
0x26e6   :  { %v5747_v8 = vpop.f32.mrb[154].mxu1 }
0x26e7   :  { %v5751_v21 = vpack.c.bf16 %v5747_v8, %v5744_v44  ;;  %v7288_v15 = vpop.f32.mrb[155].mxu1 }
0x26e9   :  { %5753 = vrot.lane.b32.xlu0 %v5751_v21, %s8119_s5 }
0x270d   :  { %v5871_v50 = vpop.f32.mrb[156].mxu1 }
0x270e   :  { %v7299_v48 = vpop.f32.mrb[157].mxu1 }
0x270f   :  { %v5874_v59 = vpop.f32.mrb[158].mxu1 }
0x2710   :  { %v5878_v18 = vpack.c.bf16 %v5874_v59, %v5871_v50  ;;  %v7300_v58 = vpop.f32.mrb[159].mxu1 }
0x2712   :  { %5880 = vrot.lane.b32.xlu1 %v5878_v18, %s8128_s21 }
0x2739   :  { %v5254_v47 = vpop.permute.xlu1 %5253 }
0x273a   :  { %5256 = vst.msk [vmem:[#allocation2] sm:$0xff] %vm962_vm6, %v5254_v47 }
0x2741   :  { %v5381_v45 = vpop.permute.xlu1 %5380 }
0x2742   :  { %5383 = vst.msk [vmem:[#allocation2] sm:$0xff] %vm1090_vm7, %v5381_v45 }
0x2749   :  { %v5884_v28 = vld [vmem:[#allocation2] sm:$0xff] }
0x274a   :  { %7317 = vmatprep.mubr.bf16.mxu0 %v5884_v28 }
0x2751   :  { %v5627_v55 = vpop.permute.xlu0 %5626 }
0x2752   :  { %5629 = vst.msk [vmem:[#allocation2 + $0x8] sm:$0xff] %vm834_vm5, %v5627_v55 }
0x275b   :  { %v5754_v14 = vpop.permute.xlu0 %5753 }
0x275c   :  { %5756 = vst.msk [vmem:[#allocation2 + $0x8] sm:$0xff] %vm962_vm6, %v5754_v14 }
0x2784   :  { %v5881_v27 = vpop.permute.xlu1 %5880 }
0x2785   :  { %5883 = vst.msk [vmem:[#allocation2 + $0x8] sm:$0xff] %vm1090_vm7, %v5881_v27 }
0x278c   :  { %v5885_v34 = vld [vmem:[#allocation2 + $0x8] sm:$0xff] }
0x278d   :  { %7318 = vmatmul.mubr.bf16.vlgmr.msra.gmra.mrb[172].mxu0 %v5885_v34 }
0x278e   :  { %6750 = vmatpush3.bf16.msra.mxu0 %v7884_v52 }
0x278f   :  { %6751 = vmatprep.subr.bf16.mxu0 %v7885_v1 }
0x2792   :  { %6752 = vmatpush3.bf16.msra.mxu0 %v7886_v46 }
0x2793   :  { %6753 = vmatprep.subr.bf16.mxu0 %v7887_v3 }
0x2796   :  { %6754 = vmatpush3.bf16.msra.mxu0 %v7888_v20 }
0x2797   :  { %6755 = vmatprep.subr.bf16.mxu0 %v7889_v2 }
0x279a   :  { %6756 = vmatpush3.bf16.msra.mxu0 %v7890_v62 }
0x279b   :  { %6757 = vmatprep.subr.bf16.mxu0 %v7891_v17 }
0x279e   :  { %6758 = vmatpush3.bf16.msra.mxu0 %v7892_v36 }
0x279f   :  { %6759 = vmatprep.subr.bf16.mxu0 %v7893_v4 }
0x27a2   :  { %6760 = vmatpush3.bf16.msra.mxu0 %v7894_v10 }
0x27a3   :  { %6761 = vmatprep.subr.bf16.mxu0 %v7895_v37 }
0x27a6   :  { %6762 = vmatpush3.bf16.msra.mxu0 %v7896_v39 }
0x27a7   :  { %6763 = vmatprep.subr.bf16.mxu0 %v7897_v32 }
0x27aa   :  { %6764 = vmatpush3.bf16.msra.mxu0 %v7898_v23 }
0x2860   :  { %v7319_v33 = vpop.f32.mrb[172].mxu0 }
0x2861   :  { %v5920_v24 = vpop.f32.mrb[173].mxu0  ;;  %v5929_v6 = vadd.f32 %v7319_v33, %v9001_v60 }
0x2862   :  { %v5921_v38 = vadd.f32 %v5920_v24, %v9001_v60  ;;  %v7320_v41 = vpop.f32.mrb[174].mxu0 }
0x2863   :  { %v5923_v56 = vpop.f32.mrb[175].mxu0  ;;  %v5937_v57 = vadd.f32 %v5929_v6, %v9478_v35  ;;  %v5932_v49 = vadd.f32 %v7320_v41, %v9001_v60 }
0x2864   :  { %v5935_v42 = vadd.f32 %v5921_v38, %v9468_v5  ;;  %v5924_v19 = vadd.f32 %v5923_v56, %v9001_v60 }
0x2865   :  { %v5938_v7 = vadd.f32 %v5932_v49, %v9481_v12 }
0x2866   :  { %v5936_v40 = vadd.f32 %v5924_v19, %v9471_v54  ;;  %5939 = vadd.xlane.f32.xlu0 %v5935_v42 }
0x2868   :  { %5941 = vadd.xlane.f32.xlu1 %v5936_v40 }
0x286a   :  { %5943 = vadd.xlane.f32.xlu0 %v5937_v57 }
0x286e   :  { %5945 = vadd.xlane.f32.xlu0 %v5938_v7 }
0x28f3   :  { %v5940_v51 = vpop.xlane.xlu0 %5939 }
0x28f4   :  { %v5947_v9 = vmul.f32 0.0078125, %v5940_v51 }
0x28f5   :  { %v5942_v31 = vpop.xlane.xlu1 %5941 }
0x28f6   :  { %v5951_v11 = vsub.f32 %v5935_v42, %v5947_v9  ;;  %v5948_v13 = vmul.f32 0.0078125, %v5942_v31 }
0x28f7   :  { %v5944_v5 = vpop.xlane.xlu0 %5943 }
0x28f8   :  { %v5952_v53 = vsub.f32 %v5936_v40, %v5948_v13  ;;  %v5949_v44 = vmul.f32 0.0078125, %v5944_v5  ;;  %v5955_v61 = vmul.f32 %v5951_v11, %v5951_v11 }
0x28fa   :  { %v5953_v54 = vsub.f32 %v5937_v57, %v5949_v44  ;;  %5959 = vadd.xlane.f32.xlu1 %v5955_v61  ;;  %v5956_v8 = vmul.f32 %v5952_v53, %v5952_v53 }
0x28fb   :  { %v5946_v35 = vpop.xlane.xlu0 %5945 }
0x28fc   :  { %v5950_v21 = vmul.f32 0.0078125, %v5946_v35  ;;  %5961 = vadd.xlane.f32.xlu0 %v5956_v8  ;;  %v5957_v60 = vmul.f32 %v5953_v54, %v5953_v54 }
0x28fe   :  { %v5954_v15 = vsub.f32 %v5938_v7, %v5950_v21  ;;  %5963 = vadd.xlane.f32.xlu1 %v5957_v60 }
0x2900   :  { %v5958_v12 = vmul.f32 %v5954_v15, %v5954_v15 }
0x2902   :  { %5965 = vadd.xlane.f32.xlu0 %v5958_v12 }
0x2987   :  { %v5960_v50 = vpop.xlane.xlu1 %5959 }
0x2988   :  { %v5967_v48 = vmul.f32 0.0078125, %v5960_v50 }
0x2989   :  { %v5962_v59 = vpop.xlane.xlu0 %5961 }
0x298a   :  { %v5971_v18 = vadd.f32 1e-05, %v5967_v48  ;;  %v5968_v58 = vmul.f32 0.0078125, %v5962_v59 }
0x298b   :  { %v5964_v47 = vpop.xlane.xlu1 %5963 }
0x298c   :  { %7779 = vrsqrt.f32 %v5971_v18  ;;  %v5972_v45 = vadd.f32 1e-05, %v5968_v58  ;;  %v5969_v28 = vmul.f32 0.0078125, %v5964_v47 }
0x298e   :  { %7781 = vrsqrt.f32 %v5972_v45  ;;  %v5973_v55 = vadd.f32 1e-05, %v5969_v28 }
0x298f   :  { %v5966_v14 = vpop.xlane.xlu0 %5965 }
0x2990   :  { %7783 = vrsqrt.f32 %v5973_v55  ;;  %v5970_v27 = vmul.f32 0.0078125, %v5966_v14 }
0x2992   :  { %v5974_v34 = vadd.f32 1e-05, %v5970_v27 }
0x2994   :  { %7785 = vrsqrt.f32 %v5974_v34 }
0x2996   :  { %v7780_v52 = vpop.eup %7779 }
0x2997   :  { %v5979_v1 = vmul.f32 %v7780_v52, %v5951_v11 }
0x2998   :  { %v7782_v46 = vpop.eup %7781 }
0x2999   :  { %v5980_v3 = vmul.f32 %v7782_v46, %v5952_v53  ;;  %v5983_v20 = vmul.f32 %v5979_v1, %v9029_v16 }
0x299a   :  { %v7784_v2 = vpop.eup %7783 }
0x299b   :  { %v5984_v62 = vmul.f32 %v5980_v3, %v9029_v16  ;;  %v5987_v17 = vadd.f32 %v5983_v20, %v9039_v26  ;;  %v5981_v4 = vmul.f32 %v7784_v2, %v5953_v54 }
0x299d   :  { %v5988_v36 = vadd.f32 %v5984_v62, %v9039_v26  ;;  %v5985_v32 = vmul.f32 %v5981_v4, %v9029_v16  ;;  %v7465_v4 = vld [vmem:[#allocation15] ss:$8 sps:$4 sm:$0xff]  }
0x299e   :  { %v7786_v10 = vpop.eup %7785 }
0x299f   :  { %v5991_v37 = vpack.c.bf16 %v5988_v36, %v5987_v17  ;;  %v5982_v39 = vmul.f32 %v7786_v10, %v5954_v15  ;;  %v5989_v24 = vadd.f32 %v5985_v32, %v9039_v26  ;;  %v7467_v10 = vld [vmem:[#allocation15 + $0x4] ss:$8 sps:$4 sm:$0xff]  }
0x29a0   :  { %6253 = vmatprep.subr.bf16.mxu1 %v7467_v10 }
0x29a1   :  { %6026 = vmatmul.mubr.bf16.vlgmr.msra.gmra.mrb[160].mxu1 %v5991_v37  ;;  %v5986_v23 = vmul.f32 %v5982_v39, %v9029_v16 }
0x29a2   :  { %6035 = vmatprep.mubr.bf16.mxu1 %v8125_v0  ;;  %6254 = vmatpush1.bf16.msra.mxu1 %v7465_v4 }
0x29a3   :  { %v5990_v33 = vadd.f32 %v5986_v23, %v9039_v26 }
0x29a5   :  { %v5992_v38 = vpack.c.bf16 %v5990_v33, %v5989_v24 }
0x29a9   :  { %6036 = vmatmul.mubr.bf16.gmra.mrb[164].mxu1 %v5992_v38 }
0x29aa   :  { %6285 = vmatprep.mubr.bf16.mxu1 %v8125_v0 }
0x2a74   :  { %v6027_v41 = vpop.f32.mrb[160].mxu1 }
0x2a75   :  { %v6028_v56 = vadd.f32 %v6027_v41, %v9067_v25  ;;  %v6029_v6 = vpop.f32.mrb[161].mxu1 }
0x2a76   :  { %v6030_v42 = vadd.f32 %v6029_v6, %v9075_v22  ;;  %v6031_v19 = vpop.f32.mrb[162].mxu1 }
0x2a77   :  { %v6032_v40 = vadd.f32 %v6031_v19, %v9067_v25  ;;  %v6033_v16 = vpop.f32.mrb[163].mxu1  ;;  %v6046_v49 = vmax.f32 %v6028_v56, 0.0 }
0x2a78   :  { %v6034_v57 = vadd.f32 %v6033_v16, %v9075_v22  ;;  %v6047_v51 = vmax.f32 %v6030_v42, 0.0 }
0x2a79   :  { %v6048_v7 = vmax.f32 %v6032_v40, 0.0 }
0x2a7a   :  { %v6049_v26 = vmax.f32 %v6034_v57, 0.0 }
0x2a7b   :  { %v6054_v9 = vpack.c.bf16 %v6048_v7, %v6046_v49  ;;  %v7473_v49 = vld [vmem:[#allocation15 + $0x24] ss:$8 sps:$4 sm:$0xff]   ;;  %v7471_v7 = vld [vmem:[#allocation15 + $0x20] ss:$8 sps:$4 sm:$0xff]  }
0x2a7c   :  { %v6055_v31 = vpack.c.bf16 %v6049_v26, %v6047_v51  ;;  %v6037_v11 = vpop.f32.mrb[164].mxu1  ;;  %v7476_v51 = vld [vmem:[#allocation15 + $0x34] ss:$8 sps:$4 sm:$0xff]   ;;  %v7474_v26 = vld [vmem:[#allocation15 + $0x30] ss:$8 sps:$4 sm:$0xff]  }
0x2a7d   :  { %v6038_v13 = vadd.f32 %v6037_v11, %v9067_v25  ;;  %v6039_v5 = vpop.f32.mrb[165].mxu1  ;;  %v7482_v11 = vld [vmem:[#allocation15 + $0x54] ss:$8 sps:$4 sm:$0xff]  }
0x2a7e   :  { %v6040_v53 = vadd.f32 %v6039_v5, %v9075_v22  ;;  %v6041_v44 = vpop.f32.mrb[166].mxu1  ;;  %6090 = vmatprep.mubr.bf16.mxu0 %v6055_v31  ;;  %v7477_v31 = vld [vmem:[#allocation15 + $0x40] ss:$8 sps:$4 sm:$0xff]   ;;  %v7485_v5 = vld [vmem:[#allocation15 + $0x64] ss:$8 sps:$4 sm:$0xff]  }
0x2a7f   :  { %v6042_v61 = vadd.f32 %v6041_v44, %v9067_v25  ;;  %v6043_v54 = vpop.f32.mrb[167].mxu1  ;;  %6091 = vmatmul.mubr.bf16.vlgmr.msra.gmra.mrb[176].mxu0 %v6054_v9  ;;  %v6050_v35 = vmax.f32 %v6038_v13, 0.0  ;;  %v7479_v9 = vld [vmem:[#allocation15 + $0x44] ss:$8 sps:$4 sm:$0xff]   ;;  %v7480_v13 = vld [vmem:[#allocation15 + $0x50] ss:$8 sps:$4 sm:$0xff]  }
0x2a80   :  { %v6044_v8 = vadd.f32 %v6043_v54, %v9075_v22  ;;  %v6051_v60 = vmax.f32 %v6040_v53, 0.0  ;;  %v7483_v53 = vld [vmem:[#allocation15 + $0x60] ss:$8 sps:$4 sm:$0xff]   ;;  %v7488_v44 = vld [vmem:[#allocation15 + $0x74] ss:$8 sps:$4 sm:$0xff]  }
0x2a81   :  { %v6052_v21 = vmax.f32 %v6042_v61, 0.0  ;;  %v7486_v61 = vld [vmem:[#allocation15 + $0x70] ss:$8 sps:$4 sm:$0xff]  }
0x2a82   :  { %v6053_v15 = vmax.f32 %v6044_v8, 0.0 }
0x2a83   :  { %v6056_v12 = vpack.c.bf16 %v6052_v21, %v6050_v35 }
0x2a84   :  { %v6057_v50 = vpack.c.bf16 %v6053_v15, %v6051_v60 }
0x2a86   :  { %6098 = vmatprep.mubr.bf16.mxu0 %v6057_v50 }
0x2a87   :  { %6099 = vmatmul.mubr.bf16.gmra.mrb[180].mxu0 %v6056_v12 }
0x2b52   :  { %v6765_v48 = vpop.f32.mrb[176].mxu0 }
0x2b53   :  { %v6766_v59 = vpop.f32.mrb[177].mxu0 }
0x2b54   :  { %v6767_v18 = vadd.f32 %v6766_v59, %v6765_v48  ;;  %v6768_v58 = vpop.f32.mrb[178].mxu0 }
0x2b55   :  { %v6769_v47 = vpop.f32.mrb[179].mxu0 }
0x2b56   :  { %v6093_v45 = vadd.f32 %v6767_v18, %v9088_v30  ;;  %v6770_v25 = vadd.f32 %v6769_v47, %v6768_v58 }
0x2b58   :  { %v6096_v28 = vadd.f32 %v6770_v25, %v9088_v30  ;;  %v6107_v55 = vadd.f32 %v6093_v45, %v5987_v17  ;;  %v7470_v17 = vld [vmem:[#allocation15 + $0x14] ss:$8 sps:$4 sm:$0xff]  }
0x2b59   :  { %6255 = vmatprep.subr.bf16.mxu1 %v7470_v17  ;;  %v6167_v17 = vsub.s32 6, %v8328_v29 }
0x2b5a   :  { %6111 = vadd.xlane.f32.xlu1 %v6107_v55  ;;  %v6771_v22 = vpop.f32.mrb[180].mxu0  ;;  %v6108_v14 = vadd.f32 %v6096_v28, %v5988_v36  ;;  %v7468_v36 = vld [vmem:[#allocation15 + $0x10] ss:$8 sps:$4 sm:$0xff]  }
0x2b5b   :  { %v6772_v27 = vpop.f32.mrb[181].mxu0  ;;  %6256 = vmatpush1.bf16.msra.mxu1 %v7468_v36  ;;  %v7899_v36 = vld [vmem:[%s9797_s8] sm:$0xff] }
0x2b5c   :  { %v6773_v34 = vadd.f32 %v6772_v27, %v6771_v22  ;;  %6113 = vadd.xlane.f32.xlu0 %v6108_v14  ;;  %v6774_v52 = vpop.f32.mrb[182].mxu0  ;;  %6257 = vmatprep.subr.bf16.mxu1 %v7473_v49 }
0x2b5d   :  { %v6775_v1 = vpop.f32.mrb[183].mxu0 }
0x2b5e   :  { %v6101_v46 = vadd.f32 %v6773_v34, %v9088_v30  ;;  %v6776_v3 = vadd.f32 %v6775_v1, %v6774_v52 }
0x2b5f   :  { %6258 = vmatpush1.bf16.msra.mxu1 %v7471_v7 }
0x2b60   :  { %v6104_v20 = vadd.f32 %v6776_v3, %v9088_v30  ;;  %v6109_v2 = vadd.f32 %v6101_v46, %v5989_v24  ;;  %6259 = vmatprep.subr.bf16.mxu1 %v7476_v51 }
0x2b62   :  { %6115 = vadd.xlane.f32.xlu1 %v6109_v2  ;;  %v6110_v62 = vadd.f32 %v6104_v20, %v5990_v33 }
0x2b63   :  { %6260 = vmatpush1.bf16.msra.mxu1 %v7474_v26 }
0x2b64   :  { %6117 = vadd.xlane.f32.xlu0 %v6110_v62  ;;  %6261 = vmatprep.subr.bf16.mxu1 %v7479_v9 }
0x2b67   :  { %6262 = vmatpush1.bf16.msra.mxu1 %v7477_v31 }
0x2b68   :  { %6263 = vmatprep.subr.bf16.mxu1 %v7482_v11 }
0x2b6b   :  { %6264 = vmatpush1.bf16.msra.mxu1 %v7480_v13 }
0x2b6c   :  { %6265 = vmatprep.subr.bf16.mxu1 %v7485_v5 }
0x2b6f   :  { %6266 = vmatpush1.bf16.msra.mxu1 %v7483_v53 }
0x2b70   :  { %6267 = vmatprep.subr.bf16.mxu1 %v7488_v44 }
0x2b73   :  { %6268 = vmatpush1.bf16.msra.mxu1 %v7486_v61 }
0x2be7   :  { %v6112_v37 = vpop.xlane.xlu1 %6111 }
0x2be8   :  { %v6119_v39 = vmul.f32 0.0078125, %v6112_v37  ;;  %v6168_v37 = vrot.slane %v7899_v36, %v6167_v17 }
0x2be9   :  { %v6114_v32 = vpop.xlane.xlu0 %6113 }
0x2bea   :  { %v6123_v23 = vsub.f32 %v6107_v55, %v6119_v39  ;;  %v6120_v38 = vmul.f32 0.0078125, %v6114_v32  ;;  %v7900_v39 = vld [vmem:[%s9797_s8 + $0x8] sm:$0xff]  ;;  %s8077_s8 = scalar_lea.vmem %s6320_s17, 1024 }
0x2beb   :  { %p8078_p8 = scmp.ne.s32.totalorder %s6320_s17, %s8077_s8  ;;  %p8083_p10 = scmp.lt.s32.totalorder %s8077_s8, %s8077_s8 }
0x2bec   :  { %v6124_v41 = vsub.f32 %v6108_v14, %v6120_v38  ;;  %v6127_v56 = vmul.f32 %v6123_v23, %v6123_v23 }
0x2bed   :  { %p8084_p11 = por %p8083_p10, %p8082_p9 }
0x2bee   :  { %6131 = vadd.xlane.f32.xlu1 %v6127_v56  ;;  %v6128_v30 = vmul.f32 %v6124_v41, %v6124_v41 }
0x2bef   :  { %v6116_v24 = vpop.xlane.xlu1 %6115  ;;  %p8085_p12 = pnand %p8084_p11, %p8078_p8 }
0x2bf0   :  { %v6121_v33 = vmul.f32 0.0078125, %v6116_v24  ;;  %6133 = vadd.xlane.f32.xlu0 %v6128_v30 }
0x2bf1   :  { %v6118_v6 = vpop.xlane.xlu0 %6117 }
0x2bf2   :  { %v6125_v42 = vsub.f32 %v6109_v2, %v6121_v33  ;;  %v6122_v19 = vmul.f32 0.0078125, %v6118_v6 }
0x2bf4   :  { %v6126_v40 = vsub.f32 %v6110_v62, %v6122_v19  ;;  %v6129_v16 = vmul.f32 %v6125_v42, %v6125_v42 }
0x2bf6   :  { %6135 = vadd.xlane.f32.xlu1 %v6129_v16  ;;  %v6130_v57 = vmul.f32 %v6126_v40, %v6126_v40 }
0x2bf8   :  { %6137 = vadd.xlane.f32.xlu0 %v6130_v57 }
0x2c7b   :  { %v6132_v54 = vpop.xlane.xlu1 %6131 }
0x2c7c   :  { %v6139_v8 = vmul.f32 0.0078125, %v6132_v54 }
0x2c7d   :  { %v6134_v35 = vpop.xlane.xlu0 %6133 }
0x2c7e   :  { %v6143_v21 = vadd.f32 1e-05, %v6139_v8  ;;  %v6140_v60 = vmul.f32 0.0078125, %v6134_v35 }
0x2c80   :  { %7787 = vrsqrt.f32 %v6143_v21  ;;  %v6144_v15 = vadd.f32 1e-05, %v6140_v60 }
0x2c82   :  { %7789 = vrsqrt.f32 %v6144_v15 }
0x2c83   :  { %v6136_v12 = vpop.xlane.xlu1 %6135 }
0x2c84   :  { %v6141_v50 = vmul.f32 0.0078125, %v6136_v12 }
0x2c85   :  { %v6138_v48 = vpop.xlane.xlu0 %6137 }
0x2c86   :  { %v6145_v59 = vadd.f32 1e-05, %v6141_v50  ;;  %v6142_v18 = vmul.f32 0.0078125, %v6138_v48 }
0x2c88   :  { %7791 = vrsqrt.f32 %v6145_v59  ;;  %v6146_v58 = vadd.f32 1e-05, %v6142_v18 }
0x2c8a   :  { %v7788_v47 = vpop.eup %7787  ;;  %7793 = vrsqrt.f32 %v6146_v58 }
0x2c8b   :  { %v6151_v45 = vmul.f32 %v7788_v47, %v6123_v23 }
0x2c8c   :  { %v7790_v25 = vpop.eup %7789 }
0x2c8d   :  { %v6155_v28 = vmul.f32 %v6151_v45, %v9100_v43  ;;  %v6152_v55 = vmul.f32 %v7790_v25, %v6124_v41 }
0x2c8f   :  { %v6156_v22 = vmul.f32 %v6152_v55, %v9100_v43  ;;  %v6159_v14 = vadd.f32 %v6155_v28, %v9104_v63 }
0x2c91   :  { %v6160_v27 = vadd.f32 %v6156_v22, %v9104_v63 }
0x2c92   :  { %v7792_v34 = vpop.eup %7791 }
0x2c93   :  { %v6163_v52 = vpack.c.bf16 %v6160_v27, %v6159_v14  ;;  %v6153_v1 = vmul.f32 %v7792_v34, %v6125_v42 }
0x2c94   :  { %v7794_v46 = vpop.eup %7793 }
0x2c95   :  { %6286 = vmatmul.mubr.bf16.vlgmr.msra.gmra.mrb[168].mxu1 %v6163_v52  ;;  %v6154_v3 = vmul.f32 %v7794_v46, %v6126_v40  ;;  %v6157_v20 = vmul.f32 %v6153_v1, %v9100_v43 }
0x2c96   :  { %6295 = vmatprep.mubr.bf16.mxu1 %v8125_v0  ;;  %v6172_v0 = vrot.slane %v7900_v39, %v6167_v17 }
0x2c97   :  { %v6158_v2 = vmul.f32 %v6154_v3, %v9100_v43  ;;  %v6161_v62 = vadd.f32 %v6157_v20, %v9104_v63 }
0x2c99   :  { %v6162_v4 = vadd.f32 %v6158_v2, %v9104_v63 }
0x2c9b   :  { %v6164_v10 = vpack.c.bf16 %v6162_v4, %v6161_v62 }
0x2c9d   :  { %6296 = vmatmul.mubr.bf16.gmra.mrb[172].mxu1 %v6164_v10 }
0x2d68   :  { %v6287_v32 = vpop.f32.mrb[168].mxu1 }
0x2d69   :  { %v6288_v43 = vadd.f32 %v6287_v32, %v6168_v37  ;;  %v6289_v23 = vpop.f32.mrb[169].mxu1 }
0x2d6a   :  { %v6290_v38 = vadd.f32 %v6289_v23, %v6172_v0  ;;  %v6291_v41 = vpop.f32.mrb[170].mxu1 }
0x2d6b   :  { %6306 = vst [vmem:[#allocation17] sm:$0xff] %v6288_v43  ;;  %v6292_v63 = vadd.f32 %v6291_v41, %v6168_v37  ;;  %v6293_v56 = vpop.f32.mrb[171].mxu1 }
0x2d6c   :  { %6307 = vst [vmem:[#allocation17 + $0x8] sm:$0xff] %v6290_v38  ;;  %v6294_v29 = vadd.f32 %v6293_v56, %v6172_v0 }
0x2d6d   :  { %6308 = vst [vmem:[#allocation17 + $0x10] sm:$0xff] %v6292_v63 }
0x2d6e   :  { %6309 = vst [vmem:[#allocation17 + $0x18] sm:$0xff] %v6294_v29 }
0x2d70   :  { %v6297_v30 = vpop.f32.mrb[172].mxu1 }
0x2d71   :  { %v6298_v24 = vadd.f32 %v6297_v30, %v6168_v37  ;;  %v6299_v33 = vpop.f32.mrb[173].mxu1 }
0x2d72   :  { %v6300_v6 = vadd.f32 %v6299_v33, %v6172_v0  ;;  %v6301_v42 = vpop.f32.mrb[174].mxu1 }
0x2d73   :  { %6310 = vst [vmem:[#allocation17 + $0x20] sm:$0xff] %v6298_v24  ;;  %v6302_v19 = vadd.f32 %v6301_v42, %v6168_v37  ;;  %v6303_v40 = vpop.f32.mrb[175].mxu1 }
0x2d74   :  { %6311 = vst [vmem:[#allocation17 + $0x28] sm:$0xff] %v6300_v6  ;;  %v6304_v16 = vadd.f32 %v6303_v40, %v6172_v0 }
0x2d75   :  { %6312 = vst [vmem:[#allocation17 + $0x30] sm:$0xff] %v6302_v19 }
0x2d76   :  { %6313 = vst [vmem:[#allocation17 + $0x38] sm:$0xff] %v6304_v16 }
0x2d77   :  { %8088 = shalt.err (!%p8085_p12)
}
0x2d78   :  { %s8089_s26 = scalar_lea.hbm %s9798_s9, 1024 }
0x2d79   :  { %p8090_p13 = scmp.ne.s32.totalorder %s9798_s9, %s8089_s26  ;;  %p8093_p0 = scmp.lt.u32.totalorder %s8089_s26, %s9798_s9 }
0x2d7b   :  { %p8095_p1 = pnand %p8093_p0, %p8090_p13 }
0x2d7d   :  { %8098 = shalt.err (!%p8095_p1)
}
0x2d7e   :  { %s8131_s21 = smov 256   ;;  %s8132_s23 = smov 16  }
0x2d7f   :  { %6325 = dma.vmem_to_hbm [thread:$0]  %s6320_s17, 1024, %s9798_s9, [#allocation5], %s8131_s21, %s8131_s21, %s8132_s23  }
0x2d80   :  { %8109 = dma.done.wait [#allocation5], 1024  }
0x2d81   :  { %8110 = vsyncadd [#allocation5], 4294966272 }
0x2d82   :  { %6329 = vsyncpa [#allocation4], 1 }
0x2d83   :  { %6330 = vsyncpa [#allocation7], 1 }
0x2d84   :  { %6331 = vsyncpa [#allocation10], 1 }
0x2d85   :  { %6332 = vsyncpa [#allocation13], 1 }
0x2d86   :  { %6333 = vsyncpa [#allocation16], 1 }
0x2d87   :  { %6334 = vsyncpa [#allocation5], 1 }

</bundles_post_ra>
